<compile_context>
chip_gen: v5e
topology: v5e:2x2
jax: 0.10.0
libtpu: 0.0.40
codegen_flags: <defaults>
</compile_context>

<pallas_src>
import jax
import jax.numpy as jnp
from jax import lax
from jax.experimental import pallas as pl
from jax.experimental.pallas import tpu as pltpu

_BN_EPS = 1e-5
_VMEM_LIMIT = 64 * 1024 * 1024       # explicit scoped-VMEM limit
_TILE_BUDGET = 24 * 1024 * 1024      # per-grid-step working set target


# ----------------------------- Pallas kernels -----------------------------

def _upconv_matmul_kernel(x_ref, w_ref, b_ref, o_ref):
    # ConvTranspose2d(k=2,s=2) as a matmul: x [TM,Cin]bf16 @ w [Cin,4*Cout]bf16 + b
    acc = jnp.dot(x_ref[...], w_ref[...], preferred_element_type=jnp.float32)
    o_ref[...] = (acc + b_ref[...]).astype(o_ref.dtype)


def _make_conv3x3_stats_kernel(n_src, th, w_out):
    """3x3 conv (pad=1) over the channel-concat of `n_src` sources, one TH-row tile per
    grid step.  Emits the raw (pre-BN) f32 output plus per-tile per-channel
    (sum, sum-of-squares) so BatchNorm statistics can be reduced across tiles."""

    def kernel(*refs):
        srcs = refs[: 2 * n_src]            # (rows, 2-row halo) ref pair per source, bf16
        wgts = refs[2 * n_src: 3 * n_src]   # [3, 3, C_s, Cout] bf16
        bias = refs[3 * n_src]              # [1, Cout] f32
        z_ref, st_ref = refs[3 * n_src + 1], refs[3 * n_src + 2]
        cout = z_ref.shape[3]

        acc = jnp.zeros((th * w_out, cout), jnp.float32)
        for s in range(n_src):
            lo, hi, wk = srcs[2 * s], srcs[2 * s + 1], wgts[s]
            # (TH+2)-row halo window of the zero-padded input: [TH+2, W+2, C]
            win = jnp.concatenate([lo[0], hi[0, :2]], axis=0)
            for kw in range(3):
                cols = win[:, kw:kw + w_out, :].reshape((th + 2) * w_out, -1)
                for kh in range(3):
                    acc = acc + jnp.dot(
                        cols[kh * w_out: kh * w_out + th * w_out],
                        wk[kh, kw],
                        preferred_element_type=jnp.float32)

        z = acc + bias[...]                                  # f32; BN sees conv + bias
        z_ref[0] = z.reshape(th, w_out, cout)
        s1 = jnp.sum(z, axis=0, keepdims=True)
        s2 = jnp.sum(z * z, axis=0, keepdims=True)
        st_ref[0, 0] = jnp.concatenate([s1, s2], axis=0)     # [2, Cout]

    return kernel


# ----------------------------- wrappers -----------------------------

def _transposed_conv2x2_padded(x_nchw, w, b):
    """ConvTranspose2d(k=2, s=2).  w: [Cin, Cout, 2, 2], b: [Cout].
    Returns the upsampled activation in NHWC bf16 with a 1-pixel zero halo."""
    N, Cin, H, W = x_nchw.shape
    Cout = w.shape[1]
    M = N * H * W

    x_flat = jnp.transpose(x_nchw, (0, 2, 3, 1)).reshape(M, Cin).astype(jnp.bfloat16)
    w_flat = jnp.transpose(w, (0, 2, 3, 1)).reshape(Cin, 4 * Cout).astype(jnp.bfloat16)
    b_flat = jnp.tile(b, 4).reshape(1, 4 * Cout).astype(jnp.float32)

    tm = min(M, 2048)                        # row tile; <=2048 keeps v7x VMEM comfortable
    out_flat = pl.pallas_call(
        _upconv_matmul_kernel,
        out_shape=jax.ShapeDtypeStruct((M, 4 * Cout), jnp.bfloat16),
        grid=(pl.cdiv(M, tm),),
        in_specs=[
            pl.BlockSpec((tm, Cin), lambda i: (i, 0)),
            pl.BlockSpec((Cin, 4 * Cout), lambda i: (0, 0)),
            pl.BlockSpec((1, 4 * Cout), lambda i: (0, 0)),
        ],
        out_specs=pl.BlockSpec((tm, 4 * Cout), lambda i: (i, 0)),
        compiler_params=pltpu.CompilerParams(
            dimension_semantics=("parallel",),
            vmem_limit_bytes=_VMEM_LIMIT),
        cost_estimate=pl.CostEstimate(
            flops=2 * M * Cin * 4 * Cout,
            transcendentals=0,
            bytes_accessed=2 * (M * Cin + Cin * 4 * Cout + M * 4 * Cout)),
    )(x_flat, w_flat, b_flat)

    # 2x2 pixel-shuffle onto the 2Hx2W grid + 1-pixel zero halo (one fused XLA pass).
    # TODO(synk): folding the pixel-shuffle into the first conv (per-parity weight
    # decomposition) would remove this remaining activation-sized XLA pass.
    up = out_flat.reshape(N, H, W, 2, 2, Cout)
    up = jnp.transpose(up, (0, 1, 3, 2, 4, 5)).reshape(N, 2 * H, 2 * W, Cout)
    return jnp.pad(up, ((0, 0), (1, 1), (1, 1), (0, 0)))


def _pick_row_tile(h, wp, c_sum, cout):
    """Largest divisor of h whose double-buffered working set fits the tile budget."""
    def tile_bytes(t):
        inputs = 4 * t * wp * c_sum * 2          # bf16 inputs, double-buffered
        temps = 2 * t * wp * c_sum * 2           # in-kernel window / shifted copies
        outs = 3 * t * (wp - 2) * cout * 4       # f32 acc + double-buffered output
        return inputs + temps + outs
    divisors = [d for d in range(2, h + 1) if h % d == 0]
    if not divisors:
        return h
    fitting = [d for d in divisors if tile_bytes(d) <= _TILE_BUDGET]
    return max(fitting) if fitting else min(divisors)


def _conv3x3_raw(padded_srcs, weights, bias):
    """Fused-concat 3x3 conv (padding=1).  `padded_srcs`: NHWC bf16 arrays, already
    zero-padded by 1 pixel; `weights[s]`: [3, 3, C_s, Cout] bf16.
    Returns (raw pre-BN output f32 [N,H,W,Cout], per-tile stats f32 [N,nH,2,Cout])."""
    n_src = len(padded_srcs)
    N, hp, wp, _ = padded_srcs[0].shape
    H, W = hp - 2, wp - 2
    Cout = int(weights[0].shape[-1])
    c_sum = sum(int(s.shape[-1]) for s in padded_srcs)

    th = _pick_row_tile(H, wp, c_sum, Cout)
    nh = H // th
    half = th // 2

    in_specs, args = [], []
    for src in padded_srcs:
        C = int(src.shape[-1])
        in_specs.append(pl.BlockSpec((1, th, wp, C), lambda n, h: (n, h, 0, 0)))
        if th % 2 == 0:
            # 2-row halo block directly below the tile (reads only the rows it needs)
            in_specs.append(pl.BlockSpec((1, 2, wp, C),
                                         lambda n, h: (n, (h + 1) * half, 0, 0)))
        else:
            in_specs.append(pl.BlockSpec((1, th, wp, C), lambda n, h: (n, h + 1, 0, 0)))
        args += [src, src]
    for wk in weights:
        in_specs.append(pl.BlockSpec(wk.shape, lambda n, h: (0, 0, 0, 0)))
        args.append(wk)
    in_specs.append(pl.BlockSpec((1, Cout), lambda n, h: (0, 0)))
    args.append(bias.reshape(1, Cout).astype(jnp.float32))

    flops = 2 * N * H * W * 9 * c_sum * Cout
    bytes_acc = int(sum(s.size * 2 for s in padded_srcs)
                    + N * H * W * Cout * 4
                    + N * nh * 2 * Cout * 4
                    + sum(int(wk.size) * 2 for wk in weights))

    z, st = pl.pallas_call(
        _make_conv3x3_stats_kernel(n_src, th, W),
        out_shape=(jax.ShapeDtypeStruct((N, H, W, Cout), jnp.float32),
                   jax.ShapeDtypeStruct((N, nh, 2, Cout), jnp.float32)),
        grid=(N, nh),
        in_specs=in_specs,
        out_specs=(pl.BlockSpec((1, th, W, Cout), lambda n, h: (n, h, 0, 0)),
                   pl.BlockSpec((1, 1, 2, Cout), lambda n, h: (n, h, 0, 0))),
        compiler_params=pltpu.CompilerParams(
            dimension_semantics=("parallel", "parallel"),
            vmem_limit_bytes=_VMEM_LIMIT),
        cost_estimate=pl.CostEstimate(flops=flops, transcendentals=0,
                                      bytes_accessed=bytes_acc),
    )(*args)
    return z, st


def _bn_scale_shift(stats, count, gamma, beta):
    # PyTorch BatchNorm2d training-mode forward: batch stats, biased variance, eps=1e-5.
    # TODO(synk): running_mean/running_var buffer updates are not modeled.
    s1 = jnp.sum(stats[:, :, 0, :], axis=(0, 1))
    s2 = jnp.sum(stats[:, :, 1, :], axis=(0, 1))
    mean = s1 / count
    var = jnp.maximum(s2 / count - mean * mean, 0.0)
    inv = lax.rsqrt(var + _BN_EPS)
    scale = gamma * inv
    shift = beta - mean * scale
    return scale, shift


def upconv_forward(params, from_down, from_up):
    """from_down: [N, Cout, 2H, 2W] NCHW; from_up: [N, Cin, H, W] NCHW; returns NCHW."""
    Co = params["up_b"].shape[0]
    N = from_up.shape[0]
    H2, W2 = from_down.shape[2], from_down.shape[3]
    count = N * H2 * W2

    # ConvTranspose2d(k=2, s=2) -> padded NHWC bf16
    up_p = _transposed_conv2x2_padded(from_up, params["up_w"], params["up_b"])
    down_p = jnp.pad(jnp.transpose(from_down, (0, 2, 3, 1)).astype(jnp.bfloat16),
                     ((0, 0), (1, 1), (1, 1), (0, 0)))

    # conv1: torch.cat((up, down), C) fused into the kernel as two weight slabs
    w1u = jnp.transpose(params["w1"][:, :Co], (2, 3, 1, 0)).astype(jnp.bfloat16)
    w1d = jnp.transpose(params["w1"][:, Co:], (2, 3, 1, 0)).astype(jnp.bfloat16)
    z1, st1 = _conv3x3_raw([up_p, down_p], [w1u, w1d], params["b1"])
    sc1, sh1 = _bn_scale_shift(st1, count, params["g1"], params["beta1"])
    # BN affine + ReLU + halo pad + bf16 cast: one fused XLA elementwise/pad pass
    y1_p = jnp.pad(jnp.maximum(z1 * sc1 + sh1, 0.0),
                   ((0, 0), (1, 1), (1, 1), (0, 0))).astype(jnp.bfloat16)

    # conv2
    w2 = jnp.transpose(params["w2"], (2, 3, 1, 0)).astype(jnp.bfloat16)
    z2, st2 = _conv3x3_raw([y1_p], [w2], params["b2"])
    sc2, sh2 = _bn_scale_shift(st2, count, params["g2"], params["beta2"])
    y2 = jnp.maximum(z2 * sc2 + sh2, 0.0)
    return jnp.transpose(y2, (0, 3, 1, 2))                   # back to NCHW


# ----------------------------- parameter init -----------------------------

def init_params(key, in_channels, out_channels):
    ks = jax.random.split(key, 8)
    co = out_channels

    def u(k, shape, fan_in):
        bound = 1.0 / jnp.sqrt(fan_in)
        return jax.random.uniform(k, shape, jnp.float32, -bound, bound)

    return {
        # ConvTranspose2d(in, out, k=2, s=2): weight [Cin, Cout, 2, 2]
        "up_w": u(ks[0], (in_channels, co, 2, 2), in_channels * 4),
        "up_b": u(ks[1], (co,), in_channels * 4),
        # conv3x3(2*out -> out)
        "w1": u(ks[2], (co, 2 * co, 3, 3), 2 * co * 9),
        "b1": u(ks[3], (co,), 2 * co * 9),
        "g1": jnp.ones((co,), jnp.float32),
        "beta1": jnp.zeros((co,), jnp.float32),
        # conv3x3(out -> out)
        "w2": u(ks[4], (co, co, 3, 3), co * 9),
        "b2": u(ks[5], (co,), co * 9),
        "g2": jnp.ones((co,), jnp.float32),
        "beta2": jnp.zeros((co,), jnp.float32),
    }


# ----------------------------- pure-JAX f32 reference -----------------------------

def _reference_forward(params, from_down, from_up):
    w, b = params["up_w"], params["up_b"]
    N, Ci, H, W = from_up.shape
    Co = w.shape[1]
    up = jnp.einsum("ncij,codk->noidjk", from_up, w,
                    precision=lax.Precision.HIGHEST).reshape(N, Co, 2 * H, 2 * W)
    up = up + b[None, :, None, None]

    def conv_bn_relu(x, wc, bc, g, beta):
        y = lax.conv_general_dilated(x, wc, (1, 1), ((1, 1), (1, 1)),
                                     dimension_numbers=("NCHW", "OIHW", "NCHW"),
                                     precision=lax.Precision.HIGHEST)
        y = y + bc[None, :, None, None]
        mean = jnp.mean(y, axis=(0, 2, 3), keepdims=True)
        var = jnp.mean(jnp.square(y - mean), axis=(0, 2, 3), keepdims=True)
        y = (y - mean) * lax.rsqrt(var + _BN_EPS) * g[None, :, None, None] \
            + beta[None, :, None, None]
        return jnp.maximum(y, 0.0)

    x = jnp.concatenate([up, from_down], axis=1)
    x = conv_bn_relu(x, params["w1"], params["b1"], params["g1"], params["beta1"])
    x = conv_bn_relu(x, params["w2"], params["b2"], params["g2"], params["beta2"])
    return x


# ----------------------------- main -----------------------------

if __name__ == "__main__":
    key = jax.random.PRNGKey(0)
    k_p, k_d, k_u = jax.random.split(key, 3)

    in_channels, out_channels = 8, 4
    N, H, W = 2, 8, 8                         # decoder is HxW; encoder skip is 2Hx2W

    params = init_params(k_p, in_channels, out_channels)
    from_up = jax.random.normal(k_u, (N, in_channels, H, W), jnp.float32)
    from_down = jax.random.normal(k_d, (N, out_channels, 2 * H, 2 * W), jnp.float32)

    fwd = jax.jit(upconv_forward)
    out = jax.block_until_ready(fwd(params, from_down, from_up))

    assert out.shape == (N, out_channels, 2 * H, 2 * W), out.shape
    assert bool(jnp.all(jnp.isfinite(out)))

    # correctness vs. a pure-JAX f32 reference (kernels use bf16 MXU operands)
    ref = jax.jit(_reference_forward)(params, from_down, from_up)
    rel = float(jnp.linalg.norm(out - ref) / (jnp.linalg.norm(ref) + 1e-12))
    assert rel < 5e-2, f"relative L2 error vs reference too large: {rel}"

    print("KERNEL_OK")
</pallas_src>

<mosaic_0001>
module attributes {stable_mosaic.version = 11 : i64} {
  func.func @_upconv_matmul_kernel(%arg0: i32, %arg1: memref<128x8xbf16, #tpu.memory_space<vmem>>, %arg2: memref<8x16xbf16, #tpu.memory_space<vmem>>, %arg3: memref<1x16xf32, #tpu.memory_space<vmem>>, %arg4: memref<128x16xbf16, #tpu.memory_space<vmem>>) attributes {dimension_semantics = [#tpu.dimension_semantics<parallel>], iteration_bounds = array<i64: 1>, scalar_prefetch = 0 : i64, scratch_operands = 0 : i64, tpu.core_type = #tpu.core_type<tc>, window_params = [{transform_indices = @transform_0, window_bounds = array<i64: 128, 8>}, {pipeline_mode = #tpu.pipeline_mode<synchronous>, transform_indices = @transform_1, window_bounds = array<i64: 8, 16>}, {pipeline_mode = #tpu.pipeline_mode<synchronous>, transform_indices = @transform_2, window_bounds = array<i64: 1, 16>}, {transform_indices = @transform_3, window_bounds = array<i64: 128, 16>}]} {
    %c0 = arith.constant 0 : index
    %c0_0 = arith.constant 0 : index
    %0 = vector.load %arg1[%c0, %c0_0] : memref<128x8xbf16, #tpu.memory_space<vmem>>, vector<128x8xbf16>
    %c0_1 = arith.constant 0 : index
    %c0_2 = arith.constant 0 : index
    %1 = vector.load %arg2[%c0_1, %c0_2] : memref<8x16xbf16, #tpu.memory_space<vmem>>, vector<8x16xbf16>
    %cst = arith.constant dense<0.000000e+00> : vector<128x16xf32>
    %2 = tpu.matmul %0, %1, %cst {dimension_numbers = #tpu.dot_dimension_numbers<[1], [0], [0], [1], [0, 0, 1, 1], [], []>} : vector<128x8xbf16>, vector<8x16xbf16>, vector<128x16xf32> -> vector<128x16xf32>
    %c0_3 = arith.constant 0 : index
    %c0_4 = arith.constant 0 : index
    %3 = vector.load %arg3[%c0_3, %c0_4] : memref<1x16xf32, #tpu.memory_space<vmem>>, vector<1x16xf32>
    %4 = vector.broadcast %3 : vector<1x16xf32> to vector<128x16xf32>
    %5 = arith.addf %2, %4 : vector<128x16xf32>
    %6 = arith.truncf %5 : vector<128x16xf32> to vector<128x16xbf16>
    %c0_5 = arith.constant 0 : index
    %c0_6 = arith.constant 0 : index
    %7 = vector.load %arg4[%c0_5, %c0_6] : memref<128x16xbf16, #tpu.memory_space<vmem>>, vector<128x16xbf16>
    tpu.vector_store %arg4[%c0_5, %c0_6], %6 {strides = array<i32>} : memref<128x16xbf16, #tpu.memory_space<vmem>>, vector<128x16xbf16>,
    return
  }
  func.func @transform_0(%arg0: i32) -> (i32, i32) {
    %c0_i32 = arith.constant 0 : i32
    %c0_i32_0 = arith.constant 0 : i32
    return %arg0, %c0_i32 : i32, i32
  }
  func.func @transform_1(%arg0: i32) -> (i32, i32) {
    %c0_i32 = arith.constant 0 : i32
    %c0_i32_0 = arith.constant 0 : i32
    %c0_i32_1 = arith.constant 0 : i32
    return %c0_i32, %c0_i32_0 : i32, i32
  }
  func.func @transform_2(%arg0: i32) -> (i32, i32) {
    %c0_i32 = arith.constant 0 : i32
    %c0_i32_0 = arith.constant 0 : i32
    %c0_i32_1 = arith.constant 0 : i32
    return %c0_i32, %c0_i32_0 : i32, i32
  }
  func.func @transform_3(%arg0: i32) -> (i32, i32) {
    %c0_i32 = arith.constant 0 : i32
    %c0_i32_0 = arith.constant 0 : i32
    return %arg0, %c0_i32 : i32, i32
  }
}

module attributes {stable_mosaic.version = 11 : i64} {
  func.func @kernel(%arg0: i32, %arg1: i32, %arg2: memref<1x16x18x4xbf16, #tpu.memory_space<vmem>>, %arg3: memref<1x2x18x4xbf16, #tpu.memory_space<vmem>>, %arg4: memref<1x16x18x4xbf16, #tpu.memory_space<vmem>>, %arg5: memref<1x2x18x4xbf16, #tpu.memory_space<vmem>>, %arg6: memref<3x3x4x4xbf16, #tpu.memory_space<vmem>>, %arg7: memref<3x3x4x4xbf16, #tpu.memory_space<vmem>>, %arg8: memref<1x4xf32, #tpu.memory_space<vmem>>, %arg9: memref<1x16x16x4xf32, #tpu.memory_space<vmem>>, %arg10: memref<1x1x2x4xf32, #tpu.memory_space<vmem>>) attributes {dimension_semantics = [#tpu.dimension_semantics<parallel>, #tpu.dimension_semantics<parallel>], iteration_bounds = array<i64: 2, 1>, scalar_prefetch = 0 : i64, scratch_operands = 0 : i64, tpu.core_type = #tpu.core_type<tc>, window_params = [{transform_indices = @transform_0, window_bounds = array<i64: 1, 16, 18, 4>}, {transform_indices = @transform_1, window_bounds = array<i64: 1, 2, 18, 4>}, {transform_indices = @transform_2, window_bounds = array<i64: 1, 16, 18, 4>}, {transform_indices = @transform_3, window_bounds = array<i64: 1, 2, 18, 4>}, {pipeline_mode = #tpu.pipeline_mode<synchronous>, transform_indices = @transform_4, window_bounds = array<i64: 3, 3, 4, 4>}, {pipeline_mode = #tpu.pipeline_mode<synchronous>, transform_indices = @transform_5, window_bounds = array<i64: 3, 3, 4, 4>}, {pipeline_mode = #tpu.pipeline_mode<synchronous>, transform_indices = @transform_6, window_bounds = array<i64: 1, 4>}, {transform_indices = @transform_7, window_bounds = array<i64: 1, 16, 16, 4>}, {transform_indices = @transform_8, window_bounds = array<i64: 1, 1, 2, 4>}]} {
    %cst = arith.constant 0.000000e+00 : f32
    %0 = vector.broadcast %cst : f32 to vector<256x4xf32>
    %c0 = arith.constant 0 : index
    %c0_0 = arith.constant 0 : index
    %c0_1 = arith.constant 0 : index
    %c0_2 = arith.constant 0 : index
    %1 = vector.load %arg2[%c0, %c0_0, %c0_1, %c0_2] : memref<1x16x18x4xbf16, #tpu.memory_space<vmem>>, vector<1x16x18x4xbf16>
    %2 = vector.shape_cast %1 : vector<1x16x18x4xbf16> to vector<16x18x4xbf16>
    %c0_3 = arith.constant 0 : index
    %c0_4 = arith.constant 0 : index
    %c0_5 = arith.constant 0 : index
    %c0_6 = arith.constant 0 : index
    %3 = vector.load %arg3[%c0_3, %c0_4, %c0_5, %c0_6] : memref<1x2x18x4xbf16, #tpu.memory_space<vmem>>, vector<1x2x18x4xbf16>
    %4 = vector.shape_cast %3 : vector<1x2x18x4xbf16> to vector<2x18x4xbf16>
    %5 = tpu.concatenate %2, %4 in 0 : vector<16x18x4xbf16>, vector<2x18x4xbf16> -> vector<18x18x4xbf16>
    %6 = vector.extract_strided_slice %5 {offsets = [0, 0, 0], sizes = [18, 16, 4], strides = [1, 1, 1]} : vector<18x18x4xbf16> to vector<18x16x4xbf16>
    %7 = vector.shape_cast %6 : vector<18x16x4xbf16> to vector<288x4xbf16>
    %8 = vector.extract_strided_slice %7 {offsets = [0, 0], sizes = [256, 4], strides = [1, 1]} : vector<288x4xbf16> to vector<256x4xbf16>
    %c0_7 = arith.constant 0 : index
    %c0_8 = arith.constant 0 : index
    %c0_9 = arith.constant 0 : index
    %c0_10 = arith.constant 0 : index
    %9 = vector.load %arg6[%c0_7, %c0_8, %c0_9, %c0_10] : memref<3x3x4x4xbf16, #tpu.memory_space<vmem>>, vector<1x1x4x4xbf16>
    %10 = vector.shape_cast %9 : vector<1x1x4x4xbf16> to vector<4x4xbf16>
    %cst_11 = arith.constant dense<0.000000e+00> : vector<256x4xf32>
    %11 = tpu.matmul %8, %10, %cst_11 {dimension_numbers = #tpu.dot_dimension_numbers<[1], [0], [0], [1], [0, 0, 1, 1], [], []>} : vector<256x4xbf16>, vector<4x4xbf16>, vector<256x4xf32> -> vector<256x4xf32>
    %12 = arith.addf %0, %11 : vector<256x4xf32>
    %13 = vector.extract_strided_slice %7 {offsets = [16, 0], sizes = [256, 4], strides = [1, 1]} : vector<288x4xbf16> to vector<256x4xbf16>
    %c1 = arith.constant 1 : index
    %c0_12 = arith.constant 0 : index
    %c0_13 = arith.constant 0 : index
    %c0_14 = arith.constant 0 : index
    %14 = vector.load %arg6[%c1, %c0_12, %c0_13, %c0_14] : memref<3x3x4x4xbf16, #tpu.memory_space<vmem>>, vector<1x1x4x4xbf16>
    %15 = vector.shape_cast %14 : vector<1x1x4x4xbf16> to vector<4x4xbf16>
    %cst_15 = arith.constant dense<0.000000e+00> : vector<256x4xf32>
    %16 = tpu.matmul %13, %15, %cst_15 {dimension_numbers = #tpu.dot_dimension_numbers<[1], [0], [0], [1], [0, 0, 1, 1], [], []>} : vector<256x4xbf16>, vector<4x4xbf16>, vector<256x4xf32> -> vector<256x4xf32>
    %17 = arith.addf %12, %16 : vector<256x4xf32>
    %18 = vector.extract_strided_slice %7 {offsets = [32, 0], sizes = [256, 4], strides = [1, 1]} : vector<288x4xbf16> to vector<256x4xbf16>
    %c2 = arith.constant 2 : index
    %c0_16 = arith.constant 0 : index
    %c0_17 = arith.constant 0 : index
    %c0_18 = arith.constant 0 : index
    %19 = vector.load %arg6[%c2, %c0_16, %c0_17, %c0_18] : memref<3x3x4x4xbf16, #tpu.memory_space<vmem>>, vector<1x1x4x4xbf16>
    %20 = vector.shape_cast %19 : vector<1x1x4x4xbf16> to vector<4x4xbf16>
    %cst_19 = arith.constant dense<0.000000e+00> : vector<256x4xf32>
    %21 = tpu.matmul %18, %20, %cst_19 {dimension_numbers = #tpu.dot_dimension_numbers<[1], [0], [0], [1], [0, 0, 1, 1], [], []>} : vector<256x4xbf16>, vector<4x4xbf16>, vector<256x4xf32> -> vector<256x4xf32>
    %22 = arith.addf %17, %21 : vector<256x4xf32>
    %23 = vector.extract_strided_slice %5 {offsets = [0, 1, 0], sizes = [18, 16, 4], strides = [1, 1, 1]} : vector<18x18x4xbf16> to vector<18x16x4xbf16>
    %24 = vector.shape_cast %23 : vector<18x16x4xbf16> to vector<288x4xbf16>
    %25 = vector.extract_strided_slice %24 {offsets = [0, 0], sizes = [256, 4], strides = [1, 1]} : vector<288x4xbf16> to vector<256x4xbf16>
    %c0_20 = arith.constant 0 : index
    %c1_21 = arith.constant 1 : index
    %c0_22 = arith.constant 0 : index
    %c0_23 = arith.constant 0 : index
    %26 = vector.load %arg6[%c0_20, %c1_21, %c0_22, %c0_23] : memref<3x3x4x4xbf16, #tpu.memory_space<vmem>>, vector<1x1x4x4xbf16>
    %27 = vector.shape_cast %26 : vector<1x1x4x4xbf16> to vector<4x4xbf16>
    %cst_24 = arith.constant dense<0.000000e+00> : vector<256x4xf32>
    %28 = tpu.matmul %25, %27, %cst_24 {dimension_numbers = #tpu.dot_dimension_numbers<[1], [0], [0], [1], [0, 0, 1, 1], [], []>} : vector<256x4xbf16>, vector<4x4xbf16>, vector<256x4xf32> -> vector<256x4xf32>
    %29 = arith.addf %22, %28 : vector<256x4xf32>
    %30 = vector.extract_strided_slice %24 {offsets = [16, 0], sizes = [256, 4], strides = [1, 1]} : vector<288x4xbf16> to vector<256x4xbf16>
    %c1_25 = arith.constant 1 : index
    %c1_26 = arith.constant 1 : index
    %c0_27 = arith.constant 0 : index
    %c0_28 = arith.constant 0 : index
    %31 = vector.load %arg6[%c1_25, %c1_26, %c0_27, %c0_28] : memref<3x3x4x4xbf16, #tpu.memory_space<vmem>>, vector<1x1x4x4xbf16>
    %32 = vector.shape_cast %31 : vector<1x1x4x4xbf16> to vector<4x4xbf16>
    %cst_29 = arith.constant dense<0.000000e+00> : vector<256x4xf32>
    %33 = tpu.matmul %30, %32, %cst_29 {dimension_numbers = #tpu.dot_dimension_numbers<[1], [0], [0], [1], [0, 0, 1, 1], [], []>} : vector<256x4xbf16>, vector<4x4xbf16>, vector<256x4xf32> -> vector<256x4xf32>
    %34 = arith.addf %29, %33 : vector<256x4xf32>
    %35 = vector.extract_strided_slice %24 {offsets = [32, 0], sizes = [256, 4], strides = [1, 1]} : vector<288x4xbf16> to vector<256x4xbf16>
    %c2_30 = arith.constant 2 : index
    %c1_31 = arith.constant 1 : index
    %c0_32 = arith.constant 0 : index
    %c0_33 = arith.constant 0 : index
    %36 = vector.load %arg6[%c2_30, %c1_31, %c0_32, %c0_33] : memref<3x3x4x4xbf16, #tpu.memory_space<vmem>>, vector<1x1x4x4xbf16>
    %37 = vector.shape_cast %36 : vector<1x1x4x4xbf16> to vector<4x4xbf16>
    %cst_34 = arith.constant dense<0.000000e+00> : vector<256x4xf32>
    %38 = tpu.matmul %35, %37, %cst_34 {dimension_numbers = #tpu.dot_dimension_numbers<[1], [0], [0], [1], [0, 0, 1, 1], [], []>} : vector<256x4xbf16>, vector<4x4xbf16>, vector<256x4xf32> -> vector<256x4xf32>
    %39 = arith.addf %34, %38 : vector<256x4xf32>
    %40 = vector.extract_strided_slice %5 {offsets = [0, 2, 0], sizes = [18, 16, 4], strides = [1, 1, 1]} : vector<18x18x4xbf16> to vector<18x16x4xbf16>
    %41 = vector.shape_cast %40 : vector<18x16x4xbf16> to vector<288x4xbf16>
    %42 = vector.extract_strided_slice %41 {offsets = [0, 0], sizes = [256, 4], strides = [1, 1]} : vector<288x4xbf16> to vector<256x4xbf16>
    %c0_35 = arith.constant 0 : index
    %c2_36 = arith.constant 2 : index
    %c0_37 = arith.constant 0 : index
    %c0_38 = arith.constant 0 : index
    %43 = vector.load %arg6[%c0_35, %c2_36, %c0_37, %c0_38] : memref<3x3x4x4xbf16, #tpu.memory_space<vmem>>, vector<1x1x4x4xbf16>
    %44 = vector.shape_cast %43 : vector<1x1x4x4xbf16> to vector<4x4xbf16>
    %cst_39 = arith.constant dense<0.000000e+00> : vector<256x4xf32>
    %45 = tpu.matmul %42, %44, %cst_39 {dimension_numbers = #tpu.dot_dimension_numbers<[1], [0], [0], [1], [0, 0, 1, 1], [], []>} : vector<256x4xbf16>, vector<4x4xbf16>, vector<256x4xf32> -> vector<256x4xf32>
    %46 = arith.addf %39, %45 : vector<256x4xf32>
    %47 = vector.extract_strided_slice %41 {offsets = [16, 0], sizes = [256, 4], strides = [1, 1]} : vector<288x4xbf16> to vector<256x4xbf16>
    %c1_40 = arith.constant 1 : index
    %c2_41 = arith.constant 2 : index
    %c0_42 = arith.constant 0 : index
    %c0_43 = arith.constant 0 : index
    %48 = vector.load %arg6[%c1_40, %c2_41, %c0_42, %c0_43] : memref<3x3x4x4xbf16, #tpu.memory_space<vmem>>, vector<1x1x4x4xbf16>
    %49 = vector.shape_cast %48 : vector<1x1x4x4xbf16> to vector<4x4xbf16>
    %cst_44 = arith.constant dense<0.000000e+00> : vector<256x4xf32>
    %50 = tpu.matmul %47, %49, %cst_44 {dimension_numbers = #tpu.dot_dimension_numbers<[1], [0], [0], [1], [0, 0, 1, 1], [], []>} : vector<256x4xbf16>, vector<4x4xbf16>, vector<256x4xf32> -> vector<256x4xf32>
    %51 = arith.addf %46, %50 : vector<256x4xf32>
    %52 = vector.extract_strided_slice %41 {offsets = [32, 0], sizes = [256, 4], strides = [1, 1]} : vector<288x4xbf16> to vector<256x4xbf16>
    %c2_45 = arith.constant 2 : index
    %c2_46 = arith.constant 2 : index
    %c0_47 = arith.constant 0 : index
    %c0_48 = arith.constant 0 : index
    %53 = vector.load %arg6[%c2_45, %c2_46, %c0_47, %c0_48] : memref<3x3x4x4xbf16, #tpu.memory_space<vmem>>, vector<1x1x4x4xbf16>
    %54 = vector.shape_cast %53 : vector<1x1x4x4xbf16> to vector<4x4xbf16>
    %cst_49 = arith.constant dense<0.000000e+00> : vector<256x4xf32>
    %55 = tpu.matmul %52, %54, %cst_49 {dimension_numbers = #tpu.dot_dimension_numbers<[1], [0], [0], [1], [0, 0, 1, 1], [], []>} : vector<256x4xbf16>, vector<4x4xbf16>, vector<256x4xf32> -> vector<256x4xf32>
    %56 = arith.addf %51, %55 : vector<256x4xf32>
    %c0_50 = arith.constant 0 : index
    %c0_51 = arith.constant 0 : index
    %c0_52 = arith.constant 0 : index
    %c0_53 = arith.constant 0 : index
    %57 = vector.load %arg4[%c0_50, %c0_51, %c0_52, %c0_53] : memref<1x16x18x4xbf16, #tpu.memory_space<vmem>>, vector<1x16x18x4xbf16>
    %58 = vector.shape_cast %57 : vector<1x16x18x4xbf16> to vector<16x18x4xbf16>
    %c0_54 = arith.constant 0 : index
    %c0_55 = arith.constant 0 : index
    %c0_56 = arith.constant 0 : index
    %c0_57 = arith.constant 0 : index
    %59 = vector.load %arg5[%c0_54, %c0_55, %c0_56, %c0_57] : memref<1x2x18x4xbf16, #tpu.memory_space<vmem>>, vector<1x2x18x4xbf16>
    %60 = vector.shape_cast %59 : vector<1x2x18x4xbf16> to vector<2x18x4xbf16>
    %61 = tpu.concatenate %58, %60 in 0 : vector<16x18x4xbf16>, vector<2x18x4xbf16> -> vector<18x18x4xbf16>
    %62 = vector.extract_strided_slice %61 {offsets = [0, 0, 0], sizes = [18, 16, 4], strides = [1, 1, 1]} : vector<18x18x4xbf16> to vector<18x16x4xbf16>
    %63 = vector.shape_cast %62 : vector<18x16x4xbf16> to vector<288x4xbf16>
    %64 = vector.extract_strided_slice %63 {offsets = [0, 0], sizes = [256, 4], strides = [1, 1]} : vector<288x4xbf16> to vector<256x4xbf16>
    %c0_58 = arith.constant 0 : index
    %c0_59 = arith.constant 0 : index
    %c0_60 = arith.constant 0 : index
    %c0_61 = arith.constant 0 : index
    %65 = vector.load %arg7[%c0_58, %c0_59, %c0_60, %c0_61] : memref<3x3x4x4xbf16, #tpu.memory_space<vmem>>, vector<1x1x4x4xbf16>
    %66 = vector.shape_cast %65 : vector<1x1x4x4xbf16> to vector<4x4xbf16>
    %cst_62 = arith.constant dense<0.000000e+00> : vector<256x4xf32>
    %67 = tpu.matmul %64, %66, %cst_62 {dimension_numbers = #tpu.dot_dimension_numbers<[1], [0], [0], [1], [0, 0, 1, 1], [], []>} : vector<256x4xbf16>, vector<4x4xbf16>, vector<256x4xf32> -> vector<256x4xf32>
    %68 = arith.addf %56, %67 : vector<256x4xf32>
    %69 = vector.extract_strided_slice %63 {offsets = [16, 0], sizes = [256, 4], strides = [1, 1]} : vector<288x4xbf16> to vector<256x4xbf16>
    %c1_63 = arith.constant 1 : index
    %c0_64 = arith.constant 0 : index
    %c0_65 = arith.constant 0 : index
    %c0_66 = arith.constant 0 : index
    %70 = vector.load %arg7[%c1_63, %c0_64, %c0_65, %c0_66] : memref<3x3x4x4xbf16, #tpu.memory_space<vmem>>, vector<1x1x4x4xbf16>
    %71 = vector.shape_cast %70 : vector<1x1x4x4xbf16> to vector<4x4xbf16>
    %cst_67 = arith.constant dense<0.000000e+00> : vector<256x4xf32>
    %72 = tpu.matmul %69, %71, %cst_67 {dimension_numbers = #tpu.dot_dimension_numbers<[1], [0], [0], [1], [0, 0, 1, 1], [], []>} : vector<256x4xbf16>, vector<4x4xbf16>, vector<256x4xf32> -> vector<256x4xf32>
    %73 = arith.addf %68, %72 : vector<256x4xf32>
    %74 = vector.extract_strided_slice %63 {offsets = [32, 0], sizes = [256, 4], strides = [1, 1]} : vector<288x4xbf16> to vector<256x4xbf16>
    %c2_68 = arith.constant 2 : index
    %c0_69 = arith.constant 0 : index
    %c0_70 = arith.constant 0 : index
    %c0_71 = arith.constant 0 : index
    %75 = vector.load %arg7[%c2_68, %c0_69, %c0_70, %c0_71] : memref<3x3x4x4xbf16, #tpu.memory_space<vmem>>, vector<1x1x4x4xbf16>
    %76 = vector.shape_cast %75 : vector<1x1x4x4xbf16> to vector<4x4xbf16>
    %cst_72 = arith.constant dense<0.000000e+00> : vector<256x4xf32>
    %77 = tpu.matmul %74, %76, %cst_72 {dimension_numbers = #tpu.dot_dimension_numbers<[1], [0], [0], [1], [0, 0, 1, 1], [], []>} : vector<256x4xbf16>, vector<4x4xbf16>, vector<256x4xf32> -> vector<256x4xf32>
    %78 = arith.addf %73, %77 : vector<256x4xf32>
    %79 = vector.extract_strided_slice %61 {offsets = [0, 1, 0], sizes = [18, 16, 4], strides = [1, 1, 1]} : vector<18x18x4xbf16> to vector<18x16x4xbf16>
    %80 = vector.shape_cast %79 : vector<18x16x4xbf16> to vector<288x4xbf16>
    %81 = vector.extract_strided_slice %80 {offsets = [0, 0], sizes = [256, 4], strides = [1, 1]} : vector<288x4xbf16> to vector<256x4xbf16>
    %c0_73 = arith.constant 0 : index
    %c1_74 = arith.constant 1 : index
    %c0_75 = arith.constant 0 : index
    %c0_76 = arith.constant 0 : index
    %82 = vector.load %arg7[%c0_73, %c1_74, %c0_75, %c0_76] : memref<3x3x4x4xbf16, #tpu.memory_space<vmem>>, vector<1x1x4x4xbf16>
    %83 = vector.shape_cast %82 : vector<1x1x4x4xbf16> to vector<4x4xbf16>
    %cst_77 = arith.constant dense<0.000000e+00> : vector<256x4xf32>
    %84 = tpu.matmul %81, %83, %cst_77 {dimension_numbers = #tpu.dot_dimension_numbers<[1], [0], [0], [1], [0, 0, 1, 1], [], []>} : vector<256x4xbf16>, vector<4x4xbf16>, vector<256x4xf32> -> vector<256x4xf32>
    %85 = arith.addf %78, %84 : vector<256x4xf32>
    %86 = vector.extract_strided_slice %80 {offsets = [16, 0], sizes = [256, 4], strides = [1, 1]} : vector<288x4xbf16> to vector<256x4xbf16>
    %c1_78 = arith.constant 1 : index
    %c1_79 = arith.constant 1 : index
    %c0_80 = arith.constant 0 : index
    %c0_81 = arith.constant 0 : index
    %87 = vector.load %arg7[%c1_78, %c1_79, %c0_80, %c0_81] : memref<3x3x4x4xbf16, #tpu.memory_space<vmem>>, vector<1x1x4x4xbf16>
    %88 = vector.shape_cast %87 : vector<1x1x4x4xbf16> to vector<4x4xbf16>
    %cst_82 = arith.constant dense<0.000000e+00> : vector<256x4xf32>
    %89 = tpu.matmul %86, %88, %cst_82 {dimension_numbers = #tpu.dot_dimension_numbers<[1], [0], [0], [1], [0, 0, 1, 1], [], []>} : vector<256x4xbf16>, vector<4x4xbf16>, vector<256x4xf32> -> vector<256x4xf32>
    %90 = arith.addf %85, %89 : vector<256x4xf32>
    %91 = vector.extract_strided_slice %80 {offsets = [32, 0], sizes = [256, 4], strides = [1, 1]} : vector<288x4xbf16> to vector<256x4xbf16>
    %c2_83 = arith.constant 2 : index
    %c1_84 = arith.constant 1 : index
    %c0_85 = arith.constant 0 : index
    %c0_86 = arith.constant 0 : index
    %92 = vector.load %arg7[%c2_83, %c1_84, %c0_85, %c0_86] : memref<3x3x4x4xbf16, #tpu.memory_space<vmem>>, vector<1x1x4x4xbf16>
    %93 = vector.shape_cast %92 : vector<1x1x4x4xbf16> to vector<4x4xbf16>
    %cst_87 = arith.constant dense<0.000000e+00> : vector<256x4xf32>
    %94 = tpu.matmul %91, %93, %cst_87 {dimension_numbers = #tpu.dot_dimension_numbers<[1], [0], [0], [1], [0, 0, 1, 1], [], []>} : vector<256x4xbf16>, vector<4x4xbf16>, vector<256x4xf32> -> vector<256x4xf32>
    %95 = arith.addf %90, %94 : vector<256x4xf32>
    %96 = vector.extract_strided_slice %61 {offsets = [0, 2, 0], sizes = [18, 16, 4], strides = [1, 1, 1]} : vector<18x18x4xbf16> to vector<18x16x4xbf16>
    %97 = vector.shape_cast %96 : vector<18x16x4xbf16> to vector<288x4xbf16>
    %98 = vector.extract_strided_slice %97 {offsets = [0, 0], sizes = [256, 4], strides = [1, 1]} : vector<288x4xbf16> to vector<256x4xbf16>
    %c0_88 = arith.constant 0 : index
    %c2_89 = arith.constant 2 : index
    %c0_90 = arith.constant 0 : index
    %c0_91 = arith.constant 0 : index
    %99 = vector.load %arg7[%c0_88, %c2_89, %c0_90, %c0_91] : memref<3x3x4x4xbf16, #tpu.memory_space<vmem>>, vector<1x1x4x4xbf16>
    %100 = vector.shape_cast %99 : vector<1x1x4x4xbf16> to vector<4x4xbf16>
    %cst_92 = arith.constant dense<0.000000e+00> : vector<256x4xf32>
    %101 = tpu.matmul %98, %100, %cst_92 {dimension_numbers = #tpu.dot_dimension_numbers<[1], [0], [0], [1], [0, 0, 1, 1], [], []>} : vector<256x4xbf16>, vector<4x4xbf16>, vector<256x4xf32> -> vector<256x4xf32>
    %102 = arith.addf %95, %101 : vector<256x4xf32>
    %103 = vector.extract_strided_slice %97 {offsets = [16, 0], sizes = [256, 4], strides = [1, 1]} : vector<288x4xbf16> to vector<256x4xbf16>
    %c1_93 = arith.constant 1 : index
    %c2_94 = arith.constant 2 : index
    %c0_95 = arith.constant 0 : index
    %c0_96 = arith.constant 0 : index
    %104 = vector.load %arg7[%c1_93, %c2_94, %c0_95, %c0_96] : memref<3x3x4x4xbf16, #tpu.memory_space<vmem>>, vector<1x1x4x4xbf16>
    %105 = vector.shape_cast %104 : vector<1x1x4x4xbf16> to vector<4x4xbf16>
    %cst_97 = arith.constant dense<0.000000e+00> : vector<256x4xf32>
    %106 = tpu.matmul %103, %105, %cst_97 {dimension_numbers = #tpu.dot_dimension_numbers<[1], [0], [0], [1], [0, 0, 1, 1], [], []>} : vector<256x4xbf16>, vector<4x4xbf16>, vector<256x4xf32> -> vector<256x4xf32>
    %107 = arith.addf %102, %106 : vector<256x4xf32>
    %108 = vector.extract_strided_slice %97 {offsets = [32, 0], sizes = [256, 4], strides = [1, 1]} : vector<288x4xbf16> to vector<256x4xbf16>
    %c2_98 = arith.constant 2 : index
    %c2_99 = arith.constant 2 : index
    %c0_100 = arith.constant 0 : index
    %c0_101 = arith.constant 0 : index
    %109 = vector.load %arg7[%c2_98, %c2_99, %c0_100, %c0_101] : memref<3x3x4x4xbf16, #tpu.memory_space<vmem>>, vector<1x1x4x4xbf16>
    %110 = vector.shape_cast %109 : vector<1x1x4x4xbf16> to vector<4x4xbf16>
    %cst_102 = arith.constant dense<0.000000e+00> : vector<256x4xf32>
    %111 = tpu.matmul %108, %110, %cst_102 {dimension_numbers = #tpu.dot_dimension_numbers<[1], [0], [0], [1], [0, 0, 1, 1], [], []>} : vector<256x4xbf16>, vector<4x4xbf16>, vector<256x4xf32> -> vector<256x4xf32>
    %112 = arith.addf %107, %111 : vector<256x4xf32>
    %c0_103 = arith.constant 0 : index
    %c0_104 = arith.constant 0 : index
    %113 = vector.load %arg8[%c0_103, %c0_104] : memref<1x4xf32, #tpu.memory_space<vmem>>, vector<1x4xf32>
    %114 = vector.broadcast %113 : vector<1x4xf32> to vector<256x4xf32>
    %115 = arith.addf %112, %114 : vector<256x4xf32>
    %116 = vector.shape_cast %115 : vector<256x4xf32> to vector<16x16x4xf32>
    %c0_105 = arith.constant 0 : index
    %c0_106 = arith.constant 0 : index
    %c0_107 = arith.constant 0 : index
    %c0_108 = arith.constant 0 : index
    %117 = vector.load %arg9[%c0_105, %c0_106, %c0_107, %c0_108] : memref<1x16x16x4xf32, #tpu.memory_space<vmem>>, vector<1x16x16x4xf32>
    %118 = vector.shape_cast %117 : vector<1x16x16x4xf32> to vector<16x16x4xf32>
    %119 = vector.shape_cast %116 : vector<16x16x4xf32> to vector<1x16x16x4xf32>
    tpu.vector_store %arg9[%c0_105, %c0_106, %c0_107, %c0_108], %119 {strides = array<i32>} : memref<1x16x16x4xf32, #tpu.memory_space<vmem>>, vector<1x16x16x4xf32>,
    %cst_109 = arith.constant dense<0.000000e+00> : vector<4xf32>
    %120 = vector.multi_reduction <add>, %115, %cst_109 [0] : vector<256x4xf32> to vector<4xf32>
    %121 = vector.shape_cast %120 : vector<4xf32> to vector<1x4xf32>
    %122 = arith.mulf %115, %115 : vector<256x4xf32>
    %cst_110 = arith.constant dense<0.000000e+00> : vector<4xf32>
    %123 = vector.multi_reduction <add>, %122, %cst_110 [0] : vector<256x4xf32> to vector<4xf32>
    %124 = vector.shape_cast %123 : vector<4xf32> to vector<1x4xf32>
    %125 = tpu.concatenate %121, %124 in 0 : vector<1x4xf32>, vector<1x4xf32> -> vector<2x4xf32>
    %c0_111 = arith.constant 0 : index
    %c0_112 = arith.constant 0 : index
    %c0_113 = arith.constant 0 : index
    %c0_114 = arith.constant 0 : index
    %126 = vector.load %arg10[%c0_111, %c0_112, %c0_113, %c0_114] : memref<1x1x2x4xf32, #tpu.memory_space<vmem>>, vector<1x1x2x4xf32>
    %127 = vector.shape_cast %126 : vector<1x1x2x4xf32> to vector<2x4xf32>
    %128 = vector.shape_cast %125 : vector<2x4xf32> to vector<1x1x2x4xf32>
    tpu.vector_store %arg10[%c0_111, %c0_112, %c0_113, %c0_114], %128 {strides = array<i32>} : memref<1x1x2x4xf32, #tpu.memory_space<vmem>>, vector<1x1x2x4xf32>,
    return
  }
  func.func @transform_0(%arg0: i32, %arg1: i32) -> (i32, i32, i32, i32) {
    %c0_i32 = arith.constant 0 : i32
    %c0_i32_0 = arith.constant 0 : i32
    %c0_i32_1 = arith.constant 0 : i32
    return %arg0, %arg1, %c0_i32, %c0_i32_0 : i32, i32, i32, i32
  }
  func.func @transform_1(%arg0: i32, %arg1: i32) -> (i32, i32, i32, i32) {
    %c1_i32 = arith.constant 1 : i32
    %0 = arith.addi %arg1, %c1_i32 : i32
    %c8_i32 = arith.constant 8 : i32
    %1 = arith.muli %0, %c8_i32 : i32
    %c0_i32 = arith.constant 0 : i32
    %c0_i32_0 = arith.constant 0 : i32
    %c0_i32_1 = arith.constant 0 : i32
    return %arg0, %1, %c0_i32, %c0_i32_0 : i32, i32, i32, i32
  }
  func.func @transform_2(%arg0: i32, %arg1: i32) -> (i32, i32, i32, i32) {
    %c0_i32 = arith.constant 0 : i32
    %c0_i32_0 = arith.constant 0 : i32
    %c0_i32_1 = arith.constant 0 : i32
    return %arg0, %arg1, %c0_i32, %c0_i32_0 : i32, i32, i32, i32
  }
  func.func @transform_3(%arg0: i32, %arg1: i32) -> (i32, i32, i32, i32) {
    %c1_i32 = arith.constant 1 : i32
    %0 = arith.addi %arg1, %c1_i32 : i32
    %c8_i32 = arith.constant 8 : i32
    %1 = arith.muli %0, %c8_i32 : i32
    %c0_i32 = arith.constant 0 : i32
    %c0_i32_0 = arith.constant 0 : i32
    %c0_i32_1 = arith.constant 0 : i32
    return %arg0, %1, %c0_i32, %c0_i32_0 : i32, i32, i32, i32
  }
  func.func @transform_4(%arg0: i32, %arg1: i32) -> (i32, i32, i32, i32) {
    %c0_i32 = arith.constant 0 : i32
    %c0_i32_0 = arith.constant 0 : i32
    %c0_i32_1 = arith.constant 0 : i32
    %c0_i32_2 = arith.constant 0 : i32
    %c0_i32_3 = arith.constant 0 : i32
    return %c0_i32, %c0_i32_0, %c0_i32_1, %c0_i32_2 : i32, i32, i32, i32
  }
  func.func @transform_5(%arg0: i32, %arg1: i32) -> (i32, i32, i32, i32) {
    %c0_i32 = arith.constant 0 : i32
    %c0_i32_0 = arith.constant 0 : i32
    %c0_i32_1 = arith.constant 0 : i32
    %c0_i32_2 = arith.constant 0 : i32
    %c0_i32_3 = arith.constant 0 : i32
    return %c0_i32, %c0_i32_0, %c0_i32_1, %c0_i32_2 : i32, i32, i32, i32
  }
  func.func @transform_6(%arg0: i32, %arg1: i32) -> (i32, i32) {
    %c0_i32 = arith.constant 0 : i32
    %c0_i32_0 = arith.constant 0 : i32
    %c0_i32_1 = arith.constant 0 : i32
    return %c0_i32, %c0_i32_0 : i32, i32
  }
  func.func @transform_7(%arg0: i32, %arg1: i32) -> (i32, i32, i32, i32) {
    %c0_i32 = arith.constant 0 : i32
    %c0_i32_0 = arith.constant 0 : i32
    %c0_i32_1 = arith.constant 0 : i32
    return %arg0, %arg1, %c0_i32, %c0_i32_0 : i32, i32, i32, i32
  }
  func.func @transform_8(%arg0: i32, %arg1: i32) -> (i32, i32, i32, i32) {
    %c0_i32 = arith.constant 0 : i32
    %c0_i32_0 = arith.constant 0 : i32
    %c0_i32_1 = arith.constant 0 : i32
    return %arg0, %arg1, %c0_i32, %c0_i32_0 : i32, i32, i32, i32
  }
}

module attributes {stable_mosaic.version = 11 : i64} {
  func.func @kernel(%arg0: i32, %arg1: i32, %arg2: memref<1x16x18x4xbf16, #tpu.memory_space<vmem>>, %arg3: memref<1x2x18x4xbf16, #tpu.memory_space<vmem>>, %arg4: memref<3x3x4x4xbf16, #tpu.memory_space<vmem>>, %arg5: memref<1x4xf32, #tpu.memory_space<vmem>>, %arg6: memref<1x16x16x4xf32, #tpu.memory_space<vmem>>, %arg7: memref<1x1x2x4xf32, #tpu.memory_space<vmem>>) attributes {dimension_semantics = [#tpu.dimension_semantics<parallel>, #tpu.dimension_semantics<parallel>], iteration_bounds = array<i64: 2, 1>, scalar_prefetch = 0 : i64, scratch_operands = 0 : i64, tpu.core_type = #tpu.core_type<tc>, window_params = [{transform_indices = @transform_0, window_bounds = array<i64: 1, 16, 18, 4>}, {transform_indices = @transform_1, window_bounds = array<i64: 1, 2, 18, 4>}, {pipeline_mode = #tpu.pipeline_mode<synchronous>, transform_indices = @transform_2, window_bounds = array<i64: 3, 3, 4, 4>}, {pipeline_mode = #tpu.pipeline_mode<synchronous>, transform_indices = @transform_3, window_bounds = array<i64: 1, 4>}, {transform_indices = @transform_4, window_bounds = array<i64: 1, 16, 16, 4>}, {transform_indices = @transform_5, window_bounds = array<i64: 1, 1, 2, 4>}]} {
    %cst = arith.constant 0.000000e+00 : f32
    %0 = vector.broadcast %cst : f32 to vector<256x4xf32>
    %c0 = arith.constant 0 : index
    %c0_0 = arith.constant 0 : index
    %c0_1 = arith.constant 0 : index
    %c0_2 = arith.constant 0 : index
    %1 = vector.load %arg2[%c0, %c0_0, %c0_1, %c0_2] : memref<1x16x18x4xbf16, #tpu.memory_space<vmem>>, vector<1x16x18x4xbf16>
    %2 = vector.shape_cast %1 : vector<1x16x18x4xbf16> to vector<16x18x4xbf16>
    %c0_3 = arith.constant 0 : index
    %c0_4 = arith.constant 0 : index
    %c0_5 = arith.constant 0 : index
    %c0_6 = arith.constant 0 : index
    %3 = vector.load %arg3[%c0_3, %c0_4, %c0_5, %c0_6] : memref<1x2x18x4xbf16, #tpu.memory_space<vmem>>, vector<1x2x18x4xbf16>
    %4 = vector.shape_cast %3 : vector<1x2x18x4xbf16> to vector<2x18x4xbf16>
    %5 = tpu.concatenate %2, %4 in 0 : vector<16x18x4xbf16>, vector<2x18x4xbf16> -> vector<18x18x4xbf16>
    %6 = vector.extract_strided_slice %5 {offsets = [0, 0, 0], sizes = [18, 16, 4], strides = [1, 1, 1]} : vector<18x18x4xbf16> to vector<18x16x4xbf16>
    %7 = vector.shape_cast %6 : vector<18x16x4xbf16> to vector<288x4xbf16>
    %8 = vector.extract_strided_slice %7 {offsets = [0, 0], sizes = [256, 4], strides = [1, 1]} : vector<288x4xbf16> to vector<256x4xbf16>
    %c0_7 = arith.constant 0 : index
    %c0_8 = arith.constant 0 : index
    %c0_9 = arith.constant 0 : index
    %c0_10 = arith.constant 0 : index
    %9 = vector.load %arg4[%c0_7, %c0_8, %c0_9, %c0_10] : memref<3x3x4x4xbf16, #tpu.memory_space<vmem>>, vector<1x1x4x4xbf16>
    %10 = vector.shape_cast %9 : vector<1x1x4x4xbf16> to vector<4x4xbf16>
    %cst_11 = arith.constant dense<0.000000e+00> : vector<256x4xf32>
    %11 = tpu.matmul %8, %10, %cst_11 {dimension_numbers = #tpu.dot_dimension_numbers<[1], [0], [0], [1], [0, 0, 1, 1], [], []>} : vector<256x4xbf16>, vector<4x4xbf16>, vector<256x4xf32> -> vector<256x4xf32>
    %12 = arith.addf %0, %11 : vector<256x4xf32>
    %13 = vector.extract_strided_slice %7 {offsets = [16, 0], sizes = [256, 4], strides = [1, 1]} : vector<288x4xbf16> to vector<256x4xbf16>
    %c1 = arith.constant 1 : index
    %c0_12 = arith.constant 0 : index
    %c0_13 = arith.constant 0 : index
    %c0_14 = arith.constant 0 : index
    %14 = vector.load %arg4[%c1, %c0_12, %c0_13, %c0_14] : memref<3x3x4x4xbf16, #tpu.memory_space<vmem>>, vector<1x1x4x4xbf16>
    %15 = vector.shape_cast %14 : vector<1x1x4x4xbf16> to vector<4x4xbf16>
    %cst_15 = arith.constant dense<0.000000e+00> : vector<256x4xf32>
    %16 = tpu.matmul %13, %15, %cst_15 {dimension_numbers = #tpu.dot_dimension_numbers<[1], [0], [0], [1], [0, 0, 1, 1], [], []>} : vector<256x4xbf16>, vector<4x4xbf16>, vector<256x4xf32> -> vector<256x4xf32>
    %17 = arith.addf %12, %16 : vector<256x4xf32>
    %18 = vector.extract_strided_slice %7 {offsets = [32, 0], sizes = [256, 4], strides = [1, 1]} : vector<288x4xbf16> to vector<256x4xbf16>
    %c2 = arith.constant 2 : index
    %c0_16 = arith.constant 0 : index
    %c0_17 = arith.constant 0 : index
    %c0_18 = arith.constant 0 : index
    %19 = vector.load %arg4[%c2, %c0_16, %c0_17, %c0_18] : memref<3x3x4x4xbf16, #tpu.memory_space<vmem>>, vector<1x1x4x4xbf16>
    %20 = vector.shape_cast %19 : vector<1x1x4x4xbf16> to vector<4x4xbf16>
    %cst_19 = arith.constant dense<0.000000e+00> : vector<256x4xf32>
    %21 = tpu.matmul %18, %20, %cst_19 {dimension_numbers = #tpu.dot_dimension_numbers<[1], [0], [0], [1], [0, 0, 1, 1], [], []>} : vector<256x4xbf16>, vector<4x4xbf16>, vector<256x4xf32> -> vector<256x4xf32>
    %22 = arith.addf %17, %21 : vector<256x4xf32>
    %23 = vector.extract_strided_slice %5 {offsets = [0, 1, 0], sizes = [18, 16, 4], strides = [1, 1, 1]} : vector<18x18x4xbf16> to vector<18x16x4xbf16>
    %24 = vector.shape_cast %23 : vector<18x16x4xbf16> to vector<288x4xbf16>
    %25 = vector.extract_strided_slice %24 {offsets = [0, 0], sizes = [256, 4], strides = [1, 1]} : vector<288x4xbf16> to vector<256x4xbf16>
    %c0_20 = arith.constant 0 : index
    %c1_21 = arith.constant 1 : index
    %c0_22 = arith.constant 0 : index
    %c0_23 = arith.constant 0 : index
    %26 = vector.load %arg4[%c0_20, %c1_21, %c0_22, %c0_23] : memref<3x3x4x4xbf16, #tpu.memory_space<vmem>>, vector<1x1x4x4xbf16>
    %27 = vector.shape_cast %26 : vector<1x1x4x4xbf16> to vector<4x4xbf16>
    %cst_24 = arith.constant dense<0.000000e+00> : vector<256x4xf32>
    %28 = tpu.matmul %25, %27, %cst_24 {dimension_numbers = #tpu.dot_dimension_numbers<[1], [0], [0], [1], [0, 0, 1, 1], [], []>} : vector<256x4xbf16>, vector<4x4xbf16>, vector<256x4xf32> -> vector<256x4xf32>
    %29 = arith.addf %22, %28 : vector<256x4xf32>
    %30 = vector.extract_strided_slice %24 {offsets = [16, 0], sizes = [256, 4], strides = [1, 1]} : vector<288x4xbf16> to vector<256x4xbf16>
    %c1_25 = arith.constant 1 : index
    %c1_26 = arith.constant 1 : index
    %c0_27 = arith.constant 0 : index
    %c0_28 = arith.constant 0 : index
    %31 = vector.load %arg4[%c1_25, %c1_26, %c0_27, %c0_28] : memref<3x3x4x4xbf16, #tpu.memory_space<vmem>>, vector<1x1x4x4xbf16>
    %32 = vector.shape_cast %31 : vector<1x1x4x4xbf16> to vector<4x4xbf16>
    %cst_29 = arith.constant dense<0.000000e+00> : vector<256x4xf32>
    %33 = tpu.matmul %30, %32, %cst_29 {dimension_numbers = #tpu.dot_dimension_numbers<[1], [0], [0], [1], [0, 0, 1, 1], [], []>} : vector<256x4xbf16>, vector<4x4xbf16>, vector<256x4xf32> -> vector<256x4xf32>
    %34 = arith.addf %29, %33 : vector<256x4xf32>
    %35 = vector.extract_strided_slice %24 {offsets = [32, 0], sizes = [256, 4], strides = [1, 1]} : vector<288x4xbf16> to vector<256x4xbf16>
    %c2_30 = arith.constant 2 : index
    %c1_31 = arith.constant 1 : index
    %c0_32 = arith.constant 0 : index
    %c0_33 = arith.constant 0 : index
    %36 = vector.load %arg4[%c2_30, %c1_31, %c0_32, %c0_33] : memref<3x3x4x4xbf16, #tpu.memory_space<vmem>>, vector<1x1x4x4xbf16>
    %37 = vector.shape_cast %36 : vector<1x1x4x4xbf16> to vector<4x4xbf16>
    %cst_34 = arith.constant dense<0.000000e+00> : vector<256x4xf32>
    %38 = tpu.matmul %35, %37, %cst_34 {dimension_numbers = #tpu.dot_dimension_numbers<[1], [0], [0], [1], [0, 0, 1, 1], [], []>} : vector<256x4xbf16>, vector<4x4xbf16>, vector<256x4xf32> -> vector<256x4xf32>
    %39 = arith.addf %34, %38 : vector<256x4xf32>
    %40 = vector.extract_strided_slice %5 {offsets = [0, 2, 0], sizes = [18, 16, 4], strides = [1, 1, 1]} : vector<18x18x4xbf16> to vector<18x16x4xbf16>
    %41 = vector.shape_cast %40 : vector<18x16x4xbf16> to vector<288x4xbf16>
    %42 = vector.extract_strided_slice %41 {offsets = [0, 0], sizes = [256, 4], strides = [1, 1]} : vector<288x4xbf16> to vector<256x4xbf16>
    %c0_35 = arith.constant 0 : index
    %c2_36 = arith.constant 2 : index
    %c0_37 = arith.constant 0 : index
    %c0_38 = arith.constant 0 : index
    %43 = vector.load %arg4[%c0_35, %c2_36, %c0_37, %c0_38] : memref<3x3x4x4xbf16, #tpu.memory_space<vmem>>, vector<1x1x4x4xbf16>
    %44 = vector.shape_cast %43 : vector<1x1x4x4xbf16> to vector<4x4xbf16>
    %cst_39 = arith.constant dense<0.000000e+00> : vector<256x4xf32>
    %45 = tpu.matmul %42, %44, %cst_39 {dimension_numbers = #tpu.dot_dimension_numbers<[1], [0], [0], [1], [0, 0, 1, 1], [], []>} : vector<256x4xbf16>, vector<4x4xbf16>, vector<256x4xf32> -> vector<256x4xf32>
    %46 = arith.addf %39, %45 : vector<256x4xf32>
    %47 = vector.extract_strided_slice %41 {offsets = [16, 0], sizes = [256, 4], strides = [1, 1]} : vector<288x4xbf16> to vector<256x4xbf16>
    %c1_40 = arith.constant 1 : index
    %c2_41 = arith.constant 2 : index
    %c0_42 = arith.constant 0 : index
    %c0_43 = arith.constant 0 : index
    %48 = vector.load %arg4[%c1_40, %c2_41, %c0_42, %c0_43] : memref<3x3x4x4xbf16, #tpu.memory_space<vmem>>, vector<1x1x4x4xbf16>
    %49 = vector.shape_cast %48 : vector<1x1x4x4xbf16> to vector<4x4xbf16>
    %cst_44 = arith.constant dense<0.000000e+00> : vector<256x4xf32>
    %50 = tpu.matmul %47, %49, %cst_44 {dimension_numbers = #tpu.dot_dimension_numbers<[1], [0], [0], [1], [0, 0, 1, 1], [], []>} : vector<256x4xbf16>, vector<4x4xbf16>, vector<256x4xf32> -> vector<256x4xf32>
    %51 = arith.addf %46, %50 : vector<256x4xf32>
    %52 = vector.extract_strided_slice %41 {offsets = [32, 0], sizes = [256, 4], strides = [1, 1]} : vector<288x4xbf16> to vector<256x4xbf16>
    %c2_45 = arith.constant 2 : index
    %c2_46 = arith.constant 2 : index
    %c0_47 = arith.constant 0 : index
    %c0_48 = arith.constant 0 : index
    %53 = vector.load %arg4[%c2_45, %c2_46, %c0_47, %c0_48] : memref<3x3x4x4xbf16, #tpu.memory_space<vmem>>, vector<1x1x4x4xbf16>
    %54 = vector.shape_cast %53 : vector<1x1x4x4xbf16> to vector<4x4xbf16>
    %cst_49 = arith.constant dense<0.000000e+00> : vector<256x4xf32>
    %55 = tpu.matmul %52, %54, %cst_49 {dimension_numbers = #tpu.dot_dimension_numbers<[1], [0], [0], [1], [0, 0, 1, 1], [], []>} : vector<256x4xbf16>, vector<4x4xbf16>, vector<256x4xf32> -> vector<256x4xf32>
    %56 = arith.addf %51, %55 : vector<256x4xf32>
    %c0_50 = arith.constant 0 : index
    %c0_51 = arith.constant 0 : index
    %57 = vector.load %arg5[%c0_50, %c0_51] : memref<1x4xf32, #tpu.memory_space<vmem>>, vector<1x4xf32>
    %58 = vector.broadcast %57 : vector<1x4xf32> to vector<256x4xf32>
    %59 = arith.addf %56, %58 : vector<256x4xf32>
    %60 = vector.shape_cast %59 : vector<256x4xf32> to vector<16x16x4xf32>
    %c0_52 = arith.constant 0 : index
    %c0_53 = arith.constant 0 : index
    %c0_54 = arith.constant 0 : index
    %c0_55 = arith.constant 0 : index
    %61 = vector.load %arg6[%c0_52, %c0_53, %c0_54, %c0_55] : memref<1x16x16x4xf32, #tpu.memory_space<vmem>>, vector<1x16x16x4xf32>
    %62 = vector.shape_cast %61 : vector<1x16x16x4xf32> to vector<16x16x4xf32>
    %63 = vector.shape_cast %60 : vector<16x16x4xf32> to vector<1x16x16x4xf32>
    tpu.vector_store %arg6[%c0_52, %c0_53, %c0_54, %c0_55], %63 {strides = array<i32>} : memref<1x16x16x4xf32, #tpu.memory_space<vmem>>, vector<1x16x16x4xf32>,
    %cst_56 = arith.constant dense<0.000000e+00> : vector<4xf32>
    %64 = vector.multi_reduction <add>, %59, %cst_56 [0] : vector<256x4xf32> to vector<4xf32>
    %65 = vector.shape_cast %64 : vector<4xf32> to vector<1x4xf32>
    %66 = arith.mulf %59, %59 : vector<256x4xf32>
    %cst_57 = arith.constant dense<0.000000e+00> : vector<4xf32>
    %67 = vector.multi_reduction <add>, %66, %cst_57 [0] : vector<256x4xf32> to vector<4xf32>
    %68 = vector.shape_cast %67 : vector<4xf32> to vector<1x4xf32>
    %69 = tpu.concatenate %65, %68 in 0 : vector<1x4xf32>, vector<1x4xf32> -> vector<2x4xf32>
    %c0_58 = arith.constant 0 : index
    %c0_59 = arith.constant 0 : index
    %c0_60 = arith.constant 0 : index
    %c0_61 = arith.constant 0 : index
    %70 = vector.load %arg7[%c0_58, %c0_59, %c0_60, %c0_61] : memref<1x1x2x4xf32, #tpu.memory_space<vmem>>, vector<1x1x2x4xf32>
    %71 = vector.shape_cast %70 : vector<1x1x2x4xf32> to vector<2x4xf32>
    %72 = vector.shape_cast %69 : vector<2x4xf32> to vector<1x1x2x4xf32>
    tpu.vector_store %arg7[%c0_58, %c0_59, %c0_60, %c0_61], %72 {strides = array<i32>} : memref<1x1x2x4xf32, #tpu.memory_space<vmem>>, vector<1x1x2x4xf32>,
    return
  }
  func.func @transform_0(%arg0: i32, %arg1: i32) -> (i32, i32, i32, i32) {
    %c0_i32 = arith.constant 0 : i32
    %c0_i32_0 = arith.constant 0 : i32
    %c0_i32_1 = arith.constant 0 : i32
    return %arg0, %arg1, %c0_i32, %c0_i32_0 : i32, i32, i32, i32
  }
  func.func @transform_1(%arg0: i32, %arg1: i32) -> (i32, i32, i32, i32) {
    %c1_i32 = arith.constant 1 : i32
    %0 = arith.addi %arg1, %c1_i32 : i32
    %c8_i32 = arith.constant 8 : i32
    %1 = arith.muli %0, %c8_i32 : i32
    %c0_i32 = arith.constant 0 : i32
    %c0_i32_0 = arith.constant 0 : i32
    %c0_i32_1 = arith.constant 0 : i32
    return %arg0, %1, %c0_i32, %c0_i32_0 : i32, i32, i32, i32
  }
  func.func @transform_2(%arg0: i32, %arg1: i32) -> (i32, i32, i32, i32) {
    %c0_i32 = arith.constant 0 : i32
    %c0_i32_0 = arith.constant 0 : i32
    %c0_i32_1 = arith.constant 0 : i32
    %c0_i32_2 = arith.constant 0 : i32
    %c0_i32_3 = arith.constant 0 : i32
    return %c0_i32, %c0_i32_0, %c0_i32_1, %c0_i32_2 : i32, i32, i32, i32
  }
  func.func @transform_3(%arg0: i32, %arg1: i32) -> (i32, i32) {
    %c0_i32 = arith.constant 0 : i32
    %c0_i32_0 = arith.constant 0 : i32
    %c0_i32_1 = arith.constant 0 : i32
    return %c0_i32, %c0_i32_0 : i32, i32
  }
  func.func @transform_4(%arg0: i32, %arg1: i32) -> (i32, i32, i32, i32) {
    %c0_i32 = arith.constant 0 : i32
    %c0_i32_0 = arith.constant 0 : i32
    %c0_i32_1 = arith.constant 0 : i32
    return %arg0, %arg1, %c0_i32, %c0_i32_0 : i32, i32, i32, i32
  }
  func.func @transform_5(%arg0: i32, %arg1: i32) -> (i32, i32, i32, i32) {
    %c0_i32 = arith.constant 0 : i32
    %c0_i32_0 = arith.constant 0 : i32
    %c0_i32_1 = arith.constant 0 : i32
    return %arg0, %arg1, %c0_i32, %c0_i32_0 : i32, i32, i32, i32
  }
}

</mosaic_0001>

<bundles_post_ra>
// kernel: tile.8
= control target key start
LH: loop header
LB: loop body
LE: loop exit
PB: predicated region body
PF: predicated region fallthrough
CT: control target
= control target key end

     0   :  { %s22_s0 = inlined_call_operand.vmem [shape: f32[4], index: 0, kind: input, shape index: {}]   ;;  %s23_s1 = inlined_call_operand.vmem [shape: f32[4,4], index: 1, kind: output, shape index: {}]  }
   0x1   :  { %v4_v0 = vld [vmem:[%s22_s0] ss:$0 sm:$0xff] }
   0x2   :  { %5 = vst [vmem:[%s23_s1] sm:$0xf] %v4_v0 }

// kernel: tile.9
= control target key start
LH: loop header
LB: loop body
LE: loop exit
PB: predicated region body
PF: predicated region fallthrough
CT: control target
= control target key end

     0   :  { %s37_s8 = smov 4   ;;  %s38_s9 = smov 8   ;;  %vm7_vm0 = vcmask 31744   ;;  %vm13_vm1 = vcmask 130144   ;;  %vm19_vm2 = vcmask 97344   ;;  %vm25_vm3 = vcmask 64544   ;;  %s55_s0 = inlined_call_operand.vmem [shape: f32[4,4], index: 0, kind: input, shape index: {}]   ;;  %s56_s1 = inlined_call_operand.vmem [shape: f32[1,16], index: 1, kind: output, shape index: {}]  }
   0x1   :  { %v4_v0 = vld [vmem:[%s55_s0] sm:$0xf]  ;;  %s36_s0 = smov 12  }
   0x2   :  { %5 = vst [vmem:[#allocation1] sm:$0xf] %v4_v0 }
   0x9   :  { %v10_v1 = vld [vmem:[#allocation1 + $0x3] sm:$0x1]   ;;  %v22_v2 = vld [vmem:[#allocation1 + $0x1] sm:$0x1]   ;;  %v16_v3 = vld [vmem:[#allocation1 + $0x2] sm:$0x1]  }
   0xa   :  { %11 = vrot.lane.b32.xlu0 %v10_v1, %s36_s0  ;;  %23 = vrot.lane.b32.xlu1 %v22_v2, %s37_s8  ;;  %v6_v4 = vld [vmem:[#allocation1] sm:$0x1]  }
   0xb   :  { %8 = vst.msk [vmem:[#allocation0] sm:$0x1] %vm7_vm0, %v6_v4  }
  0x12   :  { %17 = vrot.lane.b32.xlu0 %v16_v3, %s38_s9 }
  0x7c   :  { %v12_v5 = vpop.permute.xlu0 %11   ;;  %v24_v6 = vpop.permute.xlu1 %23  }
  0x7d   :  { %14 = vst.msk [vmem:[#allocation0] sm:$0x1] %vm13_vm1, %v12_v5  }
  0x84   :  { %v18_v7 = vpop.permute.xlu0 %17  }
  0x85   :  { %20 = vst.msk [vmem:[#allocation0] sm:$0x1] %vm19_vm2, %v18_v7  }
  0x86   :  { %26 = vst.msk [vmem:[#allocation0] sm:$0x1] %vm25_vm3, %v24_v6  }
  0x8d   :  { %v29_v8 = vld [vmem:[#allocation0] sm:$0x1] }
  0x8e   :  { %32 = vst [vmem:[%s56_s1] sm:$0x1] %v29_v8 }

// kernel: upconv_forward.3
= control target key start
LH: loop header
LB: loop body
LE: loop exit
PB: predicated region body
PF: predicated region fallthrough
CT: control target
= control target key end

     0   :  { %vm101_vm0 = vcmask 1043456   ;;  %vm76_vm1 = vcmask 64512   ;;  %vm170_vm2 = vcmask 125952   ;;  %s365_s1 = inlined_call_operand.vmem [shape: bf16[8,16], index: 1, kind: input, shape index: {}]   ;;  %s366_s0 = inlined_call_operand.vmem [shape: bf16[128,8], index: 0, kind: input, shape index: {}]   ;;  %s367_s2 = inlined_call_operand.vmem [shape: f32[1,16], index: 2, kind: input, shape index: {}]   ;;  %s368_s3 = inlined_call_operand.vmem [shape: bf16[128,16], index: 3, kind: output, shape index: {}]  }
   0x1   :  { %v31_v0 = vld [vmem:[%s365_s1] sm:$0xf]  ;;  %v233_v3 = vld [vmem:[%s366_s0 + $0x10] sm:$0xff]  ;;  %v232_v6 = vld [vmem:[%s366_s0 + $0x8] sm:$0xff] }
   0x2   :  { %v103_v1 = vsel %vm101_vm0, %v31_v0, 0  ;;  %v231_v2 = vld [vmem:[%s366_s0] sm:$0xff]  ;;  %v237_v5 = vld [vmem:[%s366_s0 + $0x30] sm:$0xff]  ;;  %v234_v7 = vld [vmem:[%s366_s0 + $0x18] sm:$0xff] }
   0x3   :  { %112 = vmatpush.bf16.msra.mxu0 %v103_v1  ;;  %239 = vmatpush.bf16.msra.mxu1 %v103_v1  ;;  %v235_v4 = vld [vmem:[%s366_s0 + $0x20] sm:$0xff]  ;;  %v236_v8 = vld [vmem:[%s366_s0 + $0x28] sm:$0xff]  ;;  %v238_v9 = vld [vmem:[%s366_s0 + $0x38] sm:$0xff] }
   0x4   :  { %240 = vmatpush.bf16.msra.mxu2 %v103_v1  ;;  %241 = vmatpush.bf16.msra.mxu3 %v103_v1  ;;  %v242_v10 = vld [vmem:[%s367_s2] ss:$0 sm:$0xff] }
   0x6   :  { %223 = vmatmul.msk.bf16.vlgmr.msra.gmra.mxu0 %vm76_vm1, %v231_v2  ;;  %225 = vmatmul.msk.bf16.vlgmr.msra.gmra.mxu1 %vm76_vm1, %v233_v3 }
   0x7   :  { %227 = vmatmul.msk.bf16.vlgmr.msra.gmra.mxu2 %vm76_vm1, %v235_v4  ;;  %229 = vmatmul.msk.bf16.vlgmr.msra.gmra.mxu3 %vm76_vm1, %v237_v5 }
  0x16   :  { %224 = vmatmul.msk.bf16.gmra.mxu0 %vm76_vm1, %v232_v6  ;;  %226 = vmatmul.msk.bf16.gmra.mxu1 %vm76_vm1, %v234_v7 }
  0x17   :  { %228 = vmatmul.msk.bf16.gmra.mxu2 %vm76_vm1, %v236_v8  ;;  %230 = vmatmul.msk.bf16.gmra.mxu3 %vm76_vm1, %v238_v9 }
  0x83   :  { %v114_v11 = vpop.f32.mrf.mxu0  ;;  %v124_v12 = vpop.f32.mrf.mxu1 }
  0x84   :  { %v115_v13 = vadd.f32 %v242_v10, %v114_v11  ;;  %v125_v14 = vadd.f32 %v242_v10, %v124_v12 }
  0x86   :  { %v154_v15 = vpack.c.bf16 %v115_v13, %v115_v13  ;;  %v158_v16 = vpack.c.bf16 %v125_v14, %v125_v14 }
  0x88   :  { %171 = vst.msk [vmem:[%s368_s3] sm:$0xf] %vm170_vm2, %v154_v15 }
  0x89   :  { %175 = vst.msk [vmem:[%s368_s3 + $0x10] sm:$0xf] %vm170_vm2, %v158_v16 }
  0x8a   :  { %v134_v17 = vpop.f32.mrf.mxu2  ;;  %v144_v18 = vpop.f32.mrf.mxu3 }
  0x8b   :  { %v135_v19 = vadd.f32 %v242_v10, %v134_v17  ;;  %v145_v20 = vadd.f32 %v242_v10, %v144_v18  ;;  %v116_v21 = vpop.f32.mrf.mxu0  ;;  %v126_v22 = vpop.f32.mrf.mxu1 }
  0x8c   :  { %v117_v23 = vadd.f32 %v242_v10, %v116_v21  ;;  %v127_v24 = vadd.f32 %v242_v10, %v126_v22 }
  0x8d   :  { %v162_v25 = vpack.c.bf16 %v135_v19, %v135_v19  ;;  %v166_v26 = vpack.c.bf16 %v145_v20, %v145_v20 }
  0x8e   :  { %v155_v27 = vpack.c.bf16 %v117_v23, %v117_v23  ;;  %v159_v28 = vpack.c.bf16 %v127_v24, %v127_v24 }
  0x8f   :  { %179 = vst.msk [vmem:[%s368_s3 + $0x20] sm:$0xf] %vm170_vm2, %v162_v25 }
  0x90   :  { %183 = vst.msk [vmem:[%s368_s3 + $0x30] sm:$0xf] %vm170_vm2, %v166_v26 }
  0x91   :  { %172 = vst.msk [vmem:[%s368_s3 + $0x4] sm:$0xf] %vm170_vm2, %v155_v27 }
  0x92   :  { %176 = vst.msk [vmem:[%s368_s3 + $0x14] sm:$0xf] %vm170_vm2, %v159_v28  ;;  %v136_v29 = vpop.f32.mrf.mxu2  ;;  %v146_v30 = vpop.f32.mrf.mxu3 }
  0x93   :  { %v137_v31 = vadd.f32 %v242_v10, %v136_v29  ;;  %v147_v32 = vadd.f32 %v242_v10, %v146_v30  ;;  %v119_v33 = vpop.f32.mrf.mxu0  ;;  %v129_v34 = vpop.f32.mrf.mxu1 }
  0x94   :  { %v120_v35 = vadd.f32 %v242_v10, %v119_v33  ;;  %v130_v36 = vadd.f32 %v242_v10, %v129_v34 }
  0x95   :  { %v163_v37 = vpack.c.bf16 %v137_v31, %v137_v31  ;;  %v167_v38 = vpack.c.bf16 %v147_v32, %v147_v32 }
  0x96   :  { %v156_v39 = vpack.c.bf16 %v120_v35, %v120_v35  ;;  %v160_v40 = vpack.c.bf16 %v130_v36, %v130_v36 }
  0x97   :  { %180 = vst.msk [vmem:[%s368_s3 + $0x24] sm:$0xf] %vm170_vm2, %v163_v37 }
  0x98   :  { %184 = vst.msk [vmem:[%s368_s3 + $0x34] sm:$0xf] %vm170_vm2, %v167_v38 }
  0x99   :  { %173 = vst.msk [vmem:[%s368_s3 + $0x8] sm:$0xf] %vm170_vm2, %v156_v39 }
  0x9a   :  { %177 = vst.msk [vmem:[%s368_s3 + $0x18] sm:$0xf] %vm170_vm2, %v160_v40  ;;  %v139_v41 = vpop.f32.mrf.mxu2  ;;  %v149_v42 = vpop.f32.mrf.mxu3 }
  0x9b   :  { %v140_v43 = vadd.f32 %v242_v10, %v139_v41  ;;  %v150_v44 = vadd.f32 %v242_v10, %v149_v42  ;;  %v121_v45 = vpop.f32.mrf.mxu0  ;;  %v131_v46 = vpop.f32.mrf.mxu1 }
  0x9c   :  { %v122_v47 = vadd.f32 %v242_v10, %v121_v45  ;;  %v132_v48 = vadd.f32 %v242_v10, %v131_v46 }
  0x9d   :  { %v164_v49 = vpack.c.bf16 %v140_v43, %v140_v43  ;;  %v168_v50 = vpack.c.bf16 %v150_v44, %v150_v44 }
  0x9e   :  { %v157_v51 = vpack.c.bf16 %v122_v47, %v122_v47  ;;  %v161_v52 = vpack.c.bf16 %v132_v48, %v132_v48 }
  0x9f   :  { %181 = vst.msk [vmem:[%s368_s3 + $0x28] sm:$0xf] %vm170_vm2, %v164_v49 }
  0xa0   :  { %185 = vst.msk [vmem:[%s368_s3 + $0x38] sm:$0xf] %vm170_vm2, %v168_v50 }
  0xa1   :  { %174 = vst.msk [vmem:[%s368_s3 + $0xc] sm:$0xf] %vm170_vm2, %v157_v51 }
  0xa2   :  { %178 = vst.msk [vmem:[%s368_s3 + $0x1c] sm:$0xf] %vm170_vm2, %v161_v52  ;;  %v141_v53 = vpop.f32.mrf.mxu2  ;;  %v151_v54 = vpop.f32.mrf.mxu3 }
  0xa3   :  { %v142_v55 = vadd.f32 %v242_v10, %v141_v53  ;;  %v152_v56 = vadd.f32 %v242_v10, %v151_v54 }
  0xa5   :  { %v165_v57 = vpack.c.bf16 %v142_v55, %v142_v55  ;;  %v169_v58 = vpack.c.bf16 %v152_v56, %v152_v56 }
  0xa7   :  { %182 = vst.msk [vmem:[%s368_s3 + $0x2c] sm:$0xf] %vm170_vm2, %v165_v57 }
  0xa8   :  { %186 = vst.msk [vmem:[%s368_s3 + $0x3c] sm:$0xf] %vm170_vm2, %v169_v58 }

// kernel: upconv_forward.5
= control target key start
LH: loop header
LB: loop body
LE: loop exit
PB: predicated region body
PF: predicated region fallthrough
CT: control target
= control target key end

     0   :  { %s3248_s18 = smov 0   ;;  %s3250_s19 = smov 0   ;;  %s4359_s0 = inlined_call_operand.vmem [shape: bf16[2,18,18,4], index: 0, kind: input, shape index: {}, may-alias: {0,1}]   ;;  %s4360_s1 = inlined_call_operand.vmem [shape: bf16[2,18,18,4], index: 1, kind: input, shape index: {}, may-alias: {0,1}]   ;;  %s4361_s2 = inlined_call_operand.vmem [shape: bf16[3,3,4,4], index: 2, kind: input, shape index: {}]   ;;  %s4362_s3 = inlined_call_operand.vmem [shape: f32[1,4], index: 3, kind: input, shape index: {}]   ;;  %s4363_s4 = inlined_call_operand.vmem [shape: f32[2,16,16,4], index: 4, kind: output, shape index: {0}]   ;;  %s4364_s5 = inlined_call_operand.vmem [shape: f32[2,1,2,4], index: 5, kind: output, shape index: {1}]  }
   0x1   :  { %s3252_s20 = smov 0  }
   0x2 LB: > { %s28_s21 = sadd.s32 1, %s3212_s19  ;;  %p2838_p0 = scmp.ge.s32.totalorder %s3216_s20, 1  ;;  %s3216_s20 = sphi %s3252_s20, %s16_s20   ;;  %s3212_s19 = sphi %s3250_s19, %s4414_s19   ;;  %s3208_s18 = sphi %s3248_s18, %s4413_s18  }
   0x3   : > { %p30_p1 = scmp.ge.s32.totalorder %s28_s21, 2  ;;  %p250_p2 = scmp.lt.s32.totalorder %s3216_s20, 3 }
   0x5   : > { %s4416_s21 = smov (%p30_p1, %s28_s21), 0  ;;  %p251_p3 = pnand %p2838_p0, %p250_p2 }
   0x7   : > { %254 = sbr.rel (%p251_p3) target bundleno = 747 (0x2eb), region = 36 }
   0xc   : > { %v2844_v0 = vld [vmem:[%s4361_s2 + $0x6] sm:$0x3]  ;;  %vm553_vm0 = vcmask 1041408   ;;  %p318_p4 = scmp.lt.s32.totalorder %s3208_s18, 1  ;;  %v2945_v2 = vld [vmem:[%s4361_s2 + $0xc] sm:$0x3] }
   0xd   : > { %v555_v1 = vsel %vm553_vm0, %v2844_v0, 0  ;;  %v2966_v3 = vld [vmem:[%s4361_s2 + $0x2] sm:$0x3]  ;;  %v757_v4 = vsel %vm553_vm0, %v2945_v2, 0  ;;  %v421_v6 = vld [vmem:[%s4361_s2] sm:$0x3] }
   0xe   : > { %3109 = vmatpush.bf16.msra.mxu1 %v555_v1  ;;  %3110 = vmatpush.bf16.msra.mxu2 %v555_v1  ;;  %s4418_s18 = smov (!%p318_p4, %s3208_s18), 1  ;;  %v1414_v5 = vsel %vm553_vm0, %v2966_v3, 0  ;;  %v655_v7 = vsel %vm553_vm0, %v421_v6, 0  ;;  %v2983_v8 = vld [vmem:[%s4361_s2 + $0x8] sm:$0x3]  ;;  %vm504_vm1 = vcmask 31744  }
   0xf   : > { %3111 = vmatpush.bf16.msra.mxu3 %v555_v1  ;;  %564 = vmatpush.bf16.msra.mxu0 %v555_v1  ;;  %s3112_s7 = smul.u32 216, %s4418_s18  ;;  %v1546_v9 = vsel %vm553_vm0, %v2983_v8, 0  ;;  %v3035_v26 = vld [vmem:[%s4361_s2 + $0x4] sm:$0x3]  ;;  %v3052_v31 = vld [vmem:[%s4361_s2 + $0xa] sm:$0x3] }
  0x10   : > { %v2047_v29 = vsel %vm553_vm0, %v3035_v26, 0  ;;  %v2179_v33 = vsel %vm553_vm0, %v3052_v31, 0  ;;  %v3000_v34 = vld [vmem:[%s4361_s2 + $0xe] sm:$0x3]  ;;  %v3069_v35 = vld [vmem:[%s4361_s2 + $0x10] sm:$0x3] }
  0x11   : > { %s3294_s10 = scalar_lea.vmem %s4359_s0, %s3112_s7  ;;  %v1678_v38 = vsel %vm553_vm0, %v3000_v34, 0  ;;  %v2311_v39 = vsel %vm553_vm0, %v3069_v35, 0  ;;  %s3089_s23 = sadd.s32 192, %s3112_s7  ;;  %vm880_vm2 = vsmask.f32 3328  ;;  %vm1819_vm5 = vcmask 1042432  }
  0x12   : > { %766 = vmatpush.bf16.msrb.mxu2 %v757_v4  ;;  %664 = vmatpush.bf16.msrb.mxu1 %v655_v7  ;;  %v3297_v10 = vld [vmem:[%s3294_s10 + $0x3c] sm:$0xff]  ;;  %v3300_v11 = vld [vmem:[%s3294_s10 + $0x6c] sm:$0xff]  ;;  %v3334_v18 = vld [vmem:[%s3294_s10 + $0x54] sm:$0xff]  ;;  %s3376_s26 = scalar_lea.vmem %s4360_s1, %s3089_s23  ;;  %vm881_vm3 = vsmask.f32 7440  ;;  %vm1820_vm6 = vcmask 1046532  }
  0x13   : > { %1423 = vmatpush.bf16.msrb.mxu3 %v1414_v5  ;;  %1555 = vmatpush.bf16.msrb.mxu0 %v1546_v9  ;;  %v3303_v12 = vld [vmem:[%s3294_s10 + $0x9c] sm:$0xff]  ;;  %v3306_v13 = vld [vmem:[%s3294_s10 + $0xc] sm:$0xff]  ;;  %v3337_v19 = vld [vmem:[%s3294_s10 + $0x84] sm:$0xff]  ;;  %s3090_s27 = sshll.u32 %s4418_s18, 8  ;;  %vm2672_vm8 = vcmask 1040384   ;;  %vm2674_vm9 = vcmask 25600  }
  0x14   : > { %2913 = vmatmul.msk.bf16.vlgmr.msra.gmra.mxu1 %vm504_vm1, %v3297_v10  ;;  %2917 = vmatmul.msk.bf16.vlgmr.msra.gmra.mxu2 %vm504_vm1, %v3300_v11  ;;  %v3317_v14 = vld [vmem:[%s3294_s10 + $0x48] sm:$0xff]  ;;  %v3320_v15 = vld [vmem:[%s3294_s10 + $0x78] sm:$0xff]  ;;  %v367_v22 = vld [vmem:[%s3294_s10] sm:$0xf]  ;;  %s4033_s7 = scalar_lea.vmem %s4363_s4, %s3090_s27 }
  0x15   : > { %2921 = vmatmul.msk.bf16.vlgmr.msra.gmra.mxu3 %vm504_vm1, %v3303_v12  ;;  %2909 = vmatmul.msk.bf16.vlgmr.msra.gmra.mxu0 %vm504_vm1, %v3306_v13  ;;  %v3105_v16 = vld [vmem:[%s3294_s10 + $0xa8] sm:$0xff]  ;;  %v3324_v17 = vld [vmem:[%s3294_s10 + $0x18] sm:$0xff]  ;;  %v368_v23 = vld [vmem:[%s3294_s10 + $0x4] sm:$0xf]  ;;  %v884_v24 = vshrl.u32 %v367_v22, 16  ;;  %v887_v25 = vshll.u32 %v367_v22, 16 }
  0x16   : > { %v3106_v20 = vld [vmem:[%s3294_s10 + $0xb4] sm:$0xff]  ;;  %v3341_v21 = vld [vmem:[%s3294_s10 + $0x24] sm:$0xff]  ;;  %v370_v27 = vld [vmem:[%s3294_s10 + $0xc] sm:$0xf]  ;;  %v893_v28 = vshll.u32 %v368_v23, 16  ;;  %v897_v32 = vshrl.u32 %v368_v23, 16  ;;  %2056 = vmatpush.bf16.msra.mxu2 %v2047_v29  ;;  %1687 = vmatpush.bf16.msra.mxu1 %v1678_v38 }
  0x17   : > { %v371_v30 = vld [vmem:[%s3294_s10 + $0x10] sm:$0xf]  ;;  %v908_v36 = vshrl.u32 %v370_v27, 16  ;;  %v911_v37 = vshll.u32 %v370_v27, 16  ;;  %2188 = vmatpush.bf16.msra.mxu3 %v2179_v33  ;;  %2320 = vmatpush.bf16.msra.mxu0 %v2311_v39  ;;  %v886_v42 = vrot.slane %v884_v24, 4  ;;  %v889_v43 = vrot.slane %v887_v25, 5  ;;  %vm3396_vm4 = vmor %vm880_vm2, %vm881_vm3 }
  0x18   : > { %v917_v40 = vshll.u32 %v371_v30, 16  ;;  %v921_v41 = vshrl.u32 %v371_v30, 16  ;;  %v895_v44 = vrot.slane %v893_v28, 5  ;;  %v899_v45 = vrot.slane %v897_v32, 4  ;;  %v369_v48 = vld [vmem:[%s3294_s10 + $0x8] sm:$0x1]  ;;  %vm3416_vm7 = vmor %vm1819_vm5, %vm1820_vm6 }
  0x19   : > { %v910_v46 = vrot.slane %v908_v36, 4  ;;  %v913_v47 = vrot.slane %v911_v37, 5  ;;  %v372_v51 = vld [vmem:[%s3294_s10 + $0x14] sm:$0x1]  ;;  %v3380_v52 = vld [vmem:[%s3294_s10 + $0x60] sm:$0xff]  ;;  %v890_v54 = vor.u32 %v889_v43, %v886_v42  ;;  %v903_v56 = vshll.u32 %v369_v48, 16 }
  0x1a   : > { %v919_v49 = vrot.slane %v917_v40, 5  ;;  %v923_v50 = vrot.slane %v921_v41, 4  ;;  %v3383_v53 = vld [vmem:[%s3294_s10 + $0x90] sm:$0xff]  ;;  %v900_v55 = vor.u32 %v899_v45, %v895_v44  ;;  %v3107_v58 = vld [vmem:[%s3376_s26] sm:$0xff]  ;;  %v927_v61 = vshll.u32 %v372_v51, 16 }
  0x1b   : > { %v914_v57 = vor.u32 %v913_v47, %v910_v46  ;;  %v3387_v59 = vld [vmem:[%s3294_s10 + $0x30] sm:$0xff]  ;;  %v891_v62 = vrot.slane %v890_v54, 4  ;;  %v905_v0 = vrot.slane %v903_v56, 5  ;;  %v3401_v5 = vld [vmem:[%s3294_s10 + $0x1c] sm:$0xf]  ;;  %v3091_v39 = vld [vmem:[%s3294_s10] sm:$0xff] }
  0x1c   : > { %v924_v60 = vor.u32 %v923_v50, %v919_v49  ;;  %v901_v63 = vrot.slane %v900_v55, 4  ;;  %v929_v4 = vrot.slane %v927_v61, 5  ;;  %v375_v6 = vld [vmem:[%s3294_s10 + $0x20] sm:$0x1]  ;;  %v373_v7 = vld [vmem:[%s3294_s10 + $0x18] sm:$0xf] }
  0x1d   : > { %v915_v1 = vrot.slane %v914_v57, 4  ;;  %v4365_v8 = vrot.slane %v3401_v5, 5  ;;  %v1841_v9 = vrot.slane %v375_v6, 5  ;;  %v932_v25 = vshrl.u32 %v373_v7, 16  ;;  %v376_v45 = vld [vmem:[%s3294_s10 + $0x24] sm:$0xf] }
  0x1e   : > { %v925_v3 = vrot.slane %v924_v60, 4  ;;  %v906_v22 = vsel %vm3396_vm4, %v901_v63, %v905_v0  ;;  %v935_v27 = vshll.u32 %v373_v7, 16  ;;  %v941_v28 = vshll.u32 %v3401_v5, 16  ;;  %v377_v46 = vld [vmem:[%s3294_s10 + $0x28] sm:$0xf] }
  0x1f   : > { %v920_v23 = vsel %vm3396_vm4, %v915_v1, %v919_v49  ;;  %v945_v29 = vshrl.u32 %v3401_v5, 16  ;;  %v1318_v32 = vunpack.c.l.b16 %v906_v22  ;;  %v934_v35 = vrot.slane %v932_v25, 4  ;;  %v378_v1 = vld [vmem:[%s3294_s10 + $0x2c] sm:$0x1]  ;;  %v379_v22 = vld [vmem:[%s3294_s10 + $0x30] sm:$0xf] }
  0x20   : > { %v930_v24 = vsel %vm3396_vm4, %v925_v3, %v929_v4  ;;  %v1319_v33 = vunpack.c.l.b16 %v920_v23  ;;  %v937_v36 = vrot.slane %v935_v27, 5  ;;  %v943_v37 = vrot.slane %v941_v28, 5  ;;  %v380_v23 = vld [vmem:[%s3294_s10 + $0x34] sm:$0xf] }
  0x21   : > { %v1320_v34 = vunpack.c.l.b16 %v930_v24  ;;  %v947_v38 = vrot.slane %v945_v29, 4  ;;  %v956_v50 = vshrl.u32 %v376_v45, 16  ;;  %v959_v51 = vshll.u32 %v376_v45, 16  ;;  %v382_v45 = vld [vmem:[%s3294_s10 + $0x3c] sm:$0xf] }
  0x22   : > { %v938_v42 = vor.u32 %v937_v36, %v934_v35  ;;  %v965_v54 = vshll.u32 %v377_v46, 16  ;;  %v969_v55 = vshrl.u32 %v377_v46, 16  ;;  %v980_v25 = vshrl.u32 %v379_v22, 16  ;;  %v383_v46 = vld [vmem:[%s3294_s10 + $0x40] sm:$0xf] }
  0x23   : > { %v1350_v41 = vpack.c.b16 %v1320_v34, %v1319_v33  ;;  %v948_v43 = vor.u32 %v947_v38, %v943_v37  ;;  %v961_v60 = vrot.slane %v959_v51, 5  ;;  %v983_v27 = vshll.u32 %v379_v22, 16 }
  0x24   : > { %2914 = vmatmul.msk.bf16.gmra.mxu1 %vm504_vm1, %v3317_v14  ;;  %2918 = vmatmul.msk.bf16.gmra.mxu2 %vm504_vm1, %v3320_v15  ;;  %v939_v47 = vrot.slane %v938_v42, 4  ;;  %v967_v61 = vrot.slane %v965_v54, 5  ;;  %v989_v28 = vshll.u32 %v380_v23, 16  ;;  %v993_v29 = vshrl.u32 %v380_v23, 16 }
  0x25   : > { %2922 = vmatmul.msk.bf16.gmra.mxu3 %vm504_vm1, %v3105_v16  ;;  %2910 = vmatmul.msk.bf16.gmra.mxu0 %vm504_vm1, %v3324_v17  ;;  %v896_v16 = vsel %vm3396_vm4, %v891_v62, %v895_v44  ;;  %v951_v44 = vshll.u32 %v375_v6, 16  ;;  %v949_v48 = vrot.slane %v948_v43, 4  ;;  %v971_v62 = vrot.slane %v969_v55, 4 }
  0x26   : > { %v1317_v31 = vunpack.c.l.b16 %v896_v16  ;;  %v944_v56 = vsel %vm3396_vm4, %v939_v47, %v943_v37  ;;  %v975_v6 = vshll.u32 %v378_v1, 16  ;;  %v982_v33 = vrot.slane %v980_v25, 4  ;;  %v381_v37 = vld [vmem:[%s3294_s10 + $0x38] sm:$0x1] }
  0x27   : > { %v953_v49 = vrot.slane %v951_v44, 5  ;;  %v1321_v63 = vunpack.c.l.b16 %v944_v56  ;;  %v972_v4 = vor.u32 %v971_v62, %v967_v61  ;;  %v985_v34 = vrot.slane %v983_v27, 5 }
  0x28   : > { %v1349_v40 = vpack.c.b16 %v1318_v32, %v1317_v31  ;;  %v991_v35 = vrot.slane %v989_v28, 5  ;;  %v995_v36 = vrot.slane %v993_v29, 4  ;;  %v1017_v51 = vshrl.u32 %v383_v46, 16 }
  0x29   : > { %v954_v57 = vsel %vm3396_vm4, %v949_v48, %v953_v49  ;;  %v973_v16 = vrot.slane %v972_v4, 4  ;;  %v1004_v48 = vshrl.u32 %v382_v45, 16  ;;  %v1007_v49 = vshll.u32 %v382_v45, 16  ;;  %v386_v4 = vld [vmem:[%s3294_s10 + $0x4c] sm:$0xf] }
  0x2a   : > { %v1322_v0 = vunpack.c.l.b16 %v954_v57  ;;  %v1037_v23 = vshll.u32 %v386_v4, 16  ;;  %v389_v45 = vld [vmem:[%s3294_s10 + $0x58] sm:$0xf] }
  0x2b   : > { %v1006_v56 = vrot.slane %v1004_v48, 4  ;;  %v1009_v57 = vrot.slane %v1007_v49, 5 }
  0x2c   : > { %v3439_v7 = vpack.c.b16 %v1322_v0, %v1321_v63  ;;  %v1039_v28 = vrot.slane %v1037_v23, 5 }
  0x2d   : > { %v1010_v63 = vor.u32 %v1009_v57, %v1006_v56 }
  0x34   : > { %2915 = vmatmul.msk.bf16.gmra.mxu1 %vm504_vm1, %v3334_v18  ;;  %2919 = vmatmul.msk.bf16.gmra.mxu2 %vm504_vm1, %v3337_v19 }
  0x35   : > { %2923 = vmatmul.msk.bf16.gmra.mxu3 %vm504_vm1, %v3106_v20  ;;  %2911 = vmatmul.msk.bf16.gmra.mxu0 %vm504_vm1, %v3341_v21  ;;  %v1840_v20 = vrot.slane %v4365_v8, 4 }
  0x37   : > { %v3424_v30 = vsel %vm3416_vm7, %v1840_v20, %v1841_v9  ;;  %v977_v20 = vrot.slane %v975_v6, 5  ;;  %v1011_v6 = vrot.slane %v1010_v63, 4 }
  0x44   : > { %2916 = vmatmul.msk.bf16.gmra.mxu1 %vm504_vm1, %v3380_v52  ;;  %2920 = vmatmul.msk.bf16.gmra.mxu2 %vm504_vm1, %v3383_v53 }
  0x45   : > { %2924 = vmatmul.msk.bf16.gmra.mxu3 %vm504_vm1, %v3107_v58  ;;  %2912 = vmatmul.msk.bf16.gmra.mxu0 %vm504_vm1, %v3387_v59  ;;  %v958_v58 = vrot.slane %v956_v50, 4  ;;  %v1013_v50 = vshll.u32 %v383_v46, 16 }
  0x47   : > { %v962_v3 = vor.u32 %v961_v60, %v958_v58  ;;  %v1015_v58 = vrot.slane %v1013_v50, 5  ;;  %v1019_v60 = vrot.slane %v1017_v51, 4  ;;  %v1061_v51 = vshll.u32 %v389_v45, 16 }
  0x49   : > { %v963_v9 = vrot.slane %v962_v3, 4  ;;  %v1020_v0 = vor.u32 %v1019_v60, %v1015_v58  ;;  %v385_v3 = vld [vmem:[%s3294_s10 + $0x48] sm:$0xf] }
  0x4a   : > { %v1031_v22 = vshll.u32 %v385_v3, 16 }
  0x4b   : > { %v968_v24 = vsel %vm3396_vm4, %v963_v9, %v967_v61  ;;  %v384_v61 = vld [vmem:[%s3294_s10 + $0x44] sm:$0x1]  ;;  %v1021_v9 = vrot.slane %v1020_v0, 4  ;;  %v390_v0 = vld [vmem:[%s3294_s10 + $0x5c] sm:$0x1] }
  0x4c   : > { %v1323_v31 = vunpack.c.l.b16 %v968_v24  ;;  %v1023_v1 = vshll.u32 %v384_v61, 16  ;;  %v1041_v24 = vshrl.u32 %v386_v4, 16  ;;  %v1033_v27 = vrot.slane %v1031_v22, 5 }
  0x4d   : > { %v1063_v61 = vrot.slane %v1061_v51, 5 }
  0x4e   : > { %v1043_v29 = vrot.slane %v1041_v24, 4 }
  0x54   : > { %2929 = vmatmul.msk.bf16.vlgmr.msrb.gmra.mxu1 %vm504_vm1, %v3091_v39  ;;  %2950 = vmatmul.msk.bf16.vlgmr.msrb.gmra.mxu2 %vm504_vm1, %v3324_v17  ;;  %v986_v39 = vor.u32 %v985_v34, %v982_v33  ;;  %v387_v33 = vld [vmem:[%s3294_s10 + $0x50] sm:$0x1] }
  0x55   : > { %2967 = vmatmul.msk.bf16.vlgmr.msrb.gmra.mxu3 %vm504_vm1, %v1349_v40  ;;  %2984 = vmatmul.msk.bf16.vlgmr.msrb.gmra.mxu0 %vm504_vm1, %v1350_v41  ;;  %v996_v40 = vor.u32 %v995_v36, %v991_v35  ;;  %v1047_v36 = vshll.u32 %v387_v33, 16 }
  0x56   : > { %v987_v42 = vrot.slane %v986_v39, 4 }
  0x57   : > { %v997_v43 = vrot.slane %v996_v40, 4 }
  0x58   : > { %v992_v47 = vsel %vm3396_vm4, %v987_v42, %v991_v35  ;;  %v1044_v35 = vor.u32 %v1043_v29, %v1039_v28 }
  0x59   : > { %v1325_v54 = vunpack.c.l.b16 %v992_v47 }
  0x5a   : > { %v1045_v42 = vrot.slane %v1044_v35, 4 }
  0x64   : > { %2930 = vmatmul.msk.bf16.gmra.mxu1 %vm504_vm1, %v3306_v13  ;;  %2951 = vmatmul.msk.bf16.gmra.mxu2 %vm504_vm1, %v3341_v21  ;;  %v978_v13 = vsel %vm3396_vm4, %v973_v16, %v977_v20  ;;  %v1025_v16 = vrot.slane %v1023_v1, 5  ;;  %v1028_v20 = vshrl.u32 %v385_v3, 16 }
  0x65   : > { %2968 = vmatmul.msk.bf16.gmra.mxu3 %vm504_vm1, %v1350_v41  ;;  %2985 = vmatmul.msk.bf16.gmra.mxu0 %vm504_vm1, %v3439_v7  ;;  %v1324_v32 = vunpack.c.l.b16 %v978_v13  ;;  %v999_v41 = vshll.u32 %v381_v37, 16 }
  0x66   : > { %v1026_v13 = vsel %vm3396_vm4, %v1021_v9, %v1025_v16  ;;  %v1030_v25 = vrot.slane %v1028_v20, 4  ;;  %v1071_v20 = vshll.u32 %v390_v0, 16 }
  0x67   : > { %v3455_v38 = vpack.c.b16 %v1324_v32, %v1323_v31  ;;  %v1001_v44 = vrot.slane %v999_v41, 5  ;;  %v1328_v32 = vunpack.c.l.b16 %v1026_v13 }
  0x68   : > { %v1034_v34 = vor.u32 %v1033_v27, %v1030_v25  ;;  %v391_v25 = vld [vmem:[%s3294_s10 + $0x60] sm:$0xf]  ;;  %v392_v27 = vld [vmem:[%s3294_s10 + $0x64] sm:$0xf] }
  0x69   : > { %v1076_v33 = vshrl.u32 %v391_v25, 16  ;;  %v1085_v35 = vshll.u32 %v392_v27, 16 }
  0x6a   : > { %v1035_v41 = vrot.slane %v1034_v34, 4  ;;  %v1079_v34 = vshll.u32 %v391_v25, 16 }
  0x74   : > { %2931 = vmatmul.msk.bf16.gmra.mxu1 %vm504_vm1, %v3324_v17  ;;  %2952 = vmatmul.msk.bf16.gmra.mxu2 %vm504_vm1, %v3387_v59  ;;  %v1002_v17 = vsel %vm3396_vm4, %v997_v43, %v1001_v44  ;;  %v1049_v43 = vrot.slane %v1047_v36, 5  ;;  %v388_v44 = vld [vmem:[%s3294_s10 + $0x54] sm:$0xf]  ;;  %v1089_v36 = vshrl.u32 %v392_v27, 16 }
  0x75   : > { %2969 = vmatmul.msk.bf16.gmra.mxu3 %vm504_vm1, %v3439_v7  ;;  %2986 = vmatmul.msk.bf16.gmra.mxu0 %vm504_vm1, %v3455_v38  ;;  %v1326_v55 = vunpack.c.l.b16 %v1002_v17  ;;  %v1052_v49 = vshrl.u32 %v388_v44, 16  ;;  %v1055_v50 = vshll.u32 %v388_v44, 16  ;;  %v1081_v44 = vrot.slane %v1079_v34, 5 }
  0x76   : > { %v1050_v17 = vsel %vm3396_vm4, %v1045_v42, %v1049_v43  ;;  %v1078_v43 = vrot.slane %v1076_v33, 4 }
  0x77   : > { %v3472_v62 = vpack.c.b16 %v1326_v55, %v1325_v54  ;;  %v1065_v54 = vshrl.u32 %v389_v45, 16  ;;  %v1330_v57 = vunpack.c.l.b16 %v1050_v17  ;;  %v1057_v60 = vrot.slane %v1055_v50, 5 }
  0x78   : > { %v1087_v45 = vrot.slane %v1085_v35, 5 }
  0x79   : > { %v1067_v63 = vrot.slane %v1065_v54, 4 }
  0x7b   : > { %v1068_v16 = vor.u32 %v1067_v63, %v1063_v61  ;;  %v395_v63 = vld [vmem:[%s3294_s10 + $0x70] sm:$0xf] }
  0x7c   : > { %v1113_v25 = vshrl.u32 %v395_v63, 16 }
  0x7d   : > { %v1069_v24 = vrot.slane %v1068_v16, 4 }
  0x84   : > { %2932 = vmatmul.msk.bf16.gmra.mxu1 %vm504_vm1, %v3341_v21  ;;  %2953 = vmatmul.msk.bf16.gmra.mxu2 %vm504_vm1, %v3297_v10  ;;  %v1016_v21 = vsel %vm3396_vm4, %v1011_v6, %v1015_v58  ;;  %v1054_v58 = vrot.slane %v1052_v49, 4  ;;  %v393_v49 = vld [vmem:[%s3294_s10 + $0x68] sm:$0x1] }
  0x85   : > { %2970 = vmatmul.msk.bf16.gmra.mxu3 %vm504_vm1, %v3455_v38  ;;  %2987 = vmatmul.msk.bf16.gmra.mxu0 %vm504_vm1, %v3472_v62  ;;  %v1327_v31 = vunpack.c.l.b16 %v1016_v21  ;;  %v1073_v21 = vrot.slane %v1071_v20, 5 }
  0x86   : > { %v1058_v9 = vor.u32 %v1057_v60, %v1054_v58  ;;  %v1095_v60 = vshll.u32 %v393_v49, 16 }
  0x87   : > { %v3491_v39 = vpack.c.b16 %v1328_v32, %v1327_v31  ;;  %v1074_v31 = vsel %vm3396_vm4, %v1069_v24, %v1073_v21  ;;  %v1109_v21 = vshll.u32 %v395_v63, 16 }
  0x88   : > { %v1059_v23 = vrot.slane %v1058_v9, 4  ;;  %v1332_v42 = vunpack.c.l.b16 %v1074_v31  ;;  %v1097_v16 = vrot.slane %v1095_v60, 5 }
  0x8a   : > { %v1064_v29 = vsel %vm3396_vm4, %v1059_v23, %v1063_v61  ;;  %v394_v61 = vld [vmem:[%s3294_s10 + $0x6c] sm:$0xf] }
  0x8b   : > { %v1103_v24 = vshll.u32 %v394_v61, 16 }
  0x8d   : > { %v1105_v35 = vrot.slane %v1103_v24, 5  ;;  %v398_v24 = vld [vmem:[%s3294_s10 + $0x7c] sm:$0xf] }
  0x91   : > { %v3489_v37 = vpop.f32.mrf.mxu1 }
  0x92   : > { %v3493_v40 = vpop.f32.mrf.mxu0 }
  0x94   : > { %2933 = vmatmul.msk.bf16.gmra.mxu1 %vm504_vm1, %v3387_v59  ;;  %2954 = vmatmul.msk.bf16.gmra.mxu2 %vm504_vm1, %v3317_v14  ;;  %v1040_v59 = vsel %vm3396_vm4, %v1035_v41, %v1039_v28  ;;  %v1331_v41 = vunpack.c.l.b16 %v1064_v29 }
  0x95   : > { %2971 = vmatmul.msk.bf16.gmra.mxu3 %vm504_vm1, %v3472_v62  ;;  %2988 = vmatmul.msk.bf16.gmra.mxu0 %vm504_vm1, %v3491_v39  ;;  %v1329_v56 = vunpack.c.l.b16 %v1040_v59  ;;  %v1091_v59 = vrot.slane %v1089_v36, 4  ;;  %v1111_v36 = vrot.slane %v1109_v21, 5 }
  0x96   : > { %v3557_v54 = vpack.c.b16 %v1332_v42, %v1331_v41  ;;  %v1115_v41 = vrot.slane %v1113_v25, 4 }
  0x97   : > { %v3505_v46 = vpop.f32.mrf.mxu2  ;;  %v3524_v6 = vpack.c.b16 %v1330_v57, %v1329_v56  ;;  %v1082_v57 = vor.u32 %v1081_v44, %v1078_v43  ;;  %v1092_v58 = vor.u32 %v1091_v59, %v1087_v45  ;;  %v396_v44 = vld [vmem:[%s3294_s10 + $0x74] sm:$0x1] }
  0x98   : > { %v3507_v47 = vpop.f32.mrf.mxu3  ;;  %4377 = vst [vmem:[#allocation5_spill] sm:$0xff] %v3557_v54  ;;  %v1119_v60 = vshll.u32 %v396_v44, 16 }
  0x99   : > { %v3513_v48 = vpop.f32.mrf.mxu1  ;;  %v1083_v0 = vrot.slane %v1082_v57, 4  ;;  %v1093_v9 = vrot.slane %v1092_v58, 4  ;;  %v1116_v58 = vor.u32 %v1115_v41, %v1111_v36  ;;  %v1133_v41 = vshll.u32 %v398_v24, 16 }
  0x9a   : > { %v3515_v55 = vpop.f32.mrf.mxu0 }
  0x9b   : > { %v1088_v31 = vsel %vm3396_vm4, %v1083_v0, %v1087_v45  ;;  %v1098_v33 = vsel %vm3396_vm4, %v1093_v9, %v1097_v16  ;;  %v1117_v9 = vrot.slane %v1116_v58, 4  ;;  %v1121_v16 = vrot.slane %v1119_v60, 5 }
  0x9c   : > { %v1333_v42 = vunpack.c.l.b16 %v1088_v31  ;;  %v1334_v43 = vunpack.c.l.b16 %v1098_v33  ;;  %v1135_v8 = vrot.slane %v1133_v41, 5 }
  0x9d   : > { %v1122_v31 = vsel %vm3396_vm4, %v1117_v9, %v1121_v16 }
  0x9f   : > { %v3518_v1 = vpop.f32.mrf.mxu2 }
  0xa0   : > { %v3520_v3 = vpop.f32.mrf.mxu3 }
  0xa1   : > { %4374 = vst [vmem:[#allocation2_spill] sm:$0xff] %v3520_v3  ;;  %v3522_v4 = vpop.f32.mrf.mxu1 }
  0xa2   : > { %v3526_v22 = vpop.f32.mrf.mxu0 }
  0xa4   : > { %2934 = vmatmul.msk.bf16.gmra.mxu1 %vm504_vm1, %v3297_v10  ;;  %2955 = vmatmul.msk.bf16.gmra.mxu2 %vm504_vm1, %v3334_v18 }
  0xa5   : > { %2972 = vmatmul.msk.bf16.gmra.mxu3 %vm504_vm1, %v3491_v39  ;;  %2989 = vmatmul.msk.bf16.gmra.mxu0 %vm504_vm1, %v3524_v6 }
  0xa7   : > { %v3536_v13 = vpop.f32.mrf.mxu2 }
  0xa8   : > { %v3540_v28 = vpop.f32.mrf.mxu3 }
  0xa9   : > { %4375 = vst [vmem:[#allocation3_spill] sm:$0xff] %v3540_v28  ;;  %v3542_v10 = vpop.f32.mrf.mxu1 }
  0xaa   : > { %v3548_v32 = vpop.f32.mrf.mxu0 }
  0xaf   : > { %v3550_v17 = vpop.f32.mrf.mxu2 }
  0xb0   : > { %v3553_v50 = vpop.f32.mrf.mxu3 }
  0xb1   : > { %4376 = vst [vmem:[#allocation4_spill] sm:$0xff] %v3553_v50  ;;  %v3555_v51 = vpop.f32.mrf.mxu1 }
  0xb2   : > { %v3559_v56 = vpop.f32.mrf.mxu0 }
  0xb4   : > { %2935 = vmatmul.msk.bf16.gmra.mxu1 %vm504_vm1, %v3317_v14  ;;  %2956 = vmatmul.msk.bf16.gmra.mxu2 %vm504_vm1, %v3380_v52  ;;  %v1100_v14 = vshrl.u32 %v394_v61, 16  ;;  %v3590_v61 = vpack.c.b16 %v1334_v43, %v1333_v42  ;;  %v1137_v42 = vshrl.u32 %v398_v24, 16 }
  0xb5   : > { %2973 = vmatmul.msk.bf16.gmra.mxu3 %vm504_vm1, %v3524_v6  ;;  %2990 = vmatmul.msk.bf16.gmra.mxu0 %vm504_vm1, %v3557_v54 }
  0xb6   : > { %v1102_v34 = vrot.slane %v1100_v14, 4  ;;  %4380 = vst [vmem:[#allocation8_spill] sm:$0xff] %v3590_v61  ;;  %v397_v14 = vld [vmem:[%s3294_s10 + $0x78] sm:$0xf] }
  0xb7   : > { %v3571_v20 = vpop.f32.mrf.mxu2 }
  0xb8   : > { %v3573_v23 = vpop.f32.mrf.mxu3  ;;  %v1106_v57 = vor.u32 %v1105_v35, %v1102_v34  ;;  %v1124_v34 = vshrl.u32 %v397_v14, 16  ;;  %v1127_v35 = vshll.u32 %v397_v14, 16 }
  0xb9   : > { %4378 = vst [vmem:[#allocation6_spill] sm:$0xff] %v3573_v23  ;;  %v3575_v27 = vpop.f32.mrf.mxu1 }
  0xba   : > { %v3577_v29 = vpop.f32.mrf.mxu0  ;;  %v1107_v0 = vrot.slane %v1106_v57, 4  ;;  %v1336_v57 = vunpack.c.l.b16 %v1122_v31  ;;  %v1126_v58 = vrot.slane %v1124_v34, 4  ;;  %v1129_v60 = vrot.slane %v1127_v35, 5 }
  0xbc   : > { %v1130_v16 = vor.u32 %v1129_v60, %v1126_v58 }
  0xbe   : > { %v1131_v34 = vrot.slane %v1130_v16, 4 }
  0xbf   : > { %v3584_v59 = vpop.f32.mrf.mxu2 }
  0xc0   : > { %v3586_v49 = vpop.f32.mrf.mxu3 }
  0xc1   : > { %4379 = vst [vmem:[#allocation7_spill] sm:$0xff] %v3586_v49  ;;  %v3588_v45 = vpop.f32.mrf.mxu1  ;;  %v399_v49 = vld [vmem:[%s3294_s10 + $0x80] sm:$0x1] }
  0xc2   : > { %v3592_v63 = vpop.f32.mrf.mxu0  ;;  %v1143_v24 = vshll.u32 %v399_v49, 16 }
  0xc4   : > { %2936 = vmatmul.msk.bf16.gmra.mxu1 %vm504_vm1, %v3334_v18  ;;  %2957 = vmatmul.msk.bf16.gmra.mxu2 %vm504_vm1, %v3300_v11  ;;  %v1112_v18 = vsel %vm3396_vm4, %v1107_v0, %v1111_v36  ;;  %v1145_v41 = vrot.slane %v1143_v24, 5 }
  0xc5   : > { %2974 = vmatmul.msk.bf16.gmra.mxu3 %vm504_vm1, %v3557_v54  ;;  %2991 = vmatmul.msk.bf16.gmra.mxu0 %vm504_vm1, %v3590_v61  ;;  %v1335_v44 = vunpack.c.l.b16 %v1112_v18 }
  0xc7   : > { %v3604_v21 = vpop.f32.mrf.mxu2  ;;  %v3621_v9 = vpack.c.b16 %v1336_v57, %v1335_v44 }
  0xc8   : > { %v3606_v25 = vpop.f32.mrf.mxu3 }
  0xc9   : > { %4381 = vst [vmem:[#allocation9_spill] sm:$0xff] %v3606_v25  ;;  %v3612_v33 = vpop.f32.mrf.mxu1  ;;  %v1139_v25 = vrot.slane %v1137_v42, 4  ;;  %v401_v42 = vld [vmem:[%s3294_s10 + $0x88] sm:$0xf] }
  0xca   : > { %v3614_v43 = vpop.f32.mrf.mxu0  ;;  %v1157_v24 = vshll.u32 %v401_v42, 16 }
  0xcb   : > { %v1140_v14 = vor.u32 %v1139_v25, %v1135_v8  ;;  %v400_v25 = vld [vmem:[%s3294_s10 + $0x84] sm:$0xf] }
  0xcc   : > { %v1148_v60 = vshrl.u32 %v400_v25, 16  ;;  %v1159_v3 = vrot.slane %v1157_v24, 5 }
  0xcd   : > { %v1141_v35 = vrot.slane %v1140_v14, 4 }
  0xce   : > { %v1150_v28 = vrot.slane %v1148_v60, 4 }
  0xcf   : > { %v3617_v23 = vpop.f32.mrf.mxu2  ;;  %v1146_v58 = vsel %vm3396_vm4, %v1141_v35, %v1145_v41  ;;  %v402_v35 = vld [vmem:[%s3294_s10 + $0x8c] sm:$0x1] }
  0xd0   : > { %v3619_v36 = vpop.f32.mrf.mxu3 }
  0xd1   : > { %4382 = vst [vmem:[#allocation10_spill] sm:$0xff] %v3619_v36  ;;  %v666_v0 = vpop.f32.mrf.mxu1 }
  0xd2   : > { %v667_v18 = vadd.f32 %v666_v0, %v3493_v40  ;;  %v1557_v31 = vpop.f32.mrf.mxu0  ;;  %v1151_v0 = vshll.u32 %v400_v25, 16 }
  0xd4   : > { %2937 = vmatmul.msk.bf16.gmra.mxu1 %vm504_vm1, %v3380_v52  ;;  %2958 = vmatmul.msk.bf16.gmra.mxu2 %vm504_vm1, %v3320_v15  ;;  %v1136_v52 = vsel %vm3396_vm4, %v1131_v34, %v1135_v8  ;;  %v1153_v54 = vrot.slane %v1151_v0, 5 }
  0xd5   : > { %2975 = vmatmul.msk.bf16.gmra.mxu3 %vm504_vm1, %v3590_v61  ;;  %2992 = vmatmul.msk.bf16.gmra.mxu0 %vm504_vm1, %v3621_v9  ;;  %v1161_v61 = vshrl.u32 %v401_v42, 16 }
  0xd7   : > { %v768_v49 = vpop.f32.mrf.mxu2  ;;  %v1163_v8 = vrot.slane %v1161_v61, 4  ;;  %v403_v61 = vld [vmem:[%s3294_s10 + $0x90] sm:$0xf] }
  0xd8   : > { %v848_v40 = vadd.f32 %v768_v49, %v667_v18  ;;  %v1425_v44 = vpop.f32.mrf.mxu3  ;;  %v1337_v18 = vunpack.c.l.b16 %v1136_v52  ;;  %v1338_v49 = vunpack.c.l.b16 %v1146_v58  ;;  %v1167_v52 = vshll.u32 %v402_v35, 16 }
  0xd9   : > { %v668_v57 = vpop.f32.mrf.mxu1  ;;  %v1164_v42 = vor.u32 %v1163_v8, %v1159_v3 }
  0xda   : > { %v1505_v36 = vadd.f32 %v1425_v44, %v848_v40  ;;  %v669_v16 = vadd.f32 %v668_v57, %v3515_v55  ;;  %v1559_v14 = vpop.f32.mrf.mxu0  ;;  %v3642_v44 = vpack.c.b16 %v1338_v49, %v1337_v18  ;;  %v1154_v55 = vor.u32 %v1153_v54, %v1150_v28  ;;  %v404_v28 = vld [vmem:[%s3294_s10 + $0x94] sm:$0xf] }
  0xdb   : > { %v1165_v54 = vrot.slane %v1164_v42, 4  ;;  %v1169_v60 = vrot.slane %v1167_v52, 5  ;;  %v1175_v18 = vshll.u32 %v403_v61, 16  ;;  %v1181_v49 = vshll.u32 %v404_v28, 16 }
  0xdc   : > { %v3639_v50 = vadd.f32 %v1557_v31, %v1505_v36  ;;  %v1185_v8 = vshrl.u32 %v404_v28, 16  ;;  %v405_v28 = vld [vmem:[%s3294_s10 + $0x98] sm:$0x1] }
  0xdd   : > { %v1183_v42 = vrot.slane %v1181_v49, 5 }
  0xde   : > { %4383 = vst [vmem:[#allocation11_spill] sm:$0xff] %v3639_v50 }
  0xdf   : > { %v770_v34 = vpop.f32.mrf.mxu2 }
  0xe0   : > { %v849_v41 = vadd.f32 %v770_v34, %v669_v16  ;;  %v1427_v25 = vpop.f32.mrf.mxu3  ;;  %v1172_v16 = vshrl.u32 %v403_v61, 16 }
  0xe1   : > { %v671_v40 = vpop.f32.mrf.mxu1 }
  0xe2   : > { %v1506_v57 = vadd.f32 %v1427_v25, %v849_v41  ;;  %v672_v36 = vadd.f32 %v671_v40, %v3526_v22  ;;  %v1562_v31 = vpop.f32.mrf.mxu0  ;;  %v1155_v22 = vrot.slane %v1154_v55, 4  ;;  %v1170_v40 = vsel %vm3396_vm4, %v1165_v54, %v1169_v60 }
  0xe3   : > { %v1174_v55 = vrot.slane %v1172_v16, 4 }
  0xe4   : > { %2938 = vmatmul.msk.bf16.gmra.mxu1 %vm504_vm1, %v3300_v11  ;;  %2959 = vmatmul.msk.bf16.gmra.mxu2 %vm504_vm1, %v3337_v19  ;;  %v3650_v58 = vadd.f32 %v1559_v14, %v1506_v57  ;;  %v1160_v25 = vsel %vm3396_vm4, %v1155_v22, %v1159_v3  ;;  %v1177_v57 = vrot.slane %v1175_v18, 5  ;;  %v1191_v3 = vshll.u32 %v405_v28, 16 }
  0xe5   : > { %2976 = vmatmul.msk.bf16.gmra.mxu3 %vm504_vm1, %v3621_v9  ;;  %2993 = vmatmul.msk.bf16.gmra.mxu0 %vm504_vm1, %v3642_v44  ;;  %v1339_v61 = vunpack.c.l.b16 %v1160_v25 }
  0xe6   : > { %4384 = vst [vmem:[#allocation12_spill] sm:$0xff] %v3650_v58  ;;  %v1193_v18 = vrot.slane %v1191_v3, 5 }
  0xe7   : > { %v773_v0 = vpop.f32.mrf.mxu2 }
  0xe8   : > { %v850_v24 = vadd.f32 %v773_v0, %v672_v36  ;;  %v1430_v11 = vpop.f32.mrf.mxu3  ;;  %v1187_v36 = vrot.slane %v1185_v8, 4  ;;  %v1340_v0 = vunpack.c.l.b16 %v1170_v40  ;;  %v406_v8 = vld [vmem:[%s3294_s10 + $0x9c] sm:$0xf] }
  0xe9   : > { %v673_v14 = vpop.f32.mrf.mxu1 }
  0xea   : > { %v1507_v34 = vadd.f32 %v1430_v11, %v850_v24  ;;  %v674_v35 = vadd.f32 %v673_v14, %v3548_v32  ;;  %v1564_v41 = vpop.f32.mrf.mxu0  ;;  %v1178_v32 = vor.u32 %v1177_v57, %v1174_v55  ;;  %v1188_v14 = vor.u32 %v1187_v36, %v1183_v42 }
  0xeb   : > { %v3665_v50 = vpack.c.b16 %v1340_v0, %v1339_v61  ;;  %v1196_v55 = vshrl.u32 %v406_v8, 16  ;;  %v1199_v57 = vshll.u32 %v406_v8, 16 }
  0xec   : > { %v3662_v52 = vadd.f32 %v1562_v31, %v1507_v34  ;;  %v1179_v31 = vrot.slane %v1178_v32, 4 }
  0xed   : > { %v1198_v3 = vrot.slane %v1196_v55, 4 }
  0xef   : > { %v775_v58 = vpop.f32.mrf.mxu2 }
  0xf0   : > { %v851_v24 = vadd.f32 %v775_v58, %v674_v35  ;;  %v1432_v11 = vpop.f32.mrf.mxu3  ;;  %v1189_v58 = vrot.slane %v1188_v14, 4 }
  0xf1   : > { %v676_v22 = vpop.f32.mrf.mxu1 }
  0xf2   : > { %v1508_v54 = vadd.f32 %v1432_v11, %v851_v24  ;;  %v677_v60 = vadd.f32 %v676_v22, %v3559_v56  ;;  %v1567_v16 = vpop.f32.mrf.mxu0  ;;  %v407_v56 = vld [vmem:[%s3294_s10 + $0xa0] sm:$0xf]  ;;  %v1194_v40 = vsel %vm3396_vm4, %v1189_v58, %v1193_v18  ;;  %v1201_v22 = vrot.slane %v1199_v57, 5 }
  0xf3   : > { %v1205_v36 = vshll.u32 %v407_v56, 16  ;;  %v1209_v61 = vshrl.u32 %v407_v56, 16  ;;  %v1342_v32 = vunpack.c.l.b16 %v1194_v40 }
  0xf4   : > { %2939 = vmatmul.msk.bf16.gmra.mxu1 %vm504_vm1, %v3320_v15  ;;  %2960 = vmatmul.msk.bf16.gmra.mxu2 %vm504_vm1, %v3383_v53  ;;  %v3672_v49 = vadd.f32 %v1564_v41, %v1508_v54  ;;  %v1184_v15 = vsel %vm3396_vm4, %v1179_v31, %v1183_v42  ;;  %v1202_v56 = vor.u32 %v1201_v22, %v1198_v3 }
  0xf5   : > { %2977 = vmatmul.msk.bf16.gmra.mxu3 %vm504_vm1, %v3642_v44  ;;  %2994 = vmatmul.msk.bf16.gmra.mxu0 %vm504_vm1, %v3665_v50  ;;  %v1341_v11 = vunpack.c.l.b16 %v1184_v15  ;;  %v1207_v42 = vrot.slane %v1205_v36, 5  ;;  %v1211_v54 = vrot.slane %v1209_v61, 4  ;;  %v409_v36 = vld [vmem:[%s3294_s10 + $0xa8] sm:$0xf]  ;;  %v410_v61 = vld [vmem:[%s3294_s10 + $0xac] sm:$0xf] }
  0xf7   : > { %v778_v34 = vpop.f32.mrf.mxu2  ;;  %v3688_v8 = vpack.c.b16 %v1342_v32, %v1341_v11  ;;  %v1220_v11 = vshrl.u32 %v409_v36, 16  ;;  %v1223_v32 = vshll.u32 %v409_v36, 16 }
  0xf8   : > { %v852_v35 = vadd.f32 %v778_v34, %v677_v60  ;;  %v1435_v25 = vpop.f32.mrf.mxu3  ;;  %v408_v60 = vld [vmem:[%s3294_s10 + $0xa4] sm:$0x1] }
  0xf9   : > { %v678_v41 = vpop.f32.mrf.mxu1  ;;  %4386 = vst [vmem:[#allocation14_spill] sm:$0xff] %v3688_v8 }
  0xfa   : > { %v1509_v0 = vadd.f32 %v1435_v25, %v852_v35  ;;  %v679_v28 = vadd.f32 %v678_v41, %v3577_v29  ;;  %v1569_v24 = vpop.f32.mrf.mxu0  ;;  %v1212_v29 = vor.u32 %v1211_v54, %v1207_v42  ;;  %v1215_v35 = vshll.u32 %v408_v60, 16 }
  0xfb   : > { %v1203_v41 = vrot.slane %v1202_v56, 4  ;;  %v1229_v60 = vshll.u32 %v410_v61, 16  ;;  %v1222_v56 = vrot.slane %v1220_v11, 4 }
  0xfc   : > { %v3685_v14 = vadd.f32 %v1567_v16, %v1509_v0  ;;  %v1213_v55 = vrot.slane %v1212_v29, 4  ;;  %v1217_v57 = vrot.slane %v1215_v35, 5  ;;  %v1225_v29 = vrot.slane %v1223_v32, 5 }
  0xfe   : > { %4385 = vst [vmem:[#allocation13_spill] sm:$0xff] %v3685_v14 }
  0xff   : > { %v780_v31 = vpop.f32.mrf.mxu2 }
 0x100   : > { %v853_v58 = vadd.f32 %v780_v31, %v679_v28  ;;  %v1437_v18 = vpop.f32.mrf.mxu3  ;;  %v1233_v31 = vshrl.u32 %v410_v61, 16 }
 0x101   : > { %v681_v34 = vpop.f32.mrf.mxu1 }
 0x102   : > { %v1510_v25 = vadd.f32 %v1437_v18, %v853_v58  ;;  %v682_v16 = vadd.f32 %v681_v34, %v3592_v63  ;;  %v1572_v15 = vpop.f32.mrf.mxu0  ;;  %v1235_v35 = vrot.slane %v1233_v31, 4 }
 0x104   : > { %2940 = vmatmul.msk.bf16.gmra.mxu1 %vm504_vm1, %v3337_v19  ;;  %2961 = vmatmul.msk.bf16.gmra.mxu2 %vm504_vm1, %v3303_v12  ;;  %v3695_v40 = vadd.f32 %v1569_v24, %v1510_v25  ;;  %v1208_v12 = vsel %vm3396_vm4, %v1203_v41, %v1207_v42  ;;  %v1218_v24 = vsel %vm3396_vm4, %v1213_v55, %v1217_v57  ;;  %v1231_v42 = vrot.slane %v1229_v60, 5 }
 0x105   : > { %2978 = vmatmul.msk.bf16.gmra.mxu3 %vm504_vm1, %v3665_v50  ;;  %2995 = vmatmul.msk.bf16.gmra.mxu0 %vm504_vm1, %v3688_v8  ;;  %v1343_v18 = vunpack.c.l.b16 %v1208_v12  ;;  %v1344_v34 = vunpack.c.l.b16 %v1218_v24  ;;  %v413_v24 = vld [vmem:[%s3294_s10 + $0xb8] sm:$0xf] }
 0x106   : > { %4387 = vst [vmem:[#allocation15_spill] sm:$0xff] %v3695_v40  ;;  %v1236_v61 = vor.u32 %v1235_v35, %v1231_v42 }
 0x107   : > { %v783_v63 = vpop.f32.mrf.mxu2 }
 0x108   : > { %v854_v0 = vadd.f32 %v783_v63, %v682_v16  ;;  %v1440_v28 = vpop.f32.mrf.mxu3  ;;  %v411_v16 = vld [vmem:[%s3294_s10 + $0xb0] sm:$0x1] }
 0x109   : > { %v683_v19 = vpop.f32.mrf.mxu1 }
 0x10a   : > { %v1511_v3 = vadd.f32 %v1440_v28, %v854_v0  ;;  %v684_v22 = vadd.f32 %v683_v19, %v3614_v43  ;;  %v1574_v54 = vpop.f32.mrf.mxu0  ;;  %v3711_v43 = vpack.c.b16 %v1344_v34, %v1343_v18  ;;  %v1239_v0 = vshll.u32 %v411_v16, 16  ;;  %v3716_v28 = vld [vmem:[%s3294_s10 + $0xa8] sm:$0xff]  ;;  %v412_v19 = vld [vmem:[%s3294_s10 + $0xb4] sm:$0xf] }
 0x10b   : > { %v1244_v60 = vshrl.u32 %v412_v19, 16  ;;  %v1247_v34 = vshll.u32 %v412_v19, 16  ;;  %v414_v19 = vld [vmem:[%s3294_s10 + $0xbc] sm:$0x1] }
 0x10c   : > { %v3708_v58 = vadd.f32 %v1572_v15, %v1511_v3  ;;  %4389 = vst [vmem:[#allocation17_spill] sm:$0xff] %v3711_v43  ;;  %v1226_v15 = vor.u32 %v1225_v29, %v1222_v56  ;;  %v1237_v3 = vrot.slane %v1236_v61, 4  ;;  %v1257_v56 = vshrl.u32 %v413_v24, 16 }
 0x10e   : > { %4388 = vst [vmem:[#allocation16_spill] sm:$0xff] %v3708_v58  ;;  %v1227_v32 = vrot.slane %v1226_v15, 4 }
 0x10f   : > { %v785_v25 = vpop.f32.mrf.mxu2 }
 0x110   : > { %v855_v41 = vadd.f32 %v785_v25, %v684_v22  ;;  %v1442_v55 = vpop.f32.mrf.mxu3  ;;  %v1232_v16 = vsel %vm3396_vm4, %v1227_v32, %v1231_v42 }
 0x111   : > { %v686_v57 = vpop.f32.mrf.mxu1  ;;  %v1345_v61 = vunpack.c.l.b16 %v1232_v16 }
 0x112   : > { %v1512_v36 = vadd.f32 %v1442_v55, %v855_v41  ;;  %v1577_v63 = vpop.f32.mrf.mxu0  ;;  %v687_v11 = vadd.f32 %v686_v57, %v3489_v37  ;;  %v1246_v41 = vrot.slane %v1244_v60, 4  ;;  %v1249_v55 = vrot.slane %v1247_v34, 5  ;;  %v3141_v34 = vld [vmem:[%s3294_s10 + $0x9c] sm:$0xff] }
 0x114   : > { %2941 = vmatmul.msk.bf16.gmra.mxu1 %vm504_vm1, %v3383_v53  ;;  %2962 = vmatmul.msk.bf16.gmra.mxu2 %vm504_vm1, %v3716_v28  ;;  %v3721_v12 = vadd.f32 %v1574_v54, %v1512_v36  ;;  %v1241_v53 = vrot.slane %v1239_v0, 5  ;;  %v1253_v54 = vshll.u32 %v413_v24, 16  ;;  %v1259_v36 = vrot.slane %v1257_v56, 4 }
 0x115   : > { %2979 = vmatmul.msk.bf16.gmra.mxu3 %vm504_vm1, %v3688_v8  ;;  %2996 = vmatmul.msk.bf16.gmra.mxu0 %vm504_vm1, %v3711_v43  ;;  %v1250_v32 = vor.u32 %v1249_v55, %v1246_v41  ;;  %v416_v55 = vld [vmem:[%s3376_s26 + $0x4] sm:$0xf] }
 0x116   : > { %4390 = vst [vmem:[#allocation18_spill] sm:$0xff] %v3721_v12  ;;  %v1242_v37 = vsel %vm3396_vm4, %v1237_v3, %v1241_v53  ;;  %v1255_v57 = vrot.slane %v1253_v54, 5  ;;  %v1263_v3 = vshll.u32 %v414_v19, 16  ;;  %v3742_v54 = vld [vmem:[%s3294_s10 + $0xb4] sm:$0xff] }
 0x117   : > { %v788_v22 = vpop.f32.mrf.mxu2  ;;  %v1346_v0 = vunpack.c.l.b16 %v1242_v37 }
 0x118   : > { %v856_v31 = vadd.f32 %v788_v22, %v687_v11  ;;  %v1445_v18 = vpop.f32.mrf.mxu3 }
 0x119   : > { %v688_v29 = vpop.f32.mrf.mxu1  ;;  %v3737_v60 = vpack.c.b16 %v1346_v0, %v1345_v61  ;;  %v3143_v0 = vld [vmem:[%s3294_s10 + $0x4] sm:$0xf] }
 0x11a   : > { %v1513_v35 = vadd.f32 %v1445_v18, %v856_v31  ;;  %v1579_v25 = vpop.f32.mrf.mxu0  ;;  %v689_v24 = vadd.f32 %v688_v29, %v3513_v48  ;;  %v1260_v31 = vor.u32 %v1259_v36, %v1255_v57  ;;  %v1251_v48 = vrot.slane %v1250_v32, 4 }
 0x11b   : > { %v1265_v29 = vrot.slane %v1263_v3, 5  ;;  %v1824_v19 = vrot.slane %v3143_v0, 5 }
 0x11c   : > { %v3733_v15 = vadd.f32 %v1577_v63, %v1513_v35  ;;  %v1261_v56 = vrot.slane %v1260_v31, 4  ;;  %v415_v35 = vld [vmem:[%s3376_s26] sm:$0xf] }
 0x11d   : > { %v1268_v36 = vshrl.u32 %v415_v35, 16  ;;  %v1271_v61 = vshll.u32 %v415_v35, 16  ;;  %v1281_v35 = vshrl.u32 %v416_v55, 16  ;;  %v1826_v0 = vrot.slane %v1824_v19, 4 }
 0x11e   : > { %4391 = vst [vmem:[#allocation19_spill] sm:$0xff] %v3733_v15 }
 0x11f   : > { %v790_v11 = vpop.f32.mrf.mxu2 }
 0x120   : > { %v857_v22 = vadd.f32 %v790_v11, %v689_v24  ;;  %v1447_v42 = vpop.f32.mrf.mxu3 }
 0x121   : > { %v691_v53 = vpop.f32.mrf.mxu1 }
 0x122   : > { %v1514_v18 = vadd.f32 %v1447_v42, %v857_v22  ;;  %v1582_v63 = vpop.f32.mrf.mxu0  ;;  %v692_v37 = vadd.f32 %v691_v53, %v3522_v4  ;;  %v1266_v22 = vsel %vm3396_vm4, %v1261_v56, %v1265_v29  ;;  %v3144_v42 = vld [vmem:[%s3294_s10 + $0x10] sm:$0xf]  ;;  %v3145_v4 = vld [vmem:[%s3294_s10] sm:$0xf]  ;;  %v3147_v29 = vld [vmem:[%s3294_s10 + $0xc] sm:$0xf] }
 0x123   : > { %v1831_v32 = vrot.slane %v3144_v42, 5  ;;  %v3017_v3 = vrot.slane %v3145_v4, 9  ;;  %v3018_v15 = vrot.slane %v3147_v29, 9  ;;  %v417_v42 = vld [vmem:[%s3376_s26 + $0x8] sm:$0x1] }
 0x124   : > { %2942 = vmatmul.msk.bf16.gmra.mxu1 %vm504_vm1, %v3141_v34  ;;  %2963 = vmatmul.msk.bf16.gmra.mxu2 %vm504_vm1, %v3742_v54  ;;  %v3747_v16 = vadd.f32 %v1579_v25, %v1514_v18  ;;  %v1256_v25 = vsel %vm3396_vm4, %v1251_v48, %v1255_v57  ;;  %v1277_v34 = vshll.u32 %v416_v55, 16  ;;  %v1270_v57 = vrot.slane %v1268_v36, 4  ;;  %v3148_v4 = vld [vmem:[%s3294_s10 + $0x14] sm:$0x1] }
 0x125   : > { %2980 = vmatmul.msk.bf16.gmra.mxu3 %vm504_vm1, %v3711_v43  ;;  %2997 = vmatmul.msk.bf16.gmra.mxu0 %vm504_vm1, %v3737_v60  ;;  %v1273_v48 = vrot.slane %v1271_v61, 5  ;;  %v1833_v58 = vrot.slane %v1831_v32, 4  ;;  %v1955_v36 = vunpack.c.l.b16 %v3424_v30  ;;  %v1287_v14 = vshll.u32 %v417_v42, 16 }
 0x126   : > { %4392 = vst [vmem:[#allocation20_spill] sm:$0xff] %v3747_v16  ;;  %v3146_v16 = vld [vmem:[%s3294_s10 + $0x8] sm:$0x1]  ;;  %v1279_v55 = vrot.slane %v1277_v34, 5 }
 0x127   : > { %v793_v41 = vpop.f32.mrf.mxu2  ;;  %v1827_v56 = vrot.slane %v3146_v16, 5  ;;  %v1274_v16 = vor.u32 %v1273_v48, %v1270_v57 }
 0x128   : > { %v858_v24 = vadd.f32 %v793_v41, %v692_v37  ;;  %v1450_v11 = vpop.f32.mrf.mxu3  ;;  %v1347_v37 = vunpack.c.l.b16 %v1256_v25  ;;  %v1348_v41 = vunpack.c.l.b16 %v1266_v22  ;;  %v1283_v25 = vrot.slane %v1281_v35, 4 }
 0x129   : > { %v693_v31 = vpop.f32.mrf.mxu1 }
 0x12a   : > { %v1515_v53 = vadd.f32 %v1450_v11, %v858_v24  ;;  %v1584_v18 = vpop.f32.mrf.mxu0  ;;  %v1834_v24 = vrot.slane %v3148_v4, 5  ;;  %v3149_v11 = vld [vmem:[%s3294_s10 + $0x18] sm:$0xf]  ;;  %v694_v40 = vadd.f32 %v693_v31, %v3542_v10  ;;  %v3771_v22 = vpack.c.b16 %v1348_v41, %v1347_v37 }
 0x12b   : > { %v3019_v43 = vrot.slane %v3149_v11, 9  ;;  %v1832_v10 = vsel %vm3416_vm7, %v3018_v15, %v1831_v32  ;;  %v1284_v57 = vor.u32 %v1283_v25, %v1279_v55  ;;  %v3150_v15 = vld [vmem:[%s3376_s26] sm:$0xff] }
 0x12c   : > { %v3765_v12 = vadd.f32 %v1582_v63, %v1515_v53  ;;  %v1825_v63 = vsel %vm3416_vm7, %v3017_v3, %v1824_v19  ;;  %v1828_v53 = vsel %vm3416_vm7, %v1826_v0, %v1827_v56  ;;  %v1835_v35 = vsel %vm3416_vm7, %v1833_v58, %v1834_v24 }
 0x12d   : > { %v1950_v34 = vunpack.c.l.b16 %v1825_v63  ;;  %v1951_v30 = vunpack.c.l.b16 %v1828_v53  ;;  %v1952_v37 = vunpack.c.l.b16 %v1832_v10  ;;  %v1953_v48 = vunpack.c.l.b16 %v1835_v35 }
 0x12e   : > { %v4393_v19 = vrot.slane %v3401_v5, 5  ;;  %v1285_v42 = vrot.slane %v1284_v57, 4 }
 0x12f   : > { %v795_v61 = vpop.f32.mrf.mxu2  ;;  %v1982_v0 = vpack.c.b16 %v1951_v30, %v1950_v34  ;;  %v3789_v32 = vpack.c.b16 %v1953_v48, %v1952_v37  ;;  %v3108_v34 = vld [vmem:[%s3376_s26 + $0xc] sm:$0xff] }
 0x130   : > { %v859_v29 = vadd.f32 %v795_v61, %v694_v40  ;;  %v1452_v8 = vpop.f32.mrf.mxu3  ;;  %v1839_v3 = vsel %vm3416_vm7, %v3019_v43, %v4393_v19  ;;  %v1275_v43 = vrot.slane %v1274_v16, 4 }
 0x131   : > { %v696_v31 = vpop.f32.mrf.mxu1  ;;  %v1954_v56 = vunpack.c.l.b16 %v1839_v3 }
 0x132   : > { %v1516_v41 = vadd.f32 %v1452_v8, %v859_v29  ;;  %v1587_v40 = vpop.f32.mrf.mxu0  ;;  %v697_v8 = vadd.f32 %v696_v31, %v3555_v51  ;;  %v1280_v29 = vsel %vm3396_vm4, %v1275_v43, %v1279_v55 }
 0x133   : > { %v3797_v5 = vpack.c.b16 %v1955_v36, %v1954_v56  ;;  %v1539_v53 = vunpack.c.l.b16 %v1280_v29  ;;  %v3153_v29 = vld [vmem:[%s3294_s10 + $0x24] sm:$0xf] }
 0x134   : > { %2943 = vmatmul.msk.bf16.gmra.mxu1 %vm504_vm1, %v3716_v28  ;;  %2964 = vmatmul.msk.bf16.gmra.mxu2 %vm504_vm1, %v3150_v15  ;;  %v3791_v58 = vadd.f32 %v1584_v18, %v1516_v41  ;;  %v1289_v28 = vrot.slane %v1287_v14, 5 }
 0x135   : > { %2981 = vmatmul.msk.bf16.gmra.mxu3 %vm504_vm1, %v3737_v60  ;;  %2998 = vmatmul.msk.bf16.gmra.mxu0 %vm504_vm1, %v3771_v22 }
 0x136   : > { %v1290_v63 = vsel %vm3396_vm4, %v1285_v42, %v1289_v28 }
 0x137   : > { %v798_v4 = vpop.f32.mrf.mxu2  ;;  %v1540_v51 = vunpack.c.l.b16 %v1290_v63  ;;  %v3020_v63 = vrot.slane %v3153_v29, 9 }
 0x138   : > { %v860_v24 = vadd.f32 %v798_v4, %v697_v8  ;;  %v1455_v11 = vpop.f32.mrf.mxu3 }
 0x139   : > { %v698_v25 = vpop.f32.mrf.mxu1  ;;  %v3808_v35 = vpack.c.b16 %v1540_v51, %v1539_v53 }
 0x13a   : > { %v1517_v18 = vadd.f32 %v1455_v11, %v860_v24  ;;  %v1589_v61 = vpop.f32.mrf.mxu0  ;;  %v699_v16 = vadd.f32 %v698_v25, %v3575_v27  ;;  %v3151_v11 = vld [vmem:[%s3294_s10 + $0x28] sm:$0xf] }
 0x13c   : > { %v3804_v36 = vadd.f32 %v1587_v40, %v1517_v18 }
 0x13f   : > { %v800_v14 = vpop.f32.mrf.mxu2 }
 0x140   : > { %v861_v10 = vadd.f32 %v800_v14, %v699_v16  ;;  %v1457_v31 = vpop.f32.mrf.mxu3 }
 0x141   : > { %v701_v30 = vpop.f32.mrf.mxu1 }
 0x142   : > { %v1518_v37 = vadd.f32 %v1457_v31, %v861_v10  ;;  %v1592_v41 = vpop.f32.mrf.mxu0  ;;  %v702_v27 = vadd.f32 %v701_v30, %v3588_v45  ;;  %v1845_v45 = vrot.slane %v3151_v11, 5 }
 0x144   : > { %2944 = vmatmul.msk.bf16.gmra.mxu1 %vm504_vm1, %v3742_v54  ;;  %2965 = vmatmul.msk.bf16.gmra.mxu2 %vm504_vm1, %v3108_v34  ;;  %v3813_v55 = vadd.f32 %v1589_v61, %v1518_v37  ;;  %v1847_v53 = vrot.slane %v1845_v45, 4  ;;  %v1846_v31 = vsel %vm3416_vm7, %v3020_v63, %v1845_v45 }
 0x145   : > { %2982 = vmatmul.msk.bf16.gmra.mxu3 %vm504_vm1, %v3771_v22  ;;  %2999 = vmatmul.msk.bf16.gmra.mxu0 %vm504_vm1, %v3808_v35  ;;  %v1956_v37 = vunpack.c.l.b16 %v1846_v31 }
 0x147   : > { %v803_v40 = vpop.f32.mrf.mxu2 }
 0x148   : > { %v862_v57 = vadd.f32 %v803_v40, %v702_v27  ;;  %v1460_v48 = vpop.f32.mrf.mxu3 }
 0x149   : > { %v703_v19 = vpop.f32.mrf.mxu1 }
 0x14a   : > { %v1519_v3 = vadd.f32 %v1460_v48, %v862_v57  ;;  %v1594_v56 = vpop.f32.mrf.mxu0  ;;  %v704_v15 = vadd.f32 %v703_v19, %v3612_v33  ;;  %v3152_v33 = vld [vmem:[%s3294_s10 + $0x2c] sm:$0x1] }
 0x14b   : > { %v1848_v18 = vrot.slane %v3152_v33, 5 }
 0x14c   : > { %v3820_v54 = vadd.f32 %v1592_v41, %v1519_v3 }
 0x14d   : > { %v1849_v34 = vsel %vm3416_vm7, %v1847_v53, %v1848_v18 }
 0x14f   : > { %v805_v8 = vpop.f32.mrf.mxu2 }
 0x150   : > { %v863_v43 = vadd.f32 %v805_v8, %v704_v15  ;;  %v1462_v42 = vpop.f32.mrf.mxu3  ;;  %v3154_v15 = vld [vmem:[%s3294_s10 + $0x34] sm:$0xf] }
 0x151   : > { %v706_v28 = vpop.f32.mrf.mxu1  ;;  %v1852_v8 = vrot.slane %v3154_v15, 5 }
 0x152   : > { %v1520_v4 = vadd.f32 %v1462_v42, %v863_v43  ;;  %v1597_v24 = vpop.f32.mrf.mxu0  ;;  %v707_v61 = vadd.f32 %v706_v28, %v3505_v46  ;;  %v1957_v46 = vunpack.c.l.b16 %v1849_v34 }
 0x153   : > { %v1854_v11 = vrot.slane %v1852_v8, 4 }
 0x154   : > { %3001 = vmatmul.msk.bf16.vlgmr.msra.gmra.mxu1 %vm504_vm1, %v3439_v7  ;;  %3036 = vmatmul.msk.bf16.vlgmr.msra.gmra.mxu2 %vm504_vm1, %v1982_v0  ;;  %v3827_v25 = vadd.f32 %v1594_v56, %v1520_v4  ;;  %v3843_v19 = vpack.c.b16 %v1957_v46, %v1956_v37  ;;  %v3156_v4 = vld [vmem:[%s3294_s10 + $0x30] sm:$0xf]  ;;  %v3157_v46 = vld [vmem:[%s3294_s10 + $0x40] sm:$0xf] }
 0x155   : > { %3053 = vmatmul.msk.bf16.vlgmr.msra.gmra.mxu3 %vm504_vm1, %v3789_v32  ;;  %3070 = vmatmul.msk.bf16.vlgmr.msra.gmra.mxu0 %vm504_vm1, %v3797_v5 }
 0x157   : > { %v808_v51 = vpop.f32.mrf.mxu2 }
 0x158   : > { %v864_v16 = vadd.f32 %v808_v51, %v707_v61  ;;  %v1465_v7 = vpop.f32.mrf.mxu3 }
 0x159   : > { %v708_v14 = vpop.f32.mrf.mxu1 }
 0x15a   : > { %v1521_v0 = vadd.f32 %v1465_v7, %v864_v16  ;;  %v1599_v10 = vpop.f32.mrf.mxu0  ;;  %v709_v41 = vadd.f32 %v708_v14, %v3518_v1  ;;  %v3155_v1 = vld [vmem:[%s3294_s10 + $0x38] sm:$0x1] }
 0x15b   : > { %v1855_v42 = vrot.slane %v3155_v1, 5 }
 0x15c   : > { %v3840_v30 = vadd.f32 %v1597_v24, %v1521_v0  ;;  %v3021_v24 = vrot.slane %v3156_v4, 9 }
 0x15d   : > { %v1856_v63 = vsel %vm3416_vm7, %v1854_v11, %v1855_v42 }
 0x15e   : > { %v1853_v29 = vsel %vm3416_vm7, %v3021_v24, %v1852_v8 }
 0x15f   : > { %v810_v27 = vpop.f32.mrf.mxu2  ;;  %v1958_v51 = vunpack.c.l.b16 %v1853_v29 }
 0x160   : > { %v865_v40 = vadd.f32 %v810_v27, %v709_v41  ;;  %v1467_v57 = vpop.f32.mrf.mxu3  ;;  %v1859_v41 = vrot.slane %v3157_v46, 5 }
 0x161   : > { %v711_v48 = vpop.f32.mrf.mxu1 }
 0x162   : > { %v1522_v3 = vadd.f32 %v1467_v57, %v865_v40  ;;  %v1602_v56 = vpop.f32.mrf.mxu0  ;;  %v712_v28 = vadd.f32 %v711_v48, %v3536_v13  ;;  %v1959_v13 = vunpack.c.l.b16 %v1856_v63  ;;  %v3159_v48 = vld [vmem:[%s3294_s10 + $0x3c] sm:$0xf] }
 0x164   : > { %3002 = vmatmul.msk.bf16.gmra.mxu1 %vm504_vm1, %v3455_v38  ;;  %3037 = vmatmul.msk.bf16.gmra.mxu2 %vm504_vm1, %v3789_v32  ;;  %v3850_v43 = vadd.f32 %v1599_v10, %v1522_v3  ;;  %v3866_v31 = vpack.c.b16 %v1959_v13, %v1958_v51  ;;  %v3022_v3 = vrot.slane %v3159_v48, 9  ;;  %v3160_v51 = vld [vmem:[%s3294_s10 + $0x4c] sm:$0xf] }
 0x165   : > { %3054 = vmatmul.msk.bf16.gmra.mxu3 %vm504_vm1, %v3797_v5  ;;  %3071 = vmatmul.msk.bf16.gmra.mxu0 %vm504_vm1, %v3843_v19  ;;  %v1866_v13 = vrot.slane %v3160_v51, 5 }
 0x167   : > { %v813_v45 = vpop.f32.mrf.mxu2 }
 0x168   : > { %v866_v38 = vadd.f32 %v813_v45, %v712_v28  ;;  %v1470_v33 = vpop.f32.mrf.mxu3  ;;  %v1860_v28 = vsel %vm3416_vm7, %v3022_v3, %v1859_v41 }
 0x169   : > { %v713_v18 = vpop.f32.mrf.mxu1  ;;  %v1960_v11 = vunpack.c.l.b16 %v1860_v28 }
 0x16a   : > { %v1523_v32 = vadd.f32 %v1470_v33, %v866_v38  ;;  %v1604_v61 = vpop.f32.mrf.mxu0  ;;  %v714_v16 = vadd.f32 %v713_v18, %v3550_v17  ;;  %v3158_v17 = vld [vmem:[%s3294_s10 + $0x44] sm:$0x1] }
 0x16b   : > { %v1862_v40 = vrot.slane %v3158_v17, 5 }
 0x16c   : > { %v3863_v53 = vadd.f32 %v1602_v56, %v1523_v32  ;;  %v1861_v56 = vrot.slane %v1859_v41, 4 }
 0x16e   : > { %v1863_v4 = vsel %vm3416_vm7, %v1861_v56, %v1862_v40 }
 0x16f   : > { %v815_v7 = vpop.f32.mrf.mxu2 }
 0x170   : > { %v867_v14 = vadd.f32 %v815_v7, %v714_v16  ;;  %v1472_v0 = vpop.f32.mrf.mxu3 }
 0x171   : > { %v716_v10 = vpop.f32.mrf.mxu1 }
 0x172   : > { %v1524_v34 = vadd.f32 %v1472_v0, %v867_v14  ;;  %v1607_v37 = vpop.f32.mrf.mxu0  ;;  %v717_v57 = vadd.f32 %v716_v10, %v3571_v20  ;;  %v1961_v20 = vunpack.c.l.b16 %v1863_v4  ;;  %v3162_v0 = vld [vmem:[%s3294_s10 + $0x48] sm:$0xf]  ;;  %v3163_v4 = vld [vmem:[%s3294_s10 + $0x58] sm:$0xf] }
 0x173   : > { %v3023_v10 = vrot.slane %v3162_v0, 9 }
 0x174   : > { %3003 = vmatmul.msk.bf16.gmra.mxu1 %vm504_vm1, %v3472_v62  ;;  %3038 = vmatmul.msk.bf16.gmra.mxu2 %vm504_vm1, %v3797_v5  ;;  %v3873_v27 = vadd.f32 %v1604_v61, %v1524_v34  ;;  %v3889_v61 = vpack.c.b16 %v1961_v20, %v1960_v11  ;;  %v1868_v34 = vrot.slane %v1866_v13, 4  ;;  %v1873_v11 = vrot.slane %v3163_v4, 5 }
 0x175   : > { %3055 = vmatmul.msk.bf16.gmra.mxu3 %vm504_vm1, %v3843_v19  ;;  %3072 = vmatmul.msk.bf16.gmra.mxu0 %vm504_vm1, %v3866_v31  ;;  %v1867_v40 = vsel %vm3416_vm7, %v3023_v10, %v1866_v13  ;;  %v4394_v10 = vld [vmem:[#allocation2_spill] sm:$0xff] }
 0x176   : > { %v1962_v3 = vunpack.c.l.b16 %v1867_v40 }
 0x177   : > { %v818_v15 = vpop.f32.mrf.mxu2 }
 0x178   : > { %v868_v62 = vadd.f32 %v818_v15, %v717_v57  ;;  %v1475_v8 = vpop.f32.mrf.mxu3 }
 0x179   : > { %v718_v1 = vpop.f32.mrf.mxu1 }
 0x17a   : > { %v1525_v5 = vadd.f32 %v1475_v8, %v868_v62  ;;  %v1609_v42 = vpop.f32.mrf.mxu0  ;;  %v719_v45 = vadd.f32 %v718_v1, %v3584_v59  ;;  %v3161_v59 = vld [vmem:[%s3294_s10 + $0x50] sm:$0x1] }
 0x17b   : > { %v1869_v7 = vrot.slane %v3161_v59, 5 }
 0x17c   : > { %v3886_v24 = vadd.f32 %v1607_v37, %v1525_v5 }
 0x17d   : > { %v1870_v57 = vsel %vm3416_vm7, %v1868_v34, %v1869_v7 }
 0x17f   : > { %v820_v38 = vpop.f32.mrf.mxu2 }
 0x180   : > { %v869_v33 = vadd.f32 %v820_v38, %v719_v45  ;;  %v1477_v18 = vpop.f32.mrf.mxu3 }
 0x181   : > { %v721_v32 = vpop.f32.mrf.mxu1 }
 0x182   : > { %v1526_v29 = vadd.f32 %v1477_v18, %v869_v33  ;;  %v1612_v63 = vpop.f32.mrf.mxu0  ;;  %v722_v14 = vadd.f32 %v721_v32, %v3604_v21  ;;  %v1963_v21 = vunpack.c.l.b16 %v1870_v57  ;;  %v3165_v33 = vld [vmem:[%s3294_s10 + $0x54] sm:$0xf]  ;;  %v1875_v32 = vrot.slane %v1873_v11, 4  ;;  %v3166_v57 = vld [vmem:[%s3294_s10 + $0x64] sm:$0xf] }
 0x183   : > { %v3024_v18 = vrot.slane %v3165_v33, 9 }
 0x184   : > { %3004 = vmatmul.msk.bf16.gmra.mxu1 %vm504_vm1, %v3491_v39  ;;  %3039 = vmatmul.msk.bf16.gmra.mxu2 %vm504_vm1, %v3843_v19  ;;  %v3896_v16 = vadd.f32 %v1609_v42, %v1526_v29  ;;  %v3912_v5 = vpack.c.b16 %v1963_v21, %v1962_v3  ;;  %v1880_v3 = vrot.slane %v3166_v57, 5  ;;  %v4395_v21 = vld [vmem:[#allocation5_spill] sm:$0xff]  ;;  %v3170_v57 = vld [vmem:[%s3294_s10 + $0x6c] sm:$0xf] }
 0x185   : > { %3056 = vmatmul.msk.bf16.gmra.mxu3 %vm504_vm1, %v3866_v31  ;;  %3073 = vmatmul.msk.bf16.gmra.mxu0 %vm504_vm1, %v3889_v61  ;;  %v1874_v59 = vsel %vm3416_vm7, %v3024_v18, %v1873_v11 }
 0x186   : > { %v1964_v0 = vunpack.c.l.b16 %v1874_v59  ;;  %v1882_v4 = vrot.slane %v1880_v3, 4 }
 0x187   : > { %v823_v37 = vpop.f32.mrf.mxu2 }
 0x188   : > { %v870_v39 = vadd.f32 %v823_v37, %v722_v14  ;;  %v1480_v46 = vpop.f32.mrf.mxu3 }
 0x189   : > { %v723_v41 = vpop.f32.mrf.mxu1 }
 0x18a   : > { %v1527_v19 = vadd.f32 %v1480_v46, %v870_v39  ;;  %v1614_v17 = vpop.f32.mrf.mxu0  ;;  %v724_v56 = vadd.f32 %v723_v41, %v3617_v23  ;;  %v3164_v23 = vld [vmem:[%s3294_s10 + $0x5c] sm:$0x1] }
 0x18b   : > { %v1876_v45 = vrot.slane %v3164_v23, 5 }
 0x18c   : > { %v3909_v48 = vadd.f32 %v1612_v63, %v1527_v19 }
 0x18d   : > { %v1877_v7 = vsel %vm3416_vm7, %v1875_v32, %v1876_v45 }
 0x18f   : > { %v825_v15 = vpop.f32.mrf.mxu2 }
 0x190   : > { %v871_v62 = vadd.f32 %v825_v15, %v724_v56  ;;  %v1482_v8 = vpop.f32.mrf.mxu3  ;;  %v3167_v15 = vld [vmem:[%s3294_s10 + $0x68] sm:$0x1] }
 0x191   : > { %v726_v1 = vpop.f32.mrf.mxu1 }
 0x192   : > { %v1528_v42 = vadd.f32 %v1482_v8, %v871_v62  ;;  %v1617_v28 = vpop.f32.mrf.mxu0  ;;  %v727_v38 = vadd.f32 %v726_v1, %v3507_v47  ;;  %v1965_v47 = vunpack.c.l.b16 %v1877_v7  ;;  %v1883_v62 = vrot.slane %v3167_v15, 5  ;;  %v4396_v8 = vld [vmem:[#allocation3_spill] sm:$0xff]  ;;  %v3171_v15 = vld [vmem:[%s3294_s10 + $0x74] sm:$0x1] }
 0x194   : > { %3005 = vmatmul.msk.bf16.gmra.mxu1 %vm504_vm1, %v3524_v6  ;;  %3040 = vmatmul.msk.bf16.gmra.mxu2 %vm504_vm1, %v3866_v31  ;;  %v3919_v20 = vadd.f32 %v1614_v17, %v1528_v42  ;;  %v3935_v19 = vpack.c.b16 %v1965_v47, %v1964_v0  ;;  %v3168_v42 = vld [vmem:[%s3294_s10 + $0x60] sm:$0xf]  ;;  %v1884_v32 = vsel %vm3416_vm7, %v1882_v4, %v1883_v62  ;;  %v1890_v62 = vrot.slane %v3171_v15, 5 }
 0x195   : > { %3057 = vmatmul.msk.bf16.gmra.mxu3 %vm504_vm1, %v3889_v61  ;;  %3074 = vmatmul.msk.bf16.gmra.mxu0 %vm504_vm1, %v3912_v5 }
 0x197   : > { %v828_v29 = vpop.f32.mrf.mxu2 }
 0x198   : > { %v872_v6 = vadd.f32 %v828_v29, %v727_v38  ;;  %v1485_v63 = vpop.f32.mrf.mxu3 }
 0x199   : > { %v728_v51 = vpop.f32.mrf.mxu1 }
 0x19a   : > { %v1529_v31 = vadd.f32 %v1485_v63, %v872_v6  ;;  %v1619_v13 = vpop.f32.mrf.mxu0  ;;  %v729_v34 = vadd.f32 %v728_v51, %v4394_v10  ;;  %v1967_v63 = vunpack.c.l.b16 %v1884_v32  ;;  %v4397_v51 = vld [vmem:[#allocation4_spill] sm:$0xff] }
 0x19c   : > { %v3932_v14 = vadd.f32 %v1617_v28, %v1529_v31  ;;  %v3025_v28 = vrot.slane %v3168_v42, 9 }
 0x19e   : > { %v1881_v18 = vsel %vm3416_vm7, %v3025_v28, %v1880_v3  ;;  %v3026_v3 = vrot.slane %v3170_v57, 9 }
 0x19f   : > { %v830_v37 = vpop.f32.mrf.mxu2  ;;  %v1966_v6 = vunpack.c.l.b16 %v1881_v18 }
 0x1a0   : > { %v873_v39 = vadd.f32 %v830_v37, %v729_v34  ;;  %v1487_v46 = vpop.f32.mrf.mxu3  ;;  %v3169_v37 = vld [vmem:[%s3294_s10 + $0x70] sm:$0xf] }
 0x1a1   : > { %v731_v41 = vpop.f32.mrf.mxu1  ;;  %v3958_v47 = vpack.c.b16 %v1967_v63, %v1966_v6 }
 0x1a2   : > { %v1530_v17 = vadd.f32 %v1487_v46, %v873_v39  ;;  %v1622_v40 = vpop.f32.mrf.mxu0  ;;  %v732_v1 = vadd.f32 %v731_v41, %v4396_v8  ;;  %v1887_v39 = vrot.slane %v3169_v37, 5  ;;  %v4398_v46 = vld [vmem:[#allocation8_spill] sm:$0xff] }
 0x1a4   : > { %3006 = vmatmul.msk.bf16.gmra.mxu1 %vm504_vm1, %v4395_v21  ;;  %3041 = vmatmul.msk.bf16.gmra.mxu2 %vm504_vm1, %v3889_v61  ;;  %v3942_v56 = vadd.f32 %v1619_v13, %v1530_v17  ;;  %v4399_v17 = vld [vmem:[#allocation6_spill] sm:$0xff]  ;;  %v1889_v21 = vrot.slane %v1887_v39, 4 }
 0x1a5   : > { %3058 = vmatmul.msk.bf16.gmra.mxu3 %vm504_vm1, %v3912_v5  ;;  %3075 = vmatmul.msk.bf16.gmra.mxu0 %vm504_vm1, %v3935_v19 }
 0x1a7   : > { %v833_v11 = vpop.f32.mrf.mxu2 }
 0x1a8   : > { %v874_v23 = vadd.f32 %v833_v11, %v732_v1  ;;  %v1490_v45 = vpop.f32.mrf.mxu3  ;;  %v1888_v11 = vsel %vm3416_vm7, %v3026_v3, %v1887_v39  ;;  %v3173_v39 = vld [vmem:[%s3294_s10 + $0x78] sm:$0xf] }
 0x1a9   : > { %v733_v38 = vpop.f32.mrf.mxu1 }
 0x1aa   : > { %v1531_v61 = vadd.f32 %v1490_v45, %v874_v23  ;;  %v1624_v33 = vpop.f32.mrf.mxu0  ;;  %v734_v31 = vadd.f32 %v733_v38, %v4397_v51  ;;  %v1891_v23 = vsel %vm3416_vm7, %v1889_v21, %v1890_v62  ;;  %v1968_v38 = vunpack.c.l.b16 %v1888_v11 }
 0x1ac   : > { %v3955_v29 = vadd.f32 %v1622_v40, %v1531_v61  ;;  %v1969_v61 = vunpack.c.l.b16 %v1891_v23 }
 0x1af   : > { %v835_v13 = vpop.f32.mrf.mxu2 }
 0x1b0   : > { %v875_v59 = vadd.f32 %v835_v13, %v734_v31  ;;  %v1492_v7 = vpop.f32.mrf.mxu3  ;;  %v3981_v31 = vpack.c.b16 %v1969_v61, %v1968_v38 }
 0x1b1   : > { %v736_v0 = vpop.f32.mrf.mxu1 }
 0x1b2   : > { %v1532_v10 = vadd.f32 %v1492_v7, %v875_v59  ;;  %v1627_v34 = vpop.f32.mrf.mxu0  ;;  %v737_v40 = vadd.f32 %v736_v0, %v4399_v17  ;;  %v3172_v7 = vld [vmem:[%s3294_s10 + $0x7c] sm:$0xf] }
 0x1b3   : > { %v1894_v0 = vrot.slane %v3172_v7, 5 }
 0x1b4   : > { %3007 = vmatmul.msk.bf16.gmra.mxu1 %vm504_vm1, %v4398_v46  ;;  %3042 = vmatmul.msk.bf16.gmra.mxu2 %vm504_vm1, %v3912_v5  ;;  %v3965_v41 = vadd.f32 %v1624_v33, %v1532_v10  ;;  %v4400_v33 = vld [vmem:[#allocation7_spill] sm:$0xff]  ;;  %v3027_v46 = vrot.slane %v3173_v39, 9 }
 0x1b5   : > { %3059 = vmatmul.msk.bf16.gmra.mxu3 %vm504_vm1, %v3935_v19  ;;  %3076 = vmatmul.msk.bf16.gmra.mxu0 %vm504_vm1, %v3958_v47  ;;  %v1896_v17 = vrot.slane %v1894_v0, 4  ;;  %v3177_v39 = vld [vmem:[%s3294_s10 + $0x8c] sm:$0x1] }
 0x1b7   : > { %v838_v8 = vpop.f32.mrf.mxu2 }
 0x1b8   : > { %v876_v1 = vadd.f32 %v838_v8, %v737_v40  ;;  %v1495_v42 = vpop.f32.mrf.mxu3  ;;  %v3174_v40 = vld [vmem:[%s3294_s10 + $0x80] sm:$0x1]  ;;  %v1895_v8 = vsel %vm3416_vm7, %v3027_v46, %v1894_v0  ;;  %v3176_v0 = vld [vmem:[%s3294_s10 + $0x84] sm:$0xf]  ;;  %v1904_v46 = vrot.slane %v3177_v39, 5 }
 0x1b9   : > { %v738_v28 = vpop.f32.mrf.mxu1  ;;  %v1897_v57 = vrot.slane %v3174_v40, 5 }
 0x1ba   : > { %v1533_v5 = vadd.f32 %v1495_v42, %v876_v1  ;;  %v1629_v4 = vpop.f32.mrf.mxu0  ;;  %v739_v18 = vadd.f32 %v738_v28, %v4400_v33  ;;  %v1970_v28 = vunpack.c.l.b16 %v1895_v8 }
 0x1bb   : > { %v1898_v1 = vsel %vm3416_vm7, %v1896_v17, %v1897_v57 }
 0x1bc   : > { %v3978_v45 = vadd.f32 %v1627_v34, %v1533_v5  ;;  %v4401_v34 = vld [vmem:[#allocation9_spill] sm:$0xff]  ;;  %v1971_v5 = vunpack.c.l.b16 %v1898_v1 }
 0x1bf   : > { %v840_v32 = vpop.f32.mrf.mxu2 }
 0x1c0   : > { %v877_v6 = vadd.f32 %v840_v32, %v739_v18  ;;  %v1497_v63 = vpop.f32.mrf.mxu3  ;;  %v4004_v18 = vpack.c.b16 %v1971_v5, %v1970_v28  ;;  %v4404_v28 = vld [vmem:[#allocation12_spill] sm:$0xff] }
 0x1c1   : > { %v741_v51 = vpop.f32.mrf.mxu1 }
 0x1c2   : > { %v1534_v13 = vadd.f32 %v1497_v63, %v877_v6  ;;  %v1632_v59 = vpop.f32.mrf.mxu0  ;;  %v742_v37 = vadd.f32 %v741_v51, %v4401_v34  ;;  %v3175_v63 = vld [vmem:[%s3294_s10 + $0x88] sm:$0xf]  ;;  %v3028_v34 = vrot.slane %v3176_v0, 9 }
 0x1c3   : > { %v1901_v51 = vrot.slane %v3175_v63, 5 }
 0x1c4   : > { %3008 = vmatmul.msk.bf16.gmra.mxu1 %vm504_vm1, %v3621_v9  ;;  %3043 = vmatmul.msk.bf16.gmra.mxu2 %vm504_vm1, %v3935_v19  ;;  %v3988_v10 = vadd.f32 %v1629_v4, %v1534_v13  ;;  %v4402_v4 = vld [vmem:[#allocation10_spill] sm:$0xff] }
 0x1c5   : > { %3060 = vmatmul.msk.bf16.gmra.mxu3 %vm504_vm1, %v3958_v47  ;;  %3077 = vmatmul.msk.bf16.gmra.mxu0 %vm504_vm1, %v3981_v31 }
 0x1c7   : > { %v843_v3 = vpop.f32.mrf.mxu2 }
 0x1c8   : > { %v878_v9 = vadd.f32 %v843_v3, %v742_v37  ;;  %v1500_v21 = vpop.f32.mrf.mxu3  ;;  %v1903_v37 = vrot.slane %v1901_v51, 4  ;;  %v4024_v3 = vld [vmem:[%s4362_s3] ss:$0 sm:$0xff] }
 0x1c9   : > { %v743_v15 = vpop.f32.mrf.mxu1 }
 0x1ca   : > { %v1535_v19 = vadd.f32 %v1500_v21, %v878_v9  ;;  %v1634_v62 = vpop.f32.mrf.mxu0  ;;  %v744_v11 = vadd.f32 %v743_v15, %v4402_v4  ;;  %v1902_v21 = vsel %vm3416_vm7, %v3028_v34, %v1901_v51  ;;  %v1905_v15 = vsel %vm3416_vm7, %v1903_v37, %v1904_v46  ;;  %v3180_v46 = vld [vmem:[%s3294_s10 + $0x98] sm:$0x1] }
 0x1cb   : > { %v1973_v8 = vunpack.c.l.b16 %v1905_v15 }
 0x1cc   : > { %v4001_v42 = vadd.f32 %v1632_v59, %v1535_v19  ;;  %v4403_v59 = vld [vmem:[#allocation11_spill] sm:$0xff] }
 0x1cf   : > { %v845_v23 = vpop.f32.mrf.mxu2 }
 0x1d0   : > { %v879_v38 = vadd.f32 %v845_v23, %v744_v11  ;;  %v1502_v61 = vpop.f32.mrf.mxu3 }
 0x1d1   : > { %v1689_v33 = vpop.f32.mrf.mxu1 }
 0x1d2   : > { %v1536_v32 = vadd.f32 %v1502_v61, %v879_v38  ;;  %v2322_v6 = vpop.f32.mrf.mxu0  ;;  %v1769_v7 = vadd.f32 %v1689_v33, %v4403_v59  ;;  %v3178_v33 = vld [vmem:[%s3294_s10 + $0x94] sm:$0xf]  ;;  %v3179_v59 = vld [vmem:[%s3294_s10 + $0x90] sm:$0xf] }
 0x1d4   : > { %3009 = vmatmul.msk.bf16.gmra.mxu1 %vm504_vm1, %v3642_v44  ;;  %3044 = vmatmul.msk.bf16.gmra.mxu2 %vm504_vm1, %v3958_v47  ;;  %v4011_v13 = vadd.f32 %v1634_v62, %v1536_v32  ;;  %v1972_v62 = vunpack.c.l.b16 %v1902_v21  ;;  %v1908_v32 = vrot.slane %v3178_v33, 5 }
 0x1d5   : > { %3061 = vmatmul.msk.bf16.gmra.mxu3 %vm504_vm1, %v3981_v31  ;;  %3078 = vmatmul.msk.bf16.gmra.mxu0 %vm504_vm1, %v4004_v18 }
 0x1d6   : > { %v4039_v61 = vpack.c.b16 %v1973_v8, %v1972_v62  ;;  %v1910_v0 = vrot.slane %v1908_v32, 4 }
 0x1d7   : > { %v2058_v17 = vpop.f32.mrf.mxu2 }
 0x1d8   : > { %v2138_v44 = vadd.f32 %v2058_v17, %v1769_v7  ;;  %v2190_v40 = vpop.f32.mrf.mxu3  ;;  %v3029_v7 = vrot.slane %v3179_v59, 9  ;;  %v1911_v17 = vrot.slane %v3180_v46, 5  ;;  %v3181_v46 = vld [vmem:[%s3294_s10 + $0xa0] sm:$0xf] }
 0x1d9   : > { %v1691_v57 = vpop.f32.mrf.mxu1 }
 0x1da   : > { %v2270_v47 = vadd.f32 %v2190_v40, %v2138_v44  ;;  %v2324_v9 = vpop.f32.mrf.mxu0  ;;  %v1770_v5 = vadd.f32 %v1691_v57, %v4404_v28  ;;  %v1909_v15 = vsel %vm3416_vm7, %v3029_v7, %v1908_v32 }
 0x1dc   : > { %v2402_v19 = vadd.f32 %v2322_v6, %v2270_v47 }
 0x1de   : > { %v2438_v1 = vadd.f32 %v4024_v3, %v2402_v19 }
 0x1df   : > { %v2060_v4 = vpop.f32.mrf.mxu2 }
 0x1e0   : > { %2470 = vst.msk [vmem:[%s4033_s7] sm:$0xff] %vm504_vm1, %v2438_v1  ;;  %v2139_v11 = vadd.f32 %v2060_v4, %v1770_v5  ;;  %v2192_v23 = vpop.f32.mrf.mxu3  ;;  %v2571_v34 = vmul.f32 %v2438_v1, %v2438_v1  ;;  %v2502_v44 = vsel %vm504_vm1, %v2438_v1, 0.0  ;;  %v1912_v1 = vsel %vm3416_vm7, %v1910_v0, %v1911_v17 }
 0x1e1   : > { %v1694_v38 = vpop.f32.mrf.mxu1  ;;  %v1974_v4 = vunpack.c.l.b16 %v1909_v15  ;;  %v3183_v15 = vld [vmem:[%s3294_s10 + $0xa4] sm:$0x1] }
 0x1e2   : > { %v2271_v6 = vadd.f32 %v2192_v23, %v2139_v11  ;;  %v2327_v63 = vpop.f32.mrf.mxu0  ;;  %v1771_v39 = vadd.f32 %v1694_v38, %v3662_v52  ;;  %v2603_v52 = vsel %vm504_vm1, %v2571_v34, 0.0  ;;  %v1975_v11 = vunpack.c.l.b16 %v1912_v1 }
 0x1e4   : > { %v2403_v51 = vadd.f32 %v2324_v9, %v2271_v6  ;;  %3010 = vmatmul.msk.bf16.gmra.mxu1 %vm504_vm1, %v3665_v50  ;;  %3045 = vmatmul.msk.bf16.gmra.mxu2 %vm504_vm1, %v3981_v31  ;;  %v4069_v34 = vpack.c.b16 %v1975_v11, %v1974_v4 }
 0x1e5   : > { %3062 = vmatmul.msk.bf16.gmra.mxu3 %vm504_vm1, %v4004_v18  ;;  %3079 = vmatmul.msk.bf16.gmra.mxu0 %vm504_vm1, %v4039_v61 }
 0x1e6   : > { %v2439_v37 = vadd.f32 %v4024_v3, %v2403_v51 }
 0x1e7   : > { %v2063_v50 = vpop.f32.mrf.mxu2 }
 0x1e8   : > { %2471 = vst.msk [vmem:[%s4033_s7 + $0x8] sm:$0xff] %vm504_vm1, %v2439_v37  ;;  %v2503_v31 = vsel %vm504_vm1, %v2439_v37, 0.0  ;;  %v2572_v40 = vmul.f32 %v2439_v37, %v2439_v37  ;;  %v2140_v57 = vadd.f32 %v2063_v50, %v1771_v39  ;;  %v2195_v47 = vpop.f32.mrf.mxu3 }
 0x1e9   : > { %v2504_v9 = vadd.f32 %v2503_v31, %v2502_v44  ;;  %v1696_v21 = vpop.f32.mrf.mxu1  ;;  %v4405_v44 = vld [vmem:[#allocation14_spill] sm:$0xff]  ;;  %v3182_v31 = vld [vmem:[%s3294_s10 + $0x9c] sm:$0xf] }
 0x1ea   : > { %v2604_v19 = vsel %vm504_vm1, %v2572_v40, 0.0  ;;  %v2272_v62 = vadd.f32 %v2195_v47, %v2140_v57  ;;  %v2329_v8 = vpop.f32.mrf.mxu0  ;;  %v1772_v38 = vadd.f32 %v1696_v21, %v3672_v49  ;;  %v1915_v49 = vrot.slane %v3181_v46, 5  ;;  %v4406_v47 = vld [vmem:[#allocation13_spill] sm:$0xff] }
 0x1eb   : > { %v2605_v28 = vadd.f32 %v2604_v19, %v2603_v52  ;;  %v3030_v40 = vrot.slane %v3182_v31, 9  ;;  %v1918_v52 = vrot.slane %v3183_v15, 5 }
 0x1ec   : > { %v2404_v5 = vadd.f32 %v2327_v63, %v2272_v62  ;;  %v1917_v21 = vrot.slane %v1915_v49, 4 }
 0x1ee   : > { %v2440_v23 = vadd.f32 %v4024_v3, %v2404_v5 }
 0x1ef   : > { %v2065_v33 = vpop.f32.mrf.mxu2 }
 0x1f0   : > { %2472 = vst.msk [vmem:[%s4033_s7 + $0x10] sm:$0xff] %vm504_vm1, %v2440_v23  ;;  %v2505_v32 = vsel %vm504_vm1, %v2440_v23, 0.0  ;;  %v2573_v6 = vmul.f32 %v2440_v23, %v2440_v23  ;;  %v2141_v51 = vadd.f32 %v2065_v33, %v1772_v38  ;;  %v2197_v59 = vpop.f32.mrf.mxu3  ;;  %v1916_v38 = vsel %vm3416_vm7, %v3030_v40, %v1915_v49 }
 0x1f1   : > { %v2506_v7 = vadd.f32 %v2505_v32, %v2504_v9  ;;  %v1699_v0 = vpop.f32.mrf.mxu1  ;;  %v1919_v33 = vsel %vm3416_vm7, %v1917_v21, %v1918_v52 }
 0x1f2   : > { %v2606_v63 = vsel %vm504_vm1, %v2573_v6, 0.0  ;;  %v2273_v37 = vadd.f32 %v2197_v59, %v2141_v51  ;;  %v2332_v39 = vpop.f32.mrf.mxu0  ;;  %v1773_v9 = vadd.f32 %v1699_v0, %v4406_v47  ;;  %v1976_v51 = vunpack.c.l.b16 %v1916_v38 }
 0x1f3   : > { %v2607_v17 = vadd.f32 %v2606_v63, %v2605_v28  ;;  %v1977_v59 = vunpack.c.l.b16 %v1919_v33  ;;  %v4407_v63 = vld [vmem:[#allocation15_spill] sm:$0xff] }
 0x1f4   : > { %v2405_v50 = vadd.f32 %v2329_v8, %v2273_v37  ;;  %3011 = vmatmul.msk.bf16.gmra.mxu1 %vm504_vm1, %v4405_v44  ;;  %3046 = vmatmul.msk.bf16.gmra.mxu2 %vm504_vm1, %v4004_v18 }
 0x1f5   : > { %3063 = vmatmul.msk.bf16.gmra.mxu3 %vm504_vm1, %v4039_v61  ;;  %3080 = vmatmul.msk.bf16.gmra.mxu0 %vm504_vm1, %v4069_v34 }
 0x1f6   : > { %v2441_v57 = vadd.f32 %v4024_v3, %v2405_v50 }
 0x1f7   : > { %v2068_v19 = vpop.f32.mrf.mxu2 }
 0x1f8   : > { %2473 = vst.msk [vmem:[%s4033_s7 + $0x18] sm:$0xff] %vm504_vm1, %v2441_v57  ;;  %v2507_v18 = vsel %vm504_vm1, %v2441_v57, 0.0  ;;  %v2574_v62 = vmul.f32 %v2441_v57, %v2441_v57  ;;  %v2142_v8 = vadd.f32 %v2068_v19, %v1773_v9  ;;  %v2200_v1 = vpop.f32.mrf.mxu3  ;;  %v3184_v9 = vld [vmem:[%s3294_s10 + $0xac] sm:$0xf]  ;;  %v4408_v19 = vld [vmem:[#allocation17_spill] sm:$0xff] }
 0x1f9   : > { %v2508_v28 = vadd.f32 %v2507_v18, %v2506_v7  ;;  %v1701_v5 = vpop.f32.mrf.mxu1  ;;  %v1922_v21 = vrot.slane %v3184_v9, 5  ;;  %v3185_v18 = vld [vmem:[%s3294_s10 + $0xa8] sm:$0xf] }
 0x1fa   : > { %v2608_v4 = vsel %vm504_vm1, %v2574_v62, 0.0  ;;  %v2274_v11 = vadd.f32 %v2200_v1, %v2142_v8  ;;  %v2334_v23 = vpop.f32.mrf.mxu0  ;;  %v1774_v7 = vadd.f32 %v1701_v5, %v4407_v63  ;;  %v3031_v62 = vrot.slane %v3185_v18, 9  ;;  %v4409_v1 = vld [vmem:[#allocation16_spill] sm:$0xff] }
 0x1fb   : > { %v2609_v32 = vadd.f32 %v2608_v4, %v2607_v17  ;;  %v4098_v17 = vpack.c.b16 %v1977_v59, %v1976_v51  ;;  %v1924_v5 = vrot.slane %v1922_v21, 4  ;;  %v3186_v4 = vld [vmem:[%s3294_s10 + $0xb0] sm:$0x1] }
 0x1fc   : > { %v2406_v6 = vadd.f32 %v2332_v39, %v2274_v11  ;;  %v1925_v11 = vrot.slane %v3186_v4, 5 }
 0x1fe   : > { %v2442_v0 = vadd.f32 %v4024_v3, %v2406_v6 }
 0x1ff   : > { %v2070_v37 = vpop.f32.mrf.mxu2 }
 0x200   : > { %2474 = vst.msk [vmem:[%s4033_s7 + $0x20] sm:$0xff] %vm504_vm1, %v2442_v0  ;;  %v2509_v46 = vsel %vm504_vm1, %v2442_v0, 0.0  ;;  %v2575_v50 = vmul.f32 %v2442_v0, %v2442_v0  ;;  %v2143_v44 = vadd.f32 %v2070_v37, %v1774_v7  ;;  %v2202_v49 = vpop.f32.mrf.mxu3  ;;  %v1923_v7 = vsel %vm3416_vm7, %v3031_v62, %v1922_v21 }
 0x201   : > { %v2510_v31 = vadd.f32 %v2509_v46, %v2508_v28  ;;  %v1704_v40 = vpop.f32.mrf.mxu1  ;;  %v1926_v37 = vsel %vm3416_vm7, %v1924_v5, %v1925_v11 }
 0x202   : > { %v2610_v39 = vsel %vm504_vm1, %v2575_v50, 0.0  ;;  %v2275_v57 = vadd.f32 %v2202_v49, %v2143_v44  ;;  %v2337_v47 = vpop.f32.mrf.mxu0  ;;  %v1775_v28 = vadd.f32 %v1704_v40, %v4409_v1  ;;  %v1978_v44 = vunpack.c.l.b16 %v1923_v7 }
 0x203   : > { %v2611_v15 = vadd.f32 %v2610_v39, %v2609_v32  ;;  %v1979_v49 = vunpack.c.l.b16 %v1926_v37  ;;  %v4410_v39 = vld [vmem:[#allocation18_spill] sm:$0xff] }
 0x204   : > { %v2407_v52 = vadd.f32 %v2334_v23, %v2275_v57  ;;  %3012 = vmatmul.msk.bf16.gmra.mxu1 %vm504_vm1, %v4408_v19  ;;  %3047 = vmatmul.msk.bf16.gmra.mxu2 %vm504_vm1, %v4039_v61 }
 0x205   : > { %3064 = vmatmul.msk.bf16.gmra.mxu3 %vm504_vm1, %v4069_v34  ;;  %3081 = vmatmul.msk.bf16.gmra.mxu0 %vm504_vm1, %v4098_v17 }
 0x206   : > { %v2443_v8 = vadd.f32 %v4024_v3, %v2407_v52 }
 0x207   : > { %v2073_v23 = vpop.f32.mrf.mxu2 }
 0x208   : > { %2475 = vst.msk [vmem:[%s4033_s7 + $0x28] sm:$0xff] %vm504_vm1, %v2443_v8  ;;  %v2511_v61 = vsel %vm504_vm1, %v2443_v8, 0.0  ;;  %v2576_v38 = vmul.f32 %v2443_v8, %v2443_v8  ;;  %v2144_v33 = vadd.f32 %v2073_v23, %v1775_v28  ;;  %v2205_v32 = vpop.f32.mrf.mxu3  ;;  %v3187_v28 = vld [vmem:[%s3294_s10 + $0xb8] sm:$0xf]  ;;  %v3188_v23 = vld [vmem:[%s3294_s10 + $0xb4] sm:$0xf] }
 0x209   : > { %v2512_v6 = vadd.f32 %v2511_v61, %v2510_v31  ;;  %v1706_v51 = vpop.f32.mrf.mxu1  ;;  %v1929_v5 = vrot.slane %v3187_v28, 5  ;;  %v3032_v61 = vrot.slane %v3188_v23, 9 }
 0x20a   : > { %v2612_v59 = vsel %vm504_vm1, %v2576_v38, 0.0  ;;  %v2276_v0 = vadd.f32 %v2205_v32, %v2144_v33  ;;  %v2339_v63 = vpop.f32.mrf.mxu0  ;;  %v1776_v31 = vadd.f32 %v1706_v51, %v4410_v39  ;;  %v4411_v33 = vld [vmem:[#allocation19_spill] sm:$0xff]  ;;  %v3189_v51 = vld [vmem:[%s3294_s10 + $0xbc] sm:$0x1]  ;;  %s2843_s10 = sshll.u32 %s4418_s18, 1 }
 0x20b   : > { %v2613_v46 = vadd.f32 %v2612_v59, %v2611_v15  ;;  %v4127_v15 = vpack.c.b16 %v1979_v49, %v1978_v44  ;;  %v1932_v59 = vrot.slane %v3189_v51, 5  ;;  %v3191_v51 = vld [vmem:[%s3376_s26] sm:$0xf]  ;;  %s365_s13 = scalar_lea.vmem %s4364_s5, %s2843_s10 }
 0x20c   : > { %v2408_v50 = vadd.f32 %v2337_v47, %v2276_v0 }
 0x20e   : > { %v2444_v40 = vadd.f32 %v4024_v3, %v2408_v50 }
 0x20f   : > { %v2075_v57 = vpop.f32.mrf.mxu2 }
 0x210   : > { %2476 = vst.msk [vmem:[%s4033_s7 + $0x30] sm:$0xff] %vm504_vm1, %v2444_v40  ;;  %v2513_v9 = vsel %vm504_vm1, %v2444_v40, 0.0  ;;  %v2577_v52 = vmul.f32 %v2444_v40, %v2444_v40  ;;  %v2145_v19 = vadd.f32 %v2075_v57, %v1776_v31  ;;  %v2207_v21 = vpop.f32.mrf.mxu3  ;;  %v1930_v40 = vsel %vm3416_vm7, %v3032_v61, %v1929_v5 }
 0x211   : > { %v2514_v18 = vadd.f32 %v2513_v9, %v2512_v6  ;;  %v1709_v62 = vpop.f32.mrf.mxu1  ;;  %v1931_v6 = vrot.slane %v1929_v5, 4  ;;  %v1980_v9 = vunpack.c.l.b16 %v1930_v40 }
 0x212   : > { %v2614_v47 = vsel %vm504_vm1, %v2577_v52, 0.0  ;;  %v2277_v8 = vadd.f32 %v2207_v21, %v2145_v19  ;;  %v2342_v1 = vpop.f32.mrf.mxu0  ;;  %v1777_v32 = vadd.f32 %v1709_v62, %v4411_v33  ;;  %v4412_v21 = vld [vmem:[#allocation20_spill] sm:$0xff] }
 0x213   : > { %v2615_v4 = vadd.f32 %v2614_v47, %v2613_v46  ;;  %v1933_v39 = vsel %vm3416_vm7, %v1931_v6, %v1932_v59  ;;  %v3190_v47 = vld [vmem:[%s3376_s26 + $0x4] sm:$0xf]  ;;  %v3033_v59 = vrot.slane %v3191_v51, 9 }
 0x214   : > { %v2409_v11 = vadd.f32 %v2339_v63, %v2277_v8  ;;  %3013 = vmatmul.msk.bf16.gmra.mxu1 %vm504_vm1, %v3737_v60  ;;  %3048 = vmatmul.msk.bf16.gmra.mxu2 %vm504_vm1, %v4069_v34  ;;  %v1981_v52 = vunpack.c.l.b16 %v1933_v39  ;;  %v1936_v8 = vrot.slane %v3190_v47, 5 }
 0x215   : > { %3065 = vmatmul.msk.bf16.gmra.mxu3 %vm504_vm1, %v4098_v17  ;;  %3082 = vmatmul.msk.bf16.gmra.mxu0 %vm504_vm1, %v4127_v15 }
 0x216   : > { %v2445_v38 = vadd.f32 %v4024_v3, %v2409_v11  ;;  %v4157_v61 = vpack.c.b16 %v1981_v52, %v1980_v9 }
 0x217   : > { %v2078_v0 = vpop.f32.mrf.mxu2 }
 0x218   : > { %2477 = vst.msk [vmem:[%s4033_s7 + $0x38] sm:$0xff] %vm504_vm1, %v2445_v38  ;;  %v2515_v60 = vsel %vm504_vm1, %v2445_v38, 0.0  ;;  %v2578_v34 = vmul.f32 %v2445_v38, %v2445_v38  ;;  %v2146_v63 = vadd.f32 %v2078_v0, %v1777_v32  ;;  %v2210_v7 = vpop.f32.mrf.mxu3  ;;  %v1938_v0 = vrot.slane %v1936_v8, 4 }
 0x219   : > { %v2516_v37 = vadd.f32 %v2515_v60, %v2514_v18  ;;  %v1711_v46 = vpop.f32.mrf.mxu1  ;;  %v3192_v60 = vld [vmem:[%s3376_s26 + $0x8] sm:$0x1] }
 0x21a   : > { %v2616_v50 = vsel %vm504_vm1, %v2578_v34, 0.0  ;;  %v2278_v44 = vadd.f32 %v2210_v7, %v2146_v63  ;;  %v2344_v49 = vpop.f32.mrf.mxu0  ;;  %v1778_v18 = vadd.f32 %v1711_v46, %v4412_v21  ;;  %v1939_v34 = vrot.slane %v3192_v60, 5  ;;  %v4171_v7 = vld [vmem:[%s3376_s26 + $0xc] sm:$0xf] }
 0x21b   : > { %v2617_v31 = vadd.f32 %v2616_v50, %v2615_v4  ;;  %v4176_v50 = vld [vmem:[%s3376_s26 + $0x10] sm:$0xf]  ;;  %v1295_v52 = vshll.u32 %v4171_v7, 16 }
 0x21c   : > { %v2410_v57 = vadd.f32 %v2342_v1, %v2278_v44  ;;  %v1305_v21 = vshrl.u32 %v4176_v50, 16 }
 0x21e   : > { %v2446_v19 = vadd.f32 %v4024_v3, %v2410_v57  ;;  %v1292_v57 = vshrl.u32 %v4171_v7, 16 }
 0x21f   : > { %v2080_v62 = vpop.f32.mrf.mxu2 }
 0x220   : > { %2478 = vst.msk [vmem:[%s4033_s7 + $0x40] sm:$0xff] %vm504_vm1, %v2446_v19  ;;  %v2517_v28 = vsel %vm504_vm1, %v2446_v19, 0.0  ;;  %v2579_v5 = vmul.f32 %v2446_v19, %v2446_v19  ;;  %v2147_v11 = vadd.f32 %v2080_v62, %v1778_v18  ;;  %v2212_v23 = vpop.f32.mrf.mxu3  ;;  %v1301_v19 = vshll.u32 %v4176_v50, 16 }
 0x221   : > { %v2518_v4 = vadd.f32 %v2517_v28, %v2516_v37  ;;  %v1714_v1 = vpop.f32.mrf.mxu1 }
 0x222   : > { %v2618_v38 = vsel %vm504_vm1, %v2579_v5, 0.0  ;;  %v2279_v33 = vadd.f32 %v2212_v23, %v2147_v11  ;;  %v2347_v32 = vpop.f32.mrf.mxu0  ;;  %v1779_v46 = vadd.f32 %v1714_v1, %v3765_v12  ;;  %v1294_v23 = vrot.slane %v1292_v57, 4 }
 0x223   : > { %v2619_v6 = vadd.f32 %v2618_v38, %v2617_v31  ;;  %v1297_v1 = vrot.slane %v1295_v52, 5  ;;  %v1307_v38 = vrot.slane %v1305_v21, 4 }
 0x224   : > { %v2411_v63 = vadd.f32 %v2344_v49, %v2279_v33  ;;  %3014 = vmatmul.msk.bf16.gmra.mxu1 %vm504_vm1, %v3771_v22  ;;  %3049 = vmatmul.msk.bf16.gmra.mxu2 %vm504_vm1, %v4098_v17  ;;  %v1937_v22 = vsel %vm3416_vm7, %v3033_v59, %v1936_v8  ;;  %v1940_v17 = vsel %vm3416_vm7, %v1938_v0, %v1939_v34  ;;  %v420_v59 = vld [vmem:[%s3376_s26 + $0x14] sm:$0x1] }
 0x225   : > { %3066 = vmatmul.msk.bf16.gmra.mxu3 %vm504_vm1, %v4127_v15  ;;  %3083 = vmatmul.msk.bf16.gmra.mxu0 %vm504_vm1, %v4157_v61  ;;  %v2172_v5 = vunpack.c.l.b16 %v1937_v22  ;;  %v2173_v11 = vunpack.c.l.b16 %v1940_v17  ;;  %v1311_v17 = vshll.u32 %v420_v59, 16 }
 0x226   : > { %v2447_v37 = vadd.f32 %v4024_v3, %v2411_v63 }
 0x227   : > { %v2083_v44 = vpop.f32.mrf.mxu2  ;;  %v1313_v52 = vrot.slane %v1311_v17, 5 }
 0x228   : > { %2479 = vst.msk [vmem:[%s4033_s7 + $0x48] sm:$0xff] %vm504_vm1, %v2447_v37  ;;  %v2519_v49 = vsel %vm504_vm1, %v2447_v37, 0.0  ;;  %v2580_v40 = vmul.f32 %v2447_v37, %v2447_v37  ;;  %v2148_v39 = vadd.f32 %v2083_v44, %v1779_v46  ;;  %v2215_v31 = vpop.f32.mrf.mxu3  ;;  %v1298_v44 = vor.u32 %v1297_v1, %v1294_v23 }
 0x229   : > { %v2520_v9 = vadd.f32 %v2519_v49, %v2518_v4  ;;  %v1716_v12 = vpop.f32.mrf.mxu1  ;;  %v1303_v4 = vrot.slane %v1301_v19, 5 }
 0x22a   : > { %v2620_v18 = vsel %vm504_vm1, %v2580_v40, 0.0  ;;  %v2280_v62 = vadd.f32 %v2215_v31, %v2148_v39  ;;  %v2349_v47 = vpop.f32.mrf.mxu0  ;;  %v1780_v51 = vadd.f32 %v1716_v12, %v3791_v58  ;;  %v1943_v39 = vrot.slane %v4176_v50, 5 }
 0x22b   : > { %v2621_v8 = vadd.f32 %v2620_v18, %v2619_v6  ;;  %v1308_v22 = vor.u32 %v1307_v38, %v1303_v4  ;;  %v3034_v50 = vrot.slane %v4171_v7, 9 }
 0x22c   : > { %v2412_v28 = vadd.f32 %v2347_v32, %v2280_v62  ;;  %v4196_v32 = vpack.c.b16 %v2173_v11, %v2172_v5  ;;  %v1945_v18 = vrot.slane %v1943_v39, 4 }
 0x22d   : > { %v1309_v12 = vrot.slane %v1308_v22, 4 }
 0x22e   : > { %v2448_v33 = vadd.f32 %v4024_v3, %v2412_v28 }
 0x22f   : > { %v2085_v0 = vpop.f32.mrf.mxu2  ;;  %v1314_v7 = vsel %vm3396_vm4, %v1309_v12, %v1313_v52 }
 0x230   : > { %2480 = vst.msk [vmem:[%s4033_s7 + $0x50] sm:$0xff] %vm504_vm1, %v2448_v33  ;;  %v2521_v60 = vsel %vm504_vm1, %v2448_v33, 0.0  ;;  %v2581_v34 = vmul.f32 %v2448_v33, %v2448_v33  ;;  %v2149_v63 = vadd.f32 %v2085_v0, %v1780_v51  ;;  %v2217_v6 = vpop.f32.mrf.mxu3  ;;  %v1944_v33 = vsel %vm3416_vm7, %v3034_v50, %v1943_v39 }
 0x231   : > { %v2522_v37 = vadd.f32 %v2521_v60, %v2520_v9  ;;  %v1719_v46 = vpop.f32.mrf.mxu1  ;;  %v1299_v9 = vrot.slane %v1298_v44, 4 }
 0x232   : > { %v2622_v49 = vsel %vm504_vm1, %v2581_v34, 0.0  ;;  %v2281_v40 = vadd.f32 %v2217_v6, %v2149_v63  ;;  %v2352_v58 = vpop.f32.mrf.mxu0  ;;  %v1781_v21 = vadd.f32 %v1719_v46, %v3804_v36  ;;  %v1672_v34 = vunpack.c.l.b16 %v1314_v7 }
 0x233   : > { %v2623_v31 = vadd.f32 %v2622_v49, %v2621_v8  ;;  %v1304_v23 = vsel %vm3396_vm4, %v1299_v9, %v1303_v4  ;;  %v2304_v63 = vunpack.c.l.b16 %v1944_v33 }
 0x234   : > { %v2413_v57 = vadd.f32 %v2349_v47, %v2281_v40  ;;  %3015 = vmatmul.msk.bf16.gmra.mxu1 %vm504_vm1, %v3808_v35  ;;  %3050 = vmatmul.msk.bf16.gmra.mxu2 %vm504_vm1, %v4127_v15  ;;  %v1946_v35 = vrot.slane %v420_v59, 5  ;;  %v1671_v60 = vunpack.c.l.b16 %v1304_v23 }
 0x235   : > { %3067 = vmatmul.msk.bf16.gmra.mxu3 %vm504_vm1, %v4157_v61  ;;  %3084 = vmatmul.msk.bf16.gmra.mxu0 %vm504_vm1, %v4196_v32 }
 0x236   : > { %v2449_v19 = vadd.f32 %v4024_v3, %v2413_v57  ;;  %v1947_v51 = vsel %vm3416_vm7, %v1945_v18, %v1946_v35  ;;  %v1673_v26 = vpack.c.b16 %v1672_v34, %v1671_v60 }
 0x237   : > { %v2088_v62 = vpop.f32.mrf.mxu2  ;;  %v2305_v4 = vunpack.c.l.b16 %v1947_v51 }
 0x238   : > { %2481 = vst.msk [vmem:[%s4033_s7 + $0x58] sm:$0xff] %vm504_vm1, %v2449_v19  ;;  %v2523_v15 = vsel %vm504_vm1, %v2449_v19, 0.0  ;;  %v2582_v47 = vmul.f32 %v2449_v19, %v2449_v19  ;;  %v2150_v8 = vadd.f32 %v2088_v62, %v1781_v21  ;;  %v2220_v28 = vpop.f32.mrf.mxu3 }
 0x239   : > { %v2524_v5 = vadd.f32 %v2523_v15, %v2522_v37  ;;  %v1721_v11 = vpop.f32.mrf.mxu1 }
 0x23a   : > { %v2624_v36 = vsel %vm504_vm1, %v2582_v47, 0.0  ;;  %v2282_v1 = vadd.f32 %v2220_v28, %v2150_v8  ;;  %v2354_v38 = vpop.f32.mrf.mxu0  ;;  %v1782_v6 = vadd.f32 %v1721_v11, %v3813_v55 }
 0x23b   : > { %v2625_v59 = vadd.f32 %v2624_v36, %v2623_v31 }
 0x23c   : > { %v2414_v0 = vadd.f32 %v2352_v58, %v2282_v1  ;;  %v2306_v58 = vpack.c.b16 %v2305_v4, %v2304_v63 }
 0x23e   : > { %v2450_v2 = vadd.f32 %v4024_v3, %v2414_v0 }
 0x23f   : > { %v2090_v37 = vpop.f32.mrf.mxu2 }
 0x240   : > { %2482 = vst.msk [vmem:[%s4033_s7 + $0x60] sm:$0xff] %vm504_vm1, %v2450_v2  ;;  %v2525_v46 = vsel %vm504_vm1, %v2450_v2, 0.0  ;;  %v2583_v44 = vmul.f32 %v2450_v2, %v2450_v2  ;;  %v2151_v22 = vadd.f32 %v2090_v37, %v1782_v6  ;;  %v2222_v17 = vpop.f32.mrf.mxu3 }
 0x241   : > { %v2526_v49 = vadd.f32 %v2525_v46, %v2524_v5  ;;  %v1724_v40 = vpop.f32.mrf.mxu1 }
 0x242   : > { %v2626_v39 = vsel %vm504_vm1, %v2583_v44, 0.0  ;;  %v2283_v31 = vadd.f32 %v2222_v17, %v2151_v22  ;;  %v2357_v57 = vpop.f32.mrf.mxu0  ;;  %v1783_v52 = vadd.f32 %v1724_v40, %v3820_v54 }
 0x243   : > { %v2627_v9 = vadd.f32 %v2626_v39, %v2625_v59 }
 0x244   : > { %v2415_v12 = vadd.f32 %v2354_v38, %v2283_v31  ;;  %3016 = vmatmul.msk.bf16.gmra.mxu1 %vm504_vm1, %v1673_v26  ;;  %3051 = vmatmul.msk.bf16.gmra.mxu2 %vm504_vm1, %v4157_v61 }
 0x245   : > { %3068 = vmatmul.msk.bf16.gmra.mxu3 %vm504_vm1, %v4196_v32  ;;  %3085 = vmatmul.msk.bf16.gmra.mxu0 %vm504_vm1, %v2306_v58 }
 0x246   : > { %v2451_v55 = vadd.f32 %v4024_v3, %v2415_v12 }
 0x247   : > { %v2093_v50 = vpop.f32.mrf.mxu2 }
 0x248   : > { %2483 = vst.msk [vmem:[%s4033_s7 + $0x68] sm:$0xff] %vm504_vm1, %v2451_v55  ;;  %v2527_v19 = vsel %vm504_vm1, %v2451_v55, 0.0  ;;  %v2584_v21 = vmul.f32 %v2451_v55, %v2451_v55  ;;  %v2152_v18 = vadd.f32 %v2093_v50, %v1783_v52  ;;  %v2225_v35 = vpop.f32.mrf.mxu3 }
 0x249   : > { %v2528_v62 = vadd.f32 %v2527_v19, %v2526_v49  ;;  %v1726_v61 = vpop.f32.mrf.mxu1 }
 0x24a   : > { %v2628_v15 = vsel %vm504_vm1, %v2584_v21, 0.0  ;;  %v2284_v32 = vadd.f32 %v2225_v35, %v2152_v18  ;;  %v2359_v47 = vpop.f32.mrf.mxu0  ;;  %v1784_v54 = vadd.f32 %v1726_v61, %v3827_v25 }
 0x24b   : > { %v2629_v8 = vadd.f32 %v2628_v15, %v2627_v9 }
 0x24c   : > { %v2416_v28 = vadd.f32 %v2357_v57, %v2284_v32 }
 0x24e   : > { %v2452_v5 = vadd.f32 %v4024_v3, %v2416_v28 }
 0x24f   : > { %v2095_v11 = vpop.f32.mrf.mxu2 }
 0x250   : > { %2484 = vst.msk [vmem:[%s4033_s7 + $0x70] sm:$0xff] %vm504_vm1, %v2452_v5  ;;  %v2529_v23 = vsel %vm504_vm1, %v2452_v5, 0.0  ;;  %v2585_v7 = vmul.f32 %v2452_v5, %v2452_v5  ;;  %v2153_v36 = vadd.f32 %v2095_v11, %v1784_v54  ;;  %v2227_v1 = vpop.f32.mrf.mxu3 }
 0x251   : > { %v2530_v38 = vadd.f32 %v2529_v23, %v2528_v62  ;;  %v1729_v33 = vpop.f32.mrf.mxu1 }
 0x252   : > { %v2630_v51 = vsel %vm504_vm1, %v2585_v7, 0.0  ;;  %v2285_v59 = vadd.f32 %v2227_v1, %v2153_v36  ;;  %v2362_v0 = vpop.f32.mrf.mxu0  ;;  %v1785_v25 = vadd.f32 %v1729_v33, %v3840_v30 }
 0x253   : > { %v2631_v60 = vadd.f32 %v2630_v51, %v2629_v8 }
 0x254   : > { %v2417_v34 = vadd.f32 %v2359_v47, %v2285_v59 }
 0x256   : > { %v2453_v63 = vadd.f32 %v4024_v3, %v2417_v34 }
 0x257   : > { %v2098_v4 = vpop.f32.mrf.mxu2 }
 0x258   : > { %2485 = vst.msk [vmem:[%s4033_s7 + $0x78] sm:$0xff] %vm504_vm1, %v2453_v63  ;;  %v2531_v2 = vsel %vm504_vm1, %v2453_v63, 0.0  ;;  %v2586_v6 = vmul.f32 %v2453_v63, %v2453_v63  ;;  %v2154_v37 = vadd.f32 %v2098_v4, %v1785_v25  ;;  %v2230_v46 = vpop.f32.mrf.mxu3 }
 0x259   : > { %v2532_v44 = vadd.f32 %v2531_v2, %v2530_v38  ;;  %v1731_v22 = vpop.f32.mrf.mxu1 }
 0x25a   : > { %v2632_v17 = vsel %vm504_vm1, %v2586_v6, 0.0  ;;  %v2286_v26 = vadd.f32 %v2230_v46, %v2154_v37  ;;  %v2364_v49 = vpop.f32.mrf.mxu0  ;;  %v1786_v30 = vadd.f32 %v1731_v22, %v3850_v43 }
 0x25b   : > { %v2633_v40 = vadd.f32 %v2632_v17, %v2631_v60 }
 0x25c   : > { %v2418_v58 = vadd.f32 %v2362_v0, %v2286_v26 }
 0x25e   : > { %v2454_v39 = vadd.f32 %v4024_v3, %v2418_v58 }
 0x25f   : > { %v2100_v31 = vpop.f32.mrf.mxu2 }
 0x260   : > { %2486 = vst.msk [vmem:[%s4033_s7 + $0x80] sm:$0xff] %vm504_vm1, %v2454_v39  ;;  %v2533_v57 = vsel %vm504_vm1, %v2454_v39, 0.0  ;;  %v2587_v9 = vmul.f32 %v2454_v39, %v2454_v39  ;;  %v2155_v12 = vadd.f32 %v2100_v31, %v1786_v30  ;;  %v2232_v55 = vpop.f32.mrf.mxu3 }
 0x261   : > { %v2534_v52 = vadd.f32 %v2533_v57, %v2532_v44  ;;  %v1734_v50 = vpop.f32.mrf.mxu1 }
 0x262   : > { %v2634_v19 = vsel %vm504_vm1, %v2587_v9, 0.0  ;;  %v2287_v21 = vadd.f32 %v2232_v55, %v2155_v12  ;;  %v2367_v18 = vpop.f32.mrf.mxu0  ;;  %v1787_v43 = vadd.f32 %v1734_v50, %v3863_v53 }
 0x263   : > { %v2635_v35 = vadd.f32 %v2634_v19, %v2633_v40 }
 0x264   : > { %v2419_v62 = vadd.f32 %v2364_v49, %v2287_v21 }
 0x266   : > { %v2455_v61 = vadd.f32 %v4024_v3, %v2419_v62 }
 0x267   : > { %v2103_v15 = vpop.f32.mrf.mxu2 }
 0x268   : > { %2487 = vst.msk [vmem:[%s4033_s7 + $0x88] sm:$0xff] %vm504_vm1, %v2455_v61  ;;  %v2535_v32 = vsel %vm504_vm1, %v2455_v61, 0.0  ;;  %v2588_v47 = vmul.f32 %v2455_v61, %v2455_v61  ;;  %v2156_v8 = vadd.f32 %v2103_v15, %v1787_v43  ;;  %v2235_v28 = vpop.f32.mrf.mxu3 }
 0x269   : > { %v2536_v5 = vadd.f32 %v2535_v32, %v2534_v52  ;;  %v1736_v54 = vpop.f32.mrf.mxu1 }
 0x26a   : > { %v2636_v11 = vsel %vm504_vm1, %v2588_v47, 0.0  ;;  %v2288_v23 = vadd.f32 %v2235_v28, %v2156_v8  ;;  %v2369_v7 = vpop.f32.mrf.mxu0  ;;  %v1788_v53 = vadd.f32 %v1736_v54, %v3873_v27 }
 0x26b   : > { %v2637_v36 = vadd.f32 %v2636_v11, %v2635_v35 }
 0x26c   : > { %v2420_v1 = vadd.f32 %v2367_v18, %v2288_v23 }
 0x26e   : > { %v2456_v38 = vadd.f32 %v4024_v3, %v2420_v1 }
 0x26f   : > { %v2105_v33 = vpop.f32.mrf.mxu2 }
 0x270   : > { %2488 = vst.msk [vmem:[%s4033_s7 + $0x90] sm:$0xff] %vm504_vm1, %v2456_v38  ;;  %v2537_v51 = vsel %vm504_vm1, %v2456_v38, 0.0  ;;  %v2589_v59 = vmul.f32 %v2456_v38, %v2456_v38  ;;  %v2157_v0 = vadd.f32 %v2105_v33, %v1788_v53  ;;  %v2237_v60 = vpop.f32.mrf.mxu3 }
 0x271   : > { %v2538_v34 = vadd.f32 %v2537_v51, %v2536_v5  ;;  %v1739_v63 = vpop.f32.mrf.mxu1 }
 0x272   : > { %v2638_v25 = vsel %vm504_vm1, %v2589_v59, 0.0  ;;  %v2289_v4 = vadd.f32 %v2237_v60, %v2157_v0  ;;  %v2372_v2 = vpop.f32.mrf.mxu0  ;;  %v1789_v27 = vadd.f32 %v1739_v63, %v3886_v24 }
 0x273   : > { %v2639_v6 = vadd.f32 %v2638_v25, %v2637_v36 }
 0x274   : > { %v2421_v37 = vadd.f32 %v2369_v7, %v2289_v4 }
 0x276   : > { %v2457_v46 = vadd.f32 %v4024_v3, %v2421_v37 }
 0x277   : > { %v2108_v44 = vpop.f32.mrf.mxu2 }
 0x278   : > { %2489 = vst.msk [vmem:[%s4033_s7 + $0x98] sm:$0xff] %vm504_vm1, %v2457_v46  ;;  %v2539_v22 = vsel %vm504_vm1, %v2457_v46, 0.0  ;;  %v2590_v17 = vmul.f32 %v2457_v46, %v2457_v46  ;;  %v2158_v26 = vadd.f32 %v2108_v44, %v1789_v27  ;;  %v2240_v49 = vpop.f32.mrf.mxu3 }
 0x279   : > { %v2540_v40 = vadd.f32 %v2539_v22, %v2538_v34  ;;  %v1741_v58 = vpop.f32.mrf.mxu1 }
 0x27a   : > { %v2640_v39 = vsel %vm504_vm1, %v2590_v17, 0.0  ;;  %v2290_v30 = vadd.f32 %v2240_v49, %v2158_v26  ;;  %v2374_v31 = vpop.f32.mrf.mxu0  ;;  %v1790_v24 = vadd.f32 %v1741_v58, %v3896_v16 }
 0x27b   : > { %v2641_v57 = vadd.f32 %v2640_v39, %v2639_v6 }
 0x27c   : > { %v2422_v9 = vadd.f32 %v2372_v2, %v2290_v30 }
 0x27e   : > { %v2458_v12 = vadd.f32 %v4024_v3, %v2422_v9 }
 0x27f   : > { %v2110_v55 = vpop.f32.mrf.mxu2 }
 0x280   : > { %2490 = vst.msk [vmem:[%s4033_s7 + $0xa0] sm:$0xff] %vm504_vm1, %v2458_v12  ;;  %v2541_v52 = vsel %vm504_vm1, %v2458_v12, 0.0  ;;  %v2591_v50 = vmul.f32 %v2458_v12, %v2458_v12  ;;  %v2159_v19 = vadd.f32 %v2110_v55, %v1790_v24  ;;  %v2242_v21 = vpop.f32.mrf.mxu3 }
 0x281   : > { %v2542_v18 = vadd.f32 %v2541_v52, %v2540_v40  ;;  %v1744_v35 = vpop.f32.mrf.mxu1 }
 0x282   : > { %v2642_v62 = vsel %vm504_vm1, %v2591_v50, 0.0  ;;  %v2291_v61 = vadd.f32 %v2242_v21, %v2159_v19  ;;  %v2377_v43 = vpop.f32.mrf.mxu0  ;;  %v1791_v16 = vadd.f32 %v1744_v35, %v3909_v48 }
 0x283   : > { %v2643_v15 = vadd.f32 %v2642_v62, %v2641_v57 }
 0x284   : > { %v2423_v32 = vadd.f32 %v2374_v31, %v2291_v61 }
 0x286   : > { %v2459_v47 = vadd.f32 %v4024_v3, %v2423_v32 }
 0x287   : > { %v2113_v8 = vpop.f32.mrf.mxu2 }
 0x288   : > { %2491 = vst.msk [vmem:[%s4033_s7 + $0xa8] sm:$0xff] %vm504_vm1, %v2459_v47  ;;  %v2543_v28 = vsel %vm504_vm1, %v2459_v47, 0.0  ;;  %v2592_v5 = vmul.f32 %v2459_v47, %v2459_v47  ;;  %v2160_v54 = vadd.f32 %v2113_v8, %v1791_v16  ;;  %v2245_v11 = vpop.f32.mrf.mxu3 }
 0x289   : > { %v2544_v23 = vadd.f32 %v2543_v28, %v2542_v18  ;;  %v1746_v7 = vpop.f32.mrf.mxu1 }
 0x28a   : > { %v2644_v36 = vsel %vm504_vm1, %v2592_v5, 0.0  ;;  %v2292_v1 = vadd.f32 %v2245_v11, %v2160_v54  ;;  %v2379_v38 = vpop.f32.mrf.mxu0  ;;  %v1792_v48 = vadd.f32 %v1746_v7, %v3919_v20 }
 0x28b   : > { %v2645_v53 = vadd.f32 %v2644_v36, %v2643_v15 }
 0x28c   : > { %v2424_v33 = vadd.f32 %v2377_v43, %v2292_v1 }
 0x28e   : > { %v2460_v51 = vadd.f32 %v4024_v3, %v2424_v33 }
 0x28f   : > { %v2115_v59 = vpop.f32.mrf.mxu2 }
 0x290   : > { %2492 = vst.msk [vmem:[%s4033_s7 + $0xb0] sm:$0xff] %vm504_vm1, %v2460_v51  ;;  %v2545_v0 = vsel %vm504_vm1, %v2460_v51, 0.0  ;;  %v2593_v60 = vmul.f32 %v2460_v51, %v2460_v51  ;;  %v2161_v34 = vadd.f32 %v2115_v59, %v1792_v48  ;;  %v2247_v63 = vpop.f32.mrf.mxu3 }
 0x291   : > { %v2546_v25 = vadd.f32 %v2545_v0, %v2544_v23  ;;  %v1749_v4 = vpop.f32.mrf.mxu1 }
 0x292   : > { %v2646_v2 = vsel %vm504_vm1, %v2593_v60, 0.0  ;;  %v2293_v6 = vadd.f32 %v2247_v63, %v2161_v34  ;;  %v2382_v37 = vpop.f32.mrf.mxu0  ;;  %v1793_v20 = vadd.f32 %v1749_v4, %v3932_v14 }
 0x293   : > { %v2647_v46 = vadd.f32 %v2646_v2, %v2645_v53 }
 0x294   : > { %v2425_v27 = vadd.f32 %v2379_v38, %v2293_v6 }
 0x296   : > { %v2461_v44 = vadd.f32 %v4024_v3, %v2425_v27 }
 0x297   : > { %v2118_v22 = vpop.f32.mrf.mxu2 }
 0x298   : > { %2493 = vst.msk [vmem:[%s4033_s7 + $0xb8] sm:$0xff] %vm504_vm1, %v2461_v44  ;;  %v2547_v17 = vsel %vm504_vm1, %v2461_v44, 0.0  ;;  %v2594_v26 = vmul.f32 %v2461_v44, %v2461_v44  ;;  %v2162_v49 = vadd.f32 %v2118_v22, %v1793_v20  ;;  %v2250_v40 = vpop.f32.mrf.mxu3 }
 0x299   : > { %v2548_v58 = vadd.f32 %v2547_v17, %v2546_v25  ;;  %v1751_v39 = vpop.f32.mrf.mxu1 }
 0x29a   : > { %v2648_v30 = vsel %vm504_vm1, %v2594_v26, 0.0  ;;  %v2294_v31 = vadd.f32 %v2250_v40, %v2162_v49  ;;  %v2384_v57 = vpop.f32.mrf.mxu0  ;;  %v1794_v14 = vadd.f32 %v1751_v39, %v3942_v56 }
 0x29b   : > { %v2649_v9 = vadd.f32 %v2648_v30, %v2647_v46 }
 0x29c   : > { %v2426_v12 = vadd.f32 %v2382_v37, %v2294_v31 }
 0x29e   : > { %v2462_v24 = vadd.f32 %v4024_v3, %v2426_v12 }
 0x29f   : > { %v2120_v55 = vpop.f32.mrf.mxu2 }
 0x2a0   : > { %2494 = vst.msk [vmem:[%s4033_s7 + $0xc0] sm:$0xff] %vm504_vm1, %v2462_v24  ;;  %v2549_v52 = vsel %vm504_vm1, %v2462_v24, 0.0  ;;  %v2595_v50 = vmul.f32 %v2462_v24, %v2462_v24  ;;  %v2163_v19 = vadd.f32 %v2120_v55, %v1794_v14  ;;  %v2252_v21 = vpop.f32.mrf.mxu3 }
 0x2a1   : > { %v2550_v18 = vadd.f32 %v2549_v52, %v2548_v58  ;;  %v1754_v35 = vpop.f32.mrf.mxu1 }
 0x2a2   : > { %v2650_v62 = vsel %vm504_vm1, %v2595_v50, 0.0  ;;  %v2295_v61 = vadd.f32 %v2252_v21, %v2163_v19  ;;  %v2387_v43 = vpop.f32.mrf.mxu0  ;;  %v1795_v56 = vadd.f32 %v1754_v35, %v3955_v29 }
 0x2a3   : > { %v2651_v15 = vadd.f32 %v2650_v62, %v2649_v9 }
 0x2a4   : > { %v2427_v32 = vadd.f32 %v2384_v57, %v2295_v61 }
 0x2a6   : > { %v2463_v47 = vadd.f32 %v4024_v3, %v2427_v32 }
 0x2a7   : > { %v2123_v16 = vpop.f32.mrf.mxu2 }
 0x2a8   : > { %2495 = vst.msk [vmem:[%s4033_s7 + $0xc8] sm:$0xff] %vm504_vm1, %v2463_v47  ;;  %v2551_v8 = vsel %vm504_vm1, %v2463_v47, 0.0  ;;  %v2596_v28 = vmul.f32 %v2463_v47, %v2463_v47  ;;  %v2164_v5 = vadd.f32 %v2123_v16, %v1795_v56  ;;  %v2255_v54 = vpop.f32.mrf.mxu3 }
 0x2a9   : > { %v2552_v11 = vadd.f32 %v2551_v8, %v2550_v18  ;;  %v1756_v23 = vpop.f32.mrf.mxu1 }
 0x2aa   : > { %v2652_v7 = vsel %vm504_vm1, %v2596_v28, 0.0  ;;  %v2296_v36 = vadd.f32 %v2255_v54, %v2164_v5  ;;  %v2389_v38 = vpop.f32.mrf.mxu0  ;;  %v1796_v29 = vadd.f32 %v1756_v23, %v3965_v41  ;;  %v3193_v41 = vld [vmem:[%s4362_s3] ss:$0 sm:$0xff] }
 0x2ab   : > { %v2653_v1 = vadd.f32 %v2652_v7, %v2651_v15 }
 0x2ac   : > { %v2428_v53 = vadd.f32 %v2387_v43, %v2296_v36 }
 0x2ae   : > { %v2464_v33 = vadd.f32 %v4024_v3, %v2428_v53 }
 0x2af   : > { %v2125_v51 = vpop.f32.mrf.mxu2 }
 0x2b0   : > { %2496 = vst.msk [vmem:[%s4033_s7 + $0xd0] sm:$0xff] %vm504_vm1, %v2464_v33  ;;  %v2553_v48 = vsel %vm504_vm1, %v2464_v33, 0.0  ;;  %v2597_v59 = vmul.f32 %v2464_v33, %v2464_v33  ;;  %v2165_v0 = vadd.f32 %v2125_v51, %v1796_v29  ;;  %v2257_v60 = vpop.f32.mrf.mxu3 }
 0x2b1   : > { %v2554_v34 = vadd.f32 %v2553_v48, %v2552_v11  ;;  %v1759_v63 = vpop.f32.mrf.mxu1 }
 0x2b2   : > { %v2654_v25 = vsel %vm504_vm1, %v2597_v59, 0.0  ;;  %v2297_v4 = vadd.f32 %v2257_v60, %v2165_v0  ;;  %v2392_v37 = vpop.f32.mrf.mxu0  ;;  %v1797_v46 = vadd.f32 %v1759_v63, %v3978_v45 }
 0x2b3   : > { %v2655_v2 = vadd.f32 %v2654_v25, %v2653_v1 }
 0x2b4   : > { %v2429_v6 = vadd.f32 %v2389_v38, %v2297_v4 }
 0x2b6   : > { %v2465_v3 = vadd.f32 %v3193_v41, %v2429_v6 }
 0x2b7   : > { %v2128_v27 = vpop.f32.mrf.mxu2 }
 0x2b8   : > { %2497 = vst.msk [vmem:[%s4033_s7 + $0xd8] sm:$0xff] %vm504_vm1, %v2465_v3  ;;  %v2555_v44 = vsel %vm504_vm1, %v2465_v3, 0.0  ;;  %v2598_v20 = vmul.f32 %v2465_v3, %v2465_v3  ;;  %v2166_v22 = vadd.f32 %v2128_v27, %v1797_v46  ;;  %v2260_v17 = vpop.f32.mrf.mxu3 }
 0x2b9   : > { %v2556_v26 = vadd.f32 %v2555_v44, %v2554_v34  ;;  %v1761_v49 = vpop.f32.mrf.mxu1 }
 0x2ba   : > { %v2656_v40 = vsel %vm504_vm1, %v2598_v20, 0.0  ;;  %v2298_v58 = vadd.f32 %v2260_v17, %v2166_v22  ;;  %v1798_v57 = vadd.f32 %v1761_v49, %v3988_v10  ;;  %v2394_v45 = vpop.f32.mrf.mxu0 }
 0x2bb   : > { %v2657_v39 = vadd.f32 %v2656_v40, %v2655_v2 }
 0x2bc   : > { %v2430_v30 = vadd.f32 %v2392_v37, %v2298_v58 }
 0x2be   : > { %v2466_v31 = vadd.f32 %v3193_v41, %v2430_v30 }
 0x2bf   : > { %v2130_v9 = vpop.f32.mrf.mxu2 }
 0x2c0   : > { %2498 = vst.msk [vmem:[%s4033_s7 + $0xe0] sm:$0xff] %vm504_vm1, %v2466_v31  ;;  %v2557_v12 = vsel %vm504_vm1, %v2466_v31, 0.0  ;;  %v2599_v24 = vmul.f32 %v2466_v31, %v2466_v31  ;;  %v2167_v14 = vadd.f32 %v2130_v9, %v1798_v57  ;;  %v2262_v55 = vpop.f32.mrf.mxu3 }
 0x2c1   : > { %v2558_v52 = vadd.f32 %v2557_v12, %v2556_v26  ;;  %v1764_v50 = vpop.f32.mrf.mxu1 }
 0x2c2   : > { %v2658_v19 = vsel %vm504_vm1, %v2599_v24, 0.0  ;;  %v2299_v21 = vadd.f32 %v2262_v55, %v2167_v14  ;;  %v1799_v10 = vadd.f32 %v1764_v50, %v4001_v42  ;;  %v2397_v16 = vpop.f32.mrf.mxu0 }
 0x2c3   : > { %v2659_v18 = vadd.f32 %v2658_v19, %v2657_v39 }
 0x2c4   : > { %v2431_v35 = vadd.f32 %v2394_v45, %v2299_v21 }
 0x2c6   : > { %v2467_v62 = vadd.f32 %v3193_v41, %v2431_v35 }
 0x2c7   : > { %v2133_v61 = vpop.f32.mrf.mxu2 }
 0x2c8   : > { %2499 = vst.msk [vmem:[%s4033_s7 + $0xe8] sm:$0xff] %vm504_vm1, %v2467_v62  ;;  %v2559_v43 = vsel %vm504_vm1, %v2467_v62, 0.0  ;;  %v2600_v15 = vmul.f32 %v2467_v62, %v2467_v62  ;;  %v2168_v32 = vadd.f32 %v2133_v61, %v1799_v10  ;;  %v2265_v47 = vpop.f32.mrf.mxu3 }
 0x2c9   : > { %v2560_v56 = vadd.f32 %v2559_v43, %v2558_v52  ;;  %v1766_v54 = vpop.f32.mrf.mxu1 }
 0x2ca   : > { %v2660_v8 = vsel %vm504_vm1, %v2600_v15, 0.0  ;;  %v2300_v28 = vadd.f32 %v2265_v47, %v2168_v32  ;;  %v1800_v42 = vadd.f32 %v1766_v54, %v4011_v13  ;;  %v2399_v59 = vpop.f32.mrf.mxu0 }
 0x2cb   : > { %v2661_v5 = vadd.f32 %v2660_v8, %v2659_v18 }
 0x2cc   : > { %v2432_v11 = vadd.f32 %v2397_v16, %v2300_v28 }
 0x2ce   : > { %v2468_v23 = vadd.f32 %v3193_v41, %v2432_v11 }
 0x2cf   : > { %v2135_v7 = vpop.f32.mrf.mxu2 }
 0x2d0   : > { %2500 = vst.msk [vmem:[%s4033_s7 + $0xf0] sm:$0xff] %vm504_vm1, %v2468_v23  ;;  %v2561_v36 = vsel %vm504_vm1, %v2468_v23, 0.0  ;;  %v2601_v1 = vmul.f32 %v2468_v23, %v2468_v23  ;;  %v2169_v38 = vadd.f32 %v2135_v7, %v1800_v42  ;;  %v2267_v33 = vpop.f32.mrf.mxu3 }
 0x2d1   : > { %v2562_v53 = vadd.f32 %v2561_v36, %v2560_v56 }
 0x2d2   : > { %v2662_v29 = vsel %vm504_vm1, %v2601_v1, 0.0  ;;  %v2301_v51 = vadd.f32 %v2267_v33, %v2169_v38 }
 0x2d3   : > { %v2663_v48 = vadd.f32 %v2662_v29, %v2661_v5 }
 0x2d4   : > { %v2433_v0 = vadd.f32 %v2399_v59, %v2301_v51 }
 0x2d6   : > { %v2469_v60 = vadd.f32 %v3193_v41, %v2433_v0 }
 0x2d8   : > { %2501 = vst.msk [vmem:[%s4033_s7 + $0xf8] sm:$0xff] %vm504_vm1, %v2469_v60  ;;  %v2563_v13 = vsel %vm504_vm1, %v2469_v60, 0.0  ;;  %v2602_v34 = vmul.f32 %v2469_v60, %v2469_v60 }
 0x2d9   : > { %v2564_v63 = vadd.f32 %v2563_v13, %v2562_v53 }
 0x2da   : > { %v2664_v25 = vsel %vm504_vm1, %v2602_v34, 0.0 }
 0x2db   : > { %v2565_v4 = vrot.slane %v2564_v63, 4  ;;  %v2665_v2 = vadd.f32 %v2664_v25, %v2663_v48 }
 0x2dd   : > { %v2566_v6 = vadd.f32 %v2565_v4, %v2564_v63  ;;  %v2666_v37 = vrot.slane %v2665_v2, 4 }
 0x2df   : > { %v2567_v3 = vrot.slane %v2566_v6, 2  ;;  %v2667_v46 = vadd.f32 %v2666_v37, %v2665_v2 }
 0x2e1   : > { %v2568_v27 = vadd.f32 %v2567_v3, %v2566_v6  ;;  %v2668_v44 = vrot.slane %v2667_v46, 2 }
 0x2e3   : > { %v2569_v20 = vrot.slane %v2568_v27, 1  ;;  %v2669_v22 = vadd.f32 %v2668_v44, %v2667_v46 }
 0x2e5   : > { %v2670_v41 = vrot.slane %v2669_v22, 1  ;;  %v2570_v17 = vadd.f32 %v2569_v20, %v2568_v27 }
 0x2e7   : > { %v2671_v26 = vadd.f32 %v2670_v41, %v2669_v22 }
 0x2e9   : > { %v2673_v49 = vsel %vm2672_vm8, %v2570_v17, %v2671_v26 }
 0x2ea   : > { %2675 = vst.msk [vmem:[%s365_s13] sm:$0x3] %vm2674_vm9, %v2673_v49 }
 0x2eb PF: > { %s16_s20 = sadd.s32 1, %s3216_s20   ;;  %s4413_s18 = smov %s3212_s19 }
 0x2ec   : > { %p13_p5 = scmp.ge.s32.totalorder %s16_s20, 4   ;;  %s4414_s19 = smov %s4416_s21 }
 0x2ee   :  { %15 = sbr.rel (!%p13_p5) target bundleno = 2 (0x2), region = 89 }

// kernel: upconv_forward.4
= control target key start
LH: loop header
LB: loop body
LE: loop exit
PB: predicated region body
PF: predicated region fallthrough
CT: control target
= control target key end

     0   :  { %s5961_s27 = smov 0   ;;  %s5963_s28 = smov 0   ;;  %s7885_s0 = inlined_call_operand.vmem [shape: bf16[2,18,18,4], index: 0, kind: input, shape index: {}, may-alias: {0,1}]   ;;  %s7886_s1 = inlined_call_operand.vmem [shape: bf16[2,18,18,4], index: 1, kind: input, shape index: {}, may-alias: {0,1}]   ;;  %s7887_s2 = inlined_call_operand.vmem [shape: bf16[2,18,18,4], index: 2, kind: input, shape index: {}, may-alias: {2,3}]   ;;  %s7888_s3 = inlined_call_operand.vmem [shape: bf16[2,18,18,4], index: 3, kind: input, shape index: {}, may-alias: {2,3}]   ;;  %s7889_s4 = inlined_call_operand.vmem [shape: bf16[3,3,4,4], index: 4, kind: input, shape index: {}]   ;;  %s7890_s5 = inlined_call_operand.vmem [shape: bf16[3,3,4,4], index: 5, kind: input, shape index: {}]   ;;  %s7891_s6 = inlined_call_operand.vmem [shape: f32[1,4], index: 6, kind: input, shape index: {}]   ;;  %s7892_s7 = inlined_call_operand.vmem [shape: f32[2,16,16,4], index: 7, kind: output, shape index: {0}]   ;;  %s7893_s8 = inlined_call_operand.vmem [shape: f32[2,1,2,4], index: 8, kind: output, shape index: {1}]  }
   0x1   :  { %s5965_s29 = smov 0  }
   0x2 LB: > { %s31_s30 = sadd.s32 1, %s5910_s28  ;;  %p5201_p0 = scmp.ge.s32.totalorder %s5914_s29, 1  ;;  %s5914_s29 = sphi %s5965_s29, %s19_s29   ;;  %s5910_s28 = sphi %s5963_s28, %s7946_s28   ;;  %s5906_s27 = sphi %s5961_s27, %s7945_s27  }
   0x3   : > { %p33_p1 = scmp.ge.s32.totalorder %s31_s30, 2  ;;  %p379_p2 = scmp.lt.s32.totalorder %s5914_s29, 3 }
   0x5   : > { %s7948_s30 = smov (%p33_p1, %s31_s30), 0  ;;  %p380_p3 = pnand %p5201_p0, %p379_p2 }
   0x7   : > { %383 = sbr.rel (%p380_p3) target bundleno = 1325 (0x52d), region = 48 }
   0xc   : > { %v5209_v0 = vld [vmem:[%s7889_s4 + $0x6] sm:$0x3]  ;;  %vm751_vm0 = vcmask 1041408   ;;  %v619_v1 = vld [vmem:[%s7889_s4] sm:$0x3]  ;;  %p480_p4 = scmp.lt.s32.totalorder %s5906_s27, 1 }
   0xd   : > { %v753_v2 = vsel %vm751_vm0, %v5209_v0, 0  ;;  %v853_v3 = vsel %vm751_vm0, %v619_v1, 0  ;;  %v5310_v4 = vld [vmem:[%s7889_s4 + $0xc] sm:$0x3]  ;;  %v5331_v6 = vld [vmem:[%s7889_s4 + $0x2] sm:$0x3] }
   0xe   : > { %5736 = vmatpush.bf16.msra.mxu2 %v753_v2  ;;  %5737 = vmatpush.bf16.msra.mxu3 %v853_v3  ;;  %s7950_s27 = smov (!%p480_p4, %s5906_s27), 1  ;;  %v955_v5 = vsel %vm751_vm0, %v5310_v4, 0  ;;  %v5348_v7 = vld [vmem:[%s7889_s4 + $0x8] sm:$0x3]  ;;  %v1612_v8 = vsel %vm751_vm0, %v5331_v6, 0  ;;  %vm702_vm1 = vcmask 31744  }
   0xf   : > { %762 = vmatpush.bf16.msra.mxu0 %v753_v2  ;;  %862 = vmatpush.bf16.msra.mxu1 %v853_v3  ;;  %v1744_v9 = vsel %vm751_vm0, %v5348_v7, 0  ;;  %v5365_v10 = vld [vmem:[%s7889_s4 + $0xe] sm:$0x3]  ;;  %s6005_s21 = smul.u32 216, %s7950_s27  ;;  %v5400_v30 = vld [vmem:[%s7889_s4 + $0x4] sm:$0x3] }
  0x10   : > { %v1876_v11 = vsel %vm751_vm0, %v5365_v10, 0  ;;  %v2245_v32 = vsel %vm751_vm0, %v5400_v30, 0  ;;  %v5417_v34 = vld [vmem:[%s7889_s4 + $0xa] sm:$0x3]  ;;  %v5434_v55 = vld [vmem:[%s7889_s4 + $0x10] sm:$0x3] }
  0x11   : > { %s6012_s24 = scalar_lea.vmem %s7885_s0, %s6005_s21  ;;  %v2377_v36 = vsel %vm751_vm0, %v5417_v34, 0  ;;  %s5696_s11 = sadd.s32 192, %s6005_s21  ;;  %v2509_v59 = vsel %vm751_vm0, %v5434_v55, 0  ;;  %v2686_v10 = vld [vmem:[%s7890_s5] sm:$0x3]  ;;  %vm2017_vm5 = vcmask 1042432  }
  0x12   : > { %964 = vmatpush.bf16.msrb.mxu2 %v955_v5  ;;  %1621 = vmatpush.bf16.msrb.mxu3 %v1612_v8  ;;  %v6015_v12 = vld [vmem:[%s6012_s24 + $0x6c] sm:$0xff]  ;;  %v6018_v13 = vld [vmem:[%s6012_s24 + $0x60] sm:$0xff]  ;;  %v6029_v16 = vld [vmem:[%s6012_s24 + $0x78] sm:$0xff]  ;;  %s6123_s16 = scalar_lea.vmem %s7886_s1, %s5696_s11  ;;  %vm1078_vm2 = vsmask.f32 3328  ;;  %vm2018_vm6 = vcmask 1046532   ;;  %s6577_s14 = scalar_lea.vmem %s7887_s2, %s6005_s21 }
  0x13   : > { %1753 = vmatpush.bf16.msrb.mxu0 %v1744_v9  ;;  %1885 = vmatpush.bf16.msrb.mxu1 %v1876_v11  ;;  %v5701_v14 = vld [vmem:[%s6012_s24 + $0xc] sm:$0xff]  ;;  %v5700_v15 = vld [vmem:[%s6012_s24] sm:$0xff]  ;;  %v6032_v17 = vld [vmem:[%s6012_s24 + $0x18] sm:$0xff]  ;;  %vm1079_vm3 = vsmask.f32 7440  ;;  %s7275_s26 = scalar_lea.vmem %s7888_s3, %s5696_s11  ;;  %s5699_s21 = sshll.u32 %s7950_s27, 8 }
  0x14   : > { %5282 = vmatmul.msk.bf16.vlgmr.msra.gmra.mxu2 %vm702_vm1, %v6015_v12  ;;  %5302 = vmatmul.msk.bf16.vlgmr.msra.gmra.mxu3 %vm702_vm1, %v6018_v13  ;;  %v6042_v18 = vld [vmem:[%s6012_s24 + $0x84] sm:$0xff]  ;;  %v5712_v20 = vld [vmem:[%s6012_s24 + $0x90] sm:$0xff]  ;;  %v5713_v22 = vld [vmem:[%s6012_s24 + $0x9c] sm:$0xff]  ;;  %s7559_s13 = scalar_lea.vmem %s7892_s7, %s5699_s21  ;;  %s5208_s15 = sshll.u32 %s7950_s27, 1  ;;  %vm4993_vm8 = vcmask 1040384   ;;  %vm4995_vm9 = vcmask 25600  }
  0x15   : > { %5274 = vmatmul.msk.bf16.vlgmr.msra.gmra.mxu0 %vm702_vm1, %v5701_v14  ;;  %5294 = vmatmul.msk.bf16.vlgmr.msra.gmra.mxu1 %vm702_vm1, %v5700_v15  ;;  %v6045_v19 = vld [vmem:[%s6012_s24 + $0x24] sm:$0xff]  ;;  %v6057_v21 = vld [vmem:[%s6012_s24 + $0x30] sm:$0xff]  ;;  %v6068_v23 = vld [vmem:[%s6012_s24 + $0x3c] sm:$0xff]  ;;  %s563_s18 = scalar_lea.vmem %s7893_s8, %s5208_s15 }
  0x16   : > { %v5714_v24 = vld [vmem:[%s6012_s24 + $0xa8] sm:$0xff]  ;;  %v6087_v26 = vld [vmem:[%s6012_s24 + $0xb4] sm:$0xff]  ;;  %v565_v28 = vld [vmem:[%s6012_s24] sm:$0xf]  ;;  %2254 = vmatpush.bf16.msra.mxu2 %v2245_v32  ;;  %2386 = vmatpush.bf16.msra.mxu3 %v2377_v36 }
  0x17   : > { %v6078_v25 = vld [vmem:[%s6012_s24 + $0x48] sm:$0xff]  ;;  %v6090_v27 = vld [vmem:[%s6012_s24 + $0x54] sm:$0xff]  ;;  %v566_v29 = vld [vmem:[%s6012_s24 + $0x4] sm:$0xf]  ;;  %v1082_v35 = vshrl.u32 %v565_v28, 16  ;;  %v1085_v38 = vshll.u32 %v565_v28, 16  ;;  %2518 = vmatpush.bf16.msra.mxu0 %v2509_v59 }
  0x18   : > { %v568_v31 = vld [vmem:[%s6012_s24 + $0xc] sm:$0xf]  ;;  %v569_v33 = vld [vmem:[%s6012_s24 + $0x10] sm:$0xf]  ;;  %v571_v37 = vld [vmem:[%s6012_s24 + $0x18] sm:$0xf] }
  0x19   : > { %v1091_v39 = vshll.u32 %v566_v29, 16  ;;  %v1095_v40 = vshrl.u32 %v566_v29, 16  ;;  %v1106_v41 = vshrl.u32 %v568_v31, 16  ;;  %v572_v42 = vld [vmem:[%s6012_s24 + $0x1c] sm:$0xf]  ;;  %v1109_v43 = vshll.u32 %v568_v31, 16  ;;  %vm6136_vm4 = vmor %vm1078_vm2, %vm1079_vm3 }
  0x1a   : > { %v1115_v44 = vshll.u32 %v569_v33, 16  ;;  %v1119_v45 = vshrl.u32 %v569_v33, 16  ;;  %v1130_v46 = vshrl.u32 %v571_v37, 16  ;;  %v1133_v47 = vshll.u32 %v571_v37, 16  ;;  %v567_v60 = vld [vmem:[%s6012_s24 + $0x8] sm:$0x1]  ;;  %vm6503_vm7 = vmor %vm2017_vm5, %vm2018_vm6 }
  0x1b   : > { %v1084_v48 = vrot.slane %v1082_v35, 4  ;;  %v1139_v49 = vshll.u32 %v572_v42, 16  ;;  %v1143_v50 = vshrl.u32 %v572_v42, 16  ;;  %v1087_v51 = vrot.slane %v1085_v38, 5  ;;  %v570_v61 = vld [vmem:[%s6012_s24 + $0x14] sm:$0x1] }
  0x1c   : > { %v1093_v52 = vrot.slane %v1091_v39, 5  ;;  %v1097_v53 = vrot.slane %v1095_v40, 4  ;;  %v1108_v54 = vrot.slane %v1106_v41, 4  ;;  %v1111_v56 = vrot.slane %v1109_v43, 5  ;;  %v573_v4 = vld [vmem:[%s6012_s24 + $0x20] sm:$0x1] }
  0x1d   : > { %v1117_v57 = vrot.slane %v1115_v44, 5  ;;  %v1121_v58 = vrot.slane %v1119_v45, 4  ;;  %v1132_v62 = vrot.slane %v1130_v46, 4  ;;  %v1135_v63 = vrot.slane %v1133_v47, 5  ;;  %v5716_v5 = vld [vmem:[%s6123_s16] sm:$0xff] }
  0x1e   : > { %v1141_v0 = vrot.slane %v1139_v49, 5  ;;  %v1145_v1 = vrot.slane %v1143_v50, 4  ;;  %v1088_v2 = vor.u32 %v1087_v51, %v1084_v48  ;;  %v1098_v3 = vor.u32 %v1097_v53, %v1093_v52  ;;  %v574_v34 = vld [vmem:[%s6012_s24 + $0x24] sm:$0xf]  ;;  %v575_v37 = vld [vmem:[%s6012_s24 + $0x28] sm:$0xf] }
  0x1f   : > { %v1101_v6 = vshll.u32 %v567_v60, 16  ;;  %v1112_v7 = vor.u32 %v1111_v56, %v1108_v54  ;;  %v1122_v8 = vor.u32 %v1121_v58, %v1117_v57  ;;  %v1125_v9 = vshll.u32 %v570_v61, 16 }
  0x20   : > { %v1136_v11 = vor.u32 %v1135_v63, %v1132_v62  ;;  %v1146_v15 = vor.u32 %v1145_v1, %v1141_v0  ;;  %v1154_v41 = vshrl.u32 %v574_v34, 16  ;;  %v1157_v43 = vshll.u32 %v574_v34, 16 }
  0x21   : > { %v1103_v29 = vrot.slane %v1101_v6, 5  ;;  %v1113_v30 = vrot.slane %v1112_v7, 4  ;;  %v1123_v31 = vrot.slane %v1122_v8, 4  ;;  %v1127_v32 = vrot.slane %v1125_v9, 5  ;;  %v577_v8 = vld [vmem:[%s6012_s24 + $0x30] sm:$0xf] }
  0x22   : > { %v1137_v33 = vrot.slane %v1136_v11, 4  ;;  %v1147_v35 = vrot.slane %v1146_v15, 4  ;;  %v1163_v44 = vshll.u32 %v575_v37, 16  ;;  %v1167_v45 = vshrl.u32 %v575_v37, 16  ;;  %v578_v9 = vld [vmem:[%s6012_s24 + $0x34] sm:$0xf] }
  0x23   : > { %v1118_v39 = vsel %vm6136_vm4, %v1113_v30, %v1117_v57  ;;  %v1128_v40 = vsel %vm6136_vm4, %v1123_v31, %v1127_v32  ;;  %v1159_v54 = vrot.slane %v1157_v43, 5  ;;  %v576_v57 = vld [vmem:[%s6012_s24 + $0x2c] sm:$0x1] }
  0x24   : > { %5283 = vmatmul.msk.bf16.gmra.mxu2 %vm702_vm1, %v6029_v16  ;;  %5303 = vmatmul.msk.bf16.gmra.mxu3 %vm702_vm1, %v6015_v12  ;;  %v1142_v42 = vsel %vm6136_vm4, %v1137_v33, %v1141_v0  ;;  %v1517_v49 = vunpack.c.l.b16 %v1118_v39  ;;  %v1518_v50 = vunpack.c.l.b16 %v1128_v40  ;;  %v1165_v55 = vrot.slane %v1163_v44, 5 }
  0x25   : > { %5275 = vmatmul.msk.bf16.gmra.mxu0 %vm702_vm1, %v6032_v17  ;;  %5295 = vmatmul.msk.bf16.gmra.mxu1 %vm702_vm1, %v5701_v14  ;;  %v2816_v14 = vsel %vm751_vm0, %v2686_v10, 0  ;;  %v1519_v51 = vunpack.c.l.b16 %v1142_v42  ;;  %v1169_v56 = vrot.slane %v1167_v45, 4  ;;  %v1173_v63 = vshll.u32 %v576_v57, 16 }
  0x26   : > { %2825 = vmatpush.bf16.msra.mxu1 %v2816_v14  ;;  %v1548_v59 = vpack.c.b16 %v1518_v50, %v1517_v49 }
  0x27   : > { %v1170_v62 = vor.u32 %v1169_v56, %v1165_v55 }
  0x34   : > { %5284 = vmatmul.msk.bf16.gmra.mxu2 %vm702_vm1, %v6042_v18  ;;  %5304 = vmatmul.msk.bf16.gmra.mxu3 %vm702_vm1, %v6029_v16 }
  0x35   : > { %5276 = vmatmul.msk.bf16.gmra.mxu0 %vm702_vm1, %v6045_v19  ;;  %5296 = vmatmul.msk.bf16.gmra.mxu1 %vm702_vm1, %v6032_v17 }
  0x44   : > { %5285 = vmatmul.msk.bf16.gmra.mxu2 %vm702_vm1, %v5712_v20  ;;  %5305 = vmatmul.msk.bf16.gmra.mxu3 %vm702_vm1, %v6042_v18 }
  0x45   : > { %5277 = vmatmul.msk.bf16.gmra.mxu0 %vm702_vm1, %v6057_v21  ;;  %5297 = vmatmul.msk.bf16.gmra.mxu1 %vm702_vm1, %v6045_v19 }
  0x54   : > { %5286 = vmatmul.msk.bf16.gmra.mxu2 %vm702_vm1, %v5713_v22  ;;  %5306 = vmatmul.msk.bf16.gmra.mxu3 %vm702_vm1, %v5712_v20  ;;  %v1149_v20 = vshll.u32 %v573_v4, 16  ;;  %v1171_v4 = vrot.slane %v1170_v62, 4 }
  0x55   : > { %5278 = vmatmul.msk.bf16.gmra.mxu0 %vm702_vm1, %v6068_v23  ;;  %5298 = vmatmul.msk.bf16.gmra.mxu1 %vm702_vm1, %v6057_v21 }
  0x56   : > { %v1151_v36 = vrot.slane %v1149_v20, 5  ;;  %v1178_v20 = vshrl.u32 %v577_v8, 16 }
  0x58   : > { %v1152_v46 = vsel %vm6136_vm4, %v1147_v35, %v1151_v36  ;;  %v1180_v33 = vrot.slane %v1178_v20, 4 }
  0x59   : > { %v1520_v53 = vunpack.c.l.b16 %v1152_v46 }
  0x5b   : > { %v6159_v60 = vpack.c.b16 %v1520_v53, %v1519_v51 }
  0x64   : > { %5287 = vmatmul.msk.bf16.gmra.mxu2 %vm702_vm1, %v5714_v24  ;;  %5307 = vmatmul.msk.bf16.gmra.mxu3 %vm702_vm1, %v5713_v22  ;;  %v1089_v22 = vrot.slane %v1088_v2, 4 }
  0x65   : > { %5279 = vmatmul.msk.bf16.gmra.mxu0 %vm702_vm1, %v6078_v25  ;;  %5299 = vmatmul.msk.bf16.gmra.mxu1 %vm702_vm1, %v6068_v23 }
  0x74   : > { %5288 = vmatmul.msk.bf16.gmra.mxu2 %vm702_vm1, %v6087_v26  ;;  %5308 = vmatmul.msk.bf16.gmra.mxu3 %vm702_vm1, %v5714_v24  ;;  %v1099_v24 = vrot.slane %v1098_v3, 4 }
  0x75   : > { %5280 = vmatmul.msk.bf16.gmra.mxu0 %vm702_vm1, %v6090_v27  ;;  %5300 = vmatmul.msk.bf16.gmra.mxu1 %vm702_vm1, %v6078_v25 }
  0x76   : > { %v1104_v38 = vsel %vm6136_vm4, %v1099_v24, %v1103_v29  ;;  %v1187_v24 = vshll.u32 %v578_v9, 16  ;;  %v1191_v29 = vshrl.u32 %v578_v9, 16 }
  0x77   : > { %v1516_v48 = vunpack.c.l.b16 %v1104_v38  ;;  %v579_v38 = vld [vmem:[%s6012_s24 + $0x38] sm:$0x1] }
  0x78   : > { %v1189_v35 = vrot.slane %v1187_v24, 5  ;;  %v1193_v36 = vrot.slane %v1191_v29, 4  ;;  %v1197_v45 = vshll.u32 %v579_v38, 16 }
  0x7a   : > { %v1194_v44 = vor.u32 %v1193_v36, %v1189_v35  ;;  %v1199_v51 = vrot.slane %v1197_v45, 5 }
  0x7c   : > { %v1195_v50 = vrot.slane %v1194_v44, 4 }
  0x7e   : > { %v1200_v62 = vsel %vm6136_vm4, %v1195_v50, %v1199_v51 }
  0x84   : > { %5289 = vmatmul.msk.bf16.gmra.mxu2 %vm702_vm1, %v5716_v5  ;;  %5309 = vmatmul.msk.bf16.gmra.mxu3 %vm702_vm1, %v6087_v26  ;;  %v1094_v26 = vsel %vm6136_vm4, %v1089_v22, %v1093_v52  ;;  %v1156_v52 = vrot.slane %v1154_v41, 4  ;;  %v1175_v5 = vrot.slane %v1173_v63, 5  ;;  %v1181_v22 = vshll.u32 %v577_v8, 16 }
  0x85   : > { %5281 = vmatmul.msk.bf16.gmra.mxu0 %vm702_vm1, %v6018_v13  ;;  %5301 = vmatmul.msk.bf16.gmra.mxu1 %vm702_vm1, %v6090_v27  ;;  %v1515_v47 = vunpack.c.l.b16 %v1094_v26 }
  0x86   : > { %v1160_v61 = vor.u32 %v1159_v54, %v1156_v52  ;;  %v1183_v34 = vrot.slane %v1181_v22, 5 }
  0x87   : > { %v1547_v58 = vpack.c.b16 %v1516_v48, %v1515_v47  ;;  %v580_v47 = vld [vmem:[%s6012_s24 + $0x3c] sm:$0xf]  ;;  %v581_v48 = vld [vmem:[%s6012_s24 + $0x40] sm:$0xf] }
  0x88   : > { %v1161_v3 = vrot.slane %v1160_v61, 4  ;;  %v1184_v43 = vor.u32 %v1183_v34, %v1180_v33  ;;  %v1202_v54 = vshrl.u32 %v580_v47, 16  ;;  %v1211_v56 = vshll.u32 %v581_v48, 16  ;;  %v583_v34 = vld [vmem:[%s6012_s24 + $0x48] sm:$0xf] }
  0x89   : > { %v1215_v57 = vshrl.u32 %v581_v48, 16  ;;  %v1226_v38 = vshrl.u32 %v583_v34, 16 }
  0x8a   : > { %v1166_v11 = vsel %vm6136_vm4, %v1161_v3, %v1165_v55  ;;  %v1185_v49 = vrot.slane %v1184_v43, 4  ;;  %v1213_v3 = vrot.slane %v1211_v56, 5 }
  0x8b   : > { %v1521_v31 = vunpack.c.l.b16 %v1166_v11  ;;  %v1228_v50 = vrot.slane %v1226_v38, 4 }
  0x8c   : > { %v1190_v61 = vsel %vm6136_vm4, %v1185_v49, %v1189_v35  ;;  %v584_v35 = vld [vmem:[%s6012_s24 + $0x4c] sm:$0xf] }
  0x8d   : > { %v1239_v43 = vshrl.u32 %v584_v35, 16 }
  0x92   : > { %v764_v0 = vpop.f32.mrf.mxu0  ;;  %v864_v1 = vpop.f32.mrf.mxu1 }
  0x93   : > { %v6161_v2 = vadd.f32 %v864_v1, %v764_v0  ;;  %v1204_v0 = vrot.slane %v1202_v54, 4  ;;  %v585_v54 = vld [vmem:[%s6012_s24 + $0x50] sm:$0x1] }
  0x94   : > { %5315 = vmatmul.msk.bf16.vlgmr.msrb.gmra.mxu2 %vm702_vm1, %v6032_v17  ;;  %5332 = vmatmul.msk.bf16.vlgmr.msrb.gmra.mxu3 %vm702_vm1, %v1547_v58  ;;  %v1176_v17 = vsel %vm6136_vm4, %v1171_v4, %v1175_v5  ;;  %v1217_v4 = vrot.slane %v1215_v57, 4  ;;  %v1523_v5 = vunpack.c.l.b16 %v1190_v61 }
  0x95   : > { %5349 = vmatmul.msk.bf16.vlgmr.msrb.gmra.mxu0 %vm702_vm1, %v1548_v59  ;;  %5366 = vmatmul.msk.bf16.vlgmr.msrb.gmra.mxu1 %vm702_vm1, %v6159_v60  ;;  %v1522_v32 = vunpack.c.l.b16 %v1176_v17 }
  0x97   : > { %v804_v6 = vpop.f32.mrf.mxu2  ;;  %v904_v7 = vpop.f32.mrf.mxu3  ;;  %v6182_v40 = vpack.c.b16 %v1522_v32, %v1521_v31 }
  0x98   : > { %v6171_v10 = vadd.f32 %v904_v7, %v804_v6  ;;  %v1524_v6 = vunpack.c.l.b16 %v1200_v62  ;;  %v582_v7 = vld [vmem:[%s6012_s24 + $0x44] sm:$0x1]  ;;  %v1245_v62 = vshll.u32 %v585_v54, 16  ;;  %v589_v54 = vld [vmem:[%s6012_s24 + $0x60] sm:$0xf] }
  0x9a   : > { %v766_v14 = vpop.f32.mrf.mxu0  ;;  %v866_v15 = vpop.f32.mrf.mxu1  ;;  %v6206_v20 = vpack.c.b16 %v1524_v6, %v1523_v5  ;;  %v1247_v6 = vrot.slane %v1245_v62, 5 }
  0x9b   : > { %v6177_v30 = vadd.f32 %v866_v15, %v766_v14  ;;  %v1218_v14 = vor.u32 %v1217_v4, %v1213_v3  ;;  %v1221_v15 = vshll.u32 %v582_v7, 16 }
  0x9d   : > { %v1219_v32 = vrot.slane %v1218_v14, 4  ;;  %v1223_v33 = vrot.slane %v1221_v15, 5 }
  0x9f   : > { %v806_v37 = vpop.f32.mrf.mxu2  ;;  %v906_v26 = vpop.f32.mrf.mxu3 }
  0xa0   : > { %v6180_v39 = vadd.f32 %v906_v26, %v806_v37 }
  0xa2   : > { %v769_v41 = vpop.f32.mrf.mxu0  ;;  %v869_v42 = vpop.f32.mrf.mxu1 }
  0xa3   : > { %v6184_v46 = vadd.f32 %v869_v42, %v769_v41  ;;  %v1229_v41 = vshll.u32 %v583_v34, 16  ;;  %v1235_v42 = vshll.u32 %v584_v35, 16 }
  0xa4   : > { %5316 = vmatmul.msk.bf16.gmra.mxu2 %vm702_vm1, %v6045_v19  ;;  %5333 = vmatmul.msk.bf16.gmra.mxu3 %vm702_vm1, %v1548_v59  ;;  %v1205_v19 = vshll.u32 %v580_v47, 16 }
  0xa5   : > { %5350 = vmatmul.msk.bf16.gmra.mxu0 %vm702_vm1, %v6159_v60  ;;  %5367 = vmatmul.msk.bf16.gmra.mxu1 %vm702_vm1, %v6182_v40  ;;  %v1231_v51 = vrot.slane %v1229_v41, 5 }
  0xa6   : > { %v1207_v1 = vrot.slane %v1205_v19, 5 }
  0xa7   : > { %v809_v52 = vpop.f32.mrf.mxu2  ;;  %v909_v53 = vpop.f32.mrf.mxu3 }
  0xa8   : > { %v6195_v55 = vadd.f32 %v909_v53, %v809_v52  ;;  %v1208_v17 = vor.u32 %v1207_v1, %v1204_v0  ;;  %v1237_v52 = vrot.slane %v1235_v42, 5  ;;  %v1241_v53 = vrot.slane %v1239_v43, 4  ;;  %v588_v43 = vld [vmem:[%s6012_s24 + $0x5c] sm:$0x1] }
  0xaa   : > { %v771_v58 = vpop.f32.mrf.mxu0  ;;  %v871_v59 = vpop.f32.mrf.mxu1  ;;  %v1209_v31 = vrot.slane %v1208_v17, 4  ;;  %v1242_v61 = vor.u32 %v1241_v53, %v1237_v52  ;;  %v587_v17 = vld [vmem:[%s6012_s24 + $0x58] sm:$0xf] }
  0xab   : > { %v6201_v63 = vadd.f32 %v871_v59, %v771_v58  ;;  %v1232_v59 = vor.u32 %v1231_v51, %v1228_v50 }
  0xac   : > { %v1243_v5 = vrot.slane %v1242_v61, 4 }
  0xad   : > { %v1233_v4 = vrot.slane %v1232_v59, 4 }
  0xaf   : > { %v811_v8 = vpop.f32.mrf.mxu2  ;;  %v911_v9 = vpop.f32.mrf.mxu3 }
  0xb0   : > { %v6204_v11 = vadd.f32 %v911_v9, %v811_v8  ;;  %v586_v9 = vld [vmem:[%s6012_s24 + $0x54] sm:$0xf] }
  0xb2   : > { %v774_v22 = vpop.f32.mrf.mxu0  ;;  %v874_v24 = vpop.f32.mrf.mxu1 }
  0xb3   : > { %v6208_v29 = vadd.f32 %v874_v24, %v774_v22  ;;  %v1250_v24 = vshrl.u32 %v586_v9, 16 }
  0xb4   : > { %5317 = vmatmul.msk.bf16.gmra.mxu2 %vm702_vm1, %v6057_v21  ;;  %5334 = vmatmul.msk.bf16.gmra.mxu3 %vm702_vm1, %v6159_v60  ;;  %v1214_v21 = vsel %vm6136_vm4, %v1209_v31, %v1213_v3  ;;  %v1224_v60 = vsel %vm6136_vm4, %v1219_v32, %v1223_v33  ;;  %v1253_v31 = vshll.u32 %v586_v9, 16  ;;  %v1259_v32 = vshll.u32 %v587_v17, 16 }
  0xb5   : > { %5351 = vmatmul.msk.bf16.gmra.mxu0 %vm702_vm1, %v6182_v40  ;;  %5368 = vmatmul.msk.bf16.gmra.mxu1 %vm702_vm1, %v6206_v20  ;;  %v1525_v48 = vunpack.c.l.b16 %v1214_v21  ;;  %v1526_v49 = vunpack.c.l.b16 %v1224_v60  ;;  %v1263_v33 = vshrl.u32 %v587_v17, 16 }
  0xb6   : > { %v1255_v21 = vrot.slane %v1253_v31, 5  ;;  %v1261_v60 = vrot.slane %v1259_v32, 5  ;;  %v591_v32 = vld [vmem:[%s6012_s24 + $0x68] sm:$0x1] }
  0xb7   : > { %v814_v36 = vpop.f32.mrf.mxu2  ;;  %v914_v37 = vpop.f32.mrf.mxu3  ;;  %v6231_v58 = vpack.c.b16 %v1526_v49, %v1525_v48  ;;  %v1265_v38 = vrot.slane %v1263_v33, 4 }
  0xb8   : > { %v6220_v26 = vadd.f32 %v914_v37, %v814_v36  ;;  %v1252_v37 = vrot.slane %v1250_v24, 4 }
  0xb9   : > { %v1266_v51 = vor.u32 %v1265_v38, %v1261_v60 }
  0xba   : > { %v776_v44 = vpop.f32.mrf.mxu0  ;;  %v876_v45 = vpop.f32.mrf.mxu1  ;;  %v1256_v50 = vor.u32 %v1255_v21, %v1252_v37 }
  0xbb   : > { %v6226_v47 = vadd.f32 %v876_v45, %v776_v44  ;;  %v1267_v59 = vrot.slane %v1266_v51, 4  ;;  %v592_v51 = vld [vmem:[%s6012_s24 + $0x6c] sm:$0xf] }
  0xbf   : > { %v816_v19 = vpop.f32.mrf.mxu2  ;;  %v916_v56 = vpop.f32.mrf.mxu3 }
  0xc0   : > { %v6229_v57 = vadd.f32 %v916_v56, %v816_v19  ;;  %v590_v19 = vld [vmem:[%s6012_s24 + $0x64] sm:$0xf]  ;;  %v1257_v56 = vrot.slane %v1256_v50, 4 }
  0xc2   : > { %v779_v0 = vpop.f32.mrf.mxu0  ;;  %v879_v1 = vpop.f32.mrf.mxu1 }
  0xc3   : > { %v6233_v3 = vadd.f32 %v879_v1, %v779_v0  ;;  %v1274_v1 = vshrl.u32 %v589_v54, 16 }
  0xc4   : > { %5318 = vmatmul.msk.bf16.gmra.mxu2 %vm702_vm1, %v6068_v23  ;;  %5335 = vmatmul.msk.bf16.gmra.mxu3 %vm702_vm1, %v6182_v40  ;;  %v1238_v23 = vsel %vm6136_vm4, %v1233_v4, %v1237_v52  ;;  %v1248_v40 = vsel %vm6136_vm4, %v1243_v5, %v1247_v6  ;;  %v1269_v52 = vshll.u32 %v588_v43, 16  ;;  %v1283_v5 = vshll.u32 %v590_v19, 16 }
  0xc5   : > { %5352 = vmatmul.msk.bf16.gmra.mxu0 %vm702_vm1, %v6206_v20  ;;  %5369 = vmatmul.msk.bf16.gmra.mxu1 %vm702_vm1, %v6231_v58  ;;  %v1527_v35 = vunpack.c.l.b16 %v1238_v23  ;;  %v1528_v36 = vunpack.c.l.b16 %v1248_v40  ;;  %v1276_v23 = vrot.slane %v1274_v1, 4 }
  0xc6   : > { %v1271_v61 = vrot.slane %v1269_v52, 5  ;;  %v593_v52 = vld [vmem:[%s6012_s24 + $0x70] sm:$0xf] }
  0xc7   : > { %v819_v7 = vpop.f32.mrf.mxu2  ;;  %v919_v8 = vpop.f32.mrf.mxu3  ;;  %v6256_v45 = vpack.c.b16 %v1528_v36, %v1527_v35 }
  0xc8   : > { %v6245_v14 = vadd.f32 %v919_v8, %v819_v7  ;;  %v1262_v8 = vsel %vm6136_vm4, %v1257_v56, %v1261_v60  ;;  %v1272_v9 = vsel %vm6136_vm4, %v1267_v59, %v1271_v61  ;;  %v1293_v60 = vshll.u32 %v591_v32, 16 }
  0xc9   : > { %v1529_v24 = vunpack.c.l.b16 %v1262_v8  ;;  %v1530_v31 = vunpack.c.l.b16 %v1272_v9  ;;  %v1298_v59 = vshrl.u32 %v592_v51, 16  ;;  %v1301_v61 = vshll.u32 %v592_v51, 16  ;;  %v595_v51 = vld [vmem:[%s6012_s24 + $0x78] sm:$0xf] }
  0xca   : > { %v781_v15 = vpop.f32.mrf.mxu0  ;;  %v881_v22 = vpop.f32.mrf.mxu1  ;;  %v1295_v50 = vrot.slane %v1293_v60, 5 }
  0xcb   : > { %v6251_v34 = vadd.f32 %v881_v22, %v781_v15  ;;  %v1285_v15 = vrot.slane %v1283_v5, 5  ;;  %v6281_v38 = vpack.c.b16 %v1530_v31, %v1529_v24  ;;  %v1303_v8 = vrot.slane %v1301_v61, 5 }
  0xcf   : > { %v821_v41 = vpop.f32.mrf.mxu2  ;;  %v921_v42 = vpop.f32.mrf.mxu3 }
  0xd0   : > { %v6254_v44 = vadd.f32 %v921_v42, %v821_v41 }
  0xd2   : > { %v784_v48 = vpop.f32.mrf.mxu0  ;;  %v884_v49 = vpop.f32.mrf.mxu1 }
  0xd3   : > { %v6258_v53 = vadd.f32 %v884_v49, %v784_v48 }
  0xd4   : > { %5319 = vmatmul.msk.bf16.gmra.mxu2 %vm702_vm1, %v6078_v25  ;;  %5336 = vmatmul.msk.bf16.gmra.mxu3 %vm702_vm1, %v6206_v20  ;;  %v1277_v25 = vshll.u32 %v589_v54, 16  ;;  %v1287_v20 = vshrl.u32 %v590_v19, 16 }
  0xd5   : > { %5353 = vmatmul.msk.bf16.gmra.mxu0 %vm702_vm1, %v6231_v58  ;;  %5370 = vmatmul.msk.bf16.gmra.mxu1 %vm702_vm1, %v6256_v45 }
  0xd6   : > { %v1279_v40 = vrot.slane %v1277_v25, 5  ;;  %v1289_v22 = vrot.slane %v1287_v20, 4 }
  0xd7   : > { %v824_v62 = vpop.f32.mrf.mxu2  ;;  %v924_v0 = vpop.f32.mrf.mxu3 }
  0xd8   : > { %v6270_v4 = vadd.f32 %v924_v0, %v824_v62  ;;  %v1280_v37 = vor.u32 %v1279_v40, %v1276_v23  ;;  %v1290_v21 = vor.u32 %v1289_v22, %v1285_v15  ;;  %v1307_v62 = vshll.u32 %v593_v52, 16  ;;  %v594_v40 = vld [vmem:[%s6012_s24 + $0x74] sm:$0x1] }
  0xd9   : > { %v1311_v0 = vshrl.u32 %v593_v52, 16  ;;  %v596_v52 = vld [vmem:[%s6012_s24 + $0x7c] sm:$0xf] }
  0xda   : > { %v786_v6 = vpop.f32.mrf.mxu0  ;;  %v886_v7 = vpop.f32.mrf.mxu1  ;;  %v1281_v48 = vrot.slane %v1280_v37, 4  ;;  %v1291_v49 = vrot.slane %v1290_v21, 4  ;;  %v1309_v9 = vrot.slane %v1307_v62, 5  ;;  %v1331_v61 = vshll.u32 %v596_v52, 16 }
  0xdb   : > { %v6276_v17 = vadd.f32 %v886_v7, %v786_v6  ;;  %v1300_v7 = vrot.slane %v1298_v59, 4  ;;  %v1313_v23 = vrot.slane %v1311_v0, 4  ;;  %v1325_v59 = vshll.u32 %v595_v51, 16 }
  0xdc   : > { %v1335_v62 = vshrl.u32 %v596_v52, 16 }
  0xdd   : > { %v1304_v32 = vor.u32 %v1303_v8, %v1300_v7  ;;  %v1333_v7 = vrot.slane %v1331_v61, 5 }
  0xde   : > { %v1337_v8 = vrot.slane %v1335_v62, 4 }
  0xdf   : > { %v826_v33 = vpop.f32.mrf.mxu2  ;;  %v926_v35 = vpop.f32.mrf.mxu3 }
  0xe0   : > { %v6279_v36 = vadd.f32 %v926_v35, %v826_v33  ;;  %v1314_v33 = vor.u32 %v1313_v23, %v1309_v9  ;;  %v1317_v35 = vshll.u32 %v594_v40, 16  ;;  %v597_v40 = vld [vmem:[%s6012_s24 + $0x80] sm:$0x1] }
  0xe2   : > { %v789_v41 = vpop.f32.mrf.mxu0  ;;  %v889_v42 = vpop.f32.mrf.mxu1 }
  0xe3   : > { %v6283_v43 = vadd.f32 %v889_v42, %v789_v41  ;;  %v1305_v41 = vrot.slane %v1304_v32, 4  ;;  %v1315_v42 = vrot.slane %v1314_v33, 4 }
  0xe4   : > { %5320 = vmatmul.msk.bf16.gmra.mxu2 %vm702_vm1, %v6090_v27  ;;  %5337 = vmatmul.msk.bf16.gmra.mxu3 %vm702_vm1, %v6231_v58  ;;  %v1286_v27 = vsel %vm6136_vm4, %v1281_v48, %v1285_v15  ;;  %v1296_v58 = vsel %vm6136_vm4, %v1291_v49, %v1295_v50  ;;  %v1319_v48 = vrot.slane %v1317_v35, 5 }
  0xe5   : > { %5354 = vmatmul.msk.bf16.gmra.mxu0 %vm702_vm1, %v6256_v45  ;;  %5371 = vmatmul.msk.bf16.gmra.mxu1 %vm702_vm1, %v6281_v38  ;;  %v1531_v20 = vunpack.c.l.b16 %v1286_v27  ;;  %v1532_v6 = vunpack.c.l.b16 %v1296_v58  ;;  %v1322_v58 = vshrl.u32 %v595_v51, 16 }
  0xe7   : > { %v829_v54 = vpop.f32.mrf.mxu2  ;;  %v929_v19 = vpop.f32.mrf.mxu3  ;;  %v6306_v31 = vpack.c.b16 %v1532_v6, %v1531_v20  ;;  %v1324_v20 = vrot.slane %v1322_v58, 4  ;;  %v1327_v6 = vrot.slane %v1325_v59, 5 }
  0xe8   : > { %v6295_v56 = vadd.f32 %v929_v19, %v829_v54 }
  0xe9   : > { %v1328_v35 = vor.u32 %v1327_v6, %v1324_v20 }
  0xea   : > { %v791_v1 = vpop.f32.mrf.mxu0  ;;  %v891_v25 = vpop.f32.mrf.mxu1 }
  0xeb   : > { %v6301_v5 = vadd.f32 %v891_v25, %v791_v1 }
  0xef   : > { %v831_v22 = vpop.f32.mrf.mxu2  ;;  %v931_v15 = vpop.f32.mrf.mxu3 }
  0xf0   : > { %v6304_v24 = vadd.f32 %v931_v15, %v831_v22 }
  0xf2   : > { %v794_v37 = vpop.f32.mrf.mxu0  ;;  %v894_v21 = vpop.f32.mrf.mxu1 }
  0xf3   : > { %v6308_v60 = vadd.f32 %v894_v21, %v794_v37  ;;  %v1338_v37 = vor.u32 %v1337_v8, %v1333_v7  ;;  %v1341_v21 = vshll.u32 %v597_v40, 16 }
  0xf4   : > { %5321 = vmatmul.msk.bf16.gmra.mxu2 %vm702_vm1, %v6018_v13  ;;  %5338 = vmatmul.msk.bf16.gmra.mxu3 %vm702_vm1, %v6256_v45  ;;  %v1310_v13 = vsel %vm6136_vm4, %v1305_v41, %v1309_v9  ;;  %v1320_v45 = vsel %vm6136_vm4, %v1315_v42, %v1319_v48  ;;  %v1329_v42 = vrot.slane %v1328_v35, 4 }
  0xf5   : > { %5355 = vmatmul.msk.bf16.gmra.mxu0 %vm702_vm1, %v6281_v38  ;;  %5372 = vmatmul.msk.bf16.gmra.mxu1 %vm702_vm1, %v6306_v31  ;;  %v1533_v1 = vunpack.c.l.b16 %v1310_v13  ;;  %v1534_v25 = vunpack.c.l.b16 %v1320_v45  ;;  %v1339_v48 = vrot.slane %v1338_v37, 4  ;;  %v599_v13 = vld [vmem:[%s6012_s24 + $0x88] sm:$0xf] }
  0xf6   : > { %v1334_v58 = vsel %vm6136_vm4, %v1329_v42, %v1333_v7  ;;  %v1355_v61 = vshll.u32 %v599_v13, 16  ;;  %v1359_v62 = vshrl.u32 %v599_v13, 16  ;;  %v601_v13 = vld [vmem:[%s6012_s24 + $0x90] sm:$0xf] }
  0xf7   : > { %v834_v49 = vpop.f32.mrf.mxu2  ;;  %v934_v50 = vpop.f32.mrf.mxu3  ;;  %v6331_v15 = vpack.c.b16 %v1534_v25, %v1533_v1  ;;  %v1535_v25 = vunpack.c.l.b16 %v1334_v58  ;;  %v1370_v58 = vshrl.u32 %v601_v13, 16 }
  0xf8   : > { %v6320_v54 = vadd.f32 %v934_v50, %v834_v49  ;;  %v1343_v49 = vrot.slane %v1341_v21, 5  ;;  %v598_v50 = vld [vmem:[%s6012_s24 + $0x84] sm:$0xf] }
  0xfa   : > { %v796_v19 = vpop.f32.mrf.mxu0  ;;  %v896_v27 = vpop.f32.mrf.mxu1  ;;  %v1344_v59 = vsel %vm6136_vm4, %v1339_v48, %v1343_v49 }
  0xfb   : > { %v6326_v0 = vadd.f32 %v896_v27, %v796_v19  ;;  %v1346_v19 = vshrl.u32 %v598_v50, 16  ;;  %v1536_v20 = vunpack.c.l.b16 %v1344_v59 }
  0xfd   : > { %v1348_v6 = vrot.slane %v1346_v19, 4  ;;  %v6356_v7 = vpack.c.b16 %v1536_v20, %v1535_v25 }
  0xff   : > { %v836_v23 = vpop.f32.mrf.mxu2  ;;  %v936_v9 = vpop.f32.mrf.mxu3 }
 0x100   : > { %v6329_v22 = vadd.f32 %v936_v9, %v836_v23  ;;  %v1357_v23 = vrot.slane %v1355_v61, 5  ;;  %v1361_v9 = vrot.slane %v1359_v62, 4 }
 0x102   : > { %v799_v32 = vpop.f32.mrf.mxu0  ;;  %v899_v33 = vpop.f32.mrf.mxu1  ;;  %v1362_v48 = vor.u32 %v1361_v9, %v1357_v23 }
 0x103   : > { %v6333_v41 = vadd.f32 %v899_v33, %v799_v32  ;;  %v600_v33 = vld [vmem:[%s6012_s24 + $0x8c] sm:$0x1] }
 0x104   : > { %5322 = vmatmul.msk.bf16.gmra.mxu2 %vm702_vm1, %v6015_v12  ;;  %5339 = vmatmul.msk.bf16.gmra.mxu3 %vm702_vm1, %v6281_v38  ;;  %v1349_v12 = vshll.u32 %v598_v50, 16  ;;  %v1365_v49 = vshll.u32 %v600_v33, 16 }
 0x105   : > { %5356 = vmatmul.msk.bf16.gmra.mxu0 %vm702_vm1, %v6306_v31  ;;  %5373 = vmatmul.msk.bf16.gmra.mxu1 %vm702_vm1, %v6331_v15 }
 0x106   : > { %v1351_v8 = vrot.slane %v1349_v12, 5 }
 0x107   : > { %v839_v51 = vpop.f32.mrf.mxu2  ;;  %v939_v52 = vpop.f32.mrf.mxu3 }
 0x108   : > { %v6345_v45 = vadd.f32 %v939_v52, %v839_v51  ;;  %v1352_v37 = vor.u32 %v1351_v8, %v1348_v6  ;;  %v1363_v51 = vrot.slane %v1362_v48, 4  ;;  %v1367_v52 = vrot.slane %v1365_v49, 5 }
 0x10a   : > { %v801_v27 = vpop.f32.mrf.mxu0  ;;  %v901_v38 = vpop.f32.mrf.mxu1  ;;  %v1353_v50 = vrot.slane %v1352_v37, 4  ;;  %v1368_v25 = vsel %vm6136_vm4, %v1363_v51, %v1367_v52 }
 0x10b   : > { %v6351_v1 = vadd.f32 %v901_v38, %v801_v27  ;;  %v602_v27 = vld [vmem:[%s6012_s24 + $0x94] sm:$0xf] }
 0x10c   : > { %v1379_v20 = vshll.u32 %v602_v27, 16  ;;  %v1383_v6 = vshrl.u32 %v602_v27, 16 }
 0x10e   : > { %v1385_v37 = vrot.slane %v1383_v6, 4 }
 0x10f   : > { %v841_v40 = vpop.f32.mrf.mxu2  ;;  %v941_v32 = vpop.f32.mrf.mxu3 }
 0x110   : > { %v6354_v35 = vadd.f32 %v941_v32, %v841_v40  ;;  %v1538_v40 = vunpack.c.l.b16 %v1368_v25  ;;  %v1372_v32 = vrot.slane %v1370_v58, 4 }
 0x112   : > { %v1755_v21 = vpop.f32.mrf.mxu0  ;;  %v1887_v42 = vpop.f32.mrf.mxu1 }
 0x114   : > { %5323 = vmatmul.msk.bf16.gmra.mxu2 %vm702_vm1, %v6029_v16  ;;  %5340 = vmatmul.msk.bf16.gmra.mxu3 %vm702_vm1, %v6306_v31  ;;  %v1358_v16 = vsel %vm6136_vm4, %v1353_v50, %v1357_v23  ;;  %v1373_v31 = vshll.u32 %v601_v13, 16  ;;  %v603_v50 = vld [vmem:[%s6012_s24 + $0x98] sm:$0x1] }
 0x115   : > { %5357 = vmatmul.msk.bf16.gmra.mxu0 %vm702_vm1, %v6331_v15  ;;  %5374 = vmatmul.msk.bf16.gmra.mxu1 %vm702_vm1, %v6356_v7  ;;  %v1537_v9 = vunpack.c.l.b16 %v1358_v16 }
 0x116   : > { %v1375_v33 = vrot.slane %v1373_v31, 5  ;;  %v604_v31 = vld [vmem:[%s6012_s24 + $0x9c] sm:$0xf] }
 0x117   : > { %v966_v19 = vpop.f32.mrf.mxu2  ;;  %v1623_v12 = vpop.f32.mrf.mxu3  ;;  %v1394_v6 = vshrl.u32 %v604_v31, 16 }
 0x118   : > { %v1046_v38 = vadd.f32 %v966_v19, %v6161_v2  ;;  %v1381_v2 = vrot.slane %v1379_v20, 5  ;;  %v6377_v19 = vpack.c.b16 %v1538_v40, %v1537_v9  ;;  %v1376_v51 = vor.u32 %v1375_v33, %v1372_v32  ;;  %v605_v20 = vld [vmem:[%s6012_s24 + $0xa0] sm:$0xf] }
 0x11a   : > { %v1703_v59 = vadd.f32 %v1623_v12, %v1046_v38  ;;  %v1757_v61 = vpop.f32.mrf.mxu0  ;;  %v1889_v62 = vpop.f32.mrf.mxu1  ;;  %v1386_v27 = vor.u32 %v1385_v37, %v1381_v2  ;;  %v1389_v38 = vshll.u32 %v603_v50, 16  ;;  %v1403_v37 = vshll.u32 %v605_v20, 16 }
 0x11c   : > { %v1835_v8 = vadd.f32 %v1755_v21, %v1703_v59  ;;  %v1391_v58 = vrot.slane %v1389_v38, 5 }
 0x11e   : > { %v6373_v48 = vadd.f32 %v1887_v42, %v1835_v8  ;;  %v1387_v42 = vrot.slane %v1386_v27, 4  ;;  %v1397_v8 = vshll.u32 %v604_v31, 16 }
 0x11f   : > { %v968_v23 = vpop.f32.mrf.mxu2  ;;  %v1625_v49 = vpop.f32.mrf.mxu3 }
 0x120   : > { %v1047_v13 = vadd.f32 %v968_v23, %v6177_v30  ;;  %v1377_v30 = vrot.slane %v1376_v51, 4  ;;  %v1392_v33 = vsel %vm6136_vm4, %v1387_v42, %v1391_v58  ;;  %v1399_v51 = vrot.slane %v1397_v8, 5  ;;  %v607_v8 = vld [vmem:[%s6012_s24 + $0xa8] sm:$0xf] }
 0x121   : > { %v1540_v50 = vunpack.c.l.b16 %v1392_v33 }
 0x122   : > { %v1704_v52 = vadd.f32 %v1625_v49, %v1047_v13  ;;  %v1760_v12 = vpop.f32.mrf.mxu0  ;;  %v1892_v21 = vpop.f32.mrf.mxu1  ;;  %v1396_v13 = vrot.slane %v1394_v6, 4 }
 0x124   : > { %v1836_v16 = vadd.f32 %v1757_v61, %v1704_v52  ;;  %5324 = vmatmul.msk.bf16.gmra.mxu2 %vm702_vm1, %v6042_v18  ;;  %5341 = vmatmul.msk.bf16.gmra.mxu3 %vm702_vm1, %v6331_v15  ;;  %v1382_v15 = vsel %vm6136_vm4, %v1377_v30, %v1381_v2  ;;  %v1400_v42 = vor.u32 %v1399_v51, %v1396_v13 }
 0x125   : > { %5358 = vmatmul.msk.bf16.gmra.mxu0 %vm702_vm1, %v6356_v7  ;;  %5375 = vmatmul.msk.bf16.gmra.mxu1 %vm702_vm1, %v6377_v19  ;;  %v1539_v49 = vunpack.c.l.b16 %v1382_v15  ;;  %v5766_v15 = vld [vmem:[%s6012_s24 + $0x90] sm:$0xff] }
 0x126   : > { %v6388_v59 = vadd.f32 %v1889_v62, %v1836_v16  ;;  %v1407_v62 = vshrl.u32 %v605_v20, 16  ;;  %v606_v16 = vld [vmem:[%s6012_s24 + $0xa4] sm:$0x1] }
 0x127   : > { %v971_v25 = vpop.f32.mrf.mxu2  ;;  %v1628_v61 = vpop.f32.mrf.mxu3  ;;  %v6400_v31 = vpack.c.b16 %v1540_v50, %v1539_v49  ;;  %v1413_v20 = vshll.u32 %v606_v16, 16  ;;  %v1421_v49 = vshll.u32 %v607_v8, 16 }
 0x128   : > { %v1048_v18 = vadd.f32 %v971_v25, %v6184_v46  ;;  %v1405_v46 = vrot.slane %v1403_v37, 5  ;;  %v1409_v52 = vrot.slane %v1407_v62, 4  ;;  %v608_v37 = vld [vmem:[%s6012_s24 + $0xac] sm:$0xf] }
 0x129   : > { %v1415_v6 = vrot.slane %v1413_v20, 5 }
 0x12a   : > { %v1705_v9 = vadd.f32 %v1628_v61, %v1048_v18  ;;  %v1762_v40 = vpop.f32.mrf.mxu0  ;;  %v1894_v32 = vpop.f32.mrf.mxu1  ;;  %v1410_v61 = vor.u32 %v1409_v52, %v1405_v46 }
 0x12c   : > { %v1837_v23 = vadd.f32 %v1760_v12, %v1705_v9 }
 0x12e   : > { %v6396_v2 = vadd.f32 %v1892_v21, %v1837_v23  ;;  %v1411_v21 = vrot.slane %v1410_v61, 4  ;;  %v1418_v23 = vshrl.u32 %v607_v8, 16 }
 0x12f   : > { %v973_v27 = vpop.f32.mrf.mxu2  ;;  %v1630_v38 = vpop.f32.mrf.mxu3 }
 0x130   : > { %v1049_v30 = vadd.f32 %v973_v27, %v6201_v63  ;;  %v1401_v63 = vrot.slane %v1400_v42, 4  ;;  %v1416_v52 = vsel %vm6136_vm4, %v1411_v21, %v1415_v6  ;;  %v1427_v27 = vshll.u32 %v608_v37, 16 }
 0x131   : > { %v1420_v42 = vrot.slane %v1418_v23, 4 }
 0x132   : > { %v1706_v58 = vadd.f32 %v1630_v38, %v1049_v30  ;;  %v1765_v12 = vpop.f32.mrf.mxu0  ;;  %v1897_v25 = vpop.f32.mrf.mxu1  ;;  %v1542_v30 = vunpack.c.l.b16 %v1416_v52 }
 0x134   : > { %v1838_v18 = vadd.f32 %v1762_v40, %v1706_v58  ;;  %5325 = vmatmul.msk.bf16.gmra.mxu2 %vm702_vm1, %v5766_v15  ;;  %5342 = vmatmul.msk.bf16.gmra.mxu3 %vm702_vm1, %v6356_v7  ;;  %v1406_v7 = vsel %vm6136_vm4, %v1401_v63, %v1405_v46  ;;  %v1423_v58 = vrot.slane %v1421_v49, 5  ;;  %v609_v15 = vld [vmem:[%s6012_s24 + $0xb0] sm:$0x1] }
 0x135   : > { %5359 = vmatmul.msk.bf16.gmra.mxu0 %vm702_vm1, %v6377_v19  ;;  %5376 = vmatmul.msk.bf16.gmra.mxu1 %vm702_vm1, %v6400_v31  ;;  %v1541_v16 = vunpack.c.l.b16 %v1406_v7  ;;  %v5767_v7 = vld [vmem:[%s6012_s24 + $0x9c] sm:$0xff] }
 0x136   : > { %v6411_v9 = vadd.f32 %v1894_v32, %v1838_v18  ;;  %v1431_v32 = vshrl.u32 %v608_v37, 16  ;;  %v1424_v21 = vor.u32 %v1423_v58, %v1420_v42  ;;  %v1437_v37 = vshll.u32 %v609_v15, 16 }
 0x137   : > { %v976_v33 = vpop.f32.mrf.mxu2  ;;  %v1633_v40 = vpop.f32.mrf.mxu3  ;;  %v6423_v8 = vpack.c.b16 %v1542_v30, %v1541_v16 }
 0x138   : > { %v1050_v62 = vadd.f32 %v976_v33, %v6208_v29  ;;  %v1429_v29 = vrot.slane %v1427_v27, 5  ;;  %v1433_v61 = vrot.slane %v1431_v32, 4  ;;  %v1439_v49 = vrot.slane %v1437_v37, 5  ;;  %v611_v27 = vld [vmem:[%s6012_s24 + $0xb8] sm:$0xf] }
 0x13a   : > { %v1707_v50 = vadd.f32 %v1633_v40, %v1050_v62  ;;  %v1767_v13 = vpop.f32.mrf.mxu0  ;;  %v1899_v51 = vpop.f32.mrf.mxu1  ;;  %v1434_v40 = vor.u32 %v1433_v61, %v1429_v29 }
 0x13c   : > { %v1839_v38 = vadd.f32 %v1765_v12, %v1707_v50  ;;  %v1435_v23 = vrot.slane %v1434_v40, 4 }
 0x13e   : > { %v6419_v46 = vadd.f32 %v1897_v25, %v1839_v38  ;;  %v610_v25 = vld [vmem:[%s6012_s24 + $0xb4] sm:$0xf]  ;;  %v1440_v61 = vsel %vm6136_vm4, %v1435_v23, %v1439_v49 }
 0x13f   : > { %v978_v20 = vpop.f32.mrf.mxu2  ;;  %v1635_v18 = vpop.f32.mrf.mxu3  ;;  %v1442_v38 = vshrl.u32 %v610_v25, 16  ;;  %v1445_v16 = vshll.u32 %v610_v25, 16 }
 0x140   : > { %v1051_v63 = vadd.f32 %v978_v20, %v6226_v47  ;;  %v1425_v47 = vrot.slane %v1424_v21, 4  ;;  %v1451_v20 = vshll.u32 %v611_v27, 16 }
 0x141   : > { %v1444_v15 = vrot.slane %v1442_v38, 4  ;;  %v614_v38 = vld [vmem:[%s6123_s16 + $0x4] sm:$0xf] }
 0x142   : > { %v1708_v6 = vadd.f32 %v1635_v18, %v1051_v63  ;;  %v1770_v12 = vpop.f32.mrf.mxu0  ;;  %v1902_v33 = vpop.f32.mrf.mxu1  ;;  %v1447_v63 = vrot.slane %v1445_v16, 5 }
 0x144   : > { %v1840_v62 = vadd.f32 %v1767_v13, %v1708_v6  ;;  %5326 = vmatmul.msk.bf16.gmra.mxu2 %vm702_vm1, %v5767_v7  ;;  %5343 = vmatmul.msk.bf16.gmra.mxu3 %vm702_vm1, %v6377_v19  ;;  %v1430_v19 = vsel %vm6136_vm4, %v1425_v47, %v1429_v29  ;;  %v1453_v6 = vrot.slane %v1451_v20, 5  ;;  %v612_v7 = vld [vmem:[%s6012_s24 + $0xbc] sm:$0x1]  ;;  %v1448_v25 = vor.u32 %v1447_v63, %v1444_v15 }
 0x145   : > { %5360 = vmatmul.msk.bf16.gmra.mxu0 %vm702_vm1, %v6400_v31  ;;  %5377 = vmatmul.msk.bf16.gmra.mxu1 %vm702_vm1, %v6423_v8  ;;  %v1543_v21 = vunpack.c.l.b16 %v1430_v19  ;;  %v5768_v19 = vld [vmem:[%s6012_s24 + $0xa8] sm:$0xff]  ;;  %v1479_v20 = vshrl.u32 %v614_v38, 16 }
 0x146   : > { %v6434_v50 = vadd.f32 %v1899_v51, %v1840_v62  ;;  %v1455_v51 = vshrl.u32 %v611_v27, 16  ;;  %v1461_v27 = vshll.u32 %v612_v7, 16 }
 0x147   : > { %v981_v52 = vpop.f32.mrf.mxu2  ;;  %v1638_v13 = vpop.f32.mrf.mxu3 }
 0x148   : > { %v1052_v32 = vadd.f32 %v981_v52, %v6233_v3  ;;  %v1544_v3 = vunpack.c.l.b16 %v1440_v61  ;;  %v1457_v40 = vrot.slane %v1455_v51, 4  ;;  %v1475_v61 = vshll.u32 %v614_v38, 16 }
 0x14a   : > { %v1709_v30 = vadd.f32 %v1638_v13, %v1052_v32  ;;  %v1772_v42 = vpop.f32.mrf.mxu0  ;;  %v1904_v58 = vpop.f32.mrf.mxu1  ;;  %v6446_v23 = vpack.c.b16 %v1544_v3, %v1543_v21  ;;  %v1458_v13 = vor.u32 %v1457_v40, %v1453_v6  ;;  %v613_v32 = vld [vmem:[%s6123_s16] sm:$0xf] }
 0x14c   : > { %v1841_v18 = vadd.f32 %v1770_v12, %v1709_v30  ;;  %v1469_v30 = vshll.u32 %v613_v32, 16  ;;  %v1459_v51 = vrot.slane %v1458_v13, 4  ;;  %v615_v13 = vld [vmem:[%s6123_s16 + $0x8] sm:$0x1] }
 0x14e   : > { %v6442_v29 = vadd.f32 %v1902_v33, %v1841_v18  ;;  %v1449_v33 = vrot.slane %v1448_v25, 4  ;;  %v1471_v40 = vrot.slane %v1469_v30, 5 }
 0x14f   : > { %v983_v37 = vpop.f32.mrf.mxu2  ;;  %v1640_v62 = vpop.f32.mrf.mxu3 }
 0x150   : > { %v1053_v47 = vadd.f32 %v983_v37, %v6251_v34  ;;  %v1466_v34 = vshrl.u32 %v613_v32, 16  ;;  %v1454_v21 = vsel %vm6136_vm4, %v1449_v33, %v1453_v6  ;;  %v1477_v37 = vrot.slane %v1475_v61, 5 }
 0x151   : > { %v1485_v6 = vshll.u32 %v615_v13, 16 }
 0x152   : > { %v1710_v12 = vadd.f32 %v1640_v62, %v1053_v47  ;;  %v1775_v49 = vpop.f32.mrf.mxu0  ;;  %v1907_v52 = vpop.f32.mrf.mxu1  ;;  %v1468_v3 = vrot.slane %v1466_v34, 4  ;;  %v1481_v62 = vrot.slane %v1479_v20, 4 }
 0x154   : > { %v1842_v16 = vadd.f32 %v1772_v42, %v1710_v12  ;;  %5327 = vmatmul.msk.bf16.gmra.mxu2 %vm702_vm1, %v5768_v19  ;;  %5344 = vmatmul.msk.bf16.gmra.mxu3 %vm702_vm1, %v6400_v31  ;;  %v1463_v42 = vrot.slane %v1461_v27, 5  ;;  %v1545_v27 = vunpack.c.l.b16 %v1454_v21  ;;  %v1482_v38 = vor.u32 %v1481_v62, %v1477_v37 }
 0x155   : > { %5361 = vmatmul.msk.bf16.gmra.mxu0 %vm702_vm1, %v6423_v8  ;;  %5378 = vmatmul.msk.bf16.gmra.mxu1 %vm702_vm1, %v6446_v23 }
 0x156   : > { %v6458_v18 = vadd.f32 %v1904_v58, %v1842_v16  ;;  %v1464_v12 = vsel %vm6136_vm4, %v1459_v51, %v1463_v42  ;;  %v1483_v20 = vrot.slane %v1482_v38, 4  ;;  %v1487_v51 = vrot.slane %v1485_v6, 5  ;;  %v5772_v38 = vld [vmem:[%s6012_s24] sm:$0xf] }
 0x157   : > { %v986_v15 = vpop.f32.mrf.mxu2  ;;  %v1643_v63 = vpop.f32.mrf.mxu3  ;;  %v1546_v32 = vunpack.c.l.b16 %v1464_v12  ;;  %v5770_v12 = vld [vmem:[%s6012_s24 + $0x4] sm:$0xf]  ;;  %v5382_v6 = vrot.slane %v5772_v38, 9  ;;  %v5775_v38 = vld [vmem:[%s6012_s24 + $0xc] sm:$0xf] }
 0x158   : > { %7901 = vst [vmem:[#allocation2_spill] sm:$0xff] %v6458_v18  ;;  %v1054_v31 = vadd.f32 %v986_v15, %v6258_v53  ;;  %v1472_v53 = vor.u32 %v1471_v40, %v1468_v3  ;;  %v5769_v3 = vld [vmem:[%s6012_s24 + $0xb4] sm:$0xff]  ;;  %v2022_v13 = vrot.slane %v5770_v12, 5  ;;  %v7904_v18 = vmov 0 }
 0x159   : > { %v6469_v30 = vpack.c.b16 %v1546_v32, %v1545_v27  ;;  %v7905_v18 = vsel %vm6503_vm7, 4294967295, %v7904_v18 }
 0x15a   : > { %v1711_v7 = vadd.f32 %v1643_v63, %v1054_v31  ;;  %v1777_v47 = vpop.f32.mrf.mxu0  ;;  %v1909_v25 = vpop.f32.mrf.mxu1  ;;  %v1473_v61 = vrot.slane %v1472_v53, 4  ;;  %v616_v63 = vld [vmem:[%s6123_s16 + $0xc] sm:$0xf]  ;;  %v617_v31 = vld [vmem:[%s6123_s16 + $0x10] sm:$0xf]  ;;  %7906 = vst [vmem:[#allocation5_spill] sm:$0xff] %v7905_v18 }
 0x15b   : > { %v1490_v40 = vshrl.u32 %v616_v63, 16  ;;  %v1493_v62 = vshll.u32 %v616_v63, 16 }
 0x15c   : > { %v1843_v58 = vadd.f32 %v1775_v49, %v1711_v7  ;;  %v1499_v7 = vshll.u32 %v617_v31, 16 }
 0x15e   : > { %v6466_v16 = vadd.f32 %v1907_v52, %v1843_v58  ;;  %v1488_v52 = vsel %vm6136_vm4, %v1483_v20, %v1487_v51  ;;  %v5771_v58 = vld [vmem:[%s6012_s24 + $0x10] sm:$0xf]  ;;  %v1492_v51 = vrot.slane %v1490_v40, 4  ;;  %v5778_v40 = vld [vmem:[%s6012_s24 + $0x20] sm:$0x1] }
 0x15f   : > { %v988_v19 = vpop.f32.mrf.mxu2  ;;  %v1645_v33 = vpop.f32.mrf.mxu3  ;;  %v2029_v27 = vrot.slane %v5771_v58, 5  ;;  %v2024_v58 = vrot.slane %v2022_v13, 4 }
 0x160   : > { %7902 = vst [vmem:[#allocation3_spill] sm:$0xff] %v6466_v16  ;;  %v1055_v34 = vadd.f32 %v988_v19, %v6276_v17  ;;  %v1478_v17 = vsel %vm6136_vm4, %v1473_v61, %v1477_v37  ;;  %v5773_v37 = vld [vmem:[%s6012_s24 + $0x8] sm:$0x1] }
 0x161   : > { %v2025_v19 = vrot.slane %v5773_v37, 5  ;;  %v1737_v20 = vunpack.c.l.b16 %v1478_v17  ;;  %v5383_v37 = vrot.slane %v5775_v38, 9 }
 0x162   : > { %v1712_v49 = vadd.f32 %v1645_v33, %v1055_v34  ;;  %v1780_v42 = vpop.f32.mrf.mxu0  ;;  %v1912_v15 = vpop.f32.mrf.mxu1  ;;  %v5774_v34 = vld [vmem:[%s6012_s24 + $0x1c] sm:$0xf] }
 0x163   : > { %v2036_v61 = vrot.slane %v5774_v34, 5  ;;  %v5777_v34 = vld [vmem:[%s6012_s24 + $0x18] sm:$0xf] }
 0x164   : > { %v1844_v21 = vadd.f32 %v1777_v47, %v1712_v49  ;;  %5328 = vmatmul.msk.bf16.gmra.mxu2 %vm702_vm1, %v5769_v3  ;;  %5345 = vmatmul.msk.bf16.gmra.mxu3 %vm702_vm1, %v6423_v8  ;;  %v1503_v47 = vshrl.u32 %v617_v31, 16  ;;  %v6493_v3 = vrot.slane %v1499_v7, 5  ;;  %v5384_v16 = vrot.slane %v5777_v34, 9 }
 0x165   : > { %5362 = vmatmul.msk.bf16.gmra.mxu0 %vm702_vm1, %v6446_v23  ;;  %5379 = vmatmul.msk.bf16.gmra.mxu1 %vm702_vm1, %v6469_v30 }
 0x166   : > { %v6485_v8 = vadd.f32 %v1909_v25, %v1844_v21  ;;  %v1738_v25 = vunpack.c.l.b16 %v1488_v52  ;;  %v1495_v21 = vrot.slane %v1493_v62, 5  ;;  %v1505_v12 = vrot.slane %v1503_v47, 4  ;;  %v618_v62 = vld [vmem:[%s6123_s16 + $0x14] sm:$0x1] }
 0x167   : > { %v991_v32 = vpop.f32.mrf.mxu2  ;;  %v1648_v53 = vpop.f32.mrf.mxu3  ;;  %v2038_v52 = vrot.slane %v2036_v61, 4 }
 0x168   : > { %7903 = vst [vmem:[#allocation4_spill] sm:$0xff] %v6485_v8  ;;  %v1056_v33 = vadd.f32 %v991_v32, %v6283_v43  ;;  %v2031_v43 = vrot.slane %v2029_v27, 4  ;;  %v5776_v32 = vld [vmem:[%s6012_s24 + $0x14] sm:$0x1]  ;;  %v1496_v7 = vor.u32 %v1495_v21, %v1492_v51  ;;  %v1506_v47 = vor.u32 %v1505_v12, %v6493_v3 }
 0x169   : > { %v2032_v8 = vrot.slane %v5776_v32, 5 }
 0x16a   : > { %v1713_v49 = vadd.f32 %v1648_v53, %v1056_v33  ;;  %v1782_v63 = vpop.f32.mrf.mxu0  ;;  %v1914_v31 = vpop.f32.mrf.mxu1  ;;  %v2039_v53 = vrot.slane %v5778_v40, 5  ;;  %v6499_v33 = vpack.c.b16 %v1738_v25, %v1737_v20  ;;  %v2030_v20 = vsel %vm6503_vm7, %v5383_v37, %v2029_v27 }
 0x16b   : > { %v2033_v25 = vsel %vm6503_vm7, %v2031_v43, %v2032_v8  ;;  %v2150_v12 = vunpack.c.l.b16 %v2030_v20 }
 0x16c   : > { %v1845_v17 = vadd.f32 %v1780_v42, %v1713_v49  ;;  %v2023_v42 = vsel %vm6503_vm7, %v5382_v6, %v2022_v13  ;;  %v2026_v49 = vsel %vm6503_vm7, %v2024_v58, %v2025_v19  ;;  %v2151_v40 = vunpack.c.l.b16 %v2033_v25 }
 0x16d   : > { %v2148_v21 = vunpack.c.l.b16 %v2023_v42  ;;  %v2037_v13 = vsel %vm6503_vm7, %v5384_v16, %v2036_v61  ;;  %v2040_v6 = vsel %vm6503_vm7, %v2038_v52, %v2039_v53  ;;  %v5779_v42 = vld [vmem:[%s6123_s16] sm:$0xff]  ;;  %v1497_v52 = vrot.slane %v1496_v7, 4  ;;  %v5552_v53 = vld [vmem:[%s7890_s5 + $0xc] sm:$0x3] }
 0x16e   : > { %v6507_v38 = vadd.f32 %v1912_v15, %v1845_v17  ;;  %v2149_v15 = vunpack.c.l.b16 %v2026_v49  ;;  %v1509_v17 = vshll.u32 %v618_v62, 16  ;;  %v2152_v8 = vunpack.c.l.b16 %v2037_v13  ;;  %v5531_v16 = vld [vmem:[%s7890_s5 + $0x6] sm:$0x3] }
 0x16f   : > { %v993_v32 = vpop.f32.mrf.mxu2  ;;  %v1650_v34 = vpop.f32.mrf.mxu3  ;;  %v2153_v43 = vunpack.c.l.b16 %v2040_v6 }
 0x170   : > { %v1057_v51 = vadd.f32 %v993_v32, %v6301_v5  ;;  %v6522_v37 = vpack.c.b16 %v2149_v15, %v2148_v21  ;;  %v6524_v5 = vpack.c.b16 %v2151_v40, %v2150_v12  ;;  %v1511_v62 = vrot.slane %v1509_v17, 5 }
 0x171   : > { %v6533_v61 = vpack.c.b16 %v2153_v43, %v2152_v8  ;;  %v1502_v12 = vsel %vm6136_vm4, %v1497_v52, %v6493_v3  ;;  %v5717_v3 = vld [vmem:[%s6123_s16 + $0xc] sm:$0xff] }
 0x172   : > { %v1714_v19 = vadd.f32 %v1650_v34, %v1057_v51  ;;  %v1785_v58 = vpop.f32.mrf.mxu0  ;;  %v1917_v27 = vpop.f32.mrf.mxu1  ;;  %v3084_v34 = vsel %vm751_vm0, %v5552_v53, 0  ;;  %v1869_v40 = vunpack.c.l.b16 %v1502_v12 }
 0x173   : > { %3093 = vmatpush.bf16.msrb.mxu3 %v3084_v34 }
 0x174   : > { %v1846_v32 = vadd.f32 %v1782_v63, %v1714_v19  ;;  %5329 = vmatmul.msk.bf16.gmra.mxu2 %vm702_vm1, %v5779_v42  ;;  %5346 = vmatmul.msk.bf16.gmra.mxu3 %vm702_vm1, %v6446_v23  ;;  %v2950_v63 = vsel %vm751_vm0, %v5531_v16, 0  ;;  %v1507_v23 = vrot.slane %v1506_v47, 4 }
 0x175   : > { %5363 = vmatmul.msk.bf16.gmra.mxu0 %vm702_vm1, %v6469_v30  ;;  %5380 = vmatmul.msk.bf16.gmra.mxu1 %vm702_vm1, %v6499_v33 }
 0x176   : > { %2959 = vmatpush.bf16.msrb.mxu2 %v2950_v63  ;;  %v6544_v49 = vadd.f32 %v1914_v31, %v1846_v32  ;;  %v1512_v47 = vsel %vm6136_vm4, %v1507_v23, %v1511_v62  ;;  %v5573_v31 = vld [vmem:[%s7890_s5 + $0x2] sm:$0x3] }
 0x177   : > { %v996_v20 = vpop.f32.mrf.mxu2  ;;  %v1653_v25 = vpop.f32.mrf.mxu3  ;;  %v1870_v13 = vunpack.c.l.b16 %v1512_v47 }
 0x178   : > { %v1058_v51 = vadd.f32 %v996_v20, %v6308_v60  ;;  %v3738_v60 = vsel %vm751_vm0, %v5573_v31, 0 }
 0x179   : > { %3747 = vmatpush.bf16.msrb.mxu0 %v3738_v60  ;;  %v1871_v32 = vpack.c.b16 %v1870_v13, %v1869_v40  ;;  %v5781_v13 = vld [vmem:[%s6012_s24 + $0x2c] sm:$0x1]  ;;  %v5782_v60 = vld [vmem:[%s6012_s24 + $0x24] sm:$0xf] }
 0x17a   : > { %v1715_v7 = vadd.f32 %v1653_v25, %v1058_v51  ;;  %v1787_v21 = vpop.f32.mrf.mxu0  ;;  %v1919_v15 = vpop.f32.mrf.mxu1 }
 0x17c   : > { %v1847_v17 = vadd.f32 %v1785_v58, %v1715_v7 }
 0x17e   : > { %v6556_v6 = vadd.f32 %v1917_v27, %v1847_v17  ;;  %v5590_v27 = vld [vmem:[%s7890_s5 + $0x8] sm:$0x3] }
 0x17f   : > { %v998_v19 = vpop.f32.mrf.mxu2  ;;  %v1655_v8 = vpop.f32.mrf.mxu3  ;;  %v5780_v17 = vld [vmem:[%s6012_s24 + $0x28] sm:$0xf] }
 0x180   : > { %v1059_v43 = vadd.f32 %v998_v19, %v6326_v0  ;;  %v3870_v0 = vsel %vm751_vm0, %v5590_v27, 0  ;;  %v2043_v31 = vrot.slane %v5780_v17, 5  ;;  %v5385_v19 = vrot.slane %v5782_v60, 9 }
 0x181   : > { %3879 = vmatpush.bf16.msrb.mxu1 %v3870_v0 }
 0x182   : > { %v1716_v42 = vadd.f32 %v1655_v8, %v1059_v43  ;;  %v1790_v16 = vpop.f32.mrf.mxu0  ;;  %v1922_v58 = vpop.f32.mrf.mxu1  ;;  %v2045_v8 = vrot.slane %v2043_v31, 4 }
 0x184   : > { %v1848_v52 = vadd.f32 %v1787_v21, %v1716_v42  ;;  %5330 = vmatmul.msk.bf16.gmra.mxu2 %vm702_vm1, %v5717_v3  ;;  %5347 = vmatmul.msk.bf16.gmra.mxu3 %vm702_vm1, %v6469_v30 }
 0x185   : > { %5364 = vmatmul.msk.bf16.gmra.mxu0 %vm702_vm1, %v6499_v33  ;;  %5381 = vmatmul.msk.bf16.gmra.mxu1 %vm702_vm1, %v1871_v32 }
 0x186   : > { %v6570_v63 = vadd.f32 %v1919_v15, %v1848_v52  ;;  %v5718_v15 = vld [vmem:[%s6577_s14] sm:$0xff]  ;;  %v2044_v52 = vsel %vm6503_vm7, %v5385_v19, %v2043_v31 }
 0x187   : > { %v1001_v53 = vpop.f32.mrf.mxu2  ;;  %v1658_v23 = vpop.f32.mrf.mxu3 }
 0x188   : > { %v1060_v62 = vadd.f32 %v1001_v53, %v6333_v41  ;;  %v2154_v53 = vunpack.c.l.b16 %v2044_v52 }
 0x18a   : > { %v1717_v30 = vadd.f32 %v1658_v23, %v1060_v62  ;;  %v1792_v34 = vpop.f32.mrf.mxu0  ;;  %v1924_v20 = vpop.f32.mrf.mxu1 }
 0x18c   : > { %v1849_v25 = vadd.f32 %v1790_v16, %v1717_v30 }
 0x18e   : > { %v6579_v33 = vadd.f32 %v1922_v58, %v1849_v25  ;;  %v5719_v25 = vld [vmem:[%s6577_s14 + $0xc] sm:$0xff] }
 0x18f   : > { %v1003_v51 = vpop.f32.mrf.mxu2  ;;  %v1660_v7 = vpop.f32.mrf.mxu3 }
 0x190   : > { %v1061_v21 = vadd.f32 %v1003_v51, %v6351_v1  ;;  %v2046_v1 = vrot.slane %v5781_v13, 5 }
 0x192   : > { %v1718_v41 = vadd.f32 %v1660_v7, %v1061_v21  ;;  %v1795_v12 = vpop.f32.mrf.mxu0  ;;  %v1927_v47 = vpop.f32.mrf.mxu1  ;;  %v2047_v27 = vsel %vm6503_vm7, %v2045_v8, %v2046_v1 }
 0x193   : > { %v2155_v23 = vunpack.c.l.b16 %v2047_v27 }
 0x194   : > { %v1850_v40 = vadd.f32 %v1792_v34, %v1718_v41  ;;  %5401 = vmatmul.msk.bf16.vlgmr.msra.gmra.mxu2 %vm702_vm1, %v6522_v37  ;;  %5418 = vmatmul.msk.bf16.vlgmr.msra.gmra.mxu3 %vm702_vm1, %v6524_v5 }
 0x195   : > { %5435 = vmatmul.msk.bf16.vlgmr.msra.gmra.mxu0 %vm702_vm1, %v6533_v61  ;;  %5515 = vmatmul.msk.bf16.vlgmr.msra.gmra.mxu1 %vm702_vm1, %v5718_v15  ;;  %v5783_v15 = vld [vmem:[%s6012_s24 + $0x34] sm:$0xf] }
 0x196   : > { %v6593_v43 = vadd.f32 %v1924_v20, %v1850_v40  ;;  %v6603_v20 = vpack.c.b16 %v2155_v23, %v2154_v53  ;;  %v2050_v41 = vrot.slane %v5783_v15, 5  ;;  %v6629_v23 = vld [vmem:[%s6577_s14 + $0x18] sm:$0xff] }
 0x197   : > { %v1006_v3 = vpop.f32.mrf.mxu2  ;;  %v1663_v32 = vpop.f32.mrf.mxu3  ;;  %v5788_v15 = vld [vmem:[%s6012_s24 + $0x3c] sm:$0xf] }
 0x198   : > { %v1062_v37 = vadd.f32 %v1006_v3, %v6171_v10  ;;  %v2052_v40 = vrot.slane %v2050_v41, 4 }
 0x19a   : > { %v1719_v42 = vadd.f32 %v1663_v32, %v1062_v37  ;;  %v1797_v16 = vpop.f32.mrf.mxu0  ;;  %v1929_v58 = vpop.f32.mrf.mxu1 }
 0x19c   : > { %v1851_v0 = vadd.f32 %v1795_v12, %v1719_v42 }
 0x19e   : > { %v6600_v62 = vadd.f32 %v1927_v47, %v1851_v0  ;;  %v5785_v47 = vld [vmem:[%s6012_s24 + $0x30] sm:$0xf] }
 0x19f   : > { %v1008_v30 = vpop.f32.mrf.mxu2  ;;  %v1665_v34 = vpop.f32.mrf.mxu3  ;;  %v5386_v31 = vrot.slane %v5785_v47, 9 }
 0x1a0   : > { %v1063_v10 = vadd.f32 %v1008_v30, %v6180_v39  ;;  %v5784_v39 = vld [vmem:[%s6012_s24 + $0x38] sm:$0x1] }
 0x1a1   : > { %v2053_v12 = vrot.slane %v5784_v39, 5  ;;  %v2051_v32 = vsel %vm6503_vm7, %v5386_v31, %v2050_v41  ;;  %v5387_v41 = vrot.slane %v5788_v15, 9 }
 0x1a2   : > { %v1720_v51 = vadd.f32 %v1665_v34, %v1063_v10  ;;  %v1800_v7 = vpop.f32.mrf.mxu0  ;;  %v1932_v21 = vpop.f32.mrf.mxu1 }
 0x1a3   : > { %v2054_v37 = vsel %vm6503_vm7, %v2052_v40, %v2053_v12 }
 0x1a4   : > { %v1852_v17 = vadd.f32 %v1797_v16, %v1720_v51  ;;  %5402 = vmatmul.msk.bf16.gmra.mxu2 %vm702_vm1, %v6524_v5  ;;  %5419 = vmatmul.msk.bf16.gmra.mxu3 %vm702_vm1, %v6533_v61  ;;  %v2156_v16 = vunpack.c.l.b16 %v2051_v32  ;;  %v2157_v52 = vunpack.c.l.b16 %v2054_v37 }
 0x1a5   : > { %5436 = vmatmul.msk.bf16.gmra.mxu0 %vm702_vm1, %v6603_v20  ;;  %5516 = vmatmul.msk.bf16.gmra.mxu1 %vm702_vm1, %v5719_v25  ;;  %v5786_v25 = vld [vmem:[%s6012_s24 + $0x40] sm:$0xf] }
 0x1a6   : > { %v6616_v13 = vadd.f32 %v1929_v58, %v1852_v17  ;;  %v6626_v53 = vpack.c.b16 %v2157_v52, %v2156_v16  ;;  %v2057_v51 = vrot.slane %v5786_v25, 5  ;;  %v6655_v52 = vld [vmem:[%s6577_s14 + $0x24] sm:$0xff] }
 0x1a7   : > { %v1011_v1 = vpop.f32.mrf.mxu2  ;;  %v1668_v60 = vpop.f32.mrf.mxu3 }
 0x1a8   : > { %v1064_v5 = vadd.f32 %v1011_v1, %v6195_v55  ;;  %v2059_v17 = vrot.slane %v2057_v51, 4 }
 0x1aa   : > { %v1721_v19 = vadd.f32 %v1668_v60, %v1064_v5  ;;  %v1802_v8 = vpop.f32.mrf.mxu0  ;;  %v1934_v3 = vpop.f32.mrf.mxu1  ;;  %v2058_v60 = vsel %vm6503_vm7, %v5387_v41, %v2057_v51 }
 0x1ac   : > { %v1853_v42 = vadd.f32 %v1800_v7, %v1721_v19 }
 0x1ae   : > { %v6623_v58 = vadd.f32 %v1932_v21, %v1853_v42 }
 0x1af   : > { %v1013_v27 = vpop.f32.mrf.mxu2  ;;  %v1670_v0 = vpop.f32.mrf.mxu3 }
 0x1b0   : > { %v1065_v55 = vadd.f32 %v1013_v27, %v6204_v11  ;;  %v5787_v11 = vld [vmem:[%s6012_s24 + $0x44] sm:$0x1] }
 0x1b1   : > { %v2060_v21 = vrot.slane %v5787_v11, 5 }
 0x1b2   : > { %v1722_v30 = vadd.f32 %v1670_v0, %v1065_v55  ;;  %v1805_v34 = vpop.f32.mrf.mxu0  ;;  %v1937_v10 = vpop.f32.mrf.mxu1 }
 0x1b3   : > { %v2061_v5 = vsel %vm6503_vm7, %v2059_v17, %v2060_v21 }
 0x1b4   : > { %v1854_v7 = vadd.f32 %v1802_v8, %v1722_v30  ;;  %5403 = vmatmul.msk.bf16.gmra.mxu2 %vm702_vm1, %v6533_v61  ;;  %5420 = vmatmul.msk.bf16.gmra.mxu3 %vm702_vm1, %v6603_v20  ;;  %v2158_v8 = vunpack.c.l.b16 %v2058_v60  ;;  %v2159_v32 = vunpack.c.l.b16 %v2061_v5  ;;  %v5789_v30 = vld [vmem:[%s6012_s24 + $0x4c] sm:$0xf] }
 0x1b5   : > { %5437 = vmatmul.msk.bf16.gmra.mxu0 %vm702_vm1, %v6626_v53  ;;  %5517 = vmatmul.msk.bf16.gmra.mxu1 %vm702_vm1, %v6629_v23  ;;  %v2064_v25 = vrot.slane %v5789_v30, 5  ;;  %v5792_v30 = vld [vmem:[%s6012_s24 + $0x58] sm:$0xf] }
 0x1b6   : > { %v6642_v39 = vadd.f32 %v1934_v3, %v1854_v7  ;;  %v6652_v16 = vpack.c.b16 %v2159_v32, %v2158_v8  ;;  %v5791_v7 = vld [vmem:[%s6012_s24 + $0x50] sm:$0x1] }
 0x1b7   : > { %v1016_v12 = vpop.f32.mrf.mxu2  ;;  %v1673_v47 = vpop.f32.mrf.mxu3  ;;  %v2066_v51 = vrot.slane %v2064_v25, 4  ;;  %v2067_v11 = vrot.slane %v5791_v7, 5 }
 0x1b8   : > { %v1066_v61 = vadd.f32 %v1016_v12, %v6220_v26 }
 0x1ba   : > { %v1723_v31 = vadd.f32 %v1673_v47, %v1066_v61  ;;  %v1807_v40 = vpop.f32.mrf.mxu0  ;;  %v1939_v1 = vpop.f32.mrf.mxu1 }
 0x1bc   : > { %v1855_v19 = vadd.f32 %v1805_v34, %v1723_v31  ;;  %v2068_v31 = vsel %vm6503_vm7, %v2066_v51, %v2067_v11 }
 0x1bd   : > { %v2161_v5 = vunpack.c.l.b16 %v2068_v31 }
 0x1be   : > { %v6649_v3 = vadd.f32 %v1937_v10, %v1855_v19 }
 0x1bf   : > { %v1018_v37 = vpop.f32.mrf.mxu2  ;;  %v1675_v42 = vpop.f32.mrf.mxu3 }
 0x1c0   : > { %v1067_v26 = vadd.f32 %v1018_v37, %v6229_v57  ;;  %v5790_v57 = vld [vmem:[%s6012_s24 + $0x48] sm:$0xf]  ;;  %v6681_v37 = vld [vmem:[%s6577_s14 + $0x30] sm:$0xff] }
 0x1c1   : > { %v5388_v10 = vrot.slane %v5790_v57, 9  ;;  %v5794_v57 = vld [vmem:[%s6012_s24 + $0x5c] sm:$0x1] }
 0x1c2   : > { %v1724_v27 = vadd.f32 %v1675_v42, %v1067_v26  ;;  %v1810_v0 = vpop.f32.mrf.mxu0  ;;  %v1942_v55 = vpop.f32.mrf.mxu1 }
 0x1c3   : > { %v2065_v61 = vsel %vm6503_vm7, %v5388_v10, %v2064_v25  ;;  %v2071_v25 = vrot.slane %v5792_v30, 5  ;;  %v2074_v10 = vrot.slane %v5794_v57, 5 }
 0x1c4   : > { %v1856_v34 = vadd.f32 %v1807_v40, %v1724_v27  ;;  %5404 = vmatmul.msk.bf16.gmra.mxu2 %vm702_vm1, %v6603_v20  ;;  %5421 = vmatmul.msk.bf16.gmra.mxu3 %vm702_vm1, %v6626_v53  ;;  %v2160_v60 = vunpack.c.l.b16 %v2065_v61 }
 0x1c5   : > { %5438 = vmatmul.msk.bf16.gmra.mxu0 %vm702_vm1, %v6652_v16  ;;  %5518 = vmatmul.msk.bf16.gmra.mxu1 %vm702_vm1, %v6655_v52 }
 0x1c6   : > { %v6668_v21 = vadd.f32 %v1939_v1, %v1856_v34  ;;  %v6678_v32 = vpack.c.b16 %v2161_v5, %v2160_v60  ;;  %v2073_v34 = vrot.slane %v2071_v25, 4 }
 0x1c7   : > { %v1021_v15 = vpop.f32.mrf.mxu2  ;;  %v1678_v41 = vpop.f32.mrf.mxu3 }
 0x1c8   : > { %v1068_v20 = vadd.f32 %v1021_v15, %v6245_v14 }
 0x1ca   : > { %v1725_v17 = vadd.f32 %v1678_v41, %v1068_v20  ;;  %v1812_v12 = vpop.f32.mrf.mxu0  ;;  %v1944_v47 = vpop.f32.mrf.mxu1 }
 0x1cc   : > { %v1857_v40 = vadd.f32 %v1810_v0, %v1725_v17 }
 0x1ce   : > { %v6675_v1 = vadd.f32 %v1942_v55, %v1857_v40 }
 0x1cf   : > { %v1023_v19 = vpop.f32.mrf.mxu2  ;;  %v1680_v8 = vpop.f32.mrf.mxu3 }
 0x1d0   : > { %v1069_v14 = vadd.f32 %v1023_v19, %v6254_v44  ;;  %v5793_v44 = vld [vmem:[%s6012_s24 + $0x54] sm:$0xf] }
 0x1d1   : > { %v5389_v55 = vrot.slane %v5793_v44, 9 }
 0x1d2   : > { %v1726_v42 = vadd.f32 %v1680_v8, %v1069_v14  ;;  %v1815_v26 = vpop.f32.mrf.mxu0  ;;  %v1947_v27 = vpop.f32.mrf.mxu1  ;;  %v5723_v8 = vld [vmem:[%s6577_s14 + $0x3c] sm:$0xff] }
 0x1d3   : > { %v2072_v17 = vsel %vm6503_vm7, %v5389_v55, %v2071_v25  ;;  %v5795_v25 = vld [vmem:[%s6012_s24 + $0x64] sm:$0xf]  ;;  %v5797_v55 = vld [vmem:[%s6012_s24 + $0x68] sm:$0x1] }
 0x1d4   : > { %v1858_v0 = vadd.f32 %v1812_v12, %v1726_v42  ;;  %5405 = vmatmul.msk.bf16.gmra.mxu2 %vm702_vm1, %v6626_v53  ;;  %5422 = vmatmul.msk.bf16.gmra.mxu3 %vm702_vm1, %v6652_v16  ;;  %v2075_v12 = vsel %vm6503_vm7, %v2073_v34, %v2074_v10  ;;  %v2162_v31 = vunpack.c.l.b16 %v2072_v17  ;;  %v2081_v34 = vrot.slane %v5797_v55, 5 }
 0x1d5   : > { %5439 = vmatmul.msk.bf16.gmra.mxu0 %vm702_vm1, %v6678_v32  ;;  %5519 = vmatmul.msk.bf16.gmra.mxu1 %vm702_vm1, %v6681_v37  ;;  %v2163_v40 = vunpack.c.l.b16 %v2075_v12 }
 0x1d6   : > { %v6694_v51 = vadd.f32 %v1944_v47, %v1858_v0  ;;  %v2078_v0 = vrot.slane %v5795_v25, 5 }
 0x1d7   : > { %v1026_v7 = vpop.f32.mrf.mxu2  ;;  %v1683_v11 = vpop.f32.mrf.mxu3  ;;  %v6704_v19 = vpack.c.b16 %v2163_v40, %v2162_v31 }
 0x1d8   : > { %v1070_v53 = vadd.f32 %v1026_v7, %v6270_v4 }
 0x1da   : > { %v1727_v15 = vadd.f32 %v1683_v11, %v1070_v53  ;;  %v1817_v41 = vpop.f32.mrf.mxu0  ;;  %v1949_v20 = vpop.f32.mrf.mxu1 }
 0x1dc   : > { %v1859_v61 = vadd.f32 %v1815_v26, %v1727_v15 }
 0x1de   : > { %v6701_v47 = vadd.f32 %v1947_v27, %v1859_v61  ;;  %v2080_v27 = vrot.slane %v2078_v0, 4 }
 0x1df   : > { %v1028_v60 = vpop.f32.mrf.mxu2  ;;  %v1685_v5 = vpop.f32.mrf.mxu3 }
 0x1e0   : > { %v1071_v4 = vadd.f32 %v1028_v60, %v6279_v36  ;;  %v5796_v36 = vld [vmem:[%s6012_s24 + $0x60] sm:$0xf]  ;;  %v2082_v17 = vsel %vm6503_vm7, %v2080_v27, %v2081_v34 }
 0x1e1   : > { %v5390_v26 = vrot.slane %v5796_v36, 9  ;;  %v2165_v31 = vunpack.c.l.b16 %v2082_v17 }
 0x1e2   : > { %v1728_v14 = vadd.f32 %v1685_v5, %v1071_v4  ;;  %v1820_v42 = vpop.f32.mrf.mxu0  ;;  %v1952_v30 = vpop.f32.mrf.mxu1  ;;  %v5724_v4 = vld [vmem:[%s6577_s14 + $0x48] sm:$0xff] }
 0x1e4   : > { %v1860_v44 = vadd.f32 %v1817_v41, %v1728_v14  ;;  %5406 = vmatmul.msk.bf16.gmra.mxu2 %vm702_vm1, %v6652_v16  ;;  %5423 = vmatmul.msk.bf16.gmra.mxu3 %vm702_vm1, %v6678_v32  ;;  %v2079_v41 = vsel %vm6503_vm7, %v5390_v26, %v2078_v0  ;;  %v5798_v0 = vld [vmem:[%s6012_s24 + $0x70] sm:$0xf]  ;;  %v5800_v26 = vld [vmem:[%s6012_s24 + $0x74] sm:$0x1] }
 0x1e5   : > { %5440 = vmatmul.msk.bf16.gmra.mxu0 %vm702_vm1, %v6704_v19  ;;  %5520 = vmatmul.msk.bf16.gmra.mxu1 %vm702_vm1, %v5723_v8  ;;  %v2164_v61 = vunpack.c.l.b16 %v2079_v41  ;;  %v2088_v27 = vrot.slane %v5800_v26, 5 }
 0x1e6   : > { %v6717_v57 = vadd.f32 %v1949_v20, %v1860_v44  ;;  %v2085_v44 = vrot.slane %v5798_v0, 5 }
 0x1e7   : > { %v1031_v10 = vpop.f32.mrf.mxu2  ;;  %v1688_v7 = vpop.f32.mrf.mxu3  ;;  %v6727_v5 = vpack.c.b16 %v2165_v31, %v2164_v61 }
 0x1e8   : > { %v1072_v16 = vadd.f32 %v1031_v10, %v6295_v56 }
 0x1ea   : > { %v1729_v11 = vadd.f32 %v1688_v7, %v1072_v16  ;;  %v1822_v53 = vpop.f32.mrf.mxu0  ;;  %v1954_v15 = vpop.f32.mrf.mxu1 }
 0x1ec   : > { %v1861_v12 = vadd.f32 %v1820_v42, %v1729_v11 }
 0x1ee   : > { %v6724_v20 = vadd.f32 %v1952_v30, %v1861_v12  ;;  %v2087_v30 = vrot.slane %v2085_v44, 4 }
 0x1ef   : > { %v1033_v40 = vpop.f32.mrf.mxu2  ;;  %v1690_v60 = vpop.f32.mrf.mxu3 }
 0x1f0   : > { %v1073_v56 = vadd.f32 %v1033_v40, %v6304_v24  ;;  %v5799_v24 = vld [vmem:[%s6012_s24 + $0x6c] sm:$0xf]  ;;  %v2089_v41 = vsel %vm6503_vm7, %v2087_v30, %v2088_v27 }
 0x1f1   : > { %v5391_v42 = vrot.slane %v5799_v24, 9  ;;  %v2167_v61 = vunpack.c.l.b16 %v2089_v41 }
 0x1f2   : > { %v1730_v8 = vadd.f32 %v1690_v60, %v1073_v56  ;;  %v1825_v14 = vpop.f32.mrf.mxu0  ;;  %v1957_v25 = vpop.f32.mrf.mxu1  ;;  %v5725_v56 = vld [vmem:[%s6577_s14 + $0x54] sm:$0xff] }
 0x1f4   : > { %v1862_v36 = vadd.f32 %v1822_v53, %v1730_v8  ;;  %5407 = vmatmul.msk.bf16.gmra.mxu2 %vm702_vm1, %v6678_v32  ;;  %5424 = vmatmul.msk.bf16.gmra.mxu3 %vm702_vm1, %v6704_v19  ;;  %v2086_v53 = vsel %vm6503_vm7, %v5391_v42, %v2085_v44  ;;  %v5801_v44 = vld [vmem:[%s6012_s24 + $0x7c] sm:$0xf]  ;;  %v5803_v42 = vld [vmem:[%s6012_s24 + $0x80] sm:$0x1] }
 0x1f5   : > { %5441 = vmatmul.msk.bf16.gmra.mxu0 %vm702_vm1, %v6727_v5  ;;  %5521 = vmatmul.msk.bf16.gmra.mxu1 %vm702_vm1, %v5724_v4  ;;  %v2166_v12 = vunpack.c.l.b16 %v2086_v53  ;;  %v2095_v30 = vrot.slane %v5803_v42, 5 }
 0x1f6   : > { %v6740_v55 = vadd.f32 %v1954_v15, %v1862_v36  ;;  %v2092_v36 = vrot.slane %v5801_v44, 5 }
 0x1f7   : > { %v1036_v34 = vpop.f32.mrf.mxu2  ;;  %v1693_v10 = vpop.f32.mrf.mxu3  ;;  %v6750_v60 = vpack.c.b16 %v2167_v61, %v2166_v12 }
 0x1f8   : > { %v1074_v32 = vadd.f32 %v1036_v34, %v6320_v54 }
 0x1fa   : > { %v1731_v7 = vadd.f32 %v1693_v10, %v1074_v32  ;;  %v1827_v16 = vpop.f32.mrf.mxu0  ;;  %v1959_v11 = vpop.f32.mrf.mxu1 }
 0x1fc   : > { %v1863_v17 = vadd.f32 %v1825_v14, %v1731_v7 }
 0x1fe   : > { %v6747_v15 = vadd.f32 %v1957_v25, %v1863_v17  ;;  %v2094_v25 = vrot.slane %v2092_v36, 4 }
 0x1ff   : > { %v1038_v31 = vpop.f32.mrf.mxu2  ;;  %v1695_v40 = vpop.f32.mrf.mxu3 }
 0x200   : > { %v1075_v54 = vadd.f32 %v1038_v31, %v6329_v22  ;;  %v5802_v22 = vld [vmem:[%s6012_s24 + $0x78] sm:$0xf]  ;;  %v2096_v53 = vsel %vm6503_vm7, %v2094_v25, %v2095_v30 }
 0x201   : > { %v5392_v14 = vrot.slane %v5802_v22, 9  ;;  %v2169_v12 = vunpack.c.l.b16 %v2096_v53 }
 0x202   : > { %v1732_v4 = vadd.f32 %v1695_v40, %v1075_v54  ;;  %v1830_v8 = vpop.f32.mrf.mxu0  ;;  %v1962_v0 = vpop.f32.mrf.mxu1  ;;  %v5726_v54 = vld [vmem:[%s6577_s14 + $0x60] sm:$0xff] }
 0x204   : > { %v1864_v24 = vadd.f32 %v1827_v16, %v1732_v4  ;;  %5408 = vmatmul.msk.bf16.gmra.mxu2 %vm702_vm1, %v6704_v19  ;;  %5425 = vmatmul.msk.bf16.gmra.mxu3 %vm702_vm1, %v6727_v5  ;;  %v2093_v16 = vsel %vm6503_vm7, %v5392_v14, %v2092_v36  ;;  %v5804_v36 = vld [vmem:[%s6012_s24 + $0x88] sm:$0xf]  ;;  %v5806_v14 = vld [vmem:[%s6012_s24 + $0x8c] sm:$0x1] }
 0x205   : > { %5442 = vmatmul.msk.bf16.gmra.mxu0 %vm702_vm1, %v6750_v60  ;;  %5522 = vmatmul.msk.bf16.gmra.mxu1 %vm702_vm1, %v5725_v56  ;;  %v2168_v17 = vunpack.c.l.b16 %v2093_v16  ;;  %v2102_v25 = vrot.slane %v5806_v14, 5 }
 0x206   : > { %v6763_v26 = vadd.f32 %v1959_v11, %v1864_v24  ;;  %v2099_v24 = vrot.slane %v5804_v36, 5 }
 0x207   : > { %v1041_v27 = vpop.f32.mrf.mxu2  ;;  %v1698_v34 = vpop.f32.mrf.mxu3  ;;  %v6773_v40 = vpack.c.b16 %v2169_v12, %v2168_v17 }
 0x208   : > { %v1076_v19 = vadd.f32 %v1041_v27, %v6345_v45 }
 0x20a   : > { %v1733_v10 = vadd.f32 %v1698_v34, %v1076_v19  ;;  %v1832_v32 = vpop.f32.mrf.mxu0  ;;  %v1964_v7 = vpop.f32.mrf.mxu1 }
 0x20c   : > { %v1865_v41 = vadd.f32 %v1830_v8, %v1733_v10 }
 0x20e   : > { %v6770_v11 = vadd.f32 %v1962_v0, %v1865_v41  ;;  %v2101_v0 = vrot.slane %v2099_v24, 4 }
 0x20f   : > { %v1043_v61 = vpop.f32.mrf.mxu2  ;;  %v1700_v31 = vpop.f32.mrf.mxu3 }
 0x210   : > { %v1077_v45 = vadd.f32 %v1043_v61, %v6354_v35  ;;  %v5805_v35 = vld [vmem:[%s6012_s24 + $0x84] sm:$0xf]  ;;  %v2103_v16 = vsel %vm6503_vm7, %v2101_v0, %v2102_v25 }
 0x211   : > { %v5393_v8 = vrot.slane %v5805_v35, 9  ;;  %v2171_v17 = vunpack.c.l.b16 %v2103_v16 }
 0x212   : > { %v1734_v56 = vadd.f32 %v1700_v31, %v1077_v45  ;;  %v2520_v4 = vpop.f32.mrf.mxu0  ;;  %v2827_v44 = vpop.f32.mrf.mxu1  ;;  %v5727_v45 = vld [vmem:[%s6577_s14 + $0x6c] sm:$0xff] }
 0x214   : > { %v1866_v22 = vadd.f32 %v1832_v32, %v1734_v56  ;;  %5409 = vmatmul.msk.bf16.gmra.mxu2 %vm702_vm1, %v6727_v5  ;;  %5426 = vmatmul.msk.bf16.gmra.mxu3 %vm702_vm1, %v6750_v60  ;;  %v2100_v32 = vsel %vm6503_vm7, %v5393_v8, %v2099_v24  ;;  %v5807_v24 = vld [vmem:[%s6012_s24 + $0x94] sm:$0xf]  ;;  %v5809_v8 = vld [vmem:[%s6012_s24 + $0x98] sm:$0x1] }
 0x215   : > { %5443 = vmatmul.msk.bf16.gmra.mxu0 %vm702_vm1, %v6773_v40  ;;  %5523 = vmatmul.msk.bf16.gmra.mxu1 %vm702_vm1, %v5726_v54  ;;  %v2170_v41 = vunpack.c.l.b16 %v2100_v32  ;;  %v2109_v0 = vrot.slane %v5809_v8, 5 }
 0x216   : > { %v6786_v42 = vadd.f32 %v1964_v7, %v1866_v22  ;;  %v2106_v22 = vrot.slane %v5807_v24, 5 }
 0x217   : > { %v2256_v30 = vpop.f32.mrf.mxu2  ;;  %v2388_v27 = vpop.f32.mrf.mxu3  ;;  %v6796_v31 = vpack.c.b16 %v2171_v17, %v2170_v41 }
 0x218   : > { %v2336_v5 = vadd.f32 %v2256_v30, %v6373_v48 }
 0x21a   : > { %v2468_v34 = vadd.f32 %v2388_v27, %v2336_v5  ;;  %v2522_v19 = vpop.f32.mrf.mxu0  ;;  %v2829_v10 = vpop.f32.mrf.mxu1 }
 0x21c   : > { %v2600_v53 = vadd.f32 %v2520_v4, %v2468_v34 }
 0x21e   : > { %v6793_v7 = vadd.f32 %v2827_v44, %v2600_v53  ;;  %v2108_v44 = vrot.slane %v2106_v22, 4 }
 0x21f   : > { %v2258_v12 = vpop.f32.mrf.mxu2  ;;  %v2390_v61 = vpop.f32.mrf.mxu3 }
 0x220   : > { %v2337_v48 = vadd.f32 %v2258_v12, %v6388_v59  ;;  %v5808_v59 = vld [vmem:[%s6012_s24 + $0x90] sm:$0xf]  ;;  %v2110_v32 = vsel %vm6503_vm7, %v2108_v44, %v2109_v0 }
 0x221   : > { %v5394_v4 = vrot.slane %v5808_v59, 9  ;;  %v2173_v41 = vunpack.c.l.b16 %v2110_v32 }
 0x222   : > { %v2469_v54 = vadd.f32 %v2390_v61, %v2337_v48  ;;  %v2525_v56 = vpop.f32.mrf.mxu0  ;;  %v2832_v36 = vpop.f32.mrf.mxu1  ;;  %v5728_v48 = vld [vmem:[%s6577_s14 + $0x78] sm:$0xff] }
 0x224   : > { %v2601_v35 = vadd.f32 %v2522_v19, %v2469_v54  ;;  %5410 = vmatmul.msk.bf16.gmra.mxu2 %vm702_vm1, %v6750_v60  ;;  %5427 = vmatmul.msk.bf16.gmra.mxu3 %vm702_vm1, %v6773_v40  ;;  %v2107_v19 = vsel %vm6503_vm7, %v5394_v4, %v2106_v22  ;;  %v5810_v22 = vld [vmem:[%s6012_s24 + $0xa0] sm:$0xf]  ;;  %v5812_v4 = vld [vmem:[%s6012_s24 + $0xa4] sm:$0x1] }
 0x225   : > { %5444 = vmatmul.msk.bf16.gmra.mxu0 %vm702_vm1, %v6796_v31  ;;  %5524 = vmatmul.msk.bf16.gmra.mxu1 %vm702_vm1, %v5727_v45  ;;  %v2172_v53 = vunpack.c.l.b16 %v2107_v19  ;;  %v2116_v44 = vrot.slane %v5812_v4, 5 }
 0x226   : > { %v6809_v14 = vadd.f32 %v2829_v10, %v2601_v35  ;;  %v2113_v35 = vrot.slane %v5810_v22, 5 }
 0x227   : > { %v2261_v25 = vpop.f32.mrf.mxu2  ;;  %v2393_v30 = vpop.f32.mrf.mxu3  ;;  %v6819_v61 = vpack.c.b16 %v2173_v41, %v2172_v53 }
 0x228   : > { %v2338_v60 = vadd.f32 %v2261_v25, %v6396_v2 }
 0x22a   : > { %v2470_v27 = vadd.f32 %v2393_v30, %v2338_v60  ;;  %v2527_v5 = vpop.f32.mrf.mxu0  ;;  %v2834_v34 = vpop.f32.mrf.mxu1 }
 0x22c   : > { %v2602_v16 = vadd.f32 %v2525_v56, %v2470_v27 }
 0x22e   : > { %v6816_v10 = vadd.f32 %v2832_v36, %v2602_v16  ;;  %v2115_v36 = vrot.slane %v2113_v35, 4 }
 0x22f   : > { %v2263_v17 = vpop.f32.mrf.mxu2  ;;  %v2395_v12 = vpop.f32.mrf.mxu3 }
 0x230   : > { %v2339_v2 = vadd.f32 %v2263_v17, %v6411_v9  ;;  %v5811_v9 = vld [vmem:[%s6012_s24 + $0x9c] sm:$0xf]  ;;  %v2117_v19 = vsel %vm6503_vm7, %v2115_v36, %v2116_v44 }
 0x231   : > { %v5395_v56 = vrot.slane %v5811_v9, 9  ;;  %v2175_v53 = vunpack.c.l.b16 %v2117_v19 }
 0x232   : > { %v2471_v45 = vadd.f32 %v2395_v12, %v2339_v2  ;;  %v2530_v54 = vpop.f32.mrf.mxu0  ;;  %v2837_v24 = vpop.f32.mrf.mxu1  ;;  %v5729_v2 = vld [vmem:[%s6577_s14 + $0x84] sm:$0xff] }
 0x234   : > { %v2603_v59 = vadd.f32 %v2527_v5, %v2471_v45  ;;  %5411 = vmatmul.msk.bf16.gmra.mxu2 %vm702_vm1, %v6773_v40  ;;  %5428 = vmatmul.msk.bf16.gmra.mxu3 %vm702_vm1, %v6796_v31  ;;  %v2114_v5 = vsel %vm6503_vm7, %v5395_v56, %v2113_v35  ;;  %v5813_v35 = vld [vmem:[%s6012_s24 + $0xac] sm:$0xf]  ;;  %v5815_v56 = vld [vmem:[%s6012_s24 + $0xb0] sm:$0x1] }
 0x235   : > { %5445 = vmatmul.msk.bf16.gmra.mxu0 %vm702_vm1, %v6819_v61  ;;  %5525 = vmatmul.msk.bf16.gmra.mxu1 %vm702_vm1, %v5728_v48  ;;  %v2174_v16 = vunpack.c.l.b16 %v2114_v5  ;;  %v2123_v36 = vrot.slane %v5815_v56, 5  ;;  %v5818_v56 = vld [vmem:[%s6012_s24 + $0xbc] sm:$0x1] }
 0x236   : > { %v6832_v8 = vadd.f32 %v2834_v34, %v2603_v59  ;;  %v2120_v59 = vrot.slane %v5813_v35, 5 }
 0x237   : > { %v2266_v0 = vpop.f32.mrf.mxu2  ;;  %v2398_v25 = vpop.f32.mrf.mxu3  ;;  %v6842_v12 = vpack.c.b16 %v2175_v53, %v2174_v16 }
 0x238   : > { %v2340_v40 = vadd.f32 %v2266_v0, %v6419_v46 }
 0x23a   : > { %v2472_v30 = vadd.f32 %v2398_v25, %v2340_v40  ;;  %v2532_v60 = vpop.f32.mrf.mxu0  ;;  %v2839_v27 = vpop.f32.mrf.mxu1 }
 0x23c   : > { %v2604_v32 = vadd.f32 %v2530_v54, %v2472_v30 }
 0x23e   : > { %v6839_v34 = vadd.f32 %v2837_v24, %v2604_v32  ;;  %v2122_v24 = vrot.slane %v2120_v59, 4 }
 0x23f   : > { %v2268_v41 = vpop.f32.mrf.mxu2  ;;  %v2400_v17 = vpop.f32.mrf.mxu3 }
 0x240   : > { %v2341_v46 = vadd.f32 %v2268_v41, %v6434_v50  ;;  %v5814_v50 = vld [vmem:[%s6012_s24 + $0xa8] sm:$0xf]  ;;  %v2124_v5 = vsel %vm6503_vm7, %v2122_v24, %v2123_v36  ;;  %v2130_v36 = vrot.slane %v5818_v56, 5 }
 0x241   : > { %v5396_v54 = vrot.slane %v5814_v50, 9  ;;  %v2177_v16 = vunpack.c.l.b16 %v2124_v5 }
 0x242   : > { %v2473_v48 = vadd.f32 %v2400_v17, %v2341_v46  ;;  %v2535_v45 = vpop.f32.mrf.mxu0  ;;  %v2842_v22 = vpop.f32.mrf.mxu1  ;;  %v7908_v17 = vld [vmem:[#allocation2_spill] sm:$0xff] }
 0x244   : > { %v2605_v9 = vadd.f32 %v2532_v60, %v2473_v48  ;;  %5412 = vmatmul.msk.bf16.gmra.mxu2 %vm702_vm1, %v6796_v31  ;;  %5429 = vmatmul.msk.bf16.gmra.mxu3 %vm702_vm1, %v6819_v61  ;;  %v2121_v60 = vsel %vm6503_vm7, %v5396_v54, %v2120_v59 }
 0x245   : > { %5446 = vmatmul.msk.bf16.gmra.mxu0 %vm702_vm1, %v6842_v12  ;;  %5526 = vmatmul.msk.bf16.gmra.mxu1 %vm702_vm1, %v5729_v2  ;;  %v2176_v32 = vunpack.c.l.b16 %v2121_v60  ;;  %v5730_v2 = vld [vmem:[%s6577_s14 + $0x90] sm:$0xff] }
 0x246   : > { %v6855_v4 = vadd.f32 %v2839_v27, %v2605_v9  ;;  %v5816_v9 = vld [vmem:[%s6012_s24 + $0xb8] sm:$0xf] }
 0x247   : > { %v2271_v44 = vpop.f32.mrf.mxu2  ;;  %v2403_v0 = vpop.f32.mrf.mxu3  ;;  %v6865_v46 = vpack.c.b16 %v2177_v16, %v2176_v32  ;;  %v2127_v50 = vrot.slane %v5816_v9, 5 }
 0x248   : > { %v2342_v31 = vadd.f32 %v2271_v44, %v6442_v29 }
 0x249   : > { %v2129_v24 = vrot.slane %v2127_v50, 4 }
 0x24a   : > { %v2474_v25 = vadd.f32 %v2403_v0, %v2342_v31  ;;  %v2537_v40 = vpop.f32.mrf.mxu0  ;;  %v2844_v30 = vpop.f32.mrf.mxu1 }
 0x24b   : > { %v2131_v32 = vsel %vm6503_vm7, %v2129_v24, %v2130_v36 }
 0x24c   : > { %v2606_v19 = vadd.f32 %v2535_v45, %v2474_v25  ;;  %v5817_v45 = vld [vmem:[%s6012_s24 + $0xb4] sm:$0xf]  ;;  %v7910_v25 = vld [vmem:[#allocation3_spill] sm:$0xff] }
 0x24e   : > { %v6862_v27 = vadd.f32 %v2842_v22, %v2606_v19  ;;  %v5397_v22 = vrot.slane %v5817_v45, 9 }
 0x24f   : > { %v2273_v53 = vpop.f32.mrf.mxu2  ;;  %v2405_v41 = vpop.f32.mrf.mxu3 }
 0x250   : > { %7907 = vst [vmem:[#allocation6_spill] sm:$0xff] %v6862_v27  ;;  %v2343_v29 = vadd.f32 %v2273_v53, %v7908_v17  ;;  %v2128_v19 = vsel %vm6503_vm7, %v5397_v22, %v2127_v50  ;;  %v5819_v22 = vld [vmem:[%s6123_s16 + $0x4] sm:$0xf] }
 0x251   : > { %v2178_v53 = vunpack.c.l.b16 %v2128_v19 }
 0x252   : > { %v2475_v48 = vadd.f32 %v2405_v41, %v2343_v29  ;;  %v2540_v35 = vpop.f32.mrf.mxu0  ;;  %v2847_v59 = vpop.f32.mrf.mxu1  ;;  %v2179_v41 = vunpack.c.l.b16 %v2131_v32 }
 0x254   : > { %v2607_v54 = vadd.f32 %v2537_v40, %v2475_v48  ;;  %5413 = vmatmul.msk.bf16.gmra.mxu2 %vm702_vm1, %v6819_v61  ;;  %5430 = vmatmul.msk.bf16.gmra.mxu3 %vm702_vm1, %v6842_v12  ;;  %v6888_v9 = vpack.c.b16 %v2179_v41, %v2178_v53 }
 0x255   : > { %5447 = vmatmul.msk.bf16.gmra.mxu0 %vm702_vm1, %v6865_v46  ;;  %5527 = vmatmul.msk.bf16.gmra.mxu1 %vm702_vm1, %v5730_v2  ;;  %v7912_v2 = vld [vmem:[#allocation4_spill] sm:$0xff] }
 0x256   : > { %v6878_v44 = vadd.f32 %v2844_v30, %v2607_v54  ;;  %v5731_v54 = vld [vmem:[%s6577_s14 + $0x9c] sm:$0xff] }
 0x257   : > { %v2276_v0 = vpop.f32.mrf.mxu2  ;;  %v2408_v31 = vpop.f32.mrf.mxu3 }
 0x258   : > { %7909 = vst [vmem:[#allocation2_spill] sm:$0xff] %v6878_v44  ;;  %v2344_v61 = vadd.f32 %v2276_v0, %v7910_v25  ;;  %v2134_v0 = vrot.slane %v5819_v22, 5 }
 0x25a   : > { %v2476_v40 = vadd.f32 %v2408_v31, %v2344_v61  ;;  %v2542_v60 = vpop.f32.mrf.mxu0  ;;  %v2849_v5 = vpop.f32.mrf.mxu1  ;;  %v2136_v36 = vrot.slane %v2134_v0, 4  ;;  %v5821_v31 = vld [vmem:[%s6123_s16 + $0x8] sm:$0x1] }
 0x25b   : > { %v2137_v25 = vrot.slane %v5821_v31, 5 }
 0x25c   : > { %v2608_v16 = vadd.f32 %v2540_v35, %v2476_v40  ;;  %v5820_v35 = vld [vmem:[%s6123_s16] sm:$0xf] }
 0x25d   : > { %v2138_v41 = vsel %vm6503_vm7, %v2136_v36, %v2137_v25 }
 0x25e   : > { %v6885_v30 = vadd.f32 %v2847_v59, %v2608_v16  ;;  %v5398_v59 = vrot.slane %v5820_v35, 9 }
 0x25f   : > { %v2278_v17 = vpop.f32.mrf.mxu2  ;;  %v2410_v29 = vpop.f32.mrf.mxu3 }
 0x260   : > { %7911 = vst [vmem:[#allocation3_spill] sm:$0xff] %v6885_v30  ;;  %v2345_v48 = vadd.f32 %v2278_v17, %v7912_v2  ;;  %v2135_v53 = vsel %vm6503_vm7, %v5398_v59, %v2134_v0  ;;  %v5732_v0 = vld [vmem:[%s6577_s14 + $0xa8] sm:$0xff] }
 0x262   : > { %v2477_v45 = vadd.f32 %v2410_v29, %v2345_v48  ;;  %v2545_v56 = vpop.f32.mrf.mxu0  ;;  %v2852_v50 = vpop.f32.mrf.mxu1  ;;  %v2370_v29 = vunpack.c.l.b16 %v2135_v53 }
 0x264   : > { %v2609_v24 = vadd.f32 %v2542_v60, %v2477_v45  ;;  %5414 = vmatmul.msk.bf16.gmra.mxu2 %vm702_vm1, %v6842_v12  ;;  %5431 = vmatmul.msk.bf16.gmra.mxu3 %vm702_vm1, %v6865_v46 }
 0x265   : > { %5448 = vmatmul.msk.bf16.gmra.mxu0 %vm702_vm1, %v6888_v9  ;;  %5528 = vmatmul.msk.bf16.gmra.mxu1 %vm702_vm1, %v5731_v54 }
 0x266   : > { %v6901_v61 = vadd.f32 %v2849_v5, %v2609_v24  ;;  %v2371_v5 = vunpack.c.l.b16 %v2138_v41  ;;  %v2635_v41 = vld [vmem:[%s6577_s14 + $0xc] sm:$0xf] }
 0x267   : > { %v2281_v40 = vpop.f32.mrf.mxu2  ;;  %v2413_v60 = vpop.f32.mrf.mxu3 }
 0x268   : > { %7913 = vst [vmem:[#allocation4_spill] sm:$0xff] %v6901_v61  ;;  %v2346_v12 = vadd.f32 %v2281_v40, %v6507_v38  ;;  %v5822_v38 = vld [vmem:[%s6123_s16 + $0x10] sm:$0xf]  ;;  %v6912_v24 = vpack.c.b16 %v2371_v5, %v2370_v29  ;;  %v5733_v61 = vld [vmem:[%s6577_s14 + $0xb4] sm:$0xff] }
 0x269   : > { %v2141_v45 = vrot.slane %v5822_v38, 5  ;;  %v2636_v38 = vld [vmem:[%s6577_s14 + $0x10] sm:$0xf] }
 0x26a   : > { %v2478_v19 = vadd.f32 %v2413_v60, %v2346_v12  ;;  %v2547_v32 = vpop.f32.mrf.mxu0  ;;  %v2854_v16 = vpop.f32.mrf.mxu1  ;;  %v2632_v12 = vld [vmem:[%s6577_s14] sm:$0xf] }
 0x26b   : > { %v2143_v25 = vrot.slane %v2141_v45, 4 }
 0x26c   : > { %v2610_v17 = vadd.f32 %v2545_v56, %v2478_v19  ;;  %v5823_v56 = vld [vmem:[%s6123_s16 + $0xc] sm:$0xf] }
 0x26d   : > { %v5399_v31 = vrot.slane %v5823_v56, 9 }
 0x26e   : > { %v6908_v2 = vadd.f32 %v2852_v50, %v2610_v17  ;;  %v5824_v50 = vld [vmem:[%s6123_s16 + $0x14] sm:$0x1] }
 0x26f   : > { %v2283_v48 = vpop.f32.mrf.mxu2  ;;  %v2415_v54 = vpop.f32.mrf.mxu3  ;;  %v2144_v40 = vrot.slane %v5824_v50, 5 }
 0x270   : > { %7914 = vst [vmem:[#allocation7_spill] sm:$0xff] %v6908_v2  ;;  %v2347_v22 = vadd.f32 %v2283_v48, %v6544_v49  ;;  %v5607_v49 = vld [vmem:[%s7890_s5 + $0xe] sm:$0x3]  ;;  %v2142_v48 = vsel %vm6503_vm7, %v5399_v31, %v2141_v45  ;;  %v3245_v2 = vshrl.u32 %v2636_v38, 16 }
 0x271   : > { %v4002_v19 = vsel %vm751_vm0, %v5607_v49, 0  ;;  %v3232_v49 = vshrl.u32 %v2635_v41, 16  ;;  %v2502_v45 = vunpack.c.l.b16 %v2142_v48 }
 0x272   : > { %v2479_v35 = vadd.f32 %v2415_v54, %v2347_v22  ;;  %v2550_v59 = vpop.f32.mrf.mxu0  ;;  %v2857_v36 = vpop.f32.mrf.mxu1  ;;  %4011 = vmatpush.bf16.msra.mxu2 %v4002_v19  ;;  %v2145_v54 = vsel %vm6503_vm7, %v2143_v25, %v2144_v40  ;;  %v3235_v19 = vshll.u32 %v2635_v41, 16 }
 0x273   : > { %v2503_v31 = vunpack.c.l.b16 %v2145_v54 }
 0x274   : > { %v2611_v60 = vadd.f32 %v2547_v32, %v2479_v35  ;;  %5415 = vmatmul.msk.bf16.gmra.mxu2 %vm702_vm1, %v6865_v46  ;;  %5432 = vmatmul.msk.bf16.gmra.mxu3 %vm702_vm1, %v6888_v9  ;;  %v2633_v32 = vld [vmem:[%s6577_s14 + $0x4] sm:$0xf]  ;;  %v3211_v35 = vshll.u32 %v2632_v12, 16  ;;  %v3237_v41 = vrot.slane %v3235_v19, 5 }
 0x275   : > { %5449 = vmatmul.msk.bf16.gmra.mxu0 %vm702_vm1, %v6912_v24  ;;  %5529 = vmatmul.msk.bf16.gmra.mxu1 %vm702_vm1, %v5732_v0  ;;  %v5642_v46 = vld [vmem:[%s7890_s5 + $0x4] sm:$0x3]  ;;  %v3208_v0 = vshrl.u32 %v2632_v12, 16  ;;  %v3217_v56 = vshll.u32 %v2633_v32, 16  ;;  %v3221_v50 = vshrl.u32 %v2633_v32, 16  ;;  %v3234_v32 = vrot.slane %v3232_v49, 4 }
 0x276   : > { %v4368_v53 = vsel %vm751_vm0, %v5642_v46, 0  ;;  %v6935_v17 = vadd.f32 %v2854_v16, %v2611_v60  ;;  %v3213_v40 = vrot.slane %v3211_v35, 5 }
 0x277   : > { %v2286_v29 = vpop.f32.mrf.mxu2  ;;  %v2418_v5 = vpop.f32.mrf.mxu3  ;;  %4377 = vmatpush.bf16.msra.mxu3 %v4368_v53  ;;  %v3210_v25 = vrot.slane %v3208_v0, 4  ;;  %v3219_v53 = vrot.slane %v3217_v56, 5  ;;  %v3223_v12 = vrot.slane %v3221_v50, 4  ;;  %v2637_v0 = vld [vmem:[%s6577_s14 + $0x14] sm:$0x1]  ;;  %v3238_v49 = vor.u32 %v3237_v41, %v3234_v32 }
 0x278   : > { %7915 = vst [vmem:[#allocation8_spill] sm:$0xff] %v6935_v17  ;;  %v2348_v22 = vadd.f32 %v2286_v29, %v6556_v6  ;;  %v3241_v17 = vshll.u32 %v2636_v38, 16  ;;  %v5659_v6 = vld [vmem:[%s7890_s5 + $0xa] sm:$0x3]  ;;  %v3247_v38 = vrot.slane %v3245_v2, 4  ;;  %v3251_v2 = vshll.u32 %v2637_v0, 16 }
 0x279   : > { %v4500_v29 = vsel %vm751_vm0, %v5659_v6, 0  ;;  %v3214_v56 = vor.u32 %v3213_v40, %v3210_v25  ;;  %v3224_v30 = vor.u32 %v3223_v12, %v3219_v53  ;;  %v2638_v40 = vld [vmem:[%s6577_s14 + $0x18] sm:$0xf]  ;;  %v2639_v41 = vld [vmem:[%s6577_s14 + $0x1c] sm:$0xf] }
 0x27a   : > { %v2480_v16 = vadd.f32 %v2418_v5, %v2348_v22  ;;  %v2552_v60 = vpop.f32.mrf.mxu0  ;;  %v2859_v46 = vpop.f32.mrf.mxu1  ;;  %v2634_v5 = vld [vmem:[%s6577_s14 + $0x8] sm:$0x1]  ;;  %v3243_v22 = vrot.slane %v3241_v17, 5  ;;  %4509 = vmatpush.bf16.msra.mxu0 %v4500_v29 }
 0x27b   : > { %v3227_v50 = vshll.u32 %v2634_v5, 16 }
 0x27c   : > { %v2612_v18 = vadd.f32 %v2550_v59, %v2480_v16  ;;  %v2504_v16 = vpack.c.b16 %v2503_v31, %v2502_v45  ;;  %v3248_v27 = vor.u32 %v3247_v38, %v3243_v22  ;;  %v3239_v31 = vrot.slane %v3238_v49, 4 }
 0x27d   : > { %v3229_v45 = vrot.slane %v3227_v50, 5  ;;  %v3259_v38 = vshll.u32 %v2638_v40, 16 }
 0x27e   : > { %v6948_v48 = vadd.f32 %v2857_v36, %v2612_v18  ;;  %v3215_v18 = vrot.slane %v3214_v56, 4  ;;  %v3225_v36 = vrot.slane %v3224_v30, 4  ;;  %v3249_v25 = vrot.slane %v3248_v27, 4 }
 0x27f   : > { %v2288_v59 = vpop.f32.mrf.mxu2  ;;  %v2420_v54 = vpop.f32.mrf.mxu3  ;;  %v3256_v27 = vshrl.u32 %v2638_v40, 16 }
 0x280   : > { %v2349_v35 = vadd.f32 %v2288_v59, %v6570_v63  ;;  %v5676_v63 = vld [vmem:[%s7890_s5 + $0x10] sm:$0x3]  ;;  %v3220_v5 = vsel %vm6136_vm4, %v3215_v18, %v3219_v53  ;;  %v3230_v30 = vsel %vm6136_vm4, %v3225_v36, %v3229_v45  ;;  %v2640_v45 = vld [vmem:[%s6577_s14 + $0x20] sm:$0x1] }
 0x281   : > { %v3642_v53 = vunpack.c.l.b16 %v3230_v30 }
 0x282   : > { %v2481_v19 = vadd.f32 %v2420_v54, %v2349_v35  ;;  %v2555_v44 = vpop.f32.mrf.mxu0  ;;  %v2862_v6 = vpop.f32.mrf.mxu1  ;;  %v3265_v35 = vshll.u32 %v2639_v41, 16 }
 0x284   : > { %v2613_v17 = vadd.f32 %v2552_v60, %v2481_v19  ;;  %5416 = vmatmul.msk.bf16.gmra.mxu2 %vm702_vm1, %v6888_v9  ;;  %5433 = vmatmul.msk.bf16.gmra.mxu3 %vm702_vm1, %v6912_v24  ;;  %v4632_v60 = vsel %vm751_vm0, %v5676_v63, 0  ;;  %v3253_v9 = vrot.slane %v3251_v2, 5  ;;  %v3258_v19 = vrot.slane %v3256_v27, 4 }
 0x285   : > { %5450 = vmatmul.msk.bf16.gmra.mxu0 %vm702_vm1, %v2504_v16  ;;  %5530 = vmatmul.msk.bf16.gmra.mxu1 %vm702_vm1, %v5733_v61  ;;  %v3244_v61 = vsel %vm6136_vm4, %v3239_v31, %v3243_v22  ;;  %v3641_v16 = vunpack.c.l.b16 %v3220_v5  ;;  %v3261_v2 = vrot.slane %v3259_v38, 5  ;;  %v5825_v5 = vld [vmem:[%s6577_s14 + $0xc] sm:$0xff] }
 0x286   : > { %4641 = vmatpush.bf16.msra.mxu1 %v4632_v60  ;;  %v6964_v24 = vadd.f32 %v2859_v46, %v2613_v17  ;;  %v3254_v0 = vsel %vm6136_vm4, %v3249_v25, %v3253_v9  ;;  %v3643_v50 = vunpack.c.l.b16 %v3244_v61  ;;  %v3267_v17 = vrot.slane %v3265_v35, 5  ;;  %v2641_v61 = vld [vmem:[%s6577_s14 + $0x24] sm:$0xf] }
 0x287   : > { %v2291_v12 = vpop.f32.mrf.mxu2  ;;  %v2423_v32 = vpop.f32.mrf.mxu3  ;;  %v3644_v49 = vunpack.c.l.b16 %v3254_v0  ;;  %v3673_v60 = vpack.c.b16 %v3642_v53, %v3641_v16  ;;  %v2642_v0 = vld [vmem:[%s6577_s14 + $0x28] sm:$0xf] }
 0x288   : > { %v2350_v29 = vadd.f32 %v2291_v12, %v6579_v33  ;;  %v3269_v33 = vshrl.u32 %v2639_v41, 16  ;;  %v3275_v41 = vshll.u32 %v2640_v45, 16 }
 0x289   : > { %v3674_v25 = vpack.c.b16 %v3644_v49, %v3643_v50  ;;  %v3289_v49 = vshll.u32 %v2642_v0, 16 }
 0x28a   : > { %v2482_v59 = vadd.f32 %v2423_v32, %v2350_v29  ;;  %v2557_v54 = vpop.f32.mrf.mxu0  ;;  %v2864_v46 = vpop.f32.mrf.mxu1  ;;  %v3271_v22 = vrot.slane %v3269_v33, 4  ;;  %v3277_v30 = vrot.slane %v3275_v41, 5  ;;  %v3280_v33 = vshrl.u32 %v2641_v61, 16 }
 0x28c   : > { %v2614_v56 = vadd.f32 %v2555_v44, %v2482_v59  ;;  %v3262_v44 = vor.u32 %v3261_v2, %v3258_v19  ;;  %v3272_v32 = vor.u32 %v3271_v22, %v3267_v17 }
 0x28e   : > { %v6976_v18 = vadd.f32 %v2862_v6, %v2614_v56  ;;  %v3273_v6 = vrot.slane %v3272_v32, 4 }
 0x28f   : > { %v2293_v63 = vpop.f32.mrf.mxu2  ;;  %v2425_v36 = vpop.f32.mrf.mxu3 }
 0x290   : > { %v2351_v31 = vadd.f32 %v2293_v63, %v6593_v43  ;;  %v3263_v43 = vrot.slane %v3262_v44, 4  ;;  %v3278_v50 = vsel %vm6136_vm4, %v3273_v6, %v3277_v30  ;;  %v3282_v63 = vrot.slane %v3280_v33, 4  ;;  %v2643_v44 = vld [vmem:[%s6577_s14 + $0x2c] sm:$0x1]  ;;  %v2645_v33 = vld [vmem:[%s6577_s14 + $0x34] sm:$0xf] }
 0x291   : > { %v3646_v22 = vunpack.c.l.b16 %v3278_v50  ;;  %v3299_v6 = vshll.u32 %v2643_v44, 16 }
 0x292   : > { %v2483_v9 = vadd.f32 %v2425_v36, %v2351_v31  ;;  %v2560_v40 = vpop.f32.mrf.mxu0  ;;  %v2867_v12 = vpop.f32.mrf.mxu1  ;;  %v3268_v35 = vsel %vm6136_vm4, %v3263_v43, %v3267_v17 }
 0x293   : > { %v3645_v2 = vunpack.c.l.b16 %v3268_v35 }
 0x294   : > { %v2615_v29 = vadd.f32 %v2557_v54, %v2483_v9  ;;  %5536 = vmatmul.msk.bf16.vlgmr.msrb.gmra.mxu2 %vm702_vm1, %v5825_v5  ;;  %5557 = vmatmul.msk.bf16.vlgmr.msrb.gmra.mxu3 %vm702_vm1, %v6629_v23  ;;  %v3283_v23 = vshll.u32 %v2641_v61, 16  ;;  %v5826_v61 = vld [vmem:[%s6577_s14 + $0x18] sm:$0xff] }
 0x295   : > { %5574 = vmatmul.msk.bf16.vlgmr.msrb.gmra.mxu0 %vm702_vm1, %v3673_v60  ;;  %5591 = vmatmul.msk.bf16.vlgmr.msrb.gmra.mxu1 %vm702_vm1, %v3674_v25  ;;  %v6999_v32 = vpack.c.b16 %v3646_v22, %v3645_v2 }
 0x296   : > { %v6987_v27 = vadd.f32 %v2864_v46, %v2615_v29  ;;  %v3293_v46 = vshrl.u32 %v2642_v0, 16  ;;  %v3285_v36 = vrot.slane %v3283_v23, 5 }
 0x297   : > { %v2296_v38 = vpop.f32.mrf.mxu2  ;;  %v2428_v59 = vpop.f32.mrf.mxu3 }
 0x298   : > { %v2352_v54 = vadd.f32 %v2296_v38, %v6600_v62  ;;  %v3291_v62 = vrot.slane %v3289_v49, 5  ;;  %v3295_v45 = vrot.slane %v3293_v46, 4  ;;  %v3286_v41 = vor.u32 %v3285_v36, %v3282_v63 }
 0x299   : > { %v3301_v38 = vrot.slane %v3299_v6, 5 }
 0x29a   : > { %v2484_v56 = vadd.f32 %v2428_v59, %v2352_v54  ;;  %v2562_v16 = vpop.f32.mrf.mxu0  ;;  %v2869_v53 = vpop.f32.mrf.mxu1  ;;  %v3296_v43 = vor.u32 %v3295_v45, %v3291_v62  ;;  %v2644_v59 = vld [vmem:[%s6577_s14 + $0x30] sm:$0xf] }
 0x29c   : > { %v2616_v19 = vadd.f32 %v2560_v40, %v2484_v56 }
 0x29e   : > { %v6995_v17 = vadd.f32 %v2867_v12, %v2616_v19  ;;  %v3297_v12 = vrot.slane %v3296_v43, 4  ;;  %v3313_v19 = vshll.u32 %v2645_v33, 16 }
 0x29f   : > { %v2298_v31 = vpop.f32.mrf.mxu2  ;;  %v2430_v60 = vpop.f32.mrf.mxu3 }
 0x2a0   : > { %v2353_v9 = vadd.f32 %v2298_v31, %v6616_v13  ;;  %v3287_v13 = vrot.slane %v3286_v41, 4  ;;  %v3302_v46 = vsel %vm6136_vm4, %v3297_v12, %v3301_v38  ;;  %v5827_v38 = vld [vmem:[%s6577_s14 + $0x24] sm:$0xff] }
 0x2a1   : > { %v3648_v63 = vunpack.c.l.b16 %v3302_v46 }
 0x2a2   : > { %v2485_v29 = vadd.f32 %v2430_v60, %v2353_v9  ;;  %v2565_v40 = vpop.f32.mrf.mxu0  ;;  %v2872_v5 = vpop.f32.mrf.mxu1  ;;  %v3292_v56 = vsel %vm6136_vm4, %v3287_v13, %v3291_v62  ;;  %v2646_v9 = vld [vmem:[%s6577_s14 + $0x38] sm:$0x1] }
 0x2a3   : > { %v3647_v22 = vunpack.c.l.b16 %v3292_v56  ;;  %v3323_v13 = vshll.u32 %v2646_v9, 16  ;;  %v2648_v56 = vld [vmem:[%s6577_s14 + $0x40] sm:$0xf] }
 0x2a4   : > { %v2617_v30 = vadd.f32 %v2562_v16, %v2485_v29  ;;  %5537 = vmatmul.msk.bf16.gmra.mxu2 %vm702_vm1, %v5826_v61  ;;  %5558 = vmatmul.msk.bf16.gmra.mxu3 %vm702_vm1, %v6655_v52  ;;  %v3304_v52 = vshrl.u32 %v2644_v59, 16  ;;  %v3307_v16 = vshll.u32 %v2644_v59, 16 }
 0x2a5   : > { %5575 = vmatmul.msk.bf16.gmra.mxu0 %vm702_vm1, %v3674_v25  ;;  %5592 = vmatmul.msk.bf16.gmra.mxu1 %vm702_vm1, %v6999_v32  ;;  %v7021_v29 = vpack.c.b16 %v3648_v63, %v3647_v22  ;;  %v3325_v59 = vrot.slane %v3323_v13, 5 }
 0x2a6   : > { %v7009_v0 = vadd.f32 %v2869_v53, %v2617_v30  ;;  %v3317_v53 = vshrl.u32 %v2645_v33, 16  ;;  %v3306_v36 = vrot.slane %v3304_v52, 4  ;;  %v3309_v45 = vrot.slane %v3307_v16, 5 }
 0x2a7   : > { %v2301_v54 = vpop.f32.mrf.mxu2  ;;  %v2433_v35 = vpop.f32.mrf.mxu3 }
 0x2a8   : > { %v2354_v23 = vadd.f32 %v2301_v54, %v6623_v58  ;;  %v3315_v58 = vrot.slane %v3313_v19, 5  ;;  %v3319_v31 = vrot.slane %v3317_v53, 4  ;;  %v3310_v43 = vor.u32 %v3309_v45, %v3306_v36  ;;  %v2647_v54 = vld [vmem:[%s6577_s14 + $0x3c] sm:$0xf] }
 0x2a9   : > { %v3328_v16 = vshrl.u32 %v2647_v54, 16 }
 0x2aa   : > { %v2486_v25 = vadd.f32 %v2433_v35, %v2354_v23  ;;  %v2567_v50 = vpop.f32.mrf.mxu0  ;;  %v2874_v49 = vpop.f32.mrf.mxu1  ;;  %v3320_v61 = vor.u32 %v3319_v31, %v3315_v58 }
 0x2ab   : > { %v3330_v45 = vrot.slane %v3328_v16, 4  ;;  %v2651_v16 = vld [vmem:[%s6577_s14 + $0x4c] sm:$0xf] }
 0x2ac   : > { %v2618_v2 = vadd.f32 %v2565_v40, %v2486_v25  ;;  %v3331_v25 = vshll.u32 %v2647_v54, 16 }
 0x2ae   : > { %v7017_v62 = vadd.f32 %v2872_v5, %v2618_v2  ;;  %v3321_v5 = vrot.slane %v3320_v61, 4  ;;  %v3337_v2 = vshll.u32 %v2648_v56, 16  ;;  %v3333_v31 = vrot.slane %v3331_v25, 5 }
 0x2af   : > { %v2303_v60 = vpop.f32.mrf.mxu2  ;;  %v2435_v44 = vpop.f32.mrf.mxu3 }
 0x2b0   : > { %v2355_v41 = vadd.f32 %v2303_v60, %v6642_v39  ;;  %v3311_v39 = vrot.slane %v3310_v43, 4  ;;  %v3326_v53 = vsel %vm6136_vm4, %v3321_v5, %v3325_v59  ;;  %v3334_v61 = vor.u32 %v3333_v31, %v3330_v45  ;;  %v5828_v59 = vld [vmem:[%s6577_s14 + $0x30] sm:$0xff] }
 0x2b1   : > { %v3650_v36 = vunpack.c.l.b16 %v3326_v53 }
 0x2b2   : > { %v2487_v6 = vadd.f32 %v2435_v44, %v2355_v41  ;;  %v2570_v40 = vpop.f32.mrf.mxu0  ;;  %v2877_v30 = vpop.f32.mrf.mxu1  ;;  %v2649_v41 = vld [vmem:[%s6577_s14 + $0x44] sm:$0x1] }
 0x2b4   : > { %v2619_v12 = vadd.f32 %v2567_v50, %v2487_v6  ;;  %5538 = vmatmul.msk.bf16.gmra.mxu2 %vm702_vm1, %v5827_v38  ;;  %5559 = vmatmul.msk.bf16.gmra.mxu3 %vm702_vm1, %v6681_v37  ;;  %v3316_v37 = vsel %vm6136_vm4, %v3311_v39, %v3315_v58  ;;  %v3347_v39 = vshll.u32 %v2649_v41, 16 }
 0x2b5   : > { %5576 = vmatmul.msk.bf16.gmra.mxu0 %vm702_vm1, %v6999_v32  ;;  %5593 = vmatmul.msk.bf16.gmra.mxu1 %vm702_vm1, %v7021_v29  ;;  %v3649_v63 = vunpack.c.l.b16 %v3316_v37 }
 0x2b6   : > { %v7032_v35 = vadd.f32 %v2874_v49, %v2619_v12  ;;  %v3341_v49 = vshrl.u32 %v2648_v56, 16 }
 0x2b7   : > { %v2306_v33 = vpop.f32.mrf.mxu2  ;;  %v2438_v23 = vpop.f32.mrf.mxu3  ;;  %v7044_v6 = vpack.c.b16 %v3650_v36, %v3649_v63  ;;  %v3361_v36 = vshll.u32 %v2651_v16, 16 }
 0x2b8   : > { %v2356_v52 = vadd.f32 %v2306_v33, %v6649_v3  ;;  %v3339_v3 = vrot.slane %v3337_v2, 5  ;;  %v3343_v60 = vrot.slane %v3341_v49, 4  ;;  %v3349_v33 = vrot.slane %v3347_v39, 5 }
 0x2ba   : > { %v2488_v50 = vadd.f32 %v2438_v23, %v2356_v52  ;;  %v2572_v46 = vpop.f32.mrf.mxu0  ;;  %v2879_v19 = vpop.f32.mrf.mxu1  ;;  %v3344_v38 = vor.u32 %v3343_v60, %v3339_v3  ;;  %v2650_v23 = vld [vmem:[%s6577_s14 + $0x48] sm:$0xf] }
 0x2bb   : > { %v3355_v53 = vshll.u32 %v2650_v23, 16 }
 0x2bc   : > { %v2620_v22 = vadd.f32 %v2570_v40, %v2488_v50  ;;  %v3345_v54 = vrot.slane %v3344_v38, 4 }
 0x2be   : > { %v7040_v58 = vadd.f32 %v2877_v30, %v2620_v22  ;;  %v5829_v30 = vld [vmem:[%s6577_s14 + $0x3c] sm:$0xff]  ;;  %v3350_v63 = vsel %vm6136_vm4, %v3345_v54, %v3349_v33 }
 0x2bf   : > { %v2308_v44 = vpop.f32.mrf.mxu2  ;;  %v2440_v9 = vpop.f32.mrf.mxu3  ;;  %v3652_v60 = vunpack.c.l.b16 %v3350_v63 }
 0x2c0   : > { %v2357_v43 = vadd.f32 %v2308_v44, %v6668_v21  ;;  %v3335_v21 = vrot.slane %v3334_v61, 4 }
 0x2c2   : > { %v2489_v40 = vadd.f32 %v2440_v9, %v2357_v43  ;;  %v2575_v13 = vpop.f32.mrf.mxu0  ;;  %v2882_v12 = vpop.f32.mrf.mxu1  ;;  %v3340_v50 = vsel %vm6136_vm4, %v3335_v21, %v3339_v3  ;;  %v3357_v9 = vrot.slane %v3355_v53, 5  ;;  %v2654_v53 = vld [vmem:[%s6577_s14 + $0x58] sm:$0xf] }
 0x2c3   : > { %v3651_v31 = vunpack.c.l.b16 %v3340_v50 }
 0x2c4   : > { %v2621_v5 = vadd.f32 %v2572_v46, %v2489_v40  ;;  %5539 = vmatmul.msk.bf16.gmra.mxu2 %vm702_vm1, %v5828_v59  ;;  %5560 = vmatmul.msk.bf16.gmra.mxu3 %vm702_vm1, %v5829_v30  ;;  %v3352_v46 = vshrl.u32 %v2650_v23, 16  ;;  %v2652_v40 = vld [vmem:[%s6577_s14 + $0x50] sm:$0x1] }
 0x2c5   : > { %5577 = vmatmul.msk.bf16.gmra.mxu0 %vm702_vm1, %v7021_v29  ;;  %5594 = vmatmul.msk.bf16.gmra.mxu1 %vm702_vm1, %v7044_v6  ;;  %v7067_v39 = vpack.c.b16 %v3652_v60, %v3651_v31  ;;  %v3371_v33 = vshll.u32 %v2652_v40, 16  ;;  %v3385_v60 = vshll.u32 %v2654_v53, 16 }
 0x2c6   : > { %v7055_v56 = vadd.f32 %v2879_v19, %v2621_v5  ;;  %v3365_v19 = vshrl.u32 %v2651_v16, 16  ;;  %v3354_v44 = vrot.slane %v3352_v46, 4  ;;  %v2653_v16 = vld [vmem:[%s6577_s14 + $0x54] sm:$0xf] }
 0x2c7   : > { %v2311_v52 = vpop.f32.mrf.mxu2  ;;  %v2443_v37 = vpop.f32.mrf.mxu3  ;;  %v3379_v63 = vshll.u32 %v2653_v16, 16 }
 0x2c8   : > { %v2358_v25 = vadd.f32 %v2311_v52, %v6675_v1  ;;  %v3363_v1 = vrot.slane %v3361_v36, 5  ;;  %v3367_v41 = vrot.slane %v3365_v19, 4  ;;  %v3358_v5 = vor.u32 %v3357_v9, %v3354_v44 }
 0x2ca   : > { %v2490_v2 = vadd.f32 %v2443_v37, %v2358_v25  ;;  %v2577_v49 = vpop.f32.mrf.mxu0  ;;  %v2884_v22 = vpop.f32.mrf.mxu1  ;;  %v3368_v54 = vor.u32 %v3367_v41, %v3363_v1  ;;  %v3373_v37 = vrot.slane %v3371_v33, 5 }
 0x2cc   : > { %v2622_v45 = vadd.f32 %v2575_v13, %v2490_v2  ;;  %v3369_v52 = vrot.slane %v3368_v54, 4 }
 0x2ce   : > { %v7063_v3 = vadd.f32 %v2882_v12, %v2622_v45  ;;  %v5830_v12 = vld [vmem:[%s6577_s14 + $0x48] sm:$0xff]  ;;  %v3374_v31 = vsel %vm6136_vm4, %v3369_v52, %v3373_v37 }
 0x2cf   : > { %v2313_v43 = vpop.f32.mrf.mxu2  ;;  %v2445_v61 = vpop.f32.mrf.mxu3  ;;  %v3654_v41 = vunpack.c.l.b16 %v3374_v31 }
 0x2d0   : > { %v2359_v38 = vadd.f32 %v2313_v43, %v6694_v51  ;;  %v3359_v51 = vrot.slane %v3358_v5, 4 }
 0x2d2   : > { %v2491_v59 = vadd.f32 %v2445_v61, %v2359_v38  ;;  %v2580_v13 = vpop.f32.mrf.mxu0  ;;  %v2887_v21 = vpop.f32.mrf.mxu1  ;;  %v3364_v2 = vsel %vm6136_vm4, %v3359_v51, %v3363_v1  ;;  %v3381_v61 = vrot.slane %v3379_v63, 5 }
 0x2d3   : > { %v3653_v9 = vunpack.c.l.b16 %v3364_v2 }
 0x2d4   : > { %v2623_v23 = vadd.f32 %v2577_v49, %v2491_v59  ;;  %5540 = vmatmul.msk.bf16.gmra.mxu2 %vm702_vm1, %v5829_v30  ;;  %5561 = vmatmul.msk.bf16.gmra.mxu3 %vm702_vm1, %v5830_v12  ;;  %v3376_v49 = vshrl.u32 %v2653_v16, 16  ;;  %v2655_v59 = vld [vmem:[%s6577_s14 + $0x5c] sm:$0x1] }
 0x2d5   : > { %5578 = vmatmul.msk.bf16.gmra.mxu0 %vm702_vm1, %v7044_v6  ;;  %5595 = vmatmul.msk.bf16.gmra.mxu1 %vm702_vm1, %v7067_v39  ;;  %v7089_v33 = vpack.c.b16 %v3654_v41, %v3653_v9  ;;  %v3395_v16 = vshll.u32 %v2655_v59, 16 }
 0x2d6   : > { %v7077_v25 = vadd.f32 %v2884_v22, %v2623_v23  ;;  %v3389_v22 = vshrl.u32 %v2654_v53, 16  ;;  %v3378_v43 = vrot.slane %v3376_v49, 4 }
 0x2d7   : > { %v2316_v50 = vpop.f32.mrf.mxu2  ;;  %v2448_v46 = vpop.f32.mrf.mxu3  ;;  %v3397_v53 = vrot.slane %v3395_v16, 5 }
 0x2d8   : > { %v2360_v30 = vadd.f32 %v2316_v50, %v6701_v47  ;;  %v3387_v47 = vrot.slane %v3385_v60, 5  ;;  %v3391_v40 = vrot.slane %v3389_v22, 4  ;;  %v3382_v23 = vor.u32 %v3381_v61, %v3378_v43 }
 0x2da   : > { %v2492_v36 = vadd.f32 %v2448_v46, %v2360_v30  ;;  %v2582_v19 = vpop.f32.mrf.mxu0  ;;  %v2889_v45 = vpop.f32.mrf.mxu1  ;;  %v3392_v37 = vor.u32 %v3391_v40, %v3387_v47  ;;  %v2656_v30 = vld [vmem:[%s6577_s14 + $0x60] sm:$0xf] }
 0x2db   : > { %v3400_v31 = vshrl.u32 %v2656_v30, 16  ;;  %v3403_v60 = vshll.u32 %v2656_v30, 16 }
 0x2dc   : > { %v2624_v44 = vadd.f32 %v2580_v13, %v2492_v36  ;;  %v3393_v46 = vrot.slane %v3392_v37, 4  ;;  %v2657_v36 = vld [vmem:[%s6577_s14 + $0x64] sm:$0xf]  ;;  %v2658_v37 = vld [vmem:[%s6577_s14 + $0x68] sm:$0x1] }
 0x2dd   : > { %v3409_v43 = vshll.u32 %v2657_v36, 16  ;;  %v3405_v59 = vrot.slane %v3403_v60, 5 }
 0x2de   : > { %v7085_v1 = vadd.f32 %v2887_v21, %v2624_v44  ;;  %v5831_v21 = vld [vmem:[%s6577_s14 + $0x54] sm:$0xff]  ;;  %v3398_v41 = vsel %vm6136_vm4, %v3393_v46, %v3397_v53 }
 0x2df   : > { %v2318_v38 = vpop.f32.mrf.mxu2  ;;  %v2450_v5 = vpop.f32.mrf.mxu3 }
 0x2e0   : > { %v2361_v54 = vadd.f32 %v2318_v38, %v6717_v57  ;;  %v3383_v57 = vrot.slane %v3382_v23, 4  ;;  %v3656_v38 = vunpack.c.l.b16 %v3398_v41 }
 0x2e2   : > { %v2493_v51 = vadd.f32 %v2450_v5, %v2361_v54  ;;  %v2585_v13 = vpop.f32.mrf.mxu0  ;;  %v2892_v52 = vpop.f32.mrf.mxu1  ;;  %v3402_v5 = vrot.slane %v3400_v31, 4 }
 0x2e4   : > { %v2625_v50 = vadd.f32 %v2582_v19, %v2493_v51  ;;  %5541 = vmatmul.msk.bf16.gmra.mxu2 %vm702_vm1, %v5830_v12  ;;  %5562 = vmatmul.msk.bf16.gmra.mxu3 %vm702_vm1, %v5831_v21  ;;  %v3388_v19 = vsel %vm6136_vm4, %v3383_v57, %v3387_v47  ;;  %v3406_v57 = vor.u32 %v3405_v59, %v3402_v5 }
 0x2e5   : > { %5579 = vmatmul.msk.bf16.gmra.mxu0 %vm702_vm1, %v7067_v39  ;;  %5596 = vmatmul.msk.bf16.gmra.mxu1 %vm702_vm1, %v7089_v33  ;;  %v3655_v40 = vunpack.c.l.b16 %v3388_v19  ;;  %v2659_v19 = vld [vmem:[%s6577_s14 + $0x6c] sm:$0xf] }
 0x2e6   : > { %v7099_v2 = vadd.f32 %v2889_v45, %v2625_v50  ;;  %v3413_v45 = vshrl.u32 %v2657_v36, 16 }
 0x2e7   : > { %v2321_v49 = vpop.f32.mrf.mxu2  ;;  %v2453_v63 = vpop.f32.mrf.mxu3  ;;  %v7111_v50 = vpack.c.b16 %v3656_v38, %v3655_v40 }
 0x2e8   : > { %v2362_v12 = vadd.f32 %v2321_v49, %v6724_v20  ;;  %v3411_v20 = vrot.slane %v3409_v43, 5  ;;  %v3415_v54 = vrot.slane %v3413_v45, 4  ;;  %v3419_v49 = vshll.u32 %v2658_v37, 16 }
 0x2e9   : > { %v3424_v43 = vshrl.u32 %v2659_v19, 16  ;;  %v3427_v45 = vshll.u32 %v2659_v19, 16 }
 0x2ea   : > { %v2494_v22 = vadd.f32 %v2453_v63, %v2362_v12  ;;  %v2587_v44 = vpop.f32.mrf.mxu0  ;;  %v2894_v9 = vpop.f32.mrf.mxu1  ;;  %v3416_v30 = vor.u32 %v3415_v54, %v3411_v20  ;;  %v3421_v12 = vrot.slane %v3419_v49, 5  ;;  %v2661_v49 = vld [vmem:[%s6577_s14 + $0x74] sm:$0x1] }
 0x2eb   : > { %v3426_v37 = vrot.slane %v3424_v43, 4  ;;  %v2662_v43 = vld [vmem:[%s6577_s14 + $0x78] sm:$0xf] }
 0x2ec   : > { %v2626_v61 = vadd.f32 %v2585_v13, %v2494_v22  ;;  %v3417_v36 = vrot.slane %v3416_v30, 4 }
 0x2ee   : > { %v7107_v47 = vadd.f32 %v2892_v52, %v2626_v61  ;;  %v5832_v52 = vld [vmem:[%s6577_s14 + $0x60] sm:$0xff]  ;;  %v3422_v5 = vsel %vm6136_vm4, %v3417_v36, %v3421_v12 }
 0x2ef   : > { %v2323_v23 = vpop.f32.mrf.mxu2  ;;  %v2455_v51 = vpop.f32.mrf.mxu3 }
 0x2f0   : > { %v2363_v16 = vadd.f32 %v2323_v23, %v6740_v55  ;;  %v3407_v55 = vrot.slane %v3406_v57, 4 }
 0x2f2   : > { %v2495_v46 = vadd.f32 %v2455_v51, %v2363_v16  ;;  %v2590_v13 = vpop.f32.mrf.mxu0  ;;  %v2897_v53 = vpop.f32.mrf.mxu1  ;;  %v3412_v41 = vsel %vm6136_vm4, %v3407_v55, %v3411_v20  ;;  %v3658_v51 = vunpack.c.l.b16 %v3422_v5  ;;  %v3429_v16 = vrot.slane %v3427_v45, 5 }
 0x2f3   : > { %v3657_v23 = vunpack.c.l.b16 %v3412_v41 }
 0x2f4   : > { %v2627_v63 = vadd.f32 %v2587_v44, %v2495_v46  ;;  %5542 = vmatmul.msk.bf16.gmra.mxu2 %vm702_vm1, %v5831_v21  ;;  %5563 = vmatmul.msk.bf16.gmra.mxu3 %vm702_vm1, %v5832_v52  ;;  %v2660_v44 = vld [vmem:[%s6577_s14 + $0x70] sm:$0xf]  ;;  %v3430_v36 = vor.u32 %v3429_v16, %v3426_v37 }
 0x2f5   : > { %5580 = vmatmul.msk.bf16.gmra.mxu0 %vm702_vm1, %v7089_v33  ;;  %5597 = vmatmul.msk.bf16.gmra.mxu1 %vm702_vm1, %v7111_v50  ;;  %v3433_v59 = vshll.u32 %v2660_v44, 16  ;;  %v7133_v55 = vpack.c.b16 %v3658_v51, %v3657_v23 }
 0x2f6   : > { %v7121_v31 = vadd.f32 %v2894_v9, %v2627_v63  ;;  %v3437_v9 = vshrl.u32 %v2660_v44, 16 }
 0x2f7   : > { %v2326_v60 = vpop.f32.mrf.mxu2  ;;  %v2458_v22 = vpop.f32.mrf.mxu3 }
 0x2f8   : > { %v2364_v21 = vadd.f32 %v2326_v60, %v6747_v15  ;;  %v3435_v15 = vrot.slane %v3433_v59, 5  ;;  %v3439_v57 = vrot.slane %v3437_v9, 4  ;;  %v3448_v9 = vshrl.u32 %v2662_v43, 16 }
 0x2fa   : > { %v2496_v61 = vadd.f32 %v2458_v22, %v2364_v21  ;;  %v2592_v40 = vpop.f32.mrf.mxu0  ;;  %v2899_v38 = vpop.f32.mrf.mxu1  ;;  %v3440_v60 = vor.u32 %v3439_v57, %v3435_v15  ;;  %v3443_v22 = vshll.u32 %v2661_v49, 16 }
 0x2fc   : > { %v2628_v54 = vadd.f32 %v2590_v13, %v2496_v61  ;;  %v3441_v21 = vrot.slane %v3440_v60, 4  ;;  %v3445_v41 = vrot.slane %v3443_v22, 5 }
 0x2fe   : > { %v7129_v20 = vadd.f32 %v2897_v53, %v2628_v54  ;;  %v5833_v53 = vld [vmem:[%s6577_s14 + $0x6c] sm:$0xff]  ;;  %v3451_v54 = vshll.u32 %v2662_v43, 16  ;;  %v3446_v16 = vsel %vm6136_vm4, %v3441_v21, %v3445_v41 }
 0x2ff   : > { %v2328_v46 = vpop.f32.mrf.mxu2  ;;  %v2460_v30 = vpop.f32.mrf.mxu3  ;;  %v3660_v49 = vunpack.c.l.b16 %v3446_v16 }
 0x300   : > { %v2365_v63 = vadd.f32 %v2328_v46, %v6763_v26  ;;  %v3431_v26 = vrot.slane %v3430_v36, 4  ;;  %v3453_v36 = vrot.slane %v3451_v54, 5  ;;  %v2665_v54 = vld [vmem:[%s6577_s14 + $0x84] sm:$0xf] }
 0x302   : > { %v2497_v12 = vadd.f32 %v2460_v30, %v2365_v63  ;;  %v2595_v13 = vpop.f32.mrf.mxu0  ;;  %v2902_v19 = vpop.f32.mrf.mxu1  ;;  %v3436_v59 = vsel %vm6136_vm4, %v3431_v26, %v3435_v15  ;;  %v3450_v63 = vrot.slane %v3448_v9, 4 }
 0x303   : > { %v3659_v30 = vunpack.c.l.b16 %v3436_v59 }
 0x304   : > { %v2629_v44 = vadd.f32 %v2592_v40, %v2497_v12  ;;  %5543 = vmatmul.msk.bf16.gmra.mxu2 %vm702_vm1, %v5832_v52  ;;  %5564 = vmatmul.msk.bf16.gmra.mxu3 %vm702_vm1, %v5833_v53  ;;  %v2663_v40 = vld [vmem:[%s6577_s14 + $0x7c] sm:$0xf]  ;;  %v3454_v21 = vor.u32 %v3453_v36, %v3450_v63 }
 0x305   : > { %5581 = vmatmul.msk.bf16.gmra.mxu0 %vm702_vm1, %v7111_v50  ;;  %5598 = vmatmul.msk.bf16.gmra.mxu1 %vm702_vm1, %v7133_v55  ;;  %v3457_v57 = vshll.u32 %v2663_v40, 16  ;;  %v7155_v43 = vpack.c.b16 %v3660_v49, %v3659_v30  ;;  %v3475_v30 = vshll.u32 %v2665_v54, 16 }
 0x306   : > { %v7143_v45 = vadd.f32 %v2899_v38, %v2629_v44  ;;  %v3461_v38 = vshrl.u32 %v2663_v40, 16  ;;  %v2664_v44 = vld [vmem:[%s6577_s14 + $0x80] sm:$0x1] }
 0x307   : > { %v2331_v61 = vpop.f32.mrf.mxu2  ;;  %v2463_v5 = vpop.f32.mrf.mxu3  ;;  %v3467_v40 = vshll.u32 %v2664_v44, 16 }
 0x308   : > { %v2366_v52 = vadd.f32 %v2331_v61, %v6770_v11  ;;  %v3459_v11 = vrot.slane %v3457_v57, 5  ;;  %v3463_v12 = vrot.slane %v3461_v38, 4 }
 0x309   : > { %v3469_v9 = vrot.slane %v3467_v40, 5 }
 0x30a   : > { %v2498_v23 = vadd.f32 %v2463_v5, %v2366_v52  ;;  %v2597_v51 = vpop.f32.mrf.mxu0  ;;  %v2904_v37 = vpop.f32.mrf.mxu1  ;;  %v3464_v5 = vor.u32 %v3463_v12, %v3459_v11 }
 0x30c   : > { %v2630_v46 = vadd.f32 %v2595_v13, %v2498_v23  ;;  %v3465_v59 = vrot.slane %v3464_v5, 4 }
 0x30e   : > { %v7151_v15 = vadd.f32 %v2902_v19, %v2630_v46  ;;  %v5834_v19 = vld [vmem:[%s6577_s14 + $0x78] sm:$0xff]  ;;  %v3472_v46 = vshrl.u32 %v2665_v54, 16  ;;  %v3470_v12 = vsel %vm6136_vm4, %v3465_v59, %v3469_v9 }
 0x30f   : > { %v2333_v60 = vpop.f32.mrf.mxu2  ;;  %v2465_v22 = vpop.f32.mrf.mxu3 }
 0x310   : > { %v2367_v26 = vadd.f32 %v2333_v60, %v6786_v42  ;;  %v3455_v42 = vrot.slane %v3454_v21, 4  ;;  %v3474_v21 = vrot.slane %v3472_v46, 4 }
 0x312   : > { %v2499_v41 = vadd.f32 %v2465_v22, %v2367_v26  ;;  %v3749_v13 = vpop.f32.mrf.mxu0  ;;  %v3881_v61 = vpop.f32.mrf.mxu1  ;;  %v3460_v38 = vsel %vm6136_vm4, %v3455_v42, %v3459_v11  ;;  %v3662_v26 = vunpack.c.l.b16 %v3470_v12  ;;  %v2667_v42 = vld [vmem:[%s6577_s14 + $0x8c] sm:$0x1] }
 0x313   : > { %v3661_v44 = vunpack.c.l.b16 %v3460_v38 }
 0x314   : > { %v2631_v52 = vadd.f32 %v2597_v51, %v2499_v41  ;;  %5544 = vmatmul.msk.bf16.gmra.mxu2 %vm702_vm1, %v5833_v53  ;;  %5565 = vmatmul.msk.bf16.gmra.mxu3 %vm702_vm1, %v5834_v19  ;;  %v2666_v51 = vld [vmem:[%s6577_s14 + $0x88] sm:$0xf]  ;;  %v3477_v41 = vrot.slane %v3475_v30, 5 }
 0x315   : > { %5582 = vmatmul.msk.bf16.gmra.mxu0 %vm702_vm1, %v7133_v55  ;;  %5599 = vmatmul.msk.bf16.gmra.mxu1 %vm702_vm1, %v7155_v43  ;;  %v3481_v60 = vshll.u32 %v2666_v51, 16 }
 0x316   : > { %v7165_v23 = vadd.f32 %v2904_v37, %v2631_v52  ;;  %v3485_v37 = vshrl.u32 %v2666_v51, 16  ;;  %v3478_v59 = vor.u32 %v3477_v41, %v3474_v21 }
 0x317   : > { %v2961_v16 = vpop.f32.mrf.mxu2  ;;  %v3095_v57 = vpop.f32.mrf.mxu3 }
 0x318   : > { %v3041_v53 = vadd.f32 %v2961_v16, %v6793_v7  ;;  %v3483_v7 = vrot.slane %v3481_v60, 5  ;;  %v3487_v5 = vrot.slane %v3485_v37, 4  ;;  %v7177_v16 = vpack.c.b16 %v3662_v26, %v3661_v44 }
 0x31a   : > { %v3175_v49 = vadd.f32 %v3095_v57, %v3041_v53  ;;  %v3751_v63 = vpop.f32.mrf.mxu0  ;;  %v3883_v36 = vpop.f32.mrf.mxu1  ;;  %v3488_v51 = vor.u32 %v3487_v5, %v3483_v7  ;;  %v3491_v53 = vshll.u32 %v2667_v42, 16 }
 0x31c   : > { %v3829_v22 = vadd.f32 %v3749_v13, %v3175_v49  ;;  %v3489_v46 = vrot.slane %v3488_v51, 4  ;;  %v3493_v30 = vrot.slane %v3491_v53, 5  ;;  %v2668_v49 = vld [vmem:[%s6577_s14 + $0x90] sm:$0xf] }
 0x31d   : > { %v3496_v44 = vshrl.u32 %v2668_v49, 16  ;;  %v3499_v26 = vshll.u32 %v2668_v49, 16  ;;  %v2670_v49 = vld [vmem:[%s6577_s14 + $0x98] sm:$0x1] }
 0x31e   : > { %v7173_v11 = vadd.f32 %v3881_v61, %v3829_v22  ;;  %v5835_v61 = vld [vmem:[%s6577_s14 + $0x84] sm:$0xff] }
 0x31f   : > { %v2963_v40 = vpop.f32.mrf.mxu2  ;;  %v3097_v52 = vpop.f32.mrf.mxu3  ;;  %v3501_v51 = vrot.slane %v3499_v26, 5 }
 0x320   : > { %v3042_v54 = vadd.f32 %v2963_v40, %v6809_v14  ;;  %v3479_v14 = vrot.slane %v3478_v59, 4  ;;  %v3494_v40 = vsel %vm6136_vm4, %v3489_v46, %v3493_v30 }
 0x321   : > { %v3664_v59 = vunpack.c.l.b16 %v3494_v40  ;;  %v2671_v40 = vld [vmem:[%s6577_s14 + $0x9c] sm:$0xf] }
 0x322   : > { %v3176_v9 = vadd.f32 %v3097_v52, %v3042_v54  ;;  %v3754_v13 = vpop.f32.mrf.mxu0  ;;  %v3886_v57 = vpop.f32.mrf.mxu1  ;;  %v3484_v22 = vsel %vm6136_vm4, %v3479_v14, %v3483_v7 }
 0x323   : > { %v3663_v54 = vunpack.c.l.b16 %v3484_v22  ;;  %v3515_v22 = vshll.u32 %v2670_v49, 16 }
 0x324   : > { %v3830_v38 = vadd.f32 %v3751_v63, %v3176_v9  ;;  %5545 = vmatmul.msk.bf16.gmra.mxu2 %vm702_vm1, %v5834_v19  ;;  %5566 = vmatmul.msk.bf16.gmra.mxu3 %vm702_vm1, %v5835_v61  ;;  %v2669_v63 = vld [vmem:[%s6577_s14 + $0x94] sm:$0xf]  ;;  %v3498_v9 = vrot.slane %v3496_v44, 4 }
 0x325   : > { %5583 = vmatmul.msk.bf16.gmra.mxu0 %vm702_vm1, %v7155_v43  ;;  %5600 = vmatmul.msk.bf16.gmra.mxu1 %vm702_vm1, %v7177_v16  ;;  %v3505_v52 = vshll.u32 %v2669_v63, 16 }
 0x326   : > { %v7187_v12 = vadd.f32 %v3883_v36, %v3830_v38  ;;  %v3509_v36 = vshrl.u32 %v2669_v63, 16  ;;  %v3502_v46 = vor.u32 %v3501_v51, %v3498_v9  ;;  %v3523_v9 = vshll.u32 %v2671_v40, 16 }
 0x327   : > { %v2966_v60 = vpop.f32.mrf.mxu2  ;;  %v3100_v37 = vpop.f32.mrf.mxu3 }
 0x328   : > { %v3043_v19 = vadd.f32 %v2966_v60, %v6816_v10  ;;  %v3507_v10 = vrot.slane %v3505_v52, 5  ;;  %v3511_v53 = vrot.slane %v3509_v36, 4 }
 0x32a   : > { %v3177_v21 = vadd.f32 %v3100_v37, %v3043_v19  ;;  %v3756_v41 = vpop.f32.mrf.mxu0  ;;  %v3888_v5 = vpop.f32.mrf.mxu1  ;;  %v7199_v37 = vpack.c.b16 %v3664_v59, %v3663_v54  ;;  %v3512_v19 = vor.u32 %v3511_v53, %v3507_v10  ;;  %v3520_v59 = vshrl.u32 %v2671_v40, 16 }
 0x32c   : > { %v3831_v42 = vadd.f32 %v3754_v13, %v3177_v21  ;;  %7917 = vst [vmem:[#allocation10_spill] sm:$0xff] %v7199_v37  ;;  %v3513_v26 = vrot.slane %v3512_v19, 4  ;;  %v3517_v21 = vrot.slane %v3515_v22, 5  ;;  %v3522_v19 = vrot.slane %v3520_v59, 4 }
 0x32d   : > { %v3525_v22 = vrot.slane %v3523_v9, 5 }
 0x32e   : > { %v7195_v7 = vadd.f32 %v3886_v57, %v3831_v42  ;;  %v5836_v57 = vld [vmem:[%s6577_s14 + $0x90] sm:$0xff] }
 0x32f   : > { %v2968_v38 = vpop.f32.mrf.mxu2  ;;  %v3102_v14 = vpop.f32.mrf.mxu3 }
 0x330   : > { %7916 = vst [vmem:[#allocation9_spill] sm:$0xff] %v7195_v7  ;;  %v3044_v60 = vadd.f32 %v2968_v38, %v6832_v8  ;;  %v3503_v8 = vrot.slane %v3502_v46, 4  ;;  %v2682_v7 = vld [vmem:[%s7275_s26 + $0x8] sm:$0x1] }
 0x332   : > { %v3178_v30 = vadd.f32 %v3102_v14, %v3044_v60  ;;  %v3759_v13 = vpop.f32.mrf.mxu0  ;;  %v3891_v63 = vpop.f32.mrf.mxu1  ;;  %v3508_v54 = vsel %vm6136_vm4, %v3503_v8, %v3507_v10  ;;  %v3518_v14 = vsel %vm6136_vm4, %v3513_v26, %v3517_v21  ;;  %v3526_v26 = vor.u32 %v3525_v22, %v3522_v19 }
 0x333   : > { %v3665_v46 = vunpack.c.l.b16 %v3508_v54 }
 0x334   : > { %v3832_v44 = vadd.f32 %v3756_v41, %v3178_v30  ;;  %5546 = vmatmul.msk.bf16.gmra.mxu2 %vm702_vm1, %v5835_v61  ;;  %5567 = vmatmul.msk.bf16.gmra.mxu3 %vm702_vm1, %v5836_v57  ;;  %v2672_v41 = vld [vmem:[%s6577_s14 + $0xa0] sm:$0xf]  ;;  %v3666_v30 = vunpack.c.l.b16 %v3518_v14 }
 0x335   : > { %5584 = vmatmul.msk.bf16.gmra.mxu0 %vm702_vm1, %v7177_v16  ;;  %5601 = vmatmul.msk.bf16.gmra.mxu1 %vm702_vm1, %v7199_v37  ;;  %v3529_v49 = vshll.u32 %v2672_v41, 16 }
 0x336   : > { %v7209_v52 = vadd.f32 %v3888_v5, %v3832_v44  ;;  %v3533_v5 = vshrl.u32 %v2672_v41, 16 }
 0x337   : > { %v2971_v36 = vpop.f32.mrf.mxu2  ;;  %v3105_v42 = vpop.f32.mrf.mxu3 }
 0x338   : > { %7918 = vst [vmem:[#allocation11_spill] sm:$0xff] %v7209_v52  ;;  %v3045_v61 = vadd.f32 %v2971_v36, %v6839_v34  ;;  %v3531_v34 = vrot.slane %v3529_v49, 5  ;;  %v3535_v44 = vrot.slane %v3533_v5, 4  ;;  %v2673_v36 = vld [vmem:[%s6577_s14 + $0xa4] sm:$0x1] }
 0x339   : > { %v3539_v59 = vshll.u32 %v2673_v36, 16  ;;  %v2674_v49 = vld [vmem:[%s6577_s14 + $0xa8] sm:$0xf] }
 0x33a   : > { %v3179_v51 = vadd.f32 %v3105_v42, %v3045_v61  ;;  %v3761_v53 = vpop.f32.mrf.mxu0  ;;  %v3893_v38 = vpop.f32.mrf.mxu1  ;;  %v7221_v61 = vpack.c.b16 %v3666_v30, %v3665_v46  ;;  %v3536_v54 = vor.u32 %v3535_v44, %v3531_v34  ;;  %v7922_v30 = vld [vmem:[#allocation6_spill] sm:$0xff]  ;;  %v3544_v22 = vshrl.u32 %v2674_v49, 16 }
 0x33b   : > { %v3541_v14 = vrot.slane %v3539_v59, 5  ;;  %v3547_v44 = vshll.u32 %v2674_v49, 16 }
 0x33c   : > { %v3833_v60 = vadd.f32 %v3759_v13, %v3179_v51  ;;  %7920 = vst [vmem:[#allocation13_spill] sm:$0xff] %v7221_v61  ;;  %v3537_v51 = vrot.slane %v3536_v54, 4 }
 0x33e   : > { %v7217_v10 = vadd.f32 %v3891_v63, %v3833_v60  ;;  %v5837_v63 = vld [vmem:[%s6577_s14 + $0x9c] sm:$0xff] }
 0x33f   : > { %v2973_v8 = vpop.f32.mrf.mxu2  ;;  %v3107_v40 = vpop.f32.mrf.mxu3 }
 0x340   : > { %7919 = vst [vmem:[#allocation12_spill] sm:$0xff] %v7217_v10  ;;  %v3046_v42 = vadd.f32 %v2973_v8, %v6855_v4  ;;  %v3527_v4 = vrot.slane %v3526_v26, 4 }
 0x342   : > { %v3180_v21 = vadd.f32 %v3107_v40, %v3046_v42  ;;  %v3764_v13 = vpop.f32.mrf.mxu0  ;;  %v3896_v41 = vpop.f32.mrf.mxu1  ;;  %v3532_v19 = vsel %vm6136_vm4, %v3527_v4, %v3531_v34  ;;  %v3542_v42 = vsel %vm6136_vm4, %v3537_v51, %v3541_v14 }
 0x343   : > { %v3667_v54 = vunpack.c.l.b16 %v3532_v19  ;;  %v3668_v59 = vunpack.c.l.b16 %v3542_v42  ;;  %v2677_v42 = vld [vmem:[%s6577_s14 + $0xb4] sm:$0xf] }
 0x344   : > { %v3834_v9 = vadd.f32 %v3761_v53, %v3180_v21  ;;  %5547 = vmatmul.msk.bf16.gmra.mxu2 %vm702_vm1, %v5836_v57  ;;  %5568 = vmatmul.msk.bf16.gmra.mxu3 %vm702_vm1, %v5837_v63  ;;  %v2675_v53 = vld [vmem:[%s6577_s14 + $0xac] sm:$0xf] }
 0x345   : > { %5585 = vmatmul.msk.bf16.gmra.mxu0 %vm702_vm1, %v7199_v37  ;;  %5602 = vmatmul.msk.bf16.gmra.mxu1 %vm702_vm1, %v7221_v61  ;;  %v3553_v26 = vshll.u32 %v2675_v53, 16  ;;  %v7243_v52 = vpack.c.b16 %v3668_v59, %v3667_v54  ;;  %v7927_v54 = vld [vmem:[#allocation3_spill] sm:$0xff] }
 0x346   : > { %v7231_v5 = vadd.f32 %v3893_v38, %v3834_v9  ;;  %v3557_v38 = vshrl.u32 %v2675_v53, 16  ;;  %v3546_v9 = vrot.slane %v3544_v22, 4 }
 0x347   : > { %v2976_v60 = vpop.f32.mrf.mxu2  ;;  %v3110_v46 = vpop.f32.mrf.mxu3 }
 0x348   : > { %7921 = vst [vmem:[#allocation14_spill] sm:$0xff] %v7231_v5  ;;  %v3047_v57 = vadd.f32 %v2976_v60, %v7922_v30  ;;  %v3549_v5 = vrot.slane %v3547_v44, 5  ;;  %v3555_v60 = vrot.slane %v3553_v26, 5  ;;  %v3559_v30 = vrot.slane %v3557_v38, 4 }
 0x34a   : > { %v3181_v8 = vadd.f32 %v3110_v46, %v3047_v57  ;;  %v3766_v40 = vpop.f32.mrf.mxu0  ;;  %v3898_v36 = vpop.f32.mrf.mxu1  ;;  %v2676_v46 = vld [vmem:[%s6577_s14 + $0xb0] sm:$0x1]  ;;  %v7924_v57 = vld [vmem:[#allocation2_spill] sm:$0xff]  ;;  %v3550_v51 = vor.u32 %v3549_v5, %v3546_v9  ;;  %v3560_v19 = vor.u32 %v3559_v30, %v3555_v60  ;;  %v3568_v9 = vshrl.u32 %v2677_v42, 16 }
 0x34b   : > { %7925 = vst [vmem:[#allocation2_spill] sm:$0xff] %v7243_v52  ;;  %v3563_v22 = vshll.u32 %v2676_v46, 16  ;;  %v3571_v30 = vshll.u32 %v2677_v42, 16 }
 0x34c   : > { %v3835_v21 = vadd.f32 %v3764_v13, %v3181_v8  ;;  %v3551_v8 = vrot.slane %v3550_v51, 4  ;;  %v3561_v5 = vrot.slane %v3560_v19, 4 }
 0x34e   : > { %v7239_v34 = vadd.f32 %v3896_v41, %v3835_v21  ;;  %v5838_v41 = vld [vmem:[%s6577_s14 + $0xa8] sm:$0xff]  ;;  %v3556_v59 = vsel %vm6136_vm4, %v3551_v8, %v3555_v60 }
 0x34f   : > { %v2978_v4 = vpop.f32.mrf.mxu2  ;;  %v3112_v49 = vpop.f32.mrf.mxu3  ;;  %v3669_v19 = vunpack.c.l.b16 %v3556_v59 }
 0x350   : > { %7923 = vst [vmem:[#allocation6_spill] sm:$0xff] %v7239_v34  ;;  %v3048_v10 = vadd.f32 %v2978_v4, %v7924_v57 }
 0x352   : > { %v3182_v14 = vadd.f32 %v3112_v49, %v3048_v10  ;;  %v3769_v13 = vpop.f32.mrf.mxu0  ;;  %v3901_v53 = vpop.f32.mrf.mxu1  ;;  %v3565_v10 = vrot.slane %v3563_v22, 5 }
 0x354   : > { %v3836_v44 = vadd.f32 %v3766_v40, %v3182_v14  ;;  %5548 = vmatmul.msk.bf16.gmra.mxu2 %vm702_vm1, %v5837_v63  ;;  %5569 = vmatmul.msk.bf16.gmra.mxu3 %vm702_vm1, %v5838_v41  ;;  %v2678_v40 = vld [vmem:[%s6577_s14 + $0xb8] sm:$0xf]  ;;  %v3566_v57 = vsel %vm6136_vm4, %v3561_v5, %v3565_v10 }
 0x355   : > { %5586 = vmatmul.msk.bf16.gmra.mxu0 %vm702_vm1, %v7221_v61  ;;  %5603 = vmatmul.msk.bf16.gmra.mxu1 %vm702_vm1, %v7243_v52  ;;  %v3577_v51 = vshll.u32 %v2678_v40, 16  ;;  %v3670_v22 = vunpack.c.l.b16 %v3566_v57 }
 0x356   : > { %v7253_v26 = vadd.f32 %v3898_v36, %v3836_v44  ;;  %v3581_v36 = vshrl.u32 %v2678_v40, 16  ;;  %v3570_v44 = vrot.slane %v3568_v9, 4 }
 0x357   : > { %v2981_v38 = vpop.f32.mrf.mxu2  ;;  %v3115_v21 = vpop.f32.mrf.mxu3  ;;  %v7265_v61 = vpack.c.b16 %v3670_v22, %v3669_v19 }
 0x358   : > { %7926 = vst [vmem:[#allocation15_spill] sm:$0xff] %v7253_v26  ;;  %v3049_v63 = vadd.f32 %v2981_v38, %v7927_v54  ;;  %v3573_v26 = vrot.slane %v3571_v30, 5  ;;  %v3579_v38 = vrot.slane %v3577_v51, 5  ;;  %v3583_v54 = vrot.slane %v3581_v36, 4  ;;  %v2681_v36 = vld [vmem:[%s7275_s26 + $0x4] sm:$0xf] }
 0x35a   : > { %v3183_v4 = vadd.f32 %v3115_v21, %v3049_v63  ;;  %v3771_v49 = vpop.f32.mrf.mxu0  ;;  %v3903_v46 = vpop.f32.mrf.mxu1  ;;  %v2679_v21 = vld [vmem:[%s6577_s14 + $0xbc] sm:$0x1]  ;;  %v7929_v63 = vld [vmem:[#allocation4_spill] sm:$0xff]  ;;  %v3574_v5 = vor.u32 %v3573_v26, %v3570_v44  ;;  %v3584_v59 = vor.u32 %v3583_v54, %v3579_v38  ;;  %v2680_v26 = vld [vmem:[%s7275_s26] sm:$0xf] }
 0x35b   : > { %v3587_v9 = vshll.u32 %v2679_v21, 16  ;;  %v3592_v44 = vshrl.u32 %v2680_v26, 16  ;;  %v3595_v54 = vshll.u32 %v2680_v26, 16 }
 0x35c   : > { %v3837_v14 = vadd.f32 %v3769_v13, %v3183_v4  ;;  %v5839_v4 = vld [vmem:[%s6577_s14 + $0xb4] sm:$0xff] }
 0x35e   : > { %v7261_v60 = vadd.f32 %v3901_v53, %v3837_v14  ;;  %v3585_v53 = vrot.slane %v3584_v59, 4  ;;  %v7931_v14 = vld [vmem:[#allocation7_spill] sm:$0xff] }
 0x35f   : > { %v2983_v8 = vpop.f32.mrf.mxu2  ;;  %v3117_v42 = vpop.f32.mrf.mxu3 }
 0x360   : > { %7928 = vst [vmem:[#allocation3_spill] sm:$0xff] %v7261_v60  ;;  %v3050_v34 = vadd.f32 %v2983_v8, %v7929_v63 }
 0x362   : > { %v3184_v10 = vadd.f32 %v3117_v42, %v3050_v34  ;;  %v3774_v13 = vpop.f32.mrf.mxu0  ;;  %v3906_v40 = vpop.f32.mrf.mxu1  ;;  %v3575_v34 = vrot.slane %v3574_v5, 4  ;;  %v3605_v5 = vshrl.u32 %v2681_v36, 16 }
 0x364   : > { %v3838_v30 = vadd.f32 %v3771_v49, %v3184_v10  ;;  %5549 = vmatmul.msk.bf16.gmra.mxu2 %vm702_vm1, %v5838_v41  ;;  %5570 = vmatmul.msk.bf16.gmra.mxu3 %vm702_vm1, %v5839_v4  ;;  %v3589_v41 = vrot.slane %v3587_v9, 5  ;;  %v3580_v22 = vsel %vm6136_vm4, %v3575_v34, %v3579_v38  ;;  %v5840_v10 = vld [vmem:[%s6577_s14 + $0x1c] sm:$0xf]  ;;  %v3594_v38 = vrot.slane %v3592_v44, 4 }
 0x365   : > { %5587 = vmatmul.msk.bf16.gmra.mxu0 %vm702_vm1, %v7243_v52  ;;  %5604 = vmatmul.msk.bf16.gmra.mxu1 %vm702_vm1, %v7265_v61  ;;  %v4159_v59 = vrot.slane %v5840_v10, 5  ;;  %v3597_v34 = vrot.slane %v3595_v54, 5  ;;  %v7932_v10 = vld [vmem:[#allocation8_spill] sm:$0xff] }
 0x366   : > { %v7282_v49 = vadd.f32 %v3903_v46, %v3838_v30  ;;  %v3590_v63 = vsel %vm6136_vm4, %v3585_v53, %v3589_v41  ;;  %v3601_v46 = vshll.u32 %v2681_v36, 16  ;;  %v3671_v30 = vunpack.c.l.b16 %v3580_v22  ;;  %v5842_v53 = vld [vmem:[%s6577_s14 + $0x20] sm:$0x1] }
 0x367   : > { %v2986_v57 = vpop.f32.mrf.mxu2  ;;  %v3120_v51 = vpop.f32.mrf.mxu3  ;;  %v4161_v60 = vrot.slane %v4159_v59, 4  ;;  %v4162_v41 = vrot.slane %v5842_v53, 5 }
 0x368   : > { %7930 = vst [vmem:[#allocation4_spill] sm:$0xff] %v7282_v49  ;;  %v3051_v19 = vadd.f32 %v2986_v57, %v7931_v14  ;;  %v3672_v57 = vunpack.c.l.b16 %v3590_v63  ;;  %v3603_v26 = vrot.slane %v3601_v46, 5 }
 0x36a   : > { %v3185_v8 = vadd.f32 %v3120_v51, %v3051_v19  ;;  %v3776_v42 = vpop.f32.mrf.mxu0  ;;  %v3908_v21 = vpop.f32.mrf.mxu1  ;;  %v3607_v51 = vrot.slane %v3605_v5, 4  ;;  %v5841_v19 = vld [vmem:[%s6577_s14 + $0x18] sm:$0xf]  ;;  %v7298_v22 = vpack.c.b16 %v3672_v57, %v3671_v30 }
 0x36b   : > { %v5626_v49 = vrot.slane %v5841_v19, 9  ;;  %v4163_v19 = vsel %vm6503_vm7, %v4161_v60, %v4162_v41 }
 0x36c   : > { %v3839_v9 = vadd.f32 %v3774_v13, %v3185_v8  ;;  %v5734_v13 = vld [vmem:[%s7275_s26] sm:$0xff]  ;;  %v3598_v8 = vor.u32 %v3597_v34, %v3594_v38  ;;  %v3608_v46 = vor.u32 %v3607_v51, %v3603_v26  ;;  %v4276_v30 = vunpack.c.l.b16 %v4163_v19 }
 0x36e   : > { %v7291_v14 = vadd.f32 %v3906_v40, %v3839_v9  ;;  %v3611_v40 = vshll.u32 %v2682_v7, 16  ;;  %v4160_v9 = vsel %vm6503_vm7, %v5626_v49, %v4159_v59  ;;  %v3599_v7 = vrot.slane %v3598_v8, 4 }
 0x36f   : > { %v2988_v52 = vpop.f32.mrf.mxu2  ;;  %v3122_v36 = vpop.f32.mrf.mxu3 }
 0x370   : > { %v3052_v37 = vadd.f32 %v2988_v52, %v7932_v10  ;;  %v4275_v52 = vunpack.c.l.b16 %v4160_v9  ;;  %v3613_v57 = vrot.slane %v3611_v40, 5  ;;  %v3604_v41 = vsel %vm6136_vm4, %v3599_v7, %v3603_v26  ;;  %v5735_v9 = vld [vmem:[%s7275_s26 + $0xc] sm:$0xff] }
 0x371   : > { %v3863_v8 = vunpack.c.l.b16 %v3604_v41 }
 0x372   : > { %v3186_v44 = vadd.f32 %v3122_v36, %v3052_v37  ;;  %v3779_v54 = vpop.f32.mrf.mxu0  ;;  %v3911_v63 = vpop.f32.mrf.mxu1  ;;  %v3609_v37 = vrot.slane %v3608_v46, 4  ;;  %v7310_v49 = vpack.c.b16 %v4276_v30, %v4275_v52 }
 0x374   : > { %v3840_v53 = vadd.f32 %v3776_v42, %v3186_v44  ;;  %5550 = vmatmul.msk.bf16.gmra.mxu2 %vm702_vm1, %v5839_v4  ;;  %5571 = vmatmul.msk.bf16.gmra.mxu3 %vm702_vm1, %v5734_v13  ;;  %v3614_v36 = vsel %vm6136_vm4, %v3609_v37, %v3613_v57 }
 0x375   : > { %5588 = vmatmul.msk.bf16.gmra.mxu0 %vm702_vm1, %v7265_v61  ;;  %5605 = vmatmul.msk.bf16.gmra.mxu1 %vm702_vm1, %v7298_v22 }
 0x376   : > { %v7312_v59 = vadd.f32 %v3908_v21, %v3840_v53  ;;  %v3864_v21 = vunpack.c.l.b16 %v3614_v36  ;;  %v5843_v53 = vld [vmem:[%s6577_s14 + $0x4] sm:$0xf] }
 0x377   : > { %v2991_v60 = vpop.f32.mrf.mxu2  ;;  %v3125_v4 = vpop.f32.mrf.mxu3  ;;  %v4145_v26 = vrot.slane %v5843_v53, 5 }
 0x378   : > { %v3053_v42 = vadd.f32 %v2991_v60, %v6948_v48  ;;  %v7323_v19 = vpack.c.b16 %v3864_v21, %v3863_v8 }
 0x379   : > { %v4147_v60 = vrot.slane %v4145_v26, 4 }
 0x37a   : > { %v3187_v38 = vadd.f32 %v3125_v4, %v3053_v42  ;;  %v3781_v34 = vpop.f32.mrf.mxu0  ;;  %v3913_v51 = vpop.f32.mrf.mxu1  ;;  %v5846_v4 = vld [vmem:[%s6577_s14 + $0x8] sm:$0x1] }
 0x37b   : > { %v4148_v42 = vrot.slane %v5846_v4, 5 }
 0x37c   : > { %v3841_v10 = vadd.f32 %v3779_v54, %v3187_v38  ;;  %v5844_v54 = vld [vmem:[%s6577_s14 + $0x10] sm:$0xf]  ;;  %v5847_v38 = vld [vmem:[%s6577_s14 + $0xc] sm:$0xf] }
 0x37d   : > { %v4152_v37 = vrot.slane %v5844_v54, 5  ;;  %v5625_v41 = vrot.slane %v5847_v38, 9 }
 0x37e   : > { %v7319_v44 = vadd.f32 %v3911_v63, %v3841_v10  ;;  %v5848_v10 = vld [vmem:[%s6577_s14 + $0x14] sm:$0x1] }
 0x37f   : > { %v2993_v46 = vpop.f32.mrf.mxu2  ;;  %v3127_v40 = vpop.f32.mrf.mxu3  ;;  %v4154_v36 = vrot.slane %v4152_v37, 4  ;;  %v4153_v54 = vsel %vm6503_vm7, %v5625_v41, %v4152_v37 }
 0x380   : > { %v3054_v48 = vadd.f32 %v2993_v46, %v6964_v24  ;;  %v5845_v24 = vld [vmem:[%s6577_s14] sm:$0xf] }
 0x381   : > { %v5624_v57 = vrot.slane %v5845_v24, 9 }
 0x382   : > { %v3188_v52 = vadd.f32 %v3127_v40, %v3054_v48  ;;  %v3784_v30 = vpop.f32.mrf.mxu0  ;;  %v3916_v7 = vpop.f32.mrf.mxu1  ;;  %v4149_v48 = vsel %vm6503_vm7, %v4147_v60, %v4148_v42 }
 0x383   : > { %v4146_v40 = vsel %vm6503_vm7, %v5624_v57, %v4145_v26  ;;  %v4272_v4 = vunpack.c.l.b16 %v4149_v48 }
 0x384   : > { %v3842_v63 = vadd.f32 %v3781_v34, %v3188_v52  ;;  %5551 = vmatmul.msk.bf16.gmra.mxu2 %vm702_vm1, %v5734_v13  ;;  %5572 = vmatmul.msk.bf16.gmra.mxu3 %vm702_vm1, %v5735_v9  ;;  %v4155_v34 = vrot.slane %v5848_v10, 5  ;;  %v4271_v24 = vunpack.c.l.b16 %v4146_v40  ;;  %v5851_v40 = vld [vmem:[%s6577_s14 + $0x2c] sm:$0x1] }
 0x385   : > { %5589 = vmatmul.msk.bf16.gmra.mxu0 %vm702_vm1, %v7298_v22  ;;  %5606 = vmatmul.msk.bf16.gmra.mxu1 %vm702_vm1, %v7323_v19  ;;  %v4169_v48 = vrot.slane %v5851_v40, 5 }
 0x386   : > { %v7337_v8 = vadd.f32 %v3913_v51, %v3842_v63  ;;  %v4156_v51 = vsel %vm6503_vm7, %v4154_v36, %v4155_v34  ;;  %v4303_v42 = vpack.c.b16 %v4272_v4, %v4271_v24 }
 0x387   : > { %v2996_v13 = vpop.f32.mrf.mxu2  ;;  %v3130_v21 = vpop.f32.mrf.mxu3  ;;  %v4274_v38 = vunpack.c.l.b16 %v4156_v51 }
 0x388   : > { %v3055_v46 = vadd.f32 %v2996_v13, %v6976_v18  ;;  %v4273_v18 = vunpack.c.l.b16 %v4153_v54 }
 0x38a   : > { %v3189_v9 = vadd.f32 %v3130_v21, %v3055_v46  ;;  %v3786_v53 = vpop.f32.mrf.mxu0  ;;  %v3918_v52 = vpop.f32.mrf.mxu1  ;;  %v4304_v13 = vpack.c.b16 %v4274_v38, %v4273_v18  ;;  %v5849_v46 = vld [vmem:[%s6577_s14 + $0x28] sm:$0xf] }
 0x38b   : > { %v4166_v36 = vrot.slane %v5849_v46, 5 }
 0x38c   : > { %v3843_v63 = vadd.f32 %v3784_v30, %v3189_v9 }
 0x38d   : > { %v4168_v34 = vrot.slane %v4166_v36, 4 }
 0x38e   : > { %v7348_v10 = vadd.f32 %v3916_v7, %v3843_v63 }
 0x38f   : > { %v2998_v26 = vpop.f32.mrf.mxu2  ;;  %v3132_v57 = vpop.f32.mrf.mxu3  ;;  %v4170_v18 = vsel %vm6503_vm7, %v4168_v34, %v4169_v48  ;;  %v5854_v34 = vld [vmem:[%s6577_s14 + $0x38] sm:$0x1] }
 0x390   : > { %v3056_v60 = vadd.f32 %v2998_v26, %v6987_v27  ;;  %v5850_v27 = vld [vmem:[%s6577_s14 + $0x24] sm:$0xf]  ;;  %v4176_v48 = vrot.slane %v5854_v34, 5 }
 0x391   : > { %v5627_v7 = vrot.slane %v5850_v27, 9 }
 0x392   : > { %v3190_v37 = vadd.f32 %v3132_v57, %v3056_v60  ;;  %v3789_v41 = vpop.f32.mrf.mxu0  ;;  %v3921_v21 = vpop.f32.mrf.mxu1  ;;  %v4278_v57 = vunpack.c.l.b16 %v4170_v18 }
 0x393   : > { %v4167_v4 = vsel %vm6503_vm7, %v5627_v7, %v4166_v36  ;;  %v5852_v36 = vld [vmem:[%s6577_s14 + $0x34] sm:$0xf] }
 0x394   : > { %v3844_v30 = vadd.f32 %v3786_v53, %v3190_v37  ;;  %5608 = vmatmul.msk.bf16.vlgmr.msra.gmra.mxu2 %vm702_vm1, %v6999_v32  ;;  %5643 = vmatmul.msk.bf16.vlgmr.msra.gmra.mxu3 %vm702_vm1, %v4303_v42  ;;  %v4277_v26 = vunpack.c.l.b16 %v4167_v4  ;;  %v4173_v7 = vrot.slane %v5852_v36, 5 }
 0x395   : > { %5660 = vmatmul.msk.bf16.vlgmr.msra.gmra.mxu0 %vm702_vm1, %v4304_v13  ;;  %5677 = vmatmul.msk.bf16.vlgmr.msra.gmra.mxu1 %vm702_vm1, %v7310_v49 }
 0x396   : > { %v7360_v9 = vadd.f32 %v3918_v52, %v3844_v30  ;;  %v7370_v37 = vpack.c.b16 %v4278_v57, %v4277_v26 }
 0x397   : > { %v3001_v54 = vpop.f32.mrf.mxu2  ;;  %v3135_v51 = vpop.f32.mrf.mxu3 }
 0x398   : > { %v3057_v53 = vadd.f32 %v3001_v54, %v6995_v17 }
 0x39a   : > { %v3191_v63 = vadd.f32 %v3135_v51, %v3057_v53  ;;  %v3791_v32 = vpop.f32.mrf.mxu0  ;;  %v3923_v24 = vpop.f32.mrf.mxu1 }
 0x39c   : > { %v3845_v38 = vadd.f32 %v3789_v41, %v3191_v63 }
 0x39e   : > { %v7367_v52 = vadd.f32 %v3921_v21, %v3845_v38  ;;  %v4175_v21 = vrot.slane %v4173_v7, 4 }
 0x39f   : > { %v3003_v60 = vpop.f32.mrf.mxu2  ;;  %v3137_v42 = vpop.f32.mrf.mxu3 }
 0x3a0   : > { %v3058_v17 = vadd.f32 %v3003_v60, %v7009_v0  ;;  %v5853_v0 = vld [vmem:[%s6577_s14 + $0x30] sm:$0xf]  ;;  %v4177_v18 = vsel %vm6503_vm7, %v4175_v21, %v4176_v48  ;;  %v5857_v21 = vld [vmem:[%s6577_s14 + $0x44] sm:$0x1] }
 0x3a1   : > { %v5628_v41 = vrot.slane %v5853_v0, 9  ;;  %v4280_v57 = vunpack.c.l.b16 %v4177_v18  ;;  %v4183_v34 = vrot.slane %v5857_v21, 5 }
 0x3a2   : > { %v3192_v46 = vadd.f32 %v3137_v42, %v3058_v17  ;;  %v3794_v30 = vpop.f32.mrf.mxu0  ;;  %v3926_v27 = vpop.f32.mrf.mxu1 }
 0x3a3   : > { %v4174_v4 = vsel %vm6503_vm7, %v5628_v41, %v4173_v7  ;;  %v5855_v7 = vld [vmem:[%s6577_s14 + $0x40] sm:$0xf] }
 0x3a4   : > { %v3846_v40 = vadd.f32 %v3791_v32, %v3192_v46  ;;  %5609 = vmatmul.msk.bf16.gmra.mxu2 %vm702_vm1, %v7021_v29  ;;  %5644 = vmatmul.msk.bf16.gmra.mxu3 %vm702_vm1, %v4304_v13  ;;  %v4279_v26 = vunpack.c.l.b16 %v4174_v4  ;;  %v4180_v0 = vrot.slane %v5855_v7, 5 }
 0x3a5   : > { %5661 = vmatmul.msk.bf16.gmra.mxu0 %vm702_vm1, %v7310_v49  ;;  %5678 = vmatmul.msk.bf16.gmra.mxu1 %vm702_vm1, %v7370_v37 }
 0x3a6   : > { %v7382_v54 = vadd.f32 %v3923_v24, %v3846_v40  ;;  %v7392_v17 = vpack.c.b16 %v4280_v57, %v4279_v26 }
 0x3a7   : > { %v3006_v51 = vpop.f32.mrf.mxu2  ;;  %v3140_v53 = vpop.f32.mrf.mxu3 }
 0x3a8   : > { %v3059_v63 = vadd.f32 %v3006_v51, %v7017_v62 }
 0x3aa   : > { %v3193_v29 = vadd.f32 %v3140_v53, %v3059_v63  ;;  %v3796_v13 = vpop.f32.mrf.mxu0  ;;  %v3928_v32 = vpop.f32.mrf.mxu1 }
 0x3ac   : > { %v3847_v38 = vadd.f32 %v3794_v30, %v3193_v29 }
 0x3ae   : > { %v7389_v24 = vadd.f32 %v3926_v27, %v3847_v38  ;;  %v4182_v27 = vrot.slane %v4180_v0, 4 }
 0x3af   : > { %v3008_v60 = vpop.f32.mrf.mxu2  ;;  %v3142_v42 = vpop.f32.mrf.mxu3 }
 0x3b0   : > { %v3060_v62 = vadd.f32 %v3008_v60, %v7032_v35  ;;  %v5856_v35 = vld [vmem:[%s6577_s14 + $0x3c] sm:$0xf]  ;;  %v4184_v4 = vsel %vm6503_vm7, %v4182_v27, %v4183_v34 }
 0x3b1   : > { %v5629_v30 = vrot.slane %v5856_v35, 9  ;;  %v4282_v26 = vunpack.c.l.b16 %v4184_v4 }
 0x3b2   : > { %v3194_v46 = vadd.f32 %v3142_v42, %v3060_v62  ;;  %v3799_v36 = vpop.f32.mrf.mxu0  ;;  %v3931_v40 = vpop.f32.mrf.mxu1 }
 0x3b4   : > { %v3848_v41 = vadd.f32 %v3796_v13, %v3194_v46  ;;  %5610 = vmatmul.msk.bf16.gmra.mxu2 %vm702_vm1, %v7044_v6  ;;  %5645 = vmatmul.msk.bf16.gmra.mxu3 %vm702_vm1, %v7310_v49  ;;  %v4181_v13 = vsel %vm6503_vm7, %v5629_v30, %v4180_v0  ;;  %v5858_v0 = vld [vmem:[%s6577_s14 + $0x4c] sm:$0xf]  ;;  %v5860_v30 = vld [vmem:[%s6577_s14 + $0x50] sm:$0x1] }
 0x3b5   : > { %5662 = vmatmul.msk.bf16.gmra.mxu0 %vm702_vm1, %v7370_v37  ;;  %5679 = vmatmul.msk.bf16.gmra.mxu1 %vm702_vm1, %v7392_v17  ;;  %v4281_v38 = vunpack.c.l.b16 %v4181_v13  ;;  %v4190_v27 = vrot.slane %v5860_v30, 5 }
 0x3b6   : > { %v7405_v48 = vadd.f32 %v3928_v32, %v3848_v41  ;;  %v4187_v41 = vrot.slane %v5858_v0, 5  ;;  %v5861_v0 = vld [vmem:[%s6577_s14 + $0x58] sm:$0xf] }
 0x3b7   : > { %v3011_v51 = vpop.f32.mrf.mxu2  ;;  %v3145_v53 = vpop.f32.mrf.mxu3  ;;  %v7415_v42 = vpack.c.b16 %v4282_v26, %v4281_v38 }
 0x3b8   : > { %v3061_v6 = vadd.f32 %v3011_v51, %v7040_v58 }
 0x3ba   : > { %v3195_v63 = vadd.f32 %v3145_v53, %v3061_v6  ;;  %v3801_v49 = vpop.f32.mrf.mxu0  ;;  %v3933_v29 = vpop.f32.mrf.mxu1 }
 0x3bc   : > { %v3849_v18 = vadd.f32 %v3799_v36, %v3195_v63 }
 0x3be   : > { %v7412_v32 = vadd.f32 %v3931_v40, %v3849_v18  ;;  %v4189_v40 = vrot.slane %v4187_v41, 4 }
 0x3bf   : > { %v3013_v57 = vpop.f32.mrf.mxu2  ;;  %v3147_v60 = vpop.f32.mrf.mxu3 }
 0x3c0   : > { %v3062_v58 = vadd.f32 %v3013_v57, %v7055_v56  ;;  %v5859_v56 = vld [vmem:[%s6577_s14 + $0x48] sm:$0xf] }
 0x3c1   : > { %v5630_v36 = vrot.slane %v5859_v56, 9  ;;  %v5863_v56 = vld [vmem:[%s6577_s14 + $0x5c] sm:$0x1] }
 0x3c2   : > { %v3196_v62 = vadd.f32 %v3147_v60, %v3062_v58  ;;  %v3804_v46 = vpop.f32.mrf.mxu0  ;;  %v3936_v7 = vpop.f32.mrf.mxu1 }
 0x3c3   : > { %v4188_v63 = vsel %vm6503_vm7, %v5630_v36, %v4187_v41  ;;  %v4194_v41 = vrot.slane %v5861_v0, 5  ;;  %v4197_v36 = vrot.slane %v5863_v56, 5 }
 0x3c4   : > { %v3850_v35 = vadd.f32 %v3801_v49, %v3196_v62  ;;  %5611 = vmatmul.msk.bf16.gmra.mxu2 %vm702_vm1, %v7067_v39  ;;  %5646 = vmatmul.msk.bf16.gmra.mxu3 %vm702_vm1, %v7370_v37  ;;  %v4191_v49 = vsel %vm6503_vm7, %v4189_v40, %v4190_v27  ;;  %v4283_v4 = vunpack.c.l.b16 %v4188_v63 }
 0x3c5   : > { %5663 = vmatmul.msk.bf16.gmra.mxu0 %vm702_vm1, %v7392_v17  ;;  %5680 = vmatmul.msk.bf16.gmra.mxu1 %vm702_vm1, %v7415_v42  ;;  %v4284_v18 = vunpack.c.l.b16 %v4191_v49 }
 0x3c6   : > { %v7428_v21 = vadd.f32 %v3933_v29, %v3850_v35 }
 0x3c7   : > { %v3016_v34 = vpop.f32.mrf.mxu2  ;;  %v3150_v51 = vpop.f32.mrf.mxu3  ;;  %v7438_v57 = vpack.c.b16 %v4284_v18, %v4283_v4 }
 0x3c8   : > { %v3063_v39 = vadd.f32 %v3016_v34, %v7063_v3 }
 0x3ca   : > { %v3197_v53 = vadd.f32 %v3150_v51, %v3063_v39  ;;  %v3806_v37 = vpop.f32.mrf.mxu0  ;;  %v3938_v6 = vpop.f32.mrf.mxu1 }
 0x3cc   : > { %v3851_v13 = vadd.f32 %v3804_v46, %v3197_v53 }
 0x3ce   : > { %v7435_v29 = vadd.f32 %v3936_v7, %v3851_v13  ;;  %v4196_v7 = vrot.slane %v4194_v41, 4 }
 0x3cf   : > { %v3018_v38 = vpop.f32.mrf.mxu2  ;;  %v3152_v26 = vpop.f32.mrf.mxu3 }
 0x3d0   : > { %v3064_v3 = vadd.f32 %v3018_v38, %v7077_v25  ;;  %v5862_v25 = vld [vmem:[%s6577_s14 + $0x54] sm:$0xf]  ;;  %v4198_v53 = vsel %vm6503_vm7, %v4196_v7, %v4197_v36 }
 0x3d1   : > { %v5631_v46 = vrot.slane %v5862_v25, 9  ;;  %v4286_v49 = vunpack.c.l.b16 %v4198_v53 }
 0x3d2   : > { %v3198_v60 = vadd.f32 %v3152_v26, %v3064_v3  ;;  %v3809_v58 = vpop.f32.mrf.mxu0  ;;  %v3941_v62 = vpop.f32.mrf.mxu1 }
 0x3d3   : > { %v4195_v39 = vsel %vm6503_vm7, %v5631_v46, %v4194_v41 }
 0x3d4   : > { %v3852_v35 = vadd.f32 %v3806_v37, %v3198_v60  ;;  %5612 = vmatmul.msk.bf16.gmra.mxu2 %vm702_vm1, %v7089_v33  ;;  %5647 = vmatmul.msk.bf16.gmra.mxu3 %vm702_vm1, %v7392_v17  ;;  %v4285_v63 = vunpack.c.l.b16 %v4195_v39  ;;  %v5864_v60 = vld [vmem:[%s6577_s14 + $0x64] sm:$0xf] }
 0x3d5   : > { %5664 = vmatmul.msk.bf16.gmra.mxu0 %vm702_vm1, %v7415_v42  ;;  %5681 = vmatmul.msk.bf16.gmra.mxu1 %vm702_vm1, %v7438_v57  ;;  %v4201_v0 = vrot.slane %v5864_v60, 5 }
 0x3d6   : > { %v7451_v40 = vadd.f32 %v3938_v6, %v3852_v35  ;;  %v7461_v18 = vpack.c.b16 %v4286_v49, %v4285_v63  ;;  %v5866_v35 = vld [vmem:[%s6577_s14 + $0x68] sm:$0x1] }
 0x3d7   : > { %v3021_v30 = vpop.f32.mrf.mxu2  ;;  %v3155_v27 = vpop.f32.mrf.mxu3  ;;  %v4204_v25 = vrot.slane %v5866_v35, 5 }
 0x3d8   : > { %v3065_v33 = vadd.f32 %v3021_v30, %v7085_v1 }
 0x3da   : > { %v3199_v34 = vadd.f32 %v3155_v27, %v3065_v33  ;;  %v3811_v17 = vpop.f32.mrf.mxu0  ;;  %v3943_v51 = vpop.f32.mrf.mxu1 }
 0x3dc   : > { %v3853_v37 = vadd.f32 %v3809_v58, %v3199_v34 }
 0x3de   : > { %v7458_v6 = vadd.f32 %v3941_v62, %v3853_v37  ;;  %v4203_v62 = vrot.slane %v4201_v0, 4 }
 0x3df   : > { %v3023_v13 = vpop.f32.mrf.mxu2  ;;  %v3157_v4 = vpop.f32.mrf.mxu3 }
 0x3e0   : > { %v3066_v1 = vadd.f32 %v3023_v13, %v7099_v2  ;;  %v5865_v2 = vld [vmem:[%s6577_s14 + $0x60] sm:$0xf]  ;;  %v4205_v33 = vsel %vm6503_vm7, %v4203_v62, %v4204_v25 }
 0x3e1   : > { %v5632_v58 = vrot.slane %v5865_v2, 9  ;;  %v4288_v39 = vunpack.c.l.b16 %v4205_v33 }
 0x3e2   : > { %v3200_v38 = vadd.f32 %v3157_v4, %v3066_v1  ;;  %v3814_v26 = vpop.f32.mrf.mxu0  ;;  %v3946_v3 = vpop.f32.mrf.mxu1  ;;  %v5867_v1 = vld [vmem:[%s6577_s14 + $0x70] sm:$0xf] }
 0x3e3   : > { %v4202_v27 = vsel %vm6503_vm7, %v5632_v58, %v4201_v0  ;;  %v5869_v0 = vld [vmem:[%s6577_s14 + $0x74] sm:$0x1] }
 0x3e4   : > { %v3854_v41 = vadd.f32 %v3811_v17, %v3200_v38  ;;  %5613 = vmatmul.msk.bf16.gmra.mxu2 %vm702_vm1, %v7111_v50  ;;  %5648 = vmatmul.msk.bf16.gmra.mxu3 %vm702_vm1, %v7415_v42  ;;  %v4287_v17 = vunpack.c.l.b16 %v4202_v27  ;;  %v4208_v38 = vrot.slane %v5867_v1, 5  ;;  %v5872_v1 = vld [vmem:[%s6577_s14 + $0x80] sm:$0x1] }
 0x3e5   : > { %5665 = vmatmul.msk.bf16.gmra.mxu0 %vm702_vm1, %v7438_v57  ;;  %5682 = vmatmul.msk.bf16.gmra.mxu1 %vm702_vm1, %v7461_v18 }
 0x3e6   : > { %v7474_v46 = vadd.f32 %v3943_v51, %v3854_v41  ;;  %v7484_v63 = vpack.c.b16 %v4288_v39, %v4287_v17  ;;  %v4211_v41 = vrot.slane %v5869_v0, 5 }
 0x3e7   : > { %v3026_v7 = vpop.f32.mrf.mxu2  ;;  %v3160_v56 = vpop.f32.mrf.mxu3 }
 0x3e8   : > { %v3067_v50 = vadd.f32 %v3026_v7, %v7107_v47 }
 0x3ea   : > { %v3201_v36 = vadd.f32 %v3160_v56, %v3067_v50  ;;  %v3816_v42 = vpop.f32.mrf.mxu0  ;;  %v3948_v30 = vpop.f32.mrf.mxu1 }
 0x3ec   : > { %v3855_v34 = vadd.f32 %v3814_v26, %v3201_v36 }
 0x3ee   : > { %v7481_v51 = vadd.f32 %v3946_v3, %v3855_v34  ;;  %v4210_v3 = vrot.slane %v4208_v38, 4 }
 0x3ef   : > { %v3028_v53 = vpop.f32.mrf.mxu2  ;;  %v3162_v37 = vpop.f32.mrf.mxu3 }
 0x3f0   : > { %v3068_v47 = vadd.f32 %v3028_v53, %v7121_v31  ;;  %v5868_v31 = vld [vmem:[%s6577_s14 + $0x6c] sm:$0xf]  ;;  %v4212_v56 = vsel %vm6503_vm7, %v4210_v3, %v4211_v41 }
 0x3f1   : > { %v5633_v26 = vrot.slane %v5868_v31, 9 }
 0x3f2   : > { %v3202_v49 = vadd.f32 %v3162_v37, %v3068_v47  ;;  %v3819_v13 = vpop.f32.mrf.mxu0  ;;  %v3951_v4 = vpop.f32.mrf.mxu1  ;;  %v5870_v37 = vld [vmem:[%s6577_s14 + $0x7c] sm:$0xf] }
 0x3f3   : > { %v4209_v7 = vsel %vm6503_vm7, %v5633_v26, %v4208_v38  ;;  %v4215_v47 = vrot.slane %v5870_v37, 5  ;;  %v4218_v38 = vrot.slane %v5872_v1, 5 }
 0x3f4   : > { %v3856_v60 = vadd.f32 %v3816_v42, %v3202_v49  ;;  %5614 = vmatmul.msk.bf16.gmra.mxu2 %vm702_vm1, %v7133_v55  ;;  %5649 = vmatmul.msk.bf16.gmra.mxu3 %vm702_vm1, %v7438_v57  ;;  %v4289_v36 = vunpack.c.l.b16 %v4209_v7  ;;  %v4290_v42 = vunpack.c.l.b16 %v4212_v56 }
 0x3f5   : > { %5666 = vmatmul.msk.bf16.gmra.mxu0 %vm702_vm1, %v7461_v18  ;;  %5683 = vmatmul.msk.bf16.gmra.mxu1 %vm702_vm1, %v7484_v63 }
 0x3f6   : > { %v7497_v2 = vadd.f32 %v3948_v30, %v3856_v60  ;;  %v7507_v34 = vpack.c.b16 %v4290_v42, %v4289_v36 }
 0x3f7   : > { %v3031_v58 = vpop.f32.mrf.mxu2  ;;  %v3165_v62 = vpop.f32.mrf.mxu3 }
 0x3f8   : > { %v3069_v55 = vadd.f32 %v3031_v58, %v7129_v20 }
 0x3fa   : > { %v3203_v35 = vadd.f32 %v3165_v62, %v3069_v55  ;;  %v3821_v57 = vpop.f32.mrf.mxu0  ;;  %v3953_v25 = vpop.f32.mrf.mxu1 }
 0x3fc   : > { %v3857_v50 = vadd.f32 %v3819_v13, %v3203_v35 }
 0x3fe   : > { %v7504_v30 = vadd.f32 %v3951_v4, %v3857_v50  ;;  %v4217_v4 = vrot.slane %v4215_v47, 4 }
 0x3ff   : > { %v3033_v27 = vpop.f32.mrf.mxu2  ;;  %v3167_v33 = vpop.f32.mrf.mxu3 }
 0x400   : > { %v3070_v20 = vadd.f32 %v3033_v27, %v7143_v45  ;;  %v5871_v45 = vld [vmem:[%s6577_s14 + $0x78] sm:$0xf]  ;;  %v4219_v58 = vsel %vm6503_vm7, %v4217_v4, %v4218_v38  ;;  %v5873_v27 = vld [vmem:[%s6577_s14 + $0x88] sm:$0xf] }
 0x401   : > { %v5634_v13 = vrot.slane %v5871_v45, 9  ;;  %v4292_v35 = vunpack.c.l.b16 %v4219_v58 }
 0x402   : > { %v3204_v17 = vadd.f32 %v3167_v33, %v3070_v20  ;;  %v3824_v39 = vpop.f32.mrf.mxu0  ;;  %v3956_v53 = vpop.f32.mrf.mxu1  ;;  %v4222_v33 = vrot.slane %v5873_v27, 5 }
 0x403   : > { %v4216_v41 = vsel %vm6503_vm7, %v5634_v13, %v4215_v47 }
 0x404   : > { %v3858_v49 = vadd.f32 %v3821_v57, %v3204_v17  ;;  %5615 = vmatmul.msk.bf16.gmra.mxu2 %vm702_vm1, %v7155_v43  ;;  %5650 = vmatmul.msk.bf16.gmra.mxu3 %vm702_vm1, %v7461_v18  ;;  %v4291_v55 = vunpack.c.l.b16 %v4216_v41 }
 0x405   : > { %5667 = vmatmul.msk.bf16.gmra.mxu0 %vm702_vm1, %v7484_v63  ;;  %5684 = vmatmul.msk.bf16.gmra.mxu1 %vm702_vm1, %v7507_v34 }
 0x406   : > { %v7520_v60 = vadd.f32 %v3953_v25, %v3858_v49  ;;  %v7530_v56 = vpack.c.b16 %v4292_v35, %v4291_v55  ;;  %v5876_v55 = vld [vmem:[%s6577_s14 + $0x94] sm:$0xf] }
 0x407   : > { %v3036_v31 = vpop.f32.mrf.mxu2  ;;  %v3170_v26 = vpop.f32.mrf.mxu3  ;;  %v4229_v35 = vrot.slane %v5876_v55, 5 }
 0x408   : > { %v3071_v43 = vadd.f32 %v3036_v31, %v7151_v15 }
 0x409   : > { %v4231_v27 = vrot.slane %v4229_v35, 4 }
 0x40a   : > { %v3205_v3 = vadd.f32 %v3170_v26, %v3071_v43  ;;  %v3826_v18 = vpop.f32.mrf.mxu0  ;;  %v3958_v0 = vpop.f32.mrf.mxu1  ;;  %v7554_v26 = vld [vmem:[%s7891_s6] ss:$0 sm:$0xff] }
 0x40c   : > { %v3859_v62 = vadd.f32 %v3824_v39, %v3205_v3  ;;  %v4224_v39 = vrot.slane %v4222_v33, 4 }
 0x40e   : > { %v7527_v57 = vadd.f32 %v3956_v53, %v3859_v62  ;;  %v5875_v53 = vld [vmem:[%s6577_s14 + $0x8c] sm:$0x1] }
 0x40f   : > { %v3038_v25 = vpop.f32.mrf.mxu2  ;;  %v3172_v7 = vpop.f32.mrf.mxu3  ;;  %v4225_v37 = vrot.slane %v5875_v53, 5 }
 0x410   : > { %v3072_v15 = vadd.f32 %v3038_v25, %v7165_v23  ;;  %v5874_v23 = vld [vmem:[%s6577_s14 + $0x84] sm:$0xf] }
 0x411   : > { %v5635_v17 = vrot.slane %v5874_v23, 9  ;;  %v4226_v38 = vsel %vm6503_vm7, %v4224_v39, %v4225_v37 }
 0x412   : > { %v3206_v50 = vadd.f32 %v3172_v7, %v3072_v15  ;;  %v4511_v36 = vpop.f32.mrf.mxu0  ;;  %v4643_v42 = vpop.f32.mrf.mxu1  ;;  %v4294_v3 = vunpack.c.l.b16 %v4226_v38 }
 0x413   : > { %v4223_v1 = vsel %vm6503_vm7, %v5635_v17, %v4222_v33  ;;  %v5878_v33 = vld [vmem:[%s6577_s14 + $0x98] sm:$0x1] }
 0x414   : > { %v3860_v20 = vadd.f32 %v3826_v18, %v3206_v50  ;;  %5616 = vmatmul.msk.bf16.gmra.mxu2 %vm702_vm1, %v7177_v16  ;;  %5651 = vmatmul.msk.bf16.gmra.mxu3 %vm702_vm1, %v7484_v63  ;;  %v4293_v43 = vunpack.c.l.b16 %v4223_v1 }
 0x415   : > { %5668 = vmatmul.msk.bf16.gmra.mxu0 %vm702_vm1, %v7507_v34  ;;  %5685 = vmatmul.msk.bf16.gmra.mxu1 %vm702_vm1, %v7530_v56 }
 0x416   : > { %v7543_v47 = vadd.f32 %v3958_v0, %v3860_v20  ;;  %v7563_v62 = vpack.c.b16 %v4294_v3, %v4293_v43  ;;  %v4232_v20 = vrot.slane %v5878_v33, 5 }
 0x417   : > { %v4013_v49 = vpop.f32.mrf.mxu2  ;;  %v4379_v45 = vpop.f32.mrf.mxu3 }
 0x418   : > { %v4093_v16 = vadd.f32 %v4013_v49, %v7173_v11  ;;  %v7935_v49 = vld [vmem:[#allocation9_spill] sm:$0xff] }
 0x41a   : > { %v4459_v13 = vadd.f32 %v4379_v45, %v4093_v16  ;;  %v4513_v63 = vpop.f32.mrf.mxu0  ;;  %v4645_v4 = vpop.f32.mrf.mxu1  ;;  %v4233_v16 = vsel %vm6503_vm7, %v4231_v27, %v4232_v20 }
 0x41b   : > { %v4296_v55 = vunpack.c.l.b16 %v4233_v16 }
 0x41c   : > { %v4591_v31 = vadd.f32 %v4511_v36, %v4459_v13  ;;  %v7934_v36 = vld [vmem:[#allocation10_spill] sm:$0xff] }
 0x41e   : > { %v4723_v11 = vadd.f32 %v4643_v42, %v4591_v31 }
 0x41f   : > { %v4015_v18 = vpop.f32.mrf.mxu2  ;;  %v4381_v0 = vpop.f32.mrf.mxu3 }
 0x420   : > { %v4759_v41 = vadd.f32 %v7554_v26, %v4723_v11  ;;  %v4094_v58 = vadd.f32 %v4015_v18, %v7187_v12  ;;  %v5877_v12 = vld [vmem:[%s6577_s14 + $0x90] sm:$0xf] }
 0x421   : > { %v5636_v42 = vrot.slane %v5877_v12, 9 }
 0x422   : > { %4791 = vst.msk [vmem:[%s7559_s13] sm:$0xff] %vm702_vm1, %v4759_v41  ;;  %v4460_v25 = vadd.f32 %v4381_v0, %v4094_v58  ;;  %v4516_v7 = vpop.f32.mrf.mxu0  ;;  %v4648_v15 = vpop.f32.mrf.mxu1  ;;  %v4892_v53 = vmul.f32 %v4759_v41, %v4759_v41  ;;  %v4823_v13 = vsel %vm702_vm1, %v4759_v41, 0.0 }
 0x423   : > { %v4230_v45 = vsel %vm6503_vm7, %v5636_v42, %v4229_v35 }
 0x424   : > { %v4592_v50 = vadd.f32 %v4513_v63, %v4460_v25  ;;  %5617 = vmatmul.msk.bf16.gmra.mxu2 %vm702_vm1, %v7934_v36  ;;  %5652 = vmatmul.msk.bf16.gmra.mxu3 %vm702_vm1, %v7507_v34  ;;  %v4924_v3 = vsel %vm702_vm1, %v4892_v53, 0.0  ;;  %v4295_v58 = vunpack.c.l.b16 %v4230_v45  ;;  %v7936_v36 = vld [vmem:[#allocation11_spill] sm:$0xff]  ;;  %v5880_v45 = vld [vmem:[%s6577_s14 + $0x9c] sm:$0xf] }
 0x425   : > { %5669 = vmatmul.msk.bf16.gmra.mxu0 %vm702_vm1, %v7530_v56  ;;  %5686 = vmatmul.msk.bf16.gmra.mxu1 %vm702_vm1, %v7563_v62  ;;  %v5637_v16 = vrot.slane %v5880_v45, 9 }
 0x426   : > { %v4724_v23 = vadd.f32 %v4645_v4, %v4592_v50  ;;  %v7592_v42 = vpack.c.b16 %v4296_v55, %v4295_v58 }
 0x427   : > { %v4018_v17 = vpop.f32.mrf.mxu2  ;;  %v4384_v39 = vpop.f32.mrf.mxu3 }
 0x428   : > { %v4760_v37 = vadd.f32 %v7554_v26, %v4724_v23  ;;  %v4095_v34 = vadd.f32 %v4018_v17, %v7935_v49  ;;  %v5879_v17 = vld [vmem:[%s6577_s14 + $0xa0] sm:$0xf]  ;;  %v7937_v49 = vld [vmem:[#allocation13_spill] sm:$0xff] }
 0x42a   : > { %4792 = vst.msk [vmem:[%s7559_s13 + $0x8] sm:$0xff] %vm702_vm1, %v4760_v37  ;;  %v4824_v63 = vsel %vm702_vm1, %v4760_v37, 0.0  ;;  %v4893_v4 = vmul.f32 %v4760_v37, %v4760_v37  ;;  %v4461_v1 = vadd.f32 %v4384_v39, %v4095_v34  ;;  %v4518_v38 = vpop.f32.mrf.mxu0  ;;  %v4650_v31 = vpop.f32.mrf.mxu1 }
 0x42b   : > { %v4825_v43 = vadd.f32 %v4824_v63, %v4823_v13 }
 0x42c   : > { %v4925_v11 = vsel %vm702_vm1, %v4893_v4, 0.0  ;;  %v4593_v18 = vadd.f32 %v4516_v7, %v4461_v1  ;;  %v5881_v4 = vld [vmem:[%s6577_s14 + $0xa4] sm:$0x1] }
 0x42d   : > { %v4926_v0 = vadd.f32 %v4925_v11, %v4924_v3  ;;  %v4239_v1 = vrot.slane %v5881_v4, 5  ;;  %v7938_v11 = vld [vmem:[#allocation12_spill] sm:$0xff] }
 0x42e   : > { %v4725_v41 = vadd.f32 %v4648_v15, %v4593_v18  ;;  %v4236_v15 = vrot.slane %v5879_v17, 5 }
 0x42f   : > { %v4020_v35 = vpop.f32.mrf.mxu2  ;;  %v4386_v25 = vpop.f32.mrf.mxu3 }
 0x430   : > { %v4761_v50 = vadd.f32 %v7554_v26, %v4725_v41  ;;  %v4096_v12 = vadd.f32 %v4020_v35, %v7936_v36  ;;  %v4238_v63 = vrot.slane %v4236_v15, 4 }
 0x432   : > { %4793 = vst.msk [vmem:[%s7559_s13 + $0x10] sm:$0xff] %vm702_vm1, %v4761_v50  ;;  %v4826_v27 = vsel %vm702_vm1, %v4761_v50, 0.0  ;;  %v4894_v33 = vmul.f32 %v4761_v50, %v4761_v50  ;;  %v4462_v7 = vadd.f32 %v4386_v25, %v4096_v12  ;;  %v4521_v20 = vpop.f32.mrf.mxu0  ;;  %v4653_v23 = vpop.f32.mrf.mxu1  ;;  %v4240_v35 = vsel %vm6503_vm7, %v4238_v63, %v4239_v1  ;;  %v5882_v63 = vld [vmem:[%s6577_s14 + $0xac] sm:$0xf] }
 0x433   : > { %v4827_v39 = vadd.f32 %v4826_v27, %v4825_v43 }
 0x434   : > { %v4927_v53 = vsel %vm702_vm1, %v4894_v33, 0.0  ;;  %v4594_v37 = vadd.f32 %v4518_v38, %v4462_v7  ;;  %5618 = vmatmul.msk.bf16.gmra.mxu2 %vm702_vm1, %v7937_v49  ;;  %5653 = vmatmul.msk.bf16.gmra.mxu3 %vm702_vm1, %v7530_v56  ;;  %v4237_v56 = vsel %vm6503_vm7, %v5637_v16, %v4236_v15  ;;  %v4298_v33 = vunpack.c.l.b16 %v4240_v35 }
 0x435   : > { %v4928_v34 = vadd.f32 %v4927_v53, %v4926_v0  ;;  %5670 = vmatmul.msk.bf16.gmra.mxu0 %vm702_vm1, %v7563_v62  ;;  %5687 = vmatmul.msk.bf16.gmra.mxu1 %vm702_vm1, %v7592_v42  ;;  %v4297_v27 = vunpack.c.l.b16 %v4237_v56 }
 0x436   : > { %v4726_v13 = vadd.f32 %v4650_v31, %v4594_v37  ;;  %v7939_v37 = vld [vmem:[#allocation14_spill] sm:$0xff] }
 0x437   : > { %v4023_v38 = vpop.f32.mrf.mxu2  ;;  %v4389_v43 = vpop.f32.mrf.mxu3  ;;  %v7621_v45 = vpack.c.b16 %v4298_v33, %v4297_v27 }
 0x438   : > { %v4762_v3 = vadd.f32 %v7554_v26, %v4726_v13  ;;  %v4097_v18 = vadd.f32 %v4023_v38, %v7938_v11  ;;  %v5883_v11 = vld [vmem:[%s6577_s14 + $0xa8] sm:$0xf] }
 0x43a   : > { %4794 = vst.msk [vmem:[%s7559_s13 + $0x18] sm:$0xff] %vm702_vm1, %v4762_v3  ;;  %v4828_v0 = vsel %vm702_vm1, %v4762_v3, 0.0  ;;  %v4895_v58 = vmul.f32 %v4762_v3, %v4762_v3  ;;  %v4463_v55 = vadd.f32 %v4389_v43, %v4097_v18  ;;  %v4523_v31 = vpop.f32.mrf.mxu0  ;;  %v4655_v41 = vpop.f32.mrf.mxu1  ;;  %v7940_v43 = vld [vmem:[#allocation2_spill] sm:$0xff]  ;;  %v5638_v18 = vrot.slane %v5883_v11, 9 }
 0x43b   : > { %v4829_v25 = vadd.f32 %v4828_v0, %v4827_v39 }
 0x43c   : > { %v4929_v50 = vsel %vm702_vm1, %v4895_v58, 0.0  ;;  %v4595_v36 = vadd.f32 %v4521_v20, %v4463_v55  ;;  %v5884_v58 = vld [vmem:[%s6577_s14 + $0xb0] sm:$0x1] }
 0x43d   : > { %v4930_v12 = vadd.f32 %v4929_v50, %v4928_v34  ;;  %v4246_v55 = vrot.slane %v5884_v58, 5  ;;  %v7941_v50 = vld [vmem:[#allocation6_spill] sm:$0xff] }
 0x43e   : > { %v4727_v7 = vadd.f32 %v4653_v23, %v4595_v36  ;;  %v4243_v23 = vrot.slane %v5882_v63, 5 }
 0x43f   : > { %v4025_v17 = vpop.f32.mrf.mxu2  ;;  %v4391_v15 = vpop.f32.mrf.mxu3 }
 0x440   : > { %v4763_v53 = vadd.f32 %v7554_v26, %v4727_v7  ;;  %v4098_v49 = vadd.f32 %v4025_v17, %v7939_v37  ;;  %v4245_v0 = vrot.slane %v4243_v23, 4 }
 0x442   : > { %4795 = vst.msk [vmem:[%s7559_s13 + $0x20] sm:$0xff] %vm702_vm1, %v4763_v53  ;;  %v4830_v39 = vsel %vm702_vm1, %v4763_v53, 0.0  ;;  %v4896_v16 = vmul.f32 %v4763_v53, %v4763_v53  ;;  %v4464_v20 = vadd.f32 %v4391_v15, %v4098_v49  ;;  %v4526_v13 = vpop.f32.mrf.mxu0  ;;  %v4658_v34 = vpop.f32.mrf.mxu1  ;;  %v4247_v17 = vsel %vm6503_vm7, %v4245_v0, %v4246_v55  ;;  %v5885_v0 = vld [vmem:[%s6577_s14 + $0xb8] sm:$0xf] }
 0x443   : > { %v4831_v4 = vadd.f32 %v4830_v39, %v4829_v25 }
 0x444   : > { %v4931_v1 = vsel %vm702_vm1, %v4896_v16, 0.0  ;;  %v4596_v38 = vadd.f32 %v4523_v31, %v4464_v20  ;;  %5619 = vmatmul.msk.bf16.gmra.mxu2 %vm702_vm1, %v7940_v43  ;;  %5654 = vmatmul.msk.bf16.gmra.mxu3 %vm702_vm1, %v7563_v62  ;;  %v4244_v62 = vsel %vm6503_vm7, %v5638_v18, %v4243_v23  ;;  %v4300_v16 = vunpack.c.l.b16 %v4247_v17  ;;  %v7943_v17 = vld [vmem:[#allocation3_spill] sm:$0xff] }
 0x445   : > { %v4932_v3 = vadd.f32 %v4931_v1, %v4930_v12  ;;  %5671 = vmatmul.msk.bf16.gmra.mxu0 %vm702_vm1, %v7592_v42  ;;  %5688 = vmatmul.msk.bf16.gmra.mxu1 %vm702_vm1, %v7621_v45  ;;  %v4299_v39 = vunpack.c.l.b16 %v4244_v62 }
 0x446   : > { %v4728_v56 = vadd.f32 %v4655_v41, %v4596_v38  ;;  %v7942_v38 = vld [vmem:[#allocation15_spill] sm:$0xff] }
 0x447   : > { %v4028_v31 = vpop.f32.mrf.mxu2  ;;  %v4394_v35 = vpop.f32.mrf.mxu3  ;;  %v7650_v11 = vpack.c.b16 %v4300_v16, %v4299_v39 }
 0x448   : > { %v4764_v25 = vadd.f32 %v7554_v26, %v4728_v56  ;;  %v4099_v36 = vadd.f32 %v4028_v31, %v7941_v50 }
 0x44a   : > { %4796 = vst.msk [vmem:[%s7559_s13 + $0x28] sm:$0xff] %vm702_vm1, %v4764_v25  ;;  %v4832_v12 = vsel %vm702_vm1, %v4764_v25, 0.0  ;;  %v4897_v27 = vmul.f32 %v4764_v25, %v4764_v25  ;;  %v4465_v33 = vadd.f32 %v4394_v35, %v4099_v36  ;;  %v4528_v41 = vpop.f32.mrf.mxu0  ;;  %v4660_v7 = vpop.f32.mrf.mxu1  ;;  %v5886_v25 = vld [vmem:[%s6577_s14 + $0xb4] sm:$0xf] }
 0x44b   : > { %v4833_v15 = vadd.f32 %v4832_v12, %v4831_v4  ;;  %v5639_v50 = vrot.slane %v5886_v25, 9  ;;  %v5887_v12 = vld [vmem:[%s6577_s14 + $0xbc] sm:$0x1] }
 0x44c   : > { %v4933_v53 = vsel %vm702_vm1, %v4897_v27, 0.0  ;;  %v4597_v37 = vadd.f32 %v4526_v13, %v4465_v33  ;;  %v4253_v27 = vrot.slane %v5887_v12, 5  ;;  %v5889_v12 = vld [vmem:[%s7275_s26] sm:$0xf] }
 0x44d   : > { %v4934_v49 = vadd.f32 %v4933_v53, %v4932_v3 }
 0x44e   : > { %v4729_v20 = vadd.f32 %v4658_v34, %v4597_v37  ;;  %v4250_v34 = vrot.slane %v5885_v0, 5 }
 0x44f   : > { %v4030_v63 = vpop.f32.mrf.mxu2  ;;  %v4396_v23 = vpop.f32.mrf.mxu3 }
 0x450   : > { %v4765_v1 = vadd.f32 %v7554_v26, %v4729_v20  ;;  %v4100_v43 = vadd.f32 %v4030_v63, %v7942_v38  ;;  %v4252_v62 = vrot.slane %v4250_v34, 4 }
 0x452   : > { %4797 = vst.msk [vmem:[%s7559_s13 + $0x30] sm:$0xff] %vm702_vm1, %v4765_v1  ;;  %v4834_v4 = vsel %vm702_vm1, %v4765_v1, 0.0  ;;  %v4898_v18 = vmul.f32 %v4765_v1, %v4765_v1  ;;  %v4466_v13 = vadd.f32 %v4396_v23, %v4100_v43  ;;  %v4531_v56 = vpop.f32.mrf.mxu0  ;;  %v4663_v3 = vpop.f32.mrf.mxu1  ;;  %v4254_v16 = vsel %vm6503_vm7, %v4252_v62, %v4253_v27 }
 0x453   : > { %v4835_v58 = vadd.f32 %v4834_v4, %v4833_v15  ;;  %v4302_v43 = vunpack.c.l.b16 %v4254_v16  ;;  %v5640_v27 = vrot.slane %v5889_v12, 9 }
 0x454   : > { %v4935_v55 = vsel %vm702_vm1, %v4898_v18, 0.0  ;;  %v4598_v31 = vadd.f32 %v4528_v41, %v4466_v13  ;;  %5620 = vmatmul.msk.bf16.gmra.mxu2 %vm702_vm1, %v7265_v61  ;;  %5655 = vmatmul.msk.bf16.gmra.mxu3 %vm702_vm1, %v7592_v42  ;;  %v4251_v42 = vsel %vm6503_vm7, %v5639_v50, %v4250_v34  ;;  %v7944_v34 = vld [vmem:[#allocation4_spill] sm:$0xff] }
 0x455   : > { %v4936_v35 = vadd.f32 %v4935_v55, %v4934_v49  ;;  %5672 = vmatmul.msk.bf16.gmra.mxu0 %vm702_vm1, %v7621_v45  ;;  %5689 = vmatmul.msk.bf16.gmra.mxu1 %vm702_vm1, %v7650_v11  ;;  %v4301_v38 = vunpack.c.l.b16 %v4251_v42 }
 0x456   : > { %v4730_v36 = vadd.f32 %v4660_v7, %v4598_v31 }
 0x457   : > { %v4033_v33 = vpop.f32.mrf.mxu2  ;;  %v4399_v41 = vpop.f32.mrf.mxu3  ;;  %v7679_v31 = vpack.c.b16 %v4302_v43, %v4301_v38 }
 0x458   : > { %v4766_v61 = vadd.f32 %v7554_v26, %v4730_v36  ;;  %v4101_v15 = vadd.f32 %v4033_v33, %v7943_v17  ;;  %v5888_v36 = vld [vmem:[%s7275_s26 + $0x4] sm:$0xf]  ;;  %v7696_v17 = vld [vmem:[%s7275_s26 + $0xc] sm:$0xf] }
 0x45a   : > { %4798 = vst.msk [vmem:[%s7559_s13 + $0x38] sm:$0xff] %vm702_vm1, %v4766_v61  ;;  %v4836_v53 = vsel %vm702_vm1, %v4766_v61, 0.0  ;;  %v4899_v37 = vmul.f32 %v4766_v61, %v4766_v61  ;;  %v4467_v49 = vadd.f32 %v4399_v41, %v4101_v15  ;;  %v4533_v7 = vpop.f32.mrf.mxu0  ;;  %v4665_v39 = vpop.f32.mrf.mxu1 }
 0x45b   : > { %v4837_v20 = vadd.f32 %v4836_v53, %v4835_v58  ;;  %v5890_v53 = vld [vmem:[%s7275_s26 + $0x8] sm:$0x1] }
 0x45c   : > { %v4937_v63 = vsel %vm702_vm1, %v4899_v37, 0.0  ;;  %v4599_v23 = vadd.f32 %v4531_v56, %v4467_v49  ;;  %v4260_v37 = vrot.slane %v5890_v53, 5  ;;  %v7700_v49 = vld [vmem:[%s7275_s26 + $0x10] sm:$0xf] }
 0x45d   : > { %v4938_v1 = vadd.f32 %v4937_v63, %v4936_v35  ;;  %v3616_v63 = vshrl.u32 %v7696_v17, 16 }
 0x45e   : > { %v4731_v4 = vadd.f32 %v4663_v3, %v4599_v23  ;;  %v4257_v3 = vrot.slane %v5888_v36, 5  ;;  %v3619_v23 = vshll.u32 %v7696_v17, 16 }
 0x45f   : > { %v4035_v18 = vpop.f32.mrf.mxu2  ;;  %v4401_v13 = vpop.f32.mrf.mxu3 }
 0x460   : > { %v4767_v0 = vadd.f32 %v7554_v26, %v4731_v4  ;;  %v4102_v55 = vadd.f32 %v4035_v18, %v7944_v34  ;;  %v4259_v42 = vrot.slane %v4257_v3, 4 }
 0x462   : > { %4799 = vst.msk [vmem:[%s7559_s13 + $0x40] sm:$0xff] %vm702_vm1, %v4767_v0  ;;  %v4838_v58 = vsel %vm702_vm1, %v4767_v0, 0.0  ;;  %v4900_v25 = vmul.f32 %v4767_v0, %v4767_v0  ;;  %v4468_v56 = vadd.f32 %v4401_v13, %v4102_v55  ;;  %v4536_v35 = vpop.f32.mrf.mxu0  ;;  %v4668_v50 = vpop.f32.mrf.mxu1 }
 0x463   : > { %v4839_v62 = vadd.f32 %v4838_v58, %v4837_v20 }
 0x464   : > { %v4939_v33 = vsel %vm702_vm1, %v4900_v25, 0.0  ;;  %v4600_v41 = vadd.f32 %v4533_v7, %v4468_v56  ;;  %5621 = vmatmul.msk.bf16.gmra.mxu2 %vm702_vm1, %v7298_v22  ;;  %5656 = vmatmul.msk.bf16.gmra.mxu3 %vm702_vm1, %v7621_v45  ;;  %v4258_v45 = vsel %vm6503_vm7, %v5640_v27, %v4257_v3  ;;  %v3618_v25 = vrot.slane %v3616_v63, 4 }
 0x465   : > { %v4940_v61 = vadd.f32 %v4939_v33, %v4938_v1  ;;  %5673 = vmatmul.msk.bf16.gmra.mxu0 %vm702_vm1, %v7650_v11  ;;  %5690 = vmatmul.msk.bf16.gmra.mxu1 %vm702_vm1, %v7679_v31  ;;  %v3629_v1 = vshrl.u32 %v7700_v49, 16  ;;  %v4493_v34 = vunpack.c.l.b16 %v4258_v45  ;;  %v3621_v56 = vrot.slane %v3619_v23, 5 }
 0x466   : > { %v4732_v15 = vadd.f32 %v4665_v39, %v4600_v41  ;;  %v3625_v39 = vshll.u32 %v7700_v49, 16  ;;  %v2685_v41 = vld [vmem:[%s7275_s26 + $0x14] sm:$0x1]  ;;  %v4264_v63 = vrot.slane %v7700_v49, 5 }
 0x467   : > { %v4038_v22 = vpop.f32.mrf.mxu2  ;;  %v4404_v7 = vpop.f32.mrf.mxu3  ;;  %v3631_v27 = vrot.slane %v3629_v1, 4 }
 0x468   : > { %v4768_v16 = vadd.f32 %v7554_v26, %v4732_v15  ;;  %v4103_v20 = vadd.f32 %v4038_v22, %v7291_v14  ;;  %v4261_v14 = vsel %vm6503_vm7, %v4259_v42, %v4260_v37  ;;  %v3627_v12 = vrot.slane %v3625_v39, 5 }
 0x469   : > { %v4494_v3 = vunpack.c.l.b16 %v4261_v14  ;;  %v4266_v14 = vrot.slane %v4264_v63, 4 }
 0x46a   : > { %4800 = vst.msk [vmem:[%s7559_s13 + $0x48] sm:$0xff] %vm702_vm1, %v4768_v16  ;;  %v4840_v38 = vsel %vm702_vm1, %v4768_v16, 0.0  ;;  %v4901_v43 = vmul.f32 %v4768_v16, %v4768_v16  ;;  %v4469_v4 = vadd.f32 %v4404_v7, %v4103_v20  ;;  %v4538_v18 = vpop.f32.mrf.mxu0  ;;  %v4670_v13 = vpop.f32.mrf.mxu1  ;;  %v3632_v7 = vor.u32 %v3631_v27, %v3627_v12 }
 0x46b   : > { %v4841_v0 = vadd.f32 %v4840_v38, %v4839_v62  ;;  %v3622_v62 = vor.u32 %v3621_v56, %v3618_v25  ;;  %v7719_v37 = vpack.c.b16 %v4494_v3, %v4493_v34 }
 0x46c   : > { %v4941_v55 = vsel %vm702_vm1, %v4901_v43, 0.0  ;;  %v4601_v58 = vadd.f32 %v4536_v35, %v4469_v4  ;;  %v3635_v35 = vshll.u32 %v2685_v41, 16  ;;  %v3633_v49 = vrot.slane %v3632_v7, 4 }
 0x46d   : > { %v4942_v36 = vadd.f32 %v4941_v55, %v4940_v61  ;;  %v5641_v4 = vrot.slane %v7696_v17, 9 }
 0x46e   : > { %v4733_v33 = vadd.f32 %v4668_v50, %v4601_v58  ;;  %v3637_v43 = vrot.slane %v3635_v35, 5 }
 0x46f   : > { %v4040_v15 = vpop.f32.mrf.mxu2  ;;  %v4406_v53 = vpop.f32.mrf.mxu3  ;;  %v4265_v56 = vsel %vm6503_vm7, %v5641_v4, %v4264_v63 }
 0x470   : > { %v4769_v22 = vadd.f32 %v7554_v26, %v4733_v33  ;;  %v4104_v42 = vadd.f32 %v4040_v15, %v7312_v59  ;;  %v3623_v59 = vrot.slane %v3622_v62, 4  ;;  %v3638_v25 = vsel %vm6136_vm4, %v3633_v49, %v3637_v43 }
 0x471   : > { %v3996_v15 = vunpack.c.l.b16 %v3638_v25 }
 0x472   : > { %4801 = vst.msk [vmem:[%s7559_s13 + $0x50] sm:$0xff] %vm702_vm1, %v4769_v22  ;;  %v4842_v61 = vsel %vm702_vm1, %v4769_v22, 0.0  ;;  %v4902_v45 = vmul.f32 %v4769_v22, %v4769_v22  ;;  %v4470_v16 = vadd.f32 %v4406_v53, %v4104_v42  ;;  %v4541_v20 = vpop.f32.mrf.mxu0  ;;  %v4673_v50 = vpop.f32.mrf.mxu1  ;;  %v3628_v58 = vsel %vm6136_vm4, %v3623_v59, %v3627_v12 }
 0x473   : > { %v4843_v23 = vadd.f32 %v4842_v61, %v4841_v0  ;;  %v4267_v0 = vrot.slane %v2685_v41, 5  ;;  %v3995_v41 = vunpack.c.l.b16 %v3628_v58  ;;  %v4625_v22 = vunpack.c.l.b16 %v4265_v56 }
 0x474   : > { %v4943_v39 = vsel %vm702_vm1, %v4902_v45, 0.0  ;;  %v4602_v1 = vadd.f32 %v4538_v18, %v4470_v16  ;;  %5622 = vmatmul.msk.bf16.gmra.mxu2 %vm702_vm1, %v7323_v19  ;;  %5657 = vmatmul.msk.bf16.gmra.mxu3 %vm702_vm1, %v7650_v11 }
 0x475   : > { %v4944_v38 = vadd.f32 %v4943_v39, %v4942_v36  ;;  %5674 = vmatmul.msk.bf16.gmra.mxu0 %vm702_vm1, %v7679_v31  ;;  %5691 = vmatmul.msk.bf16.gmra.mxu1 %vm702_vm1, %v7719_v37  ;;  %v3997_v16 = vpack.c.b16 %v3996_v15, %v3995_v41 }
 0x476   : > { %v4734_v18 = vadd.f32 %v4670_v13, %v4602_v1 }
 0x477   : > { %v4043_v19 = vpop.f32.mrf.mxu2  ;;  %v4409_v34 = vpop.f32.mrf.mxu3 }
 0x478   : > { %v4770_v11 = vadd.f32 %v7554_v26, %v4734_v18  ;;  %v4105_v55 = vadd.f32 %v4043_v19, %v7319_v44  ;;  %v4268_v44 = vsel %vm6503_vm7, %v4266_v14, %v4267_v0 }
 0x479   : > { %v4626_v42 = vunpack.c.l.b16 %v4268_v44 }
 0x47a   : > { %4802 = vst.msk [vmem:[%s7559_s13 + $0x58] sm:$0xff] %vm702_vm1, %v4770_v11  ;;  %v4844_v17 = vsel %vm702_vm1, %v4770_v11, 0.0  ;;  %v4903_v13 = vmul.f32 %v4770_v11, %v4770_v11  ;;  %v4471_v36 = vadd.f32 %v4409_v34, %v4105_v55  ;;  %v4543_v3 = vpop.f32.mrf.mxu0  ;;  %v4675_v27 = vpop.f32.mrf.mxu1 }
 0x47b   : > { %v4845_v33 = vadd.f32 %v4844_v17, %v4843_v23  ;;  %v4627_v5 = vpack.c.b16 %v4626_v42, %v4625_v22 }
 0x47c   : > { %v4945_v12 = vsel %vm702_vm1, %v4903_v13, 0.0  ;;  %v4603_v28 = vadd.f32 %v4541_v20, %v4471_v36 }
 0x47d   : > { %v4946_v53 = vadd.f32 %v4945_v12, %v4944_v38 }
 0x47e   : > { %v4735_v62 = vadd.f32 %v4673_v50, %v4603_v28 }
 0x47f   : > { %v4045_v7 = vpop.f32.mrf.mxu2  ;;  %v4411_v35 = vpop.f32.mrf.mxu3 }
 0x480   : > { %v4771_v61 = vadd.f32 %v7554_v26, %v4735_v62  ;;  %v4106_v45 = vadd.f32 %v4045_v7, %v7337_v8 }
 0x482   : > { %4803 = vst.msk [vmem:[%s7559_s13 + $0x60] sm:$0xff] %vm702_vm1, %v4771_v61  ;;  %v4846_v63 = vsel %vm702_vm1, %v4771_v61, 0.0  ;;  %v4904_v23 = vmul.f32 %v4771_v61, %v4771_v61  ;;  %v4472_v20 = vadd.f32 %v4411_v35, %v4106_v45  ;;  %v4546_v39 = vpop.f32.mrf.mxu0  ;;  %v4678_v1 = vpop.f32.mrf.mxu1 }
 0x483   : > { %v4847_v59 = vadd.f32 %v4846_v63, %v4845_v33 }
 0x484   : > { %v4947_v50 = vsel %vm702_vm1, %v4904_v23, 0.0  ;;  %v4604_v38 = vadd.f32 %v4543_v3, %v4472_v20  ;;  %5623 = vmatmul.msk.bf16.gmra.mxu2 %vm702_vm1, %v3997_v16  ;;  %5658 = vmatmul.msk.bf16.gmra.mxu3 %vm702_vm1, %v7679_v31 }
 0x485   : > { %v4948_v8 = vadd.f32 %v4947_v50, %v4946_v53  ;;  %5675 = vmatmul.msk.bf16.gmra.mxu0 %vm702_vm1, %v7719_v37  ;;  %5692 = vmatmul.msk.bf16.gmra.mxu1 %vm702_vm1, %v4627_v5 }
 0x486   : > { %v4736_v49 = vadd.f32 %v4675_v27, %v4604_v38 }
 0x487   : > { %v4048_v43 = vpop.f32.mrf.mxu2  ;;  %v4414_v4 = vpop.f32.mrf.mxu3 }
 0x488   : > { %v4772_v18 = vadd.f32 %v7554_v26, %v4736_v49  ;;  %v4107_v14 = vadd.f32 %v4048_v43, %v7348_v10 }
 0x48a   : > { %4804 = vst.msk [vmem:[%s7559_s13 + $0x68] sm:$0xff] %vm702_vm1, %v4772_v18  ;;  %v4848_v0 = vsel %vm702_vm1, %v4772_v18, 0.0  ;;  %v4905_v19 = vmul.f32 %v4772_v18, %v4772_v18  ;;  %v4473_v31 = vadd.f32 %v4414_v4, %v4107_v14  ;;  %v4548_v34 = vpop.f32.mrf.mxu0  ;;  %v4680_v11 = vpop.f32.mrf.mxu1 }
 0x48b   : > { %v4849_v55 = vadd.f32 %v4848_v0, %v4847_v59 }
 0x48c   : > { %v4949_v37 = vsel %vm702_vm1, %v4905_v19, 0.0  ;;  %v4605_v58 = vadd.f32 %v4546_v39, %v4473_v31 }
 0x48d   : > { %v4950_v25 = vadd.f32 %v4949_v37, %v4948_v8 }
 0x48e   : > { %v4737_v56 = vadd.f32 %v4678_v1, %v4605_v58 }
 0x48f   : > { %v4050_v17 = vpop.f32.mrf.mxu2  ;;  %v4416_v13 = vpop.f32.mrf.mxu3 }
 0x490   : > { %v4773_v36 = vadd.f32 %v7554_v26, %v4737_v56  ;;  %v4108_v10 = vadd.f32 %v4050_v17, %v7360_v9 }
 0x492   : > { %4805 = vst.msk [vmem:[%s7559_s13 + $0x70] sm:$0xff] %vm702_vm1, %v4773_v36  ;;  %v4850_v3 = vsel %vm702_vm1, %v4773_v36, 0.0  ;;  %v4906_v27 = vmul.f32 %v4773_v36, %v4773_v36  ;;  %v4474_v44 = vadd.f32 %v4416_v13, %v4108_v10  ;;  %v4551_v33 = vpop.f32.mrf.mxu0  ;;  %v4683_v12 = vpop.f32.mrf.mxu1 }
 0x493   : > { %v4851_v28 = vadd.f32 %v4850_v3, %v4849_v55 }
 0x494   : > { %v4951_v41 = vsel %vm702_vm1, %v4906_v27, 0.0  ;;  %v4606_v15 = vadd.f32 %v4548_v34, %v4474_v44 }
 0x495   : > { %v4952_v53 = vadd.f32 %v4951_v41, %v4950_v25 }
 0x496   : > { %v4738_v22 = vadd.f32 %v4680_v11, %v4606_v15 }
 0x497   : > { %v4053_v42 = vpop.f32.mrf.mxu2  ;;  %v4419_v62 = vpop.f32.mrf.mxu3 }
 0x498   : > { %v4774_v7 = vadd.f32 %v7554_v26, %v4738_v22  ;;  %v4109_v9 = vadd.f32 %v4053_v42, %v7367_v52 }
 0x49a   : > { %4806 = vst.msk [vmem:[%s7559_s13 + $0x78] sm:$0xff] %vm702_vm1, %v4774_v7  ;;  %v4852_v35 = vsel %vm702_vm1, %v4774_v7, 0.0  ;;  %v4907_v61 = vmul.f32 %v4774_v7, %v4774_v7  ;;  %v4475_v45 = vadd.f32 %v4419_v62, %v4109_v9  ;;  %v4553_v16 = vpop.f32.mrf.mxu0  ;;  %v4685_v5 = vpop.f32.mrf.mxu1 }
 0x49b   : > { %v4853_v63 = vadd.f32 %v4852_v35, %v4851_v28 }
 0x49c   : > { %v4953_v23 = vsel %vm702_vm1, %v4907_v61, 0.0  ;;  %v4607_v20 = vadd.f32 %v4551_v33, %v4475_v45 }
 0x49d   : > { %v4954_v39 = vadd.f32 %v4953_v23, %v4952_v53 }
 0x49e   : > { %v4739_v1 = vadd.f32 %v4683_v12, %v4607_v20 }
 0x49f   : > { %v4055_v59 = vpop.f32.mrf.mxu2  ;;  %v4421_v50 = vpop.f32.mrf.mxu3 }
 0x4a0   : > { %v4775_v38 = vadd.f32 %v7554_v26, %v4739_v1  ;;  %v4110_v52 = vadd.f32 %v4055_v59, %v7382_v54 }
 0x4a2   : > { %4807 = vst.msk [vmem:[%s7559_s13 + $0x80] sm:$0xff] %vm702_vm1, %v4775_v38  ;;  %v4854_v8 = vsel %vm702_vm1, %v4775_v38, 0.0  ;;  %v4908_v49 = vmul.f32 %v4775_v38, %v4775_v38  ;;  %v4476_v43 = vadd.f32 %v4421_v50, %v4110_v52  ;;  %v4556_v4 = vpop.f32.mrf.mxu0  ;;  %v4688_v18 = vpop.f32.mrf.mxu1 }
 0x4a3   : > { %v4855_v14 = vadd.f32 %v4854_v8, %v4853_v63 }
 0x4a4   : > { %v4955_v0 = vsel %vm702_vm1, %v4908_v49, 0.0  ;;  %v4608_v19 = vadd.f32 %v4553_v16, %v4476_v43 }
 0x4a5   : > { %v4956_v31 = vadd.f32 %v4955_v0, %v4954_v39 }
 0x4a6   : > { %v4740_v34 = vadd.f32 %v4685_v5, %v4608_v19 }
 0x4a7   : > { %v4058_v11 = vpop.f32.mrf.mxu2  ;;  %v4424_v55 = vpop.f32.mrf.mxu3 }
 0x4a8   : > { %v4776_v37 = vadd.f32 %v7554_v26, %v4740_v34  ;;  %v4111_v54 = vadd.f32 %v4058_v11, %v7389_v24 }
 0x4aa   : > { %4808 = vst.msk [vmem:[%s7559_s13 + $0x88] sm:$0xff] %vm702_vm1, %v4776_v37  ;;  %v4856_v58 = vsel %vm702_vm1, %v4776_v37, 0.0  ;;  %v4909_v25 = vmul.f32 %v4776_v37, %v4776_v37  ;;  %v4477_v56 = vadd.f32 %v4424_v55, %v4111_v54  ;;  %v4558_v17 = vpop.f32.mrf.mxu0  ;;  %v4690_v13 = vpop.f32.mrf.mxu1 }
 0x4ab   : > { %v4857_v36 = vadd.f32 %v4856_v58, %v4855_v14 }
 0x4ac   : > { %v4957_v10 = vsel %vm702_vm1, %v4909_v25, 0.0  ;;  %v4609_v3 = vadd.f32 %v4556_v4, %v4477_v56 }
 0x4ad   : > { %v4958_v27 = vadd.f32 %v4957_v10, %v4956_v31 }
 0x4ae   : > { %v4741_v44 = vadd.f32 %v4688_v18, %v4609_v3 }
 0x4af   : > { %v4060_v33 = vpop.f32.mrf.mxu2  ;;  %v4426_v12 = vpop.f32.mrf.mxu3 }
 0x4b0   : > { %v4777_v28 = vadd.f32 %v7554_v26, %v4741_v44  ;;  %v4112_v24 = vadd.f32 %v4060_v33, %v7405_v48 }
 0x4b2   : > { %4809 = vst.msk [vmem:[%s7559_s13 + $0x90] sm:$0xff] %vm702_vm1, %v4777_v28  ;;  %v4858_v41 = vsel %vm702_vm1, %v4777_v28, 0.0  ;;  %v4910_v15 = vmul.f32 %v4777_v28, %v4777_v28  ;;  %v4478_v53 = vadd.f32 %v4426_v12, %v4112_v24  ;;  %v4561_v22 = vpop.f32.mrf.mxu0  ;;  %v4693_v42 = vpop.f32.mrf.mxu1 }
 0x4b3   : > { %v4859_v62 = vadd.f32 %v4858_v41, %v4857_v36 }
 0x4b4   : > { %v4959_v7 = vsel %vm702_vm1, %v4910_v15, 0.0  ;;  %v4610_v9 = vadd.f32 %v4558_v17, %v4478_v53 }
 0x4b5   : > { %v4960_v35 = vadd.f32 %v4959_v7, %v4958_v27 }
 0x4b6   : > { %v4742_v61 = vadd.f32 %v4690_v13, %v4610_v9 }
 0x4b7   : > { %v4063_v45 = vpop.f32.mrf.mxu2  ;;  %v4429_v16 = vpop.f32.mrf.mxu3 }
 0x4b8   : > { %v4778_v5 = vadd.f32 %v7554_v26, %v4742_v61  ;;  %v4113_v48 = vadd.f32 %v4063_v45, %v7412_v32 }
 0x4ba   : > { %4810 = vst.msk [vmem:[%s7559_s13 + $0x98] sm:$0xff] %vm702_vm1, %v4778_v5  ;;  %v4860_v63 = vsel %vm702_vm1, %v4778_v5, 0.0  ;;  %v4911_v23 = vmul.f32 %v4778_v5, %v4778_v5  ;;  %v4479_v20 = vadd.f32 %v4429_v16, %v4113_v48  ;;  %v4563_v39 = vpop.f32.mrf.mxu0  ;;  %v4695_v1 = vpop.f32.mrf.mxu1 }
 0x4bb   : > { %v4861_v59 = vadd.f32 %v4860_v63, %v4859_v62 }
 0x4bc   : > { %v4961_v50 = vsel %vm702_vm1, %v4911_v23, 0.0  ;;  %v4611_v38 = vadd.f32 %v4561_v22, %v4479_v20 }
 0x4bd   : > { %v4962_v52 = vadd.f32 %v4961_v50, %v4960_v35 }
 0x4be   : > { %v4743_v8 = vadd.f32 %v4693_v42, %v4611_v38 }
 0x4bf   : > { %v4065_v49 = vpop.f32.mrf.mxu2  ;;  %v4431_v43 = vpop.f32.mrf.mxu3 }
 0x4c0   : > { %v4779_v4 = vadd.f32 %v7554_v26, %v4743_v8  ;;  %v4114_v32 = vadd.f32 %v4065_v49, %v7428_v21 }
 0x4c2   : > { %4811 = vst.msk [vmem:[%s7559_s13 + $0xa0] sm:$0xff] %vm702_vm1, %v4779_v4  ;;  %v4862_v18 = vsel %vm702_vm1, %v4779_v4, 0.0  ;;  %v4912_v14 = vmul.f32 %v4779_v4, %v4779_v4  ;;  %v4480_v0 = vadd.f32 %v4431_v43, %v4114_v32  ;;  %v4566_v19 = vpop.f32.mrf.mxu0  ;;  %v4698_v31 = vpop.f32.mrf.mxu1 }
 0x4c3   : > { %v4863_v34 = vadd.f32 %v4862_v18, %v4861_v59 }
 0x4c4   : > { %v4963_v11 = vsel %vm702_vm1, %v4912_v14, 0.0  ;;  %v4612_v55 = vadd.f32 %v4563_v39, %v4480_v0 }
 0x4c5   : > { %v4964_v37 = vadd.f32 %v4963_v11, %v4962_v52 }
 0x4c6   : > { %v4744_v54 = vadd.f32 %v4695_v1, %v4612_v55 }
 0x4c7   : > { %v4068_v58 = vpop.f32.mrf.mxu2  ;;  %v4434_v25 = vpop.f32.mrf.mxu3 }
 0x4c8   : > { %v4780_v56 = vadd.f32 %v7554_v26, %v4744_v54  ;;  %v4115_v21 = vadd.f32 %v4068_v58, %v7435_v29 }
 0x4ca   : > { %4812 = vst.msk [vmem:[%s7559_s13 + $0xa8] sm:$0xff] %vm702_vm1, %v4780_v56  ;;  %v4864_v17 = vsel %vm702_vm1, %v4780_v56, 0.0  ;;  %v4913_v13 = vmul.f32 %v4780_v56, %v4780_v56  ;;  %v4481_v36 = vadd.f32 %v4434_v25, %v4115_v21  ;;  %v4568_v10 = vpop.f32.mrf.mxu0  ;;  %v4700_v3 = vpop.f32.mrf.mxu1 }
 0x4cb   : > { %v4865_v27 = vadd.f32 %v4864_v17, %v4863_v34 }
 0x4cc   : > { %v4965_v44 = vsel %vm702_vm1, %v4913_v13, 0.0  ;;  %v4613_v33 = vadd.f32 %v4566_v19, %v4481_v36 }
 0x4cd   : > { %v4966_v12 = vadd.f32 %v4965_v44, %v4964_v37 }
 0x4ce   : > { %v4745_v28 = vadd.f32 %v4698_v31, %v4613_v33 }
 0x4cf   : > { %v4070_v24 = vpop.f32.mrf.mxu2  ;;  %v4436_v41 = vpop.f32.mrf.mxu3 }
 0x4d0   : > { %v4781_v15 = vadd.f32 %v7554_v26, %v4745_v28  ;;  %v4116_v29 = vadd.f32 %v4070_v24, %v7451_v40 }
 0x4d2   : > { %4813 = vst.msk [vmem:[%s7559_s13 + $0xb0] sm:$0xff] %vm702_vm1, %v4781_v15  ;;  %v4866_v53 = vsel %vm702_vm1, %v4781_v15, 0.0  ;;  %v4914_v22 = vmul.f32 %v4781_v15, %v4781_v15  ;;  %v4482_v42 = vadd.f32 %v4436_v41, %v4116_v29  ;;  %v4571_v62 = vpop.f32.mrf.mxu0  ;;  %v4703_v7 = vpop.f32.mrf.mxu1 }
 0x4d3   : > { %v4867_v9 = vadd.f32 %v4866_v53, %v4865_v27 }
 0x4d4   : > { %v4967_v35 = vsel %vm702_vm1, %v4914_v22, 0.0  ;;  %v4614_v61 = vadd.f32 %v4568_v10, %v4482_v42 }
 0x4d5   : > { %v4968_v45 = vadd.f32 %v4967_v35, %v4966_v12 }
 0x4d6   : > { %v4746_v16 = vadd.f32 %v4700_v3, %v4614_v61 }
 0x4d7   : > { %v4073_v5 = vpop.f32.mrf.mxu2  ;;  %v4439_v48 = vpop.f32.mrf.mxu3 }
 0x4d8   : > { %v4782_v63 = vadd.f32 %v7554_v26, %v4746_v16  ;;  %v4117_v40 = vadd.f32 %v4073_v5, %v7458_v6 }
 0x4da   : > { %4814 = vst.msk [vmem:[%s7559_s13 + $0xb8] sm:$0xff] %vm702_vm1, %v4782_v63  ;;  %v4868_v23 = vsel %vm702_vm1, %v4782_v63, 0.0  ;;  %v4915_v20 = vmul.f32 %v4782_v63, %v4782_v63  ;;  %v4483_v39 = vadd.f32 %v4439_v48, %v4117_v40  ;;  %v4573_v1 = vpop.f32.mrf.mxu0  ;;  %v4705_v59 = vpop.f32.mrf.mxu1 }
 0x4db   : > { %v4869_v50 = vadd.f32 %v4868_v23, %v4867_v9 }
 0x4dc   : > { %v4969_v38 = vsel %vm702_vm1, %v4915_v20, 0.0  ;;  %v4615_v52 = vadd.f32 %v4571_v62, %v4483_v39 }
 0x4dd   : > { %v4970_v8 = vadd.f32 %v4969_v38, %v4968_v45 }
 0x4de   : > { %v4747_v49 = vadd.f32 %v4703_v7, %v4615_v52 }
 0x4df   : > { %v4075_v43 = vpop.f32.mrf.mxu2  ;;  %v4441_v4 = vpop.f32.mrf.mxu3 }
 0x4e0   : > { %v4783_v32 = vadd.f32 %v7554_v26, %v4747_v49  ;;  %v4118_v6 = vadd.f32 %v4075_v43, %v7474_v46 }
 0x4e2   : > { %4815 = vst.msk [vmem:[%s7559_s13 + $0xc0] sm:$0xff] %vm702_vm1, %v4783_v32  ;;  %v4870_v18 = vsel %vm702_vm1, %v4783_v32, 0.0  ;;  %v4916_v14 = vmul.f32 %v4783_v32, %v4783_v32  ;;  %v4484_v0 = vadd.f32 %v4441_v4, %v4118_v6  ;;  %v4576_v19 = vpop.f32.mrf.mxu0  ;;  %v4708_v31 = vpop.f32.mrf.mxu1 }
 0x4e3   : > { %v4871_v34 = vadd.f32 %v4870_v18, %v4869_v50 }
 0x4e4   : > { %v4971_v11 = vsel %vm702_vm1, %v4916_v14, 0.0  ;;  %v4616_v55 = vadd.f32 %v4573_v1, %v4484_v0 }
 0x4e5   : > { %v4972_v37 = vadd.f32 %v4971_v11, %v4970_v8 }
 0x4e6   : > { %v4748_v54 = vadd.f32 %v4705_v59, %v4616_v55 }
 0x4e7   : > { %v4078_v58 = vpop.f32.mrf.mxu2  ;;  %v4444_v25 = vpop.f32.mrf.mxu3 }
 0x4e8   : > { %v4784_v56 = vadd.f32 %v7554_v26, %v4748_v54  ;;  %v4119_v46 = vadd.f32 %v4078_v58, %v7481_v51 }
 0x4ea   : > { %4816 = vst.msk [vmem:[%s7559_s13 + $0xc8] sm:$0xff] %vm702_vm1, %v4784_v56  ;;  %v4872_v21 = vsel %vm702_vm1, %v4784_v56, 0.0  ;;  %v4917_v17 = vmul.f32 %v4784_v56, %v4784_v56  ;;  %v4485_v13 = vadd.f32 %v4444_v25, %v4119_v46  ;;  %v4578_v36 = vpop.f32.mrf.mxu0  ;;  %v4710_v44 = vpop.f32.mrf.mxu1 }
 0x4eb   : > { %v4873_v10 = vadd.f32 %v4872_v21, %v4871_v34 }
 0x4ec   : > { %v4973_v3 = vsel %vm702_vm1, %v4917_v17, 0.0  ;;  %v4617_v27 = vadd.f32 %v4576_v19, %v4485_v13 }
 0x4ed   : > { %v4974_v33 = vadd.f32 %v4973_v3, %v4972_v37 }
 0x4ee   : > { %v4749_v12 = vadd.f32 %v4708_v31, %v4617_v27 }
 0x4ef   : > { %v4080_v28 = vpop.f32.mrf.mxu2  ;;  %v4446_v24 = vpop.f32.mrf.mxu3 }
 0x4f0   : > { %v4785_v41 = vadd.f32 %v7554_v26, %v4749_v12  ;;  %v4120_v51 = vadd.f32 %v4080_v28, %v7497_v2  ;;  %v5891_v2 = vld [vmem:[%s7891_s6] ss:$0 sm:$0xff] }
 0x4f2   : > { %4817 = vst.msk [vmem:[%s7559_s13 + $0xd0] sm:$0xff] %vm702_vm1, %v4785_v41  ;;  %v4874_v15 = vsel %vm702_vm1, %v4785_v41, 0.0  ;;  %v4918_v29 = vmul.f32 %v4785_v41, %v4785_v41  ;;  %v4486_v53 = vadd.f32 %v4446_v24, %v4120_v51  ;;  %v4581_v7 = vpop.f32.mrf.mxu0  ;;  %v4713_v61 = vpop.f32.mrf.mxu1 }
 0x4f3   : > { %v4875_v22 = vadd.f32 %v4874_v15, %v4873_v10 }
 0x4f4   : > { %v4975_v42 = vsel %vm702_vm1, %v4918_v29, 0.0  ;;  %v4618_v62 = vadd.f32 %v4578_v36, %v4486_v53 }
 0x4f5   : > { %v4976_v9 = vadd.f32 %v4975_v42, %v4974_v33 }
 0x4f6   : > { %v4750_v35 = vadd.f32 %v4710_v44, %v4618_v62 }
 0x4f7   : > { %v4083_v45 = vpop.f32.mrf.mxu2  ;;  %v4449_v16 = vpop.f32.mrf.mxu3 }
 0x4f8   : > { %v4786_v26 = vadd.f32 %v5891_v2, %v4750_v35  ;;  %v4121_v5 = vadd.f32 %v4083_v45, %v7504_v30 }
 0x4fa   : > { %4818 = vst.msk [vmem:[%s7559_s13 + $0xd8] sm:$0xff] %vm702_vm1, %v4786_v26  ;;  %v4876_v48 = vsel %vm702_vm1, %v4786_v26, 0.0  ;;  %v4919_v63 = vmul.f32 %v4786_v26, %v4786_v26  ;;  %v4487_v40 = vadd.f32 %v4449_v16, %v4121_v5  ;;  %v4583_v50 = vpop.f32.mrf.mxu0  ;;  %v4715_v30 = vpop.f32.mrf.mxu1 }
 0x4fb   : > { %v4877_v23 = vadd.f32 %v4876_v48, %v4875_v22 }
 0x4fc   : > { %v4977_v20 = vsel %vm702_vm1, %v4919_v63, 0.0  ;;  %v4619_v39 = vadd.f32 %v4581_v7, %v4487_v40 }
 0x4fd   : > { %v4978_v1 = vadd.f32 %v4977_v20, %v4976_v9 }
 0x4fe   : > { %v4751_v59 = vadd.f32 %v4713_v61, %v4619_v39 }
 0x4ff   : > { %v4085_v38 = vpop.f32.mrf.mxu2  ;;  %v4451_v52 = vpop.f32.mrf.mxu3 }
 0x500   : > { %v4787_v8 = vadd.f32 %v5891_v2, %v4751_v59  ;;  %v4122_v49 = vadd.f32 %v4085_v38, %v7520_v60 }
 0x502   : > { %4819 = vst.msk [vmem:[%s7559_s13 + $0xe0] sm:$0xff] %vm702_vm1, %v4787_v8  ;;  %v4878_v43 = vsel %vm702_vm1, %v4787_v8, 0.0  ;;  %v4920_v4 = vmul.f32 %v4787_v8, %v4787_v8  ;;  %v4488_v32 = vadd.f32 %v4451_v52, %v4122_v49  ;;  %v4586_v60 = vpop.f32.mrf.mxu0  ;;  %v4718_v56 = vpop.f32.mrf.mxu1 }
 0x503   : > { %v4879_v6 = vadd.f32 %v4878_v43, %v4877_v23 }
 0x504   : > { %v4979_v18 = vsel %vm702_vm1, %v4920_v4, 0.0  ;;  %v4620_v14 = vadd.f32 %v4583_v50, %v4488_v32 }
 0x505   : > { %v4980_v0 = vadd.f32 %v4979_v18, %v4978_v1 }
 0x506   : > { %v4752_v19 = vadd.f32 %v4715_v30, %v4620_v14 }
 0x507   : > { %v4088_v31 = vpop.f32.mrf.mxu2  ;;  %v4454_v34 = vpop.f32.mrf.mxu3 }
 0x508   : > { %v4788_v11 = vadd.f32 %v5891_v2, %v4752_v19  ;;  %v4123_v55 = vadd.f32 %v4088_v31, %v7527_v57 }
 0x50a   : > { %4820 = vst.msk [vmem:[%s7559_s13 + $0xe8] sm:$0xff] %vm702_vm1, %v4788_v11  ;;  %v4880_v37 = vsel %vm702_vm1, %v4788_v11, 0.0  ;;  %v4921_v54 = vmul.f32 %v4788_v11, %v4788_v11  ;;  %v4489_v58 = vadd.f32 %v4454_v34, %v4123_v55  ;;  %v4588_v28 = vpop.f32.mrf.mxu0  ;;  %v4720_v15 = vpop.f32.mrf.mxu1 }
 0x50b   : > { %v4881_v25 = vadd.f32 %v4880_v37, %v4879_v6 }
 0x50c   : > { %v4981_v46 = vsel %vm702_vm1, %v4921_v54, 0.0  ;;  %v4621_v21 = vadd.f32 %v4586_v60, %v4489_v58 }
 0x50d   : > { %v4982_v17 = vadd.f32 %v4981_v46, %v4980_v0 }
 0x50e   : > { %v4753_v13 = vadd.f32 %v4718_v56, %v4621_v21 }
 0x50f   : > { %v4090_v36 = vpop.f32.mrf.mxu2  ;;  %v4456_v3 = vpop.f32.mrf.mxu3 }
 0x510   : > { %v4789_v10 = vadd.f32 %v5891_v2, %v4753_v13  ;;  %v4124_v57 = vadd.f32 %v4090_v36, %v7543_v47 }
 0x512   : > { %4821 = vst.msk [vmem:[%s7559_s13 + $0xf0] sm:$0xff] %vm702_vm1, %v4789_v10  ;;  %v4882_v27 = vsel %vm702_vm1, %v4789_v10, 0.0  ;;  %v4922_v44 = vmul.f32 %v4789_v10, %v4789_v10  ;;  %v4490_v33 = vadd.f32 %v4456_v3, %v4124_v57 }
 0x513   : > { %v4883_v12 = vadd.f32 %v4882_v27, %v4881_v25 }
 0x514   : > { %v4983_v24 = vsel %vm702_vm1, %v4922_v44, 0.0  ;;  %v4622_v41 = vadd.f32 %v4588_v28, %v4490_v33 }
 0x515   : > { %v4984_v51 = vadd.f32 %v4983_v24, %v4982_v17 }
 0x516   : > { %v4754_v29 = vadd.f32 %v4720_v15, %v4622_v41 }
 0x518   : > { %v4790_v53 = vadd.f32 %v5891_v2, %v4754_v29 }
 0x51a   : > { %4822 = vst.msk [vmem:[%s7559_s13 + $0xf8] sm:$0xff] %vm702_vm1, %v4790_v53  ;;  %v4884_v47 = vsel %vm702_vm1, %v4790_v53, 0.0  ;;  %v4923_v22 = vmul.f32 %v4790_v53, %v4790_v53 }
 0x51b   : > { %v4885_v42 = vadd.f32 %v4884_v47, %v4883_v12 }
 0x51c   : > { %v4985_v62 = vsel %vm702_vm1, %v4923_v22, 0.0 }
 0x51d   : > { %v4886_v7 = vrot.slane %v4885_v42, 4  ;;  %v4986_v9 = vadd.f32 %v4985_v62, %v4984_v51 }
 0x51f   : > { %v4887_v35 = vadd.f32 %v4886_v7, %v4885_v42  ;;  %v4987_v61 = vrot.slane %v4986_v9, 4 }
 0x521   : > { %v4888_v45 = vrot.slane %v4887_v35, 2  ;;  %v4988_v16 = vadd.f32 %v4987_v61, %v4986_v9 }
 0x523   : > { %v4889_v26 = vadd.f32 %v4888_v45, %v4887_v35  ;;  %v4989_v5 = vrot.slane %v4988_v16, 2 }
 0x525   : > { %v4890_v48 = vrot.slane %v4889_v26, 1  ;;  %v4990_v63 = vadd.f32 %v4989_v5, %v4988_v16 }
 0x527   : > { %v4991_v2 = vrot.slane %v4990_v63, 1  ;;  %v4891_v40 = vadd.f32 %v4890_v48, %v4889_v26 }
 0x529   : > { %v4992_v23 = vadd.f32 %v4991_v2, %v4990_v63 }
 0x52b   : > { %v4994_v20 = vsel %vm4993_vm8, %v4891_v40, %v4992_v23 }
 0x52c   : > { %4996 = vst.msk [vmem:[%s563_s18] sm:$0x3] %vm4995_vm9, %v4994_v20 }
 0x52d PF: > { %s19_s29 = sadd.s32 1, %s5914_s29   ;;  %s7945_s27 = smov %s5910_s28 }
 0x52e   : > { %p16_p5 = scmp.ge.s32.totalorder %s19_s29, 4   ;;  %s7946_s28 = smov %s7948_s30 }
 0x530   :  { %18 = sbr.rel (!%p16_p5) target bundleno = 2 (0x2), region = 115 }

</bundles_post_ra>
